<compile_context>
chip_gen: v5e
topology: v5e:2x2
jax: 0.10.0
libtpu: 0.0.40
codegen_flags: <defaults>
</compile_context>

<pallas_src>
import functools

import jax
import jax.numpy as jnp
import numpy as np
from jax.experimental import pallas as pl
from jax.experimental.pallas import tpu as pltpu

EPS = 1e-5
LANE = 128


def _round_up(x, m=LANE):
    return ((x + m - 1) // m) * m


def _pick_row_block(m, target=4096):
    """Largest multiple of 8 <= target that divides m (>= 2 blocks when possible)."""
    assert m % 8 == 0, "N*H*W must be a multiple of 8"
    tm = min(target, m)
    if tm == m and m > 8:
        tm = m // 2 if (m // 2) % 8 == 0 else m
    tm = max(8, tm - tm % 8)
    while m % tm:
        tm -= 8
    return tm


def _cparams(block_items):
    """Parallel 1-D grid + VMEM limit derived from the actual per-step block bytes."""
    nbytes = sum(int(np.prod(s)) * jnp.dtype(d).itemsize for s, d in block_items)
    limit = int(min(max(3 * nbytes + (2 << 20), 8 << 20), 64 << 20))
    return pltpu.CompilerParams(dimension_semantics=("parallel",),
                                vmem_limit_bytes=limit)


# ------------------------------- kernels -------------------------------------

def _emit_stats(y, stats_ref):
    # fused sum / sum-of-squares from the fp32 accumulator, single packed store
    s = jnp.sum(y, axis=0, keepdims=True)
    ss = jnp.sum(y * y, axis=0, keepdims=True)
    stats_ref[0] = jnp.concatenate([s, ss], axis=0)


def _conv1x1_kernel(x_ref, w_ref, o_ref, stats_ref):
    # y = x @ w   (bf16 operands on the MXU, fp32 accumulation)
    y = jnp.dot(x_ref[...], w_ref[...], preferred_element_type=jnp.float32)
    o_ref[...] = y.astype(o_ref.dtype)
    _emit_stats(y, stats_ref)


def _bn_relu_conv1x1_kernel(h_ref, scale_ref, shift_ref, w_ref, o_ref, stats_ref):
    # y = relu(h * scale + shift) @ w   (BN folded to scale/shift in fp32)
    t = jnp.maximum(h_ref[...].astype(jnp.float32) * scale_ref[...] + shift_ref[...], 0.0)
    y = jnp.dot(t.astype(jnp.bfloat16), w_ref[...], preferred_element_type=jnp.float32)
    o_ref[...] = y.astype(o_ref.dtype)
    _emit_stats(y, stats_ref)


def _bn_relu_conv3x3_kernel(h_ref, scale_ref, shift_ref, w_ref, mask_ref,
                            o_ref, stats_ref, *, H, W):
    # One image per grid step.  BN1 + ReLU, then 3x3 conv (stride 1, pad 1) as
    # 9 accumulated MXU matmuls: each tap is a pltpu.roll on the flattened
    # (H*W) sublane axis, masked by a precomputed (HW,1) border mask, cast to
    # bf16 and accumulated into a single fp32 accumulator (no patches buffer).
    HW, C = h_ref.shape[1], h_ref.shape[2]
    assert HW == H * W
    a = jnp.maximum(h_ref[0].astype(jnp.float32) * scale_ref[...] + shift_ref[...],
                    0.0)                                             # (HW, C) f32
    acc = jnp.zeros((HW, C), jnp.float32)
    k = 0
    for dy in (-1, 0, 1):
        for dx in (-1, 0, 1):
            amt = dy * W + dx                      # flattened shift for tap (dy, dx)
            src = a if amt == 0 else pltpu.roll(a, shift=(-amt) % HW, axis=0)
            if dy == 0 and dx == 0:
                tap = src.astype(jnp.bfloat16)
            else:
                tap = (src * mask_ref[k]).astype(jnp.bfloat16)
            acc = acc + jnp.dot(tap, w_ref[k], preferred_element_type=jnp.float32)
            k += 1
    o_ref[0] = acc.astype(o_ref.dtype)
    _emit_stats(acc, stats_ref)


def _bn_add_relu_kernel(h_ref, x_ref, scale_ref, shift_ref, o_ref):
    y = (h_ref[...].astype(jnp.float32) * scale_ref[...] + shift_ref[...]
         + x_ref[...].astype(jnp.float32))
    o_ref[...] = jnp.maximum(y, 0.0).astype(o_ref.dtype)


# ---------------------------- pallas_call wrappers ----------------------------

def _conv1x1(x2d, w, tm, scale=None, shift=None):
    m, k = x2d.shape
    cout = w.shape[1]
    nblk = m // tm
    row_in = pl.BlockSpec((tm, k), lambda i: (i, 0))
    vec_k = pl.BlockSpec((1, k), lambda i: (0, 0))
    w_spec = pl.BlockSpec((k, cout), lambda i: (0, 0))
    out_shape = (jax.ShapeDtypeStruct((m, cout), jnp.bfloat16),
                 jax.ShapeDtypeStruct((nblk, 2, cout), jnp.float32))
    out_specs = (pl.BlockSpec((tm, cout), lambda i: (i, 0)),
                 pl.BlockSpec((1, 2, cout), lambda i: (i, 0, 0)))
    cost = pl.CostEstimate(
        flops=2 * m * k * cout, transcendentals=0,
        bytes_accessed=m * k * x2d.dtype.itemsize + k * cout * 2 + m * cout * 2)
    blocks = [((tm, k), x2d.dtype), ((k, cout), jnp.bfloat16),
              ((tm, cout), jnp.bfloat16), ((1, 2, cout), jnp.float32)]
    if scale is None:
        kernel, in_specs, args = _conv1x1_kernel, [row_in, w_spec], (x2d, w)
    else:
        kernel = _bn_relu_conv1x1_kernel
        in_specs = [row_in, vec_k, vec_k, w_spec]
        args = (x2d, scale, shift, w)
        blocks += [((1, k), jnp.float32)] * 2
    return pl.pallas_call(
        kernel, out_shape=out_shape, grid=(nblk,),
        in_specs=in_specs, out_specs=out_specs,
        compiler_params=_cparams(blocks), cost_estimate=cost)(*args)


def _conv3x3(h3d, w9, masks, scale, shift, H, W):
    n, hw, c = h3d.shape
    out_shape = (jax.ShapeDtypeStruct((n, hw, c), jnp.bfloat16),
                 jax.ShapeDtypeStruct((n, 2, c), jnp.float32))
    in_specs = [pl.BlockSpec((1, hw, c), lambda i: (i, 0, 0)),
                pl.BlockSpec((1, c), lambda i: (0, 0)),
                pl.BlockSpec((1, c), lambda i: (0, 0)),
                pl.BlockSpec((9, c, c), lambda i: (0, 0, 0)),
                pl.BlockSpec((9, hw, 1), lambda i: (0, 0, 0))]
    out_specs = (pl.BlockSpec((1, hw, c), lambda i: (i, 0, 0)),
                 pl.BlockSpec((1, 2, c), lambda i: (i, 0, 0)))
    cost = pl.CostEstimate(flops=2 * n * hw * 9 * c * c, transcendentals=0,
                           bytes_accessed=2 * n * hw * c * 2 + 9 * c * c * 2)
    blocks = [((1, hw, c), jnp.bfloat16), ((1, hw, c), jnp.bfloat16),
              ((9, c, c), jnp.bfloat16), ((9, hw, 1), jnp.float32),
              ((hw, c), jnp.float32), ((hw, c), jnp.float32),  # fp32 a + acc headroom
              ((1, 2, c), jnp.float32)]
    kernel = functools.partial(_bn_relu_conv3x3_kernel, H=H, W=W)
    return pl.pallas_call(
        kernel, out_shape=out_shape, grid=(n,),
        in_specs=in_specs, out_specs=out_specs,
        compiler_params=_cparams(blocks), cost_estimate=cost,
    )(h3d, scale, shift, w9, masks)


def _bn_add_relu(h2d, x2d, scale, shift, tm, out_dtype):
    m, c = h2d.shape
    assert x2d.shape == (m, c)
    nblk = m // tm
    row = pl.BlockSpec((tm, c), lambda i: (i, 0))
    vec = pl.BlockSpec((1, c), lambda i: (0, 0))
    cost = pl.CostEstimate(
        flops=4 * m * c, transcendentals=0,
        bytes_accessed=m * c * (2 + x2d.dtype.itemsize + jnp.dtype(out_dtype).itemsize))
    blocks = [((tm, c), jnp.bfloat16), ((tm, c), x2d.dtype),
              ((tm, c), out_dtype), ((1, c), jnp.float32), ((1, c), jnp.float32)]
    return pl.pallas_call(
        _bn_add_relu_kernel,
        out_shape=jax.ShapeDtypeStruct((m, c), out_dtype),
        grid=(nblk,),
        in_specs=[row, row, vec, vec], out_specs=row,
        compiler_params=_cparams(blocks), cost_estimate=cost)(h2d, x2d, scale, shift)


# ------------------------------ BN finalize -----------------------------------

def _bn_scale_shift(stats, gamma, beta, count):
    # stats: (num_blocks, 2, C) per-block [sum, sumsq] partials
    total = jnp.sum(stats, axis=0)                                   # (2, C)
    mean = total[0] / count
    var = jnp.maximum(total[1] / count - mean * mean, 0.0)           # biased (training mode)
    scale = gamma * jax.lax.rsqrt(var + EPS)
    shift = beta - mean * scale
    return scale.reshape(1, -1), shift.reshape(1, -1)


def _make_masks(H, W):
    # 9 border-validity masks for taps (dy, dx), flattened over HW, lane-broadcast.
    row = np.arange(H).reshape(H, 1)
    col = np.arange(W).reshape(1, W)
    masks = []
    for dy in (-1, 0, 1):
        for dx in (-1, 0, 1):
            valid = (row >= -dy) & (row < H - dy) & (col >= -dx) & (col < W - dx)
            masks.append(np.broadcast_to(valid, (H, W)).reshape(H * W, 1))
    return jnp.asarray(np.stack(masks, 0).astype(np.float32))        # (9, HW, 1)


# ----------------------------- parameter prep ---------------------------------

def prepare_params(w1_oihw, w2_oihw, w3_oihw, g1, b1, g2, b2, g3, b3):
    """PyTorch-layout (OIHW) conv weights + BN affines -> kernel layouts.

    Only the bottleneck 'width' dim is padded to a multiple of 128 (keeps the
    big intermediates lane-dense); cin / cout are left unpadded.
    """
    width, cin = int(w1_oihw.shape[0]), int(w1_oihw.shape[1])
    cout = int(w3_oihw.shape[0])
    wp = _round_up(width)

    w1 = jnp.transpose(w1_oihw[:, :, 0, 0], (1, 0))                   # (cin, width)
    w1 = jnp.pad(w1, ((0, 0), (0, wp - width))).astype(jnp.bfloat16)  # (cin, wp)

    w2 = jnp.transpose(w2_oihw, (2, 3, 1, 0))                         # HWIO
    w2 = jnp.pad(w2, ((0, 0), (0, 0), (0, wp - width), (0, wp - width)))
    w2 = w2.reshape(9, wp, wp).astype(jnp.bfloat16)                   # per-tap weights

    w3 = jnp.transpose(w3_oihw[:, :, 0, 0], (1, 0))                   # (width, cout)
    w3 = jnp.pad(w3, ((0, wp - width), (0, 0))).astype(jnp.bfloat16)  # (wp, cout)

    def padv(v, cp):
        v = jnp.asarray(v, jnp.float32).reshape(-1)
        return jnp.pad(v, (0, cp - v.shape[0]))   # padded channels: gamma=beta=0 -> stay 0

    return dict(w1=w1, w2=w2, w3=w3,
                g1=padv(g1, wp), b1=padv(b1, wp),
                g2=padv(g2, wp), b2=padv(b2, wp),
                g3=jnp.asarray(g3, jnp.float32), b3=jnp.asarray(b3, jnp.float32),
                cin=cin, width=width, cout=cout, widthp=wp)


# -------------------------------- forward -------------------------------------

def bottleneck_forward_nhwc(x, p):
    n, h, w, cin = x.shape
    assert cin == p["cin"], "channel mismatch"
    # stride=1, downsample=None -> identity add requires inplanes == planes*expansion
    assert cin == p["cout"], "identity path requires inplanes == expansion*planes"
    m = n * h * w
    wp, cout = p["widthp"], p["cout"]
    tm = _pick_row_block(m)

    x2d = x.reshape(m, cin)                    # residual read: original precision
    x2d_mxu = x2d.astype(jnp.bfloat16)         # conv1 MXU operand (no padded fp32 copy)

    # 1) conv1 (1x1) + bn1 partial stats
    h1, st1 = _conv1x1(x2d_mxu, p["w1"], tm)
    sc1, sh1 = _bn_scale_shift(st1, p["g1"], p["b1"], m)

    # 2) bn1 + relu + conv2 (3x3, pad 1) + bn2 partial stats
    masks = _make_masks(h, w)
    h2, st2 = _conv3x3(h1.reshape(n, h * w, wp), p["w2"], masks, sc1, sh1, h, w)
    sc2, sh2 = _bn_scale_shift(st2, p["g2"], p["b2"], m)

    # 3) bn2 + relu + conv3 (1x1) + bn3 partial stats
    h3, st3 = _conv1x1(h2.reshape(m, wp), p["w3"], tm, scale=sc2, shift=sh2)
    sc3, sh3 = _bn_scale_shift(st3, p["g3"], p["b3"], m)

    # 4) bn3 + residual add + relu, emitted directly in the caller dtype
    y = _bn_add_relu(h3, x2d, sc3, sh3, tm, x.dtype)
    return y.reshape(n, h, w, cout)


def bottleneck_forward_nchw(x_nchw, p):
    # Interface-only layout change; keep the surrounding model NHWC end-to-end
    # to avoid these HBM passes entirely.
    x = jnp.transpose(x_nchw, (0, 2, 3, 1))
    y = bottleneck_forward_nhwc(x, p)
    return jnp.transpose(y, (0, 3, 1, 2))


# --------------------- pure-JAX reference (for checking) ----------------------

def _bn_ref(t, g, b):
    mean = t.mean(axis=(0, 1, 2), keepdims=True)
    var = ((t - mean) ** 2).mean(axis=(0, 1, 2), keepdims=True)
    return (t - mean) * jax.lax.rsqrt(var + EPS) * g.reshape(1, 1, 1, -1) \
        + b.reshape(1, 1, 1, -1)


def reference_nhwc(x, w1_oihw, w2_oihw, w3_oihw, g1, b1, g2, b2, g3, b3):
    dn = ("NHWC", "HWIO", "NHWC")
    prec = jax.lax.Precision.HIGHEST
    w1 = jnp.transpose(w1_oihw, (2, 3, 1, 0))
    w2 = jnp.transpose(w2_oihw, (2, 3, 1, 0))
    w3 = jnp.transpose(w3_oihw, (2, 3, 1, 0))
    h = jax.lax.conv_general_dilated(x, w1, (1, 1), "VALID",
                                     dimension_numbers=dn, precision=prec)
    h = jax.nn.relu(_bn_ref(h, g1, b1))
    h = jax.lax.conv_general_dilated(h, w2, (1, 1), "SAME",
                                     dimension_numbers=dn, precision=prec)
    h = jax.nn.relu(_bn_ref(h, g2, b2))
    h = jax.lax.conv_general_dilated(h, w3, (1, 1), "VALID",
                                     dimension_numbers=dn, precision=prec)
    h = _bn_ref(h, g3, b3)
    return jax.nn.relu(h + x)


if __name__ == "__main__":
    N, H, W = 2, 16, 16
    planes = 4
    inplanes = planes * 4          # downsample=None requires inplanes == planes*expansion
    width = planes                 # base_width=64 -> width == planes
    cout = planes * 4

    key = jax.random.PRNGKey(0)
    kx, k1, k2, k3 = jax.random.split(key, 4)
    x_nchw = jax.random.normal(kx, (N, inplanes, H, W), jnp.float32)

    # PyTorch-layout (OIHW) conv weights, bias=None
    w1 = jax.random.normal(k1, (width, inplanes, 1, 1), jnp.float32) / np.sqrt(inplanes)
    w2 = jax.random.normal(k2, (width, width, 3, 3), jnp.float32) / np.sqrt(9 * width)
    w3 = jax.random.normal(k3, (cout, width, 1, 1), jnp.float32) / np.sqrt(width)
    # BatchNorm affine params (PyTorch defaults: weight=1, bias=0)
    g1 = jnp.ones((width,), jnp.float32); b1 = jnp.zeros((width,), jnp.float32)
    g2 = jnp.ones((width,), jnp.float32); b2 = jnp.zeros((width,), jnp.float32)
    g3 = jnp.ones((cout,), jnp.float32);  b3 = jnp.zeros((cout,), jnp.float32)

    params = prepare_params(w1, w2, w3, g1, b1, g2, b2, g3, b3)
    forward = jax.jit(lambda t: bottleneck_forward_nchw(t, params))

    y = jax.block_until_ready(forward(x_nchw))

    # Sanity check vs. a pure-JAX fp32 reference.  The kernel uses bf16 MXU
    # operands and bf16 inter-stage activations (fp32 accumulation / BN stats /
    # residual), so a bf16-appropriate tolerance is used; any logic error
    # (wrong tap, mask, or BN) would produce O(1) differences.
    x_nhwc = jnp.transpose(x_nchw, (0, 2, 3, 1))
    y_ref = jnp.transpose(
        reference_nhwc(x_nhwc, w1, w2, w3, g1, b1, g2, b2, g3, b3), (0, 3, 1, 2))
    np.testing.assert_allclose(np.asarray(y), np.asarray(y_ref), rtol=0.1, atol=0.1)

    print("KERNEL_OK")
</pallas_src>

<mosaic_0001>
module attributes {stable_mosaic.version = 11 : i64} {
  func.func @_conv1x1_kernel(%arg0: i32, %arg1: memref<256x16xbf16, #tpu.memory_space<vmem>>, %arg2: memref<16x128xbf16, #tpu.memory_space<vmem>>, %arg3: memref<256x128xbf16, #tpu.memory_space<vmem>>, %arg4: memref<1x2x128xf32, #tpu.memory_space<vmem>>) attributes {dimension_semantics = [#tpu.dimension_semantics<parallel>], iteration_bounds = array<i64: 2>, scalar_prefetch = 0 : i64, scratch_operands = 0 : i64, tpu.core_type = #tpu.core_type<tc>, window_params = [{transform_indices = @transform_0, window_bounds = array<i64: 256, 16>}, {pipeline_mode = #tpu.pipeline_mode<synchronous>, transform_indices = @transform_1, window_bounds = array<i64: 16, 128>}, {transform_indices = @transform_2, window_bounds = array<i64: 256, 128>}, {transform_indices = @transform_3, window_bounds = array<i64: 1, 2, 128>}]} {
    %c0 = arith.constant 0 : index
    %c0_0 = arith.constant 0 : index
    %0 = vector.load %arg1[%c0, %c0_0] : memref<256x16xbf16, #tpu.memory_space<vmem>>, vector<256x16xbf16>
    %c0_1 = arith.constant 0 : index
    %c0_2 = arith.constant 0 : index
    %1 = vector.load %arg2[%c0_1, %c0_2] : memref<16x128xbf16, #tpu.memory_space<vmem>>, vector<16x128xbf16>
    %cst = arith.constant dense<0.000000e+00> : vector<256x128xf32>
    %2 = tpu.matmul %0, %1, %cst {dimension_numbers = #tpu.dot_dimension_numbers<[1], [0], [0], [1], [0, 0, 1, 1], [], []>} : vector<256x16xbf16>, vector<16x128xbf16>, vector<256x128xf32> -> vector<256x128xf32>
    %3 = arith.truncf %2 : vector<256x128xf32> to vector<256x128xbf16>
    %c0_3 = arith.constant 0 : index
    %c0_4 = arith.constant 0 : index
    %4 = vector.load %arg3[%c0_3, %c0_4] : memref<256x128xbf16, #tpu.memory_space<vmem>>, vector<256x128xbf16>
    tpu.vector_store %arg3[%c0_3, %c0_4], %3 {strides = array<i32>} : memref<256x128xbf16, #tpu.memory_space<vmem>>, vector<256x128xbf16>,
    %cst_5 = arith.constant dense<0.000000e+00> : vector<128xf32>
    %5 = vector.multi_reduction <add>, %2, %cst_5 [0] : vector<256x128xf32> to vector<128xf32>
    %6 = vector.shape_cast %5 : vector<128xf32> to vector<1x128xf32>
    %7 = arith.mulf %2, %2 : vector<256x128xf32>
    %cst_6 = arith.constant dense<0.000000e+00> : vector<128xf32>
    %8 = vector.multi_reduction <add>, %7, %cst_6 [0] : vector<256x128xf32> to vector<128xf32>
    %9 = vector.shape_cast %8 : vector<128xf32> to vector<1x128xf32>
    %10 = tpu.concatenate %6, %9 in 0 : vector<1x128xf32>, vector<1x128xf32> -> vector<2x128xf32>
    %c0_7 = arith.constant 0 : index
    %c0_8 = arith.constant 0 : index
    %c0_9 = arith.constant 0 : index
    %11 = vector.load %arg4[%c0_7, %c0_8, %c0_9] : memref<1x2x128xf32, #tpu.memory_space<vmem>>, vector<1x2x128xf32>
    %12 = vector.shape_cast %11 : vector<1x2x128xf32> to vector<2x128xf32>
    %13 = vector.shape_cast %10 : vector<2x128xf32> to vector<1x2x128xf32>
    tpu.vector_store %arg4[%c0_7, %c0_8, %c0_9], %13 {strides = array<i32>} : memref<1x2x128xf32, #tpu.memory_space<vmem>>, vector<1x2x128xf32>,
    return
  }
  func.func @transform_0(%arg0: i32) -> (i32, i32) {
    %c0_i32 = arith.constant 0 : i32
    %c0_i32_0 = arith.constant 0 : i32
    return %arg0, %c0_i32 : i32, i32
  }
  func.func @transform_1(%arg0: i32) -> (i32, i32) {
    %c0_i32 = arith.constant 0 : i32
    %c0_i32_0 = arith.constant 0 : i32
    %c0_i32_1 = arith.constant 0 : i32
    return %c0_i32, %c0_i32_0 : i32, i32
  }
  func.func @transform_2(%arg0: i32) -> (i32, i32) {
    %c0_i32 = arith.constant 0 : i32
    %c0_i32_0 = arith.constant 0 : i32
    return %arg0, %c0_i32 : i32, i32
  }
  func.func @transform_3(%arg0: i32) -> (i32, i32, i32) {
    %c0_i32 = arith.constant 0 : i32
    %c0_i32_0 = arith.constant 0 : i32
    %c0_i32_1 = arith.constant 0 : i32
    return %arg0, %c0_i32, %c0_i32_0 : i32, i32, i32
  }
}

module attributes {stable_mosaic.version = 11 : i64} {
  func.func @_bn_relu_conv3x3_kernel(%arg0: i32, %arg1: memref<1x256x128xbf16, #tpu.memory_space<vmem>>, %arg2: memref<1x128xf32, #tpu.memory_space<vmem>>, %arg3: memref<1x128xf32, #tpu.memory_space<vmem>>, %arg4: memref<9x128x128xbf16, #tpu.memory_space<vmem>>, %arg5: memref<9x256x1xf32, #tpu.memory_space<vmem>>, %arg6: memref<1x256x128xbf16, #tpu.memory_space<vmem>>, %arg7: memref<1x2x128xf32, #tpu.memory_space<vmem>>) attributes {dimension_semantics = [#tpu.dimension_semantics<parallel>], iteration_bounds = array<i64: 2>, scalar_prefetch = 0 : i64, scratch_operands = 0 : i64, tpu.core_type = #tpu.core_type<tc>, window_params = [{transform_indices = @transform_0, window_bounds = array<i64: 1, 256, 128>}, {pipeline_mode = #tpu.pipeline_mode<synchronous>, transform_indices = @transform_1, window_bounds = array<i64: 1, 128>}, {pipeline_mode = #tpu.pipeline_mode<synchronous>, transform_indices = @transform_2, window_bounds = array<i64: 1, 128>}, {pipeline_mode = #tpu.pipeline_mode<synchronous>, transform_indices = @transform_3, window_bounds = array<i64: 9, 128, 128>}, {pipeline_mode = #tpu.pipeline_mode<synchronous>, transform_indices = @transform_4, window_bounds = array<i64: 9, 256, 1>}, {transform_indices = @transform_5, window_bounds = array<i64: 1, 256, 128>}, {transform_indices = @transform_6, window_bounds = array<i64: 1, 2, 128>}]} {
    %c0 = arith.constant 0 : index
    %c0_0 = arith.constant 0 : index
    %c0_1 = arith.constant 0 : index
    %0 = vector.load %arg1[%c0, %c0_0, %c0_1] : memref<1x256x128xbf16, #tpu.memory_space<vmem>>, vector<1x256x128xbf16>
    %1 = vector.shape_cast %0 : vector<1x256x128xbf16> to vector<256x128xbf16>
    %2 = arith.extf %1 : vector<256x128xbf16> to vector<256x128xf32>
    %c0_2 = arith.constant 0 : index
    %c0_3 = arith.constant 0 : index
    %3 = vector.load %arg2[%c0_2, %c0_3] : memref<1x128xf32, #tpu.memory_space<vmem>>, vector<1x128xf32>
    %4 = vector.broadcast %3 : vector<1x128xf32> to vector<256x128xf32>
    %5 = arith.mulf %2, %4 : vector<256x128xf32>
    %c0_4 = arith.constant 0 : index
    %c0_5 = arith.constant 0 : index
    %6 = vector.load %arg3[%c0_4, %c0_5] : memref<1x128xf32, #tpu.memory_space<vmem>>, vector<1x128xf32>
    %7 = vector.broadcast %6 : vector<1x128xf32> to vector<256x128xf32>
    %8 = arith.addf %5, %7 : vector<256x128xf32>
    %cst = arith.constant 0.000000e+00 : f32
    %9 = vector.broadcast %cst : f32 to vector<256x128xf32>
    %10 = arith.maximumf %8, %9 : vector<256x128xf32>
    %cst_6 = arith.constant 0.000000e+00 : f32
    %11 = vector.broadcast %cst_6 : f32 to vector<256x128xf32>
    %c17_i32 = arith.constant 17 : i32
    %12 = tpu.dynamic_rotate %10 by %c17_i32 dim 0 : vector<256x128xf32>, i32 -> vector<256x128xf32>
    %c0_7 = arith.constant 0 : index
    %c0_8 = arith.constant 0 : index
    %c0_9 = arith.constant 0 : index
    %13 = vector.load %arg5[%c0_7, %c0_8, %c0_9] : memref<9x256x1xf32, #tpu.memory_space<vmem>>, vector<1x256x1xf32>
    %14 = vector.shape_cast %13 : vector<1x256x1xf32> to vector<256x1xf32>
    %15 = vector.broadcast %14 : vector<256x1xf32> to vector<256x128xf32>
    %16 = arith.mulf %12, %15 : vector<256x128xf32>
    %17 = arith.truncf %16 : vector<256x128xf32> to vector<256x128xbf16>
    %c0_10 = arith.constant 0 : index
    %c0_11 = arith.constant 0 : index
    %c0_12 = arith.constant 0 : index
    %18 = vector.load %arg4[%c0_10, %c0_11, %c0_12] : memref<9x128x128xbf16, #tpu.memory_space<vmem>>, vector<1x128x128xbf16>
    %19 = vector.shape_cast %18 : vector<1x128x128xbf16> to vector<128x128xbf16>
    %cst_13 = arith.constant dense<0.000000e+00> : vector<256x128xf32>
    %20 = tpu.matmul %17, %19, %cst_13 {dimension_numbers = #tpu.dot_dimension_numbers<[1], [0], [0], [1], [0, 0, 1, 1], [], []>} : vector<256x128xbf16>, vector<128x128xbf16>, vector<256x128xf32> -> vector<256x128xf32>
    %21 = arith.addf %11, %20 : vector<256x128xf32>
    %c16_i32 = arith.constant 16 : i32
    %22 = tpu.dynamic_rotate %10 by %c16_i32 dim 0 : vector<256x128xf32>, i32 -> vector<256x128xf32>
    %c1 = arith.constant 1 : index
    %c0_14 = arith.constant 0 : index
    %c0_15 = arith.constant 0 : index
    %23 = vector.load %arg5[%c1, %c0_14, %c0_15] : memref<9x256x1xf32, #tpu.memory_space<vmem>>, vector<1x256x1xf32>
    %24 = vector.shape_cast %23 : vector<1x256x1xf32> to vector<256x1xf32>
    %25 = vector.broadcast %24 : vector<256x1xf32> to vector<256x128xf32>
    %26 = arith.mulf %22, %25 : vector<256x128xf32>
    %27 = arith.truncf %26 : vector<256x128xf32> to vector<256x128xbf16>
    %c1_16 = arith.constant 1 : index
    %c0_17 = arith.constant 0 : index
    %c0_18 = arith.constant 0 : index
    %28 = vector.load %arg4[%c1_16, %c0_17, %c0_18] : memref<9x128x128xbf16, #tpu.memory_space<vmem>>, vector<1x128x128xbf16>
    %29 = vector.shape_cast %28 : vector<1x128x128xbf16> to vector<128x128xbf16>
    %cst_19 = arith.constant dense<0.000000e+00> : vector<256x128xf32>
    %30 = tpu.matmul %27, %29, %cst_19 {dimension_numbers = #tpu.dot_dimension_numbers<[1], [0], [0], [1], [0, 0, 1, 1], [], []>} : vector<256x128xbf16>, vector<128x128xbf16>, vector<256x128xf32> -> vector<256x128xf32>
    %31 = arith.addf %21, %30 : vector<256x128xf32>
    %c15_i32 = arith.constant 15 : i32
    %32 = tpu.dynamic_rotate %10 by %c15_i32 dim 0 : vector<256x128xf32>, i32 -> vector<256x128xf32>
    %c2 = arith.constant 2 : index
    %c0_20 = arith.constant 0 : index
    %c0_21 = arith.constant 0 : index
    %33 = vector.load %arg5[%c2, %c0_20, %c0_21] : memref<9x256x1xf32, #tpu.memory_space<vmem>>, vector<1x256x1xf32>
    %34 = vector.shape_cast %33 : vector<1x256x1xf32> to vector<256x1xf32>
    %35 = vector.broadcast %34 : vector<256x1xf32> to vector<256x128xf32>
    %36 = arith.mulf %32, %35 : vector<256x128xf32>
    %37 = arith.truncf %36 : vector<256x128xf32> to vector<256x128xbf16>
    %c2_22 = arith.constant 2 : index
    %c0_23 = arith.constant 0 : index
    %c0_24 = arith.constant 0 : index
    %38 = vector.load %arg4[%c2_22, %c0_23, %c0_24] : memref<9x128x128xbf16, #tpu.memory_space<vmem>>, vector<1x128x128xbf16>
    %39 = vector.shape_cast %38 : vector<1x128x128xbf16> to vector<128x128xbf16>
    %cst_25 = arith.constant dense<0.000000e+00> : vector<256x128xf32>
    %40 = tpu.matmul %37, %39, %cst_25 {dimension_numbers = #tpu.dot_dimension_numbers<[1], [0], [0], [1], [0, 0, 1, 1], [], []>} : vector<256x128xbf16>, vector<128x128xbf16>, vector<256x128xf32> -> vector<256x128xf32>
    %41 = arith.addf %31, %40 : vector<256x128xf32>
    %c1_i32 = arith.constant 1 : i32
    %42 = tpu.dynamic_rotate %10 by %c1_i32 dim 0 : vector<256x128xf32>, i32 -> vector<256x128xf32>
    %c3 = arith.constant 3 : index
    %c0_26 = arith.constant 0 : index
    %c0_27 = arith.constant 0 : index
    %43 = vector.load %arg5[%c3, %c0_26, %c0_27] : memref<9x256x1xf32, #tpu.memory_space<vmem>>, vector<1x256x1xf32>
    %44 = vector.shape_cast %43 : vector<1x256x1xf32> to vector<256x1xf32>
    %45 = vector.broadcast %44 : vector<256x1xf32> to vector<256x128xf32>
    %46 = arith.mulf %42, %45 : vector<256x128xf32>
    %47 = arith.truncf %46 : vector<256x128xf32> to vector<256x128xbf16>
    %c3_28 = arith.constant 3 : index
    %c0_29 = arith.constant 0 : index
    %c0_30 = arith.constant 0 : index
    %48 = vector.load %arg4[%c3_28, %c0_29, %c0_30] : memref<9x128x128xbf16, #tpu.memory_space<vmem>>, vector<1x128x128xbf16>
    %49 = vector.shape_cast %48 : vector<1x128x128xbf16> to vector<128x128xbf16>
    %cst_31 = arith.constant dense<0.000000e+00> : vector<256x128xf32>
    %50 = tpu.matmul %47, %49, %cst_31 {dimension_numbers = #tpu.dot_dimension_numbers<[1], [0], [0], [1], [0, 0, 1, 1], [], []>} : vector<256x128xbf16>, vector<128x128xbf16>, vector<256x128xf32> -> vector<256x128xf32>
    %51 = arith.addf %41, %50 : vector<256x128xf32>
    %52 = arith.truncf %10 : vector<256x128xf32> to vector<256x128xbf16>
    %c4 = arith.constant 4 : index
    %c0_32 = arith.constant 0 : index
    %c0_33 = arith.constant 0 : index
    %53 = vector.load %arg4[%c4, %c0_32, %c0_33] : memref<9x128x128xbf16, #tpu.memory_space<vmem>>, vector<1x128x128xbf16>
    %54 = vector.shape_cast %53 : vector<1x128x128xbf16> to vector<128x128xbf16>
    %cst_34 = arith.constant dense<0.000000e+00> : vector<256x128xf32>
    %55 = tpu.matmul %52, %54, %cst_34 {dimension_numbers = #tpu.dot_dimension_numbers<[1], [0], [0], [1], [0, 0, 1, 1], [], []>} : vector<256x128xbf16>, vector<128x128xbf16>, vector<256x128xf32> -> vector<256x128xf32>
    %56 = arith.addf %51, %55 : vector<256x128xf32>
    %c255_i32 = arith.constant 255 : i32
    %57 = tpu.dynamic_rotate %10 by %c255_i32 dim 0 : vector<256x128xf32>, i32 -> vector<256x128xf32>
    %c5 = arith.constant 5 : index
    %c0_35 = arith.constant 0 : index
    %c0_36 = arith.constant 0 : index
    %58 = vector.load %arg5[%c5, %c0_35, %c0_36] : memref<9x256x1xf32, #tpu.memory_space<vmem>>, vector<1x256x1xf32>
    %59 = vector.shape_cast %58 : vector<1x256x1xf32> to vector<256x1xf32>
    %60 = vector.broadcast %59 : vector<256x1xf32> to vector<256x128xf32>
    %61 = arith.mulf %57, %60 : vector<256x128xf32>
    %62 = arith.truncf %61 : vector<256x128xf32> to vector<256x128xbf16>
    %c5_37 = arith.constant 5 : index
    %c0_38 = arith.constant 0 : index
    %c0_39 = arith.constant 0 : index
    %63 = vector.load %arg4[%c5_37, %c0_38, %c0_39] : memref<9x128x128xbf16, #tpu.memory_space<vmem>>, vector<1x128x128xbf16>
    %64 = vector.shape_cast %63 : vector<1x128x128xbf16> to vector<128x128xbf16>
    %cst_40 = arith.constant dense<0.000000e+00> : vector<256x128xf32>
    %65 = tpu.matmul %62, %64, %cst_40 {dimension_numbers = #tpu.dot_dimension_numbers<[1], [0], [0], [1], [0, 0, 1, 1], [], []>} : vector<256x128xbf16>, vector<128x128xbf16>, vector<256x128xf32> -> vector<256x128xf32>
    %66 = arith.addf %56, %65 : vector<256x128xf32>
    %c241_i32 = arith.constant 241 : i32
    %67 = tpu.dynamic_rotate %10 by %c241_i32 dim 0 : vector<256x128xf32>, i32 -> vector<256x128xf32>
    %c6 = arith.constant 6 : index
    %c0_41 = arith.constant 0 : index
    %c0_42 = arith.constant 0 : index
    %68 = vector.load %arg5[%c6, %c0_41, %c0_42] : memref<9x256x1xf32, #tpu.memory_space<vmem>>, vector<1x256x1xf32>
    %69 = vector.shape_cast %68 : vector<1x256x1xf32> to vector<256x1xf32>
    %70 = vector.broadcast %69 : vector<256x1xf32> to vector<256x128xf32>
    %71 = arith.mulf %67, %70 : vector<256x128xf32>
    %72 = arith.truncf %71 : vector<256x128xf32> to vector<256x128xbf16>
    %c6_43 = arith.constant 6 : index
    %c0_44 = arith.constant 0 : index
    %c0_45 = arith.constant 0 : index
    %73 = vector.load %arg4[%c6_43, %c0_44, %c0_45] : memref<9x128x128xbf16, #tpu.memory_space<vmem>>, vector<1x128x128xbf16>
    %74 = vector.shape_cast %73 : vector<1x128x128xbf16> to vector<128x128xbf16>
    %cst_46 = arith.constant dense<0.000000e+00> : vector<256x128xf32>
    %75 = tpu.matmul %72, %74, %cst_46 {dimension_numbers = #tpu.dot_dimension_numbers<[1], [0], [0], [1], [0, 0, 1, 1], [], []>} : vector<256x128xbf16>, vector<128x128xbf16>, vector<256x128xf32> -> vector<256x128xf32>
    %76 = arith.addf %66, %75 : vector<256x128xf32>
    %c240_i32 = arith.constant 240 : i32
    %77 = tpu.dynamic_rotate %10 by %c240_i32 dim 0 : vector<256x128xf32>, i32 -> vector<256x128xf32>
    %c7 = arith.constant 7 : index
    %c0_47 = arith.constant 0 : index
    %c0_48 = arith.constant 0 : index
    %78 = vector.load %arg5[%c7, %c0_47, %c0_48] : memref<9x256x1xf32, #tpu.memory_space<vmem>>, vector<1x256x1xf32>
    %79 = vector.shape_cast %78 : vector<1x256x1xf32> to vector<256x1xf32>
    %80 = vector.broadcast %79 : vector<256x1xf32> to vector<256x128xf32>
    %81 = arith.mulf %77, %80 : vector<256x128xf32>
    %82 = arith.truncf %81 : vector<256x128xf32> to vector<256x128xbf16>
    %c7_49 = arith.constant 7 : index
    %c0_50 = arith.constant 0 : index
    %c0_51 = arith.constant 0 : index
    %83 = vector.load %arg4[%c7_49, %c0_50, %c0_51] : memref<9x128x128xbf16, #tpu.memory_space<vmem>>, vector<1x128x128xbf16>
    %84 = vector.shape_cast %83 : vector<1x128x128xbf16> to vector<128x128xbf16>
    %cst_52 = arith.constant dense<0.000000e+00> : vector<256x128xf32>
    %85 = tpu.matmul %82, %84, %cst_52 {dimension_numbers = #tpu.dot_dimension_numbers<[1], [0], [0], [1], [0, 0, 1, 1], [], []>} : vector<256x128xbf16>, vector<128x128xbf16>, vector<256x128xf32> -> vector<256x128xf32>
    %86 = arith.addf %76, %85 : vector<256x128xf32>
    %c239_i32 = arith.constant 239 : i32
    %87 = tpu.dynamic_rotate %10 by %c239_i32 dim 0 : vector<256x128xf32>, i32 -> vector<256x128xf32>
    %c8 = arith.constant 8 : index
    %c0_53 = arith.constant 0 : index
    %c0_54 = arith.constant 0 : index
    %88 = vector.load %arg5[%c8, %c0_53, %c0_54] : memref<9x256x1xf32, #tpu.memory_space<vmem>>, vector<1x256x1xf32>
    %89 = vector.shape_cast %88 : vector<1x256x1xf32> to vector<256x1xf32>
    %90 = vector.broadcast %89 : vector<256x1xf32> to vector<256x128xf32>
    %91 = arith.mulf %87, %90 : vector<256x128xf32>
    %92 = arith.truncf %91 : vector<256x128xf32> to vector<256x128xbf16>
    %c8_55 = arith.constant 8 : index
    %c0_56 = arith.constant 0 : index
    %c0_57 = arith.constant 0 : index
    %93 = vector.load %arg4[%c8_55, %c0_56, %c0_57] : memref<9x128x128xbf16, #tpu.memory_space<vmem>>, vector<1x128x128xbf16>
    %94 = vector.shape_cast %93 : vector<1x128x128xbf16> to vector<128x128xbf16>
    %cst_58 = arith.constant dense<0.000000e+00> : vector<256x128xf32>
    %95 = tpu.matmul %92, %94, %cst_58 {dimension_numbers = #tpu.dot_dimension_numbers<[1], [0], [0], [1], [0, 0, 1, 1], [], []>} : vector<256x128xbf16>, vector<128x128xbf16>, vector<256x128xf32> -> vector<256x128xf32>
    %96 = arith.addf %86, %95 : vector<256x128xf32>
    %97 = arith.truncf %96 : vector<256x128xf32> to vector<256x128xbf16>
    %c0_59 = arith.constant 0 : index
    %c0_60 = arith.constant 0 : index
    %c0_61 = arith.constant 0 : index
    %98 = vector.load %arg6[%c0_59, %c0_60, %c0_61] : memref<1x256x128xbf16, #tpu.memory_space<vmem>>, vector<1x256x128xbf16>
    %99 = vector.shape_cast %98 : vector<1x256x128xbf16> to vector<256x128xbf16>
    %100 = vector.shape_cast %97 : vector<256x128xbf16> to vector<1x256x128xbf16>
    tpu.vector_store %arg6[%c0_59, %c0_60, %c0_61], %100 {strides = array<i32>} : memref<1x256x128xbf16, #tpu.memory_space<vmem>>, vector<1x256x128xbf16>,
    %cst_62 = arith.constant dense<0.000000e+00> : vector<128xf32>
    %101 = vector.multi_reduction <add>, %96, %cst_62 [0] : vector<256x128xf32> to vector<128xf32>
    %102 = vector.shape_cast %101 : vector<128xf32> to vector<1x128xf32>
    %103 = arith.mulf %96, %96 : vector<256x128xf32>
    %cst_63 = arith.constant dense<0.000000e+00> : vector<128xf32>
    %104 = vector.multi_reduction <add>, %103, %cst_63 [0] : vector<256x128xf32> to vector<128xf32>
    %105 = vector.shape_cast %104 : vector<128xf32> to vector<1x128xf32>
    %106 = tpu.concatenate %102, %105 in 0 : vector<1x128xf32>, vector<1x128xf32> -> vector<2x128xf32>
    %c0_64 = arith.constant 0 : index
    %c0_65 = arith.constant 0 : index
    %c0_66 = arith.constant 0 : index
    %107 = vector.load %arg7[%c0_64, %c0_65, %c0_66] : memref<1x2x128xf32, #tpu.memory_space<vmem>>, vector<1x2x128xf32>
    %108 = vector.shape_cast %107 : vector<1x2x128xf32> to vector<2x128xf32>
    %109 = vector.shape_cast %106 : vector<2x128xf32> to vector<1x2x128xf32>
    tpu.vector_store %arg7[%c0_64, %c0_65, %c0_66], %109 {strides = array<i32>} : memref<1x2x128xf32, #tpu.memory_space<vmem>>, vector<1x2x128xf32>,
    return
  }
  func.func @transform_0(%arg0: i32) -> (i32, i32, i32) {
    %c0_i32 = arith.constant 0 : i32
    %c0_i32_0 = arith.constant 0 : i32
    %c0_i32_1 = arith.constant 0 : i32
    return %arg0, %c0_i32, %c0_i32_0 : i32, i32, i32
  }
  func.func @transform_1(%arg0: i32) -> (i32, i32) {
    %c0_i32 = arith.constant 0 : i32
    %c0_i32_0 = arith.constant 0 : i32
    %c0_i32_1 = arith.constant 0 : i32
    return %c0_i32, %c0_i32_0 : i32, i32
  }
  func.func @transform_2(%arg0: i32) -> (i32, i32) {
    %c0_i32 = arith.constant 0 : i32
    %c0_i32_0 = arith.constant 0 : i32
    %c0_i32_1 = arith.constant 0 : i32
    return %c0_i32, %c0_i32_0 : i32, i32
  }
  func.func @transform_3(%arg0: i32) -> (i32, i32, i32) {
    %c0_i32 = arith.constant 0 : i32
    %c0_i32_0 = arith.constant 0 : i32
    %c0_i32_1 = arith.constant 0 : i32
    %c0_i32_2 = arith.constant 0 : i32
    return %c0_i32, %c0_i32_0, %c0_i32_1 : i32, i32, i32
  }
  func.func @transform_4(%arg0: i32) -> (i32, i32, i32) {
    %c0_i32 = arith.constant 0 : i32
    %c0_i32_0 = arith.constant 0 : i32
    %c0_i32_1 = arith.constant 0 : i32
    %c0_i32_2 = arith.constant 0 : i32
    return %c0_i32, %c0_i32_0, %c0_i32_1 : i32, i32, i32
  }
  func.func @transform_5(%arg0: i32) -> (i32, i32, i32) {
    %c0_i32 = arith.constant 0 : i32
    %c0_i32_0 = arith.constant 0 : i32
    %c0_i32_1 = arith.constant 0 : i32
    return %arg0, %c0_i32, %c0_i32_0 : i32, i32, i32
  }
  func.func @transform_6(%arg0: i32) -> (i32, i32, i32) {
    %c0_i32 = arith.constant 0 : i32
    %c0_i32_0 = arith.constant 0 : i32
    %c0_i32_1 = arith.constant 0 : i32
    return %arg0, %c0_i32, %c0_i32_0 : i32, i32, i32
  }
}

module attributes {stable_mosaic.version = 11 : i64} {
  func.func @_bn_relu_conv1x1_kernel(%arg0: i32, %arg1: memref<256x128xbf16, #tpu.memory_space<vmem>>, %arg2: memref<1x128xf32, #tpu.memory_space<vmem>>, %arg3: memref<1x128xf32, #tpu.memory_space<vmem>>, %arg4: memref<128x16xbf16, #tpu.memory_space<vmem>>, %arg5: memref<256x16xbf16, #tpu.memory_space<vmem>>, %arg6: memref<1x2x16xf32, #tpu.memory_space<vmem>>) attributes {dimension_semantics = [#tpu.dimension_semantics<parallel>], iteration_bounds = array<i64: 2>, scalar_prefetch = 0 : i64, scratch_operands = 0 : i64, tpu.core_type = #tpu.core_type<tc>, window_params = [{transform_indices = @transform_0, window_bounds = array<i64: 256, 128>}, {pipeline_mode = #tpu.pipeline_mode<synchronous>, transform_indices = @transform_1, window_bounds = array<i64: 1, 128>}, {pipeline_mode = #tpu.pipeline_mode<synchronous>, transform_indices = @transform_2, window_bounds = array<i64: 1, 128>}, {pipeline_mode = #tpu.pipeline_mode<synchronous>, transform_indices = @transform_3, window_bounds = array<i64: 128, 16>}, {transform_indices = @transform_4, window_bounds = array<i64: 256, 16>}, {transform_indices = @transform_5, window_bounds = array<i64: 1, 2, 16>}]} {
    %c0 = arith.constant 0 : index
    %c0_0 = arith.constant 0 : index
    %0 = vector.load %arg1[%c0, %c0_0] : memref<256x128xbf16, #tpu.memory_space<vmem>>, vector<256x128xbf16>
    %1 = arith.extf %0 : vector<256x128xbf16> to vector<256x128xf32>
    %c0_1 = arith.constant 0 : index
    %c0_2 = arith.constant 0 : index
    %2 = vector.load %arg2[%c0_1, %c0_2] : memref<1x128xf32, #tpu.memory_space<vmem>>, vector<1x128xf32>
    %3 = vector.broadcast %2 : vector<1x128xf32> to vector<256x128xf32>
    %4 = arith.mulf %1, %3 : vector<256x128xf32>
    %c0_3 = arith.constant 0 : index
    %c0_4 = arith.constant 0 : index
    %5 = vector.load %arg3[%c0_3, %c0_4] : memref<1x128xf32, #tpu.memory_space<vmem>>, vector<1x128xf32>
    %6 = vector.broadcast %5 : vector<1x128xf32> to vector<256x128xf32>
    %7 = arith.addf %4, %6 : vector<256x128xf32>
    %cst = arith.constant 0.000000e+00 : f32
    %8 = vector.broadcast %cst : f32 to vector<256x128xf32>
    %9 = arith.maximumf %7, %8 : vector<256x128xf32>
    %10 = arith.truncf %9 : vector<256x128xf32> to vector<256x128xbf16>
    %c0_5 = arith.constant 0 : index
    %c0_6 = arith.constant 0 : index
    %11 = vector.load %arg4[%c0_5, %c0_6] : memref<128x16xbf16, #tpu.memory_space<vmem>>, vector<128x16xbf16>
    %cst_7 = arith.constant dense<0.000000e+00> : vector<256x16xf32>
    %12 = tpu.matmul %10, %11, %cst_7 {dimension_numbers = #tpu.dot_dimension_numbers<[1], [0], [0], [1], [0, 0, 1, 1], [], []>} : vector<256x128xbf16>, vector<128x16xbf16>, vector<256x16xf32> -> vector<256x16xf32>
    %13 = arith.truncf %12 : vector<256x16xf32> to vector<256x16xbf16>
    %c0_8 = arith.constant 0 : index
    %c0_9 = arith.constant 0 : index
    %14 = vector.load %arg5[%c0_8, %c0_9] : memref<256x16xbf16, #tpu.memory_space<vmem>>, vector<256x16xbf16>
    tpu.vector_store %arg5[%c0_8, %c0_9], %13 {strides = array<i32>} : memref<256x16xbf16, #tpu.memory_space<vmem>>, vector<256x16xbf16>,
    %cst_10 = arith.constant dense<0.000000e+00> : vector<16xf32>
    %15 = vector.multi_reduction <add>, %12, %cst_10 [0] : vector<256x16xf32> to vector<16xf32>
    %16 = vector.shape_cast %15 : vector<16xf32> to vector<1x16xf32>
    %17 = arith.mulf %12, %12 : vector<256x16xf32>
    %cst_11 = arith.constant dense<0.000000e+00> : vector<16xf32>
    %18 = vector.multi_reduction <add>, %17, %cst_11 [0] : vector<256x16xf32> to vector<16xf32>
    %19 = vector.shape_cast %18 : vector<16xf32> to vector<1x16xf32>
    %20 = tpu.concatenate %16, %19 in 0 : vector<1x16xf32>, vector<1x16xf32> -> vector<2x16xf32>
    %c0_12 = arith.constant 0 : index
    %c0_13 = arith.constant 0 : index
    %c0_14 = arith.constant 0 : index
    %21 = vector.load %arg6[%c0_12, %c0_13, %c0_14] : memref<1x2x16xf32, #tpu.memory_space<vmem>>, vector<1x2x16xf32>
    %22 = vector.shape_cast %21 : vector<1x2x16xf32> to vector<2x16xf32>
    %23 = vector.shape_cast %20 : vector<2x16xf32> to vector<1x2x16xf32>
    tpu.vector_store %arg6[%c0_12, %c0_13, %c0_14], %23 {strides = array<i32>} : memref<1x2x16xf32, #tpu.memory_space<vmem>>, vector<1x2x16xf32>,
    return
  }
  func.func @transform_0(%arg0: i32) -> (i32, i32) {
    %c0_i32 = arith.constant 0 : i32
    %c0_i32_0 = arith.constant 0 : i32
    return %arg0, %c0_i32 : i32, i32
  }
  func.func @transform_1(%arg0: i32) -> (i32, i32) {
    %c0_i32 = arith.constant 0 : i32
    %c0_i32_0 = arith.constant 0 : i32
    %c0_i32_1 = arith.constant 0 : i32
    return %c0_i32, %c0_i32_0 : i32, i32
  }
  func.func @transform_2(%arg0: i32) -> (i32, i32) {
    %c0_i32 = arith.constant 0 : i32
    %c0_i32_0 = arith.constant 0 : i32
    %c0_i32_1 = arith.constant 0 : i32
    return %c0_i32, %c0_i32_0 : i32, i32
  }
  func.func @transform_3(%arg0: i32) -> (i32, i32) {
    %c0_i32 = arith.constant 0 : i32
    %c0_i32_0 = arith.constant 0 : i32
    %c0_i32_1 = arith.constant 0 : i32
    return %c0_i32, %c0_i32_0 : i32, i32
  }
  func.func @transform_4(%arg0: i32) -> (i32, i32) {
    %c0_i32 = arith.constant 0 : i32
    %c0_i32_0 = arith.constant 0 : i32
    return %arg0, %c0_i32 : i32, i32
  }
  func.func @transform_5(%arg0: i32) -> (i32, i32, i32) {
    %c0_i32 = arith.constant 0 : i32
    %c0_i32_0 = arith.constant 0 : i32
    %c0_i32_1 = arith.constant 0 : i32
    return %arg0, %c0_i32, %c0_i32_0 : i32, i32, i32
  }
}

module attributes {stable_mosaic.version = 11 : i64} {
  func.func @_bn_add_relu_kernel(%arg0: i32, %arg1: memref<256x16xbf16, #tpu.memory_space<vmem>>, %arg2: memref<256x16xf32, #tpu.memory_space<vmem>>, %arg3: memref<1x16xf32, #tpu.memory_space<vmem>>, %arg4: memref<1x16xf32, #tpu.memory_space<vmem>>, %arg5: memref<256x16xf32, #tpu.memory_space<vmem>>) attributes {dimension_semantics = [#tpu.dimension_semantics<parallel>], iteration_bounds = array<i64: 2>, scalar_prefetch = 0 : i64, scratch_operands = 0 : i64, tpu.core_type = #tpu.core_type<tc>, window_params = [{transform_indices = @transform_0, window_bounds = array<i64: 256, 16>}, {transform_indices = @transform_1, window_bounds = array<i64: 256, 16>}, {pipeline_mode = #tpu.pipeline_mode<synchronous>, transform_indices = @transform_2, window_bounds = array<i64: 1, 16>}, {pipeline_mode = #tpu.pipeline_mode<synchronous>, transform_indices = @transform_3, window_bounds = array<i64: 1, 16>}, {transform_indices = @transform_4, window_bounds = array<i64: 256, 16>}]} {
    %c0 = arith.constant 0 : index
    %c0_0 = arith.constant 0 : index
    %0 = vector.load %arg1[%c0, %c0_0] : memref<256x16xbf16, #tpu.memory_space<vmem>>, vector<256x16xbf16>
    %1 = arith.extf %0 : vector<256x16xbf16> to vector<256x16xf32>
    %c0_1 = arith.constant 0 : index
    %c0_2 = arith.constant 0 : index
    %2 = vector.load %arg3[%c0_1, %c0_2] : memref<1x16xf32, #tpu.memory_space<vmem>>, vector<1x16xf32>
    %3 = vector.broadcast %2 : vector<1x16xf32> to vector<256x16xf32>
    %4 = arith.mulf %1, %3 : vector<256x16xf32>
    %c0_3 = arith.constant 0 : index
    %c0_4 = arith.constant 0 : index
    %5 = vector.load %arg4[%c0_3, %c0_4] : memref<1x16xf32, #tpu.memory_space<vmem>>, vector<1x16xf32>
    %6 = vector.broadcast %5 : vector<1x16xf32> to vector<256x16xf32>
    %7 = arith.addf %4, %6 : vector<256x16xf32>
    %c0_5 = arith.constant 0 : index
    %c0_6 = arith.constant 0 : index
    %8 = vector.load %arg2[%c0_5, %c0_6] : memref<256x16xf32, #tpu.memory_space<vmem>>, vector<256x16xf32>
    %9 = arith.addf %7, %8 : vector<256x16xf32>
    %cst = arith.constant 0.000000e+00 : f32
    %10 = vector.broadcast %cst : f32 to vector<256x16xf32>
    %11 = arith.maximumf %9, %10 : vector<256x16xf32>
    %c0_7 = arith.constant 0 : index
    %c0_8 = arith.constant 0 : index
    %12 = vector.load %arg5[%c0_7, %c0_8] : memref<256x16xf32, #tpu.memory_space<vmem>>, vector<256x16xf32>
    tpu.vector_store %arg5[%c0_7, %c0_8], %11 {strides = array<i32>} : memref<256x16xf32, #tpu.memory_space<vmem>>, vector<256x16xf32>,
    return
  }
  func.func @transform_0(%arg0: i32) -> (i32, i32) {
    %c0_i32 = arith.constant 0 : i32
    %c0_i32_0 = arith.constant 0 : i32
    return %arg0, %c0_i32 : i32, i32
  }
  func.func @transform_1(%arg0: i32) -> (i32, i32) {
    %c0_i32 = arith.constant 0 : i32
    %c0_i32_0 = arith.constant 0 : i32
    return %arg0, %c0_i32 : i32, i32
  }
  func.func @transform_2(%arg0: i32) -> (i32, i32) {
    %c0_i32 = arith.constant 0 : i32
    %c0_i32_0 = arith.constant 0 : i32
    %c0_i32_1 = arith.constant 0 : i32
    return %c0_i32, %c0_i32_0 : i32, i32
  }
  func.func @transform_3(%arg0: i32) -> (i32, i32) {
    %c0_i32 = arith.constant 0 : i32
    %c0_i32_0 = arith.constant 0 : i32
    %c0_i32_1 = arith.constant 0 : i32
    return %c0_i32, %c0_i32_0 : i32, i32
  }
  func.func @transform_4(%arg0: i32) -> (i32, i32) {
    %c0_i32 = arith.constant 0 : i32
    %c0_i32_0 = arith.constant 0 : i32
    return %arg0, %c0_i32 : i32, i32
  }
}

</mosaic_0001>

<bundles_post_ra>
// kernel: _lambda_.6
= control target key start
LH: loop header
LB: loop body
LE: loop exit
PB: predicated region body
PF: predicated region fallthrough
CT: control target
= control target key end

     0   :  { %s1106_s18 = smov 0   ;;  %s1552_s0 = inlined_call_operand.vmem [shape: bf16[512,128], index: 0, kind: input, shape index: {}]   ;;  %s1553_s1 = inlined_call_operand.vmem [shape: f32[1,128], index: 1, kind: input, shape index: {}]   ;;  %s1554_s2 = inlined_call_operand.vmem [shape: f32[1,128], index: 2, kind: input, shape index: {}]   ;;  %s1555_s3 = inlined_call_operand.vmem [shape: bf16[128,16], index: 3, kind: input, shape index: {}]   ;;  %s1556_s4 = inlined_call_operand.vmem [shape: bf16[512,16], index: 4, kind: output, shape index: {0}]   ;;  %s1557_s5 = inlined_call_operand.vmem [shape: f32[2,2,16], index: 5, kind: output, shape index: {1}]  }
   0x1 LB: > { %s1112_s19 = sadd.s32 4294967295, %s1074_s18   ;;  %p907_p0 = scmp.ge.s32.totalorder %s1074_s18, 1  ;;  %s1074_s18 = sphi %s1106_s18, %s16_s18  }
   0x2   : > { %p191_p1 = scmp.lt.s32.totalorder %s1074_s18, 3 }
   0x4   : > { %p192_p2 = pnand %p907_p0, %p191_p1 }
   0x5   : > { %s908_s22 = sshll.u32 (!%p192_p2), %s1112_s19, 5  ;;  %p235_p4 = scmp.lt.s32.totalorder (!%p192_p2), %s1112_s19, 1 }
   0x6   : > { %195 = sbr.rel (%p192_p2) target bundleno = 292 (0x124), region = 36  ;;  %p224_p3 = scmp.lt.s32.totalorder (!%p192_p2), %s908_s22, 63 }
   0xb   : > { %v954_v0 = vld [vmem:[%s1555_s3 + $0x38] sm:$0xff]  ;;  %v953_v1 = vld [vmem:[%s1555_s3 + $0x30] sm:$0xff]  ;;  %s1559_s22 = smov (!%p224_p3, %s908_s22), 63  ;;  %v952_v2 = vld [vmem:[%s1555_s3 + $0x28] sm:$0xff]  ;;  %vm608_vm0 = vcmask 125952   ;;  %vm641_vm1 = vcmask 130048  }
   0xc   : > { %487 = vmatpush.bf16.msra.mxu0 %v954_v0  ;;  %1034 = vmatpush.bf16.msra.mxu1 %v954_v0  ;;  %s909_s25 = sshll.u32 %s1559_s22, 2  ;;  %v951_v4 = vld [vmem:[%s1555_s3 + $0x20] sm:$0xff]  ;;  %v950_v12 = vld [vmem:[%s1555_s3 + $0x18] sm:$0xff]  ;;  %v949_v20 = vld [vmem:[%s1555_s3 + $0x10] sm:$0xff]  ;;  %s1561_s19 = smov (!%p235_p4, %s1112_s19), 1  ;;  %vm812_vm2 = vcmask 1040384  }
   0xd   : > { %1035 = vmatpush.bf16.msra.mxu2 %v954_v0  ;;  %1036 = vmatpush.bf16.msra.mxu3 %v954_v0  ;;  %s1134_s30 = scalar_lea.vmem %s1552_s0, %s909_s25  ;;  %v1145_v9 = vld [vmem:[%s1553_s1] ss:$0 sm:$0xff]  ;;  %v948_v27 = vld [vmem:[%s1555_s3 + $0x8] sm:$0xff]  ;;  %s1246_s26 = scalar_lea.vmem %s1556_s4, %s909_s25  ;;  %vm814_vm3 = vcmask 123904  }
   0xe   : > { %v956_v3 = vld [vmem:[%s1134_s30] sm:$0xff]   ;;  %v1019_v32 = vld [vmem:[%s1134_s30 + $0x8] sm:$0xff]   ;;  %s912_s22 = sshll.u32 %s1561_s19, 1 }
   0xf   : > { %v1022_v5 = vld [vmem:[%s1134_s30 + $0x20] sm:$0xff]   ;;  %v957_v7 = vunpack.c.l.bf16 %v956_v3  ;;  %v958_v8 = vunpack.c.h.bf16 %v956_v3  ;;  %v1023_v36 = vld [vmem:[%s1134_s30 + $0x28] sm:$0xff]   ;;  %v961_v42 = vunpack.c.l.bf16 %v1019_v32  ;;  %v962_v45 = vunpack.c.h.bf16 %v1019_v32  ;;  %s238_s28 = scalar_lea.vmem %s1557_s5, %s912_s22 }
  0x10   : > { %488 = vmatpush.bf16.msra.mxu0 %v953_v1  ;;  %1037 = vmatpush.bf16.msra.mxu1 %v953_v1  ;;  %v1026_v6 = vld [vmem:[%s1134_s30 + $0x40] sm:$0xff]   ;;  %v973_v10 = vunpack.c.l.bf16 %v1022_v5  ;;  %v974_v11 = vunpack.c.h.bf16 %v1022_v5  ;;  %v1027_v43 = vld [vmem:[%s1134_s30 + $0x48] sm:$0xff]   ;;  %v977_v46 = vunpack.c.l.bf16 %v1023_v36  ;;  %v978_v47 = vunpack.c.h.bf16 %v1023_v36 }
  0x11   : > { %1038 = vmatpush.bf16.msra.mxu2 %v953_v1  ;;  %1039 = vmatpush.bf16.msra.mxu3 %v953_v1  ;;  %v989_v13 = vunpack.c.l.bf16 %v1026_v6  ;;  %v990_v14 = vunpack.c.h.bf16 %v1026_v6  ;;  %v307_v15 = vmul.f32 %v1145_v9, %v957_v7  ;;  %v308_v16 = vmul.f32 %v1145_v9, %v958_v8  ;;  %v1155_v17 = vld [vmem:[%s1554_s2] ss:$0 sm:$0xff] }
  0x12   : > { %v315_v18 = vmul.f32 %v1145_v9, %v973_v10  ;;  %v316_v19 = vmul.f32 %v1145_v9, %v974_v11  ;;  %v1030_v33 = vld [vmem:[%s1134_s30 + $0x60] sm:$0xff]   ;;  %v993_v53 = vunpack.c.l.bf16 %v1027_v43  ;;  %v994_v54 = vunpack.c.h.bf16 %v1027_v43  ;;  %v1032_v43 = vld [vmem:[%s1134_s30 + $0x70] sm:$0xff]  }
  0x13   : > { %v323_v21 = vmul.f32 %v1145_v9, %v989_v13  ;;  %v324_v22 = vmul.f32 %v1145_v9, %v990_v14  ;;  %v343_v23 = vadd.f32 %v1155_v17, %v307_v15  ;;  %v344_v24 = vadd.f32 %v1155_v17, %v308_v16  ;;  %v947_v39 = vld [vmem:[%s1555_s3] sm:$0xff]  ;;  %v1020_v13 = vld [vmem:[%s1134_s30 + $0x10] sm:$0xff]  }
  0x14   : > { %489 = vmatpush.bf16.msra.mxu0 %v952_v2  ;;  %1040 = vmatpush.bf16.msra.mxu1 %v952_v2  ;;  %v351_v25 = vadd.f32 %v1155_v17, %v315_v18  ;;  %v352_v26 = vadd.f32 %v1155_v17, %v316_v19  ;;  %v1005_v37 = vunpack.c.l.bf16 %v1030_v33  ;;  %v1006_v38 = vunpack.c.h.bf16 %v1030_v33  ;;  %v1024_v19 = vld [vmem:[%s1134_s30 + $0x30] sm:$0xff]  }
  0x15   : > { %1041 = vmatpush.bf16.msra.mxu2 %v952_v2  ;;  %1042 = vmatpush.bf16.msra.mxu3 %v952_v2  ;;  %v359_v28 = vadd.f32 %v1155_v17, %v323_v21  ;;  %v360_v29 = vadd.f32 %v1155_v17, %v324_v22  ;;  %v375_v30 = vmax.f32 %v343_v23, 0.0  ;;  %v376_v31 = vmax.f32 %v344_v24, 0.0 }
  0x16   : > { %v383_v34 = vmax.f32 %v351_v25, 0.0  ;;  %v384_v35 = vmax.f32 %v352_v26, 0.0  ;;  %v331_v44 = vmul.f32 %v1145_v9, %v1005_v37  ;;  %v332_v48 = vmul.f32 %v1145_v9, %v1006_v38 }
  0x17   : > { %v391_v40 = vmax.f32 %v359_v28, 0.0  ;;  %v392_v41 = vmax.f32 %v360_v29, 0.0  ;;  %v407_v49 = vpack.c.bf16 %v376_v31, %v375_v30  ;;  %v309_v56 = vmul.f32 %v1145_v9, %v961_v42 }
  0x18   : > { %490 = vmatpush.bf16.msra.mxu0 %v951_v4  ;;  %1043 = vmatpush.bf16.msra.mxu1 %v951_v4  ;;  %v411_v50 = vpack.c.bf16 %v384_v35, %v383_v34  ;;  %v367_v51 = vadd.f32 %v1155_v17, %v331_v44  ;;  %v368_v55 = vadd.f32 %v1155_v17, %v332_v48  ;;  %v965_v25 = vunpack.c.l.bf16 %v1020_v13 }
  0x19   : > { %1044 = vmatpush.bf16.msra.mxu2 %v951_v4  ;;  %1045 = vmatpush.bf16.msra.mxu3 %v951_v4  ;;  %v415_v52 = vpack.c.bf16 %v392_v41, %v391_v40  ;;  %v310_v58 = vmul.f32 %v1145_v9, %v962_v45  ;;  %v317_v59 = vmul.f32 %v1145_v9, %v977_v46  ;;  %v966_v26 = vunpack.c.h.bf16 %v1020_v13 }
  0x1a   : > { %v399_v57 = vmax.f32 %v367_v51, 0.0  ;;  %v318_v60 = vmul.f32 %v1145_v9, %v978_v47  ;;  %v400_v61 = vmax.f32 %v368_v55, 0.0  ;;  %v325_v62 = vmul.f32 %v1145_v9, %v993_v53 }
  0x1b   : > { %v326_v63 = vmul.f32 %v1145_v9, %v994_v54  ;;  %v345_v1 = vadd.f32 %v1155_v17, %v309_v56  ;;  %v346_v2 = vadd.f32 %v1155_v17, %v310_v58  ;;  %v353_v3 = vadd.f32 %v1155_v17, %v317_v59 }
  0x1c   : > { %491 = vmatpush.bf16.msra.mxu0 %v950_v12  ;;  %1046 = vmatpush.bf16.msra.mxu1 %v950_v12  ;;  %v419_v0 = vpack.c.bf16 %v400_v61, %v399_v57  ;;  %v354_v4 = vadd.f32 %v1155_v17, %v318_v60  ;;  %v361_v5 = vadd.f32 %v1155_v17, %v325_v62  ;;  %v982_v28 = vunpack.c.h.bf16 %v1024_v19  ;;  %v1021_v60 = vld [vmem:[%s1134_s30 + $0x18] sm:$0xff]  }
  0x1d   : > { %1047 = vmatpush.bf16.msra.mxu2 %v950_v12  ;;  %1048 = vmatpush.bf16.msra.mxu3 %v950_v12  ;;  %v362_v6 = vadd.f32 %v1155_v17, %v326_v63  ;;  %v377_v7 = vmax.f32 %v345_v1, 0.0  ;;  %v378_v8 = vmax.f32 %v346_v2, 0.0  ;;  %v385_v10 = vmax.f32 %v353_v3, 0.0  ;;  %v1031_v12 = vld [vmem:[%s1134_s30 + $0x68] sm:$0xff]   ;;  %v1025_v63 = vld [vmem:[%s1134_s30 + $0x38] sm:$0xff]  }
  0x1e   : > { %v386_v11 = vmax.f32 %v354_v4, 0.0  ;;  %v1009_v14 = vunpack.c.l.bf16 %v1031_v12  ;;  %v1010_v15 = vunpack.c.h.bf16 %v1031_v12  ;;  %v393_v16 = vmax.f32 %v361_v5, 0.0 }
  0x1f   : > { %v394_v18 = vmax.f32 %v362_v6, 0.0  ;;  %v408_v23 = vpack.c.bf16 %v378_v8, %v377_v7  ;;  %v311_v36 = vmul.f32 %v1145_v9, %v965_v25  ;;  %v312_v37 = vmul.f32 %v1145_v9, %v966_v26 }
  0x20   : > { %492 = vmatpush.bf16.msra.mxu0 %v949_v20  ;;  %1049 = vmatpush.bf16.msra.mxu1 %v949_v20  ;;  %v333_v21 = vmul.f32 %v1145_v9, %v1009_v14  ;;  %v334_v22 = vmul.f32 %v1145_v9, %v1010_v15  ;;  %v412_v24 = vpack.c.bf16 %v386_v11, %v385_v10  ;;  %v1013_v44 = vunpack.c.l.bf16 %v1032_v43  ;;  %v1033_v10 = vld [vmem:[%s1134_s30 + $0x78] sm:$0xff]  }
  0x21   : > { %1050 = vmatpush.bf16.msra.mxu2 %v949_v20  ;;  %1051 = vmatpush.bf16.msra.mxu3 %v949_v20  ;;  %v1028_v20 = vld [vmem:[%s1134_s30 + $0x50] sm:$0xff]   ;;  %v416_v31 = vpack.c.bf16 %v394_v18, %v393_v16  ;;  %v1014_v45 = vunpack.c.h.bf16 %v1032_v43  ;;  %v347_v46 = vadd.f32 %v1155_v17, %v311_v36  ;;  %v348_v47 = vadd.f32 %v1155_v17, %v312_v37 }
  0x22   : > { %v369_v29 = vadd.f32 %v1155_v17, %v333_v21  ;;  %v370_v30 = vadd.f32 %v1155_v17, %v334_v22  ;;  %v997_v32 = vunpack.c.l.bf16 %v1028_v20  ;;  %v998_v33 = vunpack.c.h.bf16 %v1028_v20 }
  0x23   : > { %v336_v51 = vmul.f32 %v1145_v9, %v1014_v45  ;;  %v379_v54 = vmax.f32 %v347_v46, 0.0  ;;  %v380_v55 = vmax.f32 %v348_v47, 0.0  ;;  %v969_v2 = vunpack.c.l.bf16 %v1021_v60 }
  0x24   : > { %493 = vmatpush.bf16.msra.mxu0 %v948_v27  ;;  %1052 = vmatpush.bf16.msra.mxu1 %v948_v27  ;;  %v401_v34 = vmax.f32 %v369_v29, 0.0  ;;  %v402_v35 = vmax.f32 %v370_v30, 0.0  ;;  %v327_v41 = vmul.f32 %v1145_v9, %v997_v32  ;;  %v328_v42 = vmul.f32 %v1145_v9, %v998_v33 }
  0x25   : > { %1053 = vmatpush.bf16.msra.mxu2 %v948_v27  ;;  %1054 = vmatpush.bf16.msra.mxu3 %v948_v27  ;;  %v981_v27 = vunpack.c.l.bf16 %v1024_v19  ;;  %v372_v57 = vadd.f32 %v1155_v17, %v336_v51  ;;  %v409_v1 = vpack.c.bf16 %v380_v55, %v379_v54  ;;  %v970_v6 = vunpack.c.h.bf16 %v1021_v60 }
  0x26   : > { %v420_v40 = vpack.c.bf16 %v402_v35, %v401_v34  ;;  %v364_v53 = vadd.f32 %v1155_v17, %v328_v42  ;;  %v985_v7 = vunpack.c.l.bf16 %v1025_v63  ;;  %v986_v8 = vunpack.c.h.bf16 %v1025_v63 }
  0x27   : > { %v319_v38 = vmul.f32 %v1145_v9, %v981_v27  ;;  %v404_v4 = vmax.f32 %v372_v57, 0.0  ;;  %v313_v14 = vmul.f32 %v1145_v9, %v969_v2  ;;  %v1017_v16 = vunpack.c.l.bf16 %v1033_v10 }
  0x28   : > { %494 = vmatpush.bf16.msra.mxu0 %v947_v39  ;;  %1055 = vmatpush.bf16.msra.mxu1 %v947_v39  ;;  %v396_v62 = vmax.f32 %v364_v53, 0.0  ;;  %v1018_v18 = vunpack.c.h.bf16 %v1033_v10  ;;  %v314_v19 = vmul.f32 %v1145_v9, %v970_v6  ;;  %v321_v20 = vmul.f32 %v1145_v9, %v985_v7 }
  0x29   : > { %1056 = vmatpush.bf16.msra.mxu2 %v947_v39  ;;  %1057 = vmatpush.bf16.msra.mxu3 %v947_v39  ;;  %v320_v39 = vmul.f32 %v1145_v9, %v982_v28  ;;  %v355_v48 = vadd.f32 %v1155_v17, %v319_v38  ;;  %v322_v21 = vmul.f32 %v1145_v9, %v986_v8 }
  0x2a   : > { %v338_v25 = vmul.f32 %v1145_v9, %v1018_v18  ;;  %v349_v26 = vadd.f32 %v1155_v17, %v313_v14  ;;  %v350_v27 = vadd.f32 %v1155_v17, %v314_v19  ;;  %v357_v28 = vadd.f32 %v1155_v17, %v321_v20 }
  0x2b   : > { %495 = vmatmul.bf16.vlgmr.msra.gmra.mxu0 %v407_v49  ;;  %515 = vmatmul.bf16.vlgmr.msra.gmra.mxu1 %v411_v50  ;;  %v356_v49 = vadd.f32 %v1155_v17, %v320_v39  ;;  %v335_v50 = vmul.f32 %v1145_v9, %v1013_v44  ;;  %v387_v58 = vmax.f32 %v355_v48, 0.0  ;;  %v358_v29 = vadd.f32 %v1155_v17, %v322_v21 }
  0x2c   : > { %535 = vmatmul.bf16.vlgmr.msra.gmra.mxu2 %v415_v52  ;;  %555 = vmatmul.bf16.vlgmr.msra.gmra.mxu3 %v419_v0  ;;  %v363_v52 = vadd.f32 %v1155_v17, %v327_v41  ;;  %v1029_v0 = vld [vmem:[%s1134_s30 + $0x58] sm:$0xff]   ;;  %v374_v33 = vadd.f32 %v1155_v17, %v338_v25  ;;  %v381_v34 = vmax.f32 %v349_v26, 0.0  ;;  %v382_v35 = vmax.f32 %v350_v27, 0.0 }
  0x2d   : > { %v371_v56 = vadd.f32 %v1155_v17, %v335_v50  ;;  %v388_v59 = vmax.f32 %v356_v49, 0.0  ;;  %v1001_v12 = vunpack.c.l.bf16 %v1029_v0  ;;  %v1002_v13 = vunpack.c.h.bf16 %v1029_v0 }
  0x2e   : > { %v395_v61 = vmax.f32 %v363_v52, 0.0  ;;  %v390_v36 = vmax.f32 %v358_v29, 0.0  ;;  %v410_v41 = vpack.c.bf16 %v382_v35, %v381_v34 }
  0x2f   : > { %v403_v3 = vmax.f32 %v371_v56, 0.0  ;;  %v413_v5 = vpack.c.bf16 %v388_v59, %v387_v58  ;;  %v329_v22 = vmul.f32 %v1145_v9, %v1001_v12 }
  0x30   : > { %v417_v11 = vpack.c.bf16 %v396_v62, %v395_v61 }
  0x31   : > { %v421_v15 = vpack.c.bf16 %v404_v4, %v403_v3  ;;  %v365_v30 = vadd.f32 %v1155_v17, %v329_v22 }
  0x33   : > { %v397_v37 = vmax.f32 %v365_v30, 0.0 }
  0x3b   : > { %500 = vmatmul.bf16.gmra.mxu0 %v408_v23  ;;  %520 = vmatmul.bf16.gmra.mxu1 %v412_v24  ;;  %v330_v23 = vmul.f32 %v1145_v9, %v1002_v13  ;;  %v337_v24 = vmul.f32 %v1145_v9, %v1017_v16  ;;  %v389_v9 = vmax.f32 %v357_v28, 0.0 }
  0x3c   : > { %540 = vmatmul.bf16.gmra.mxu2 %v416_v31  ;;  %560 = vmatmul.bf16.gmra.mxu3 %v420_v40  ;;  %v406_v40 = vmax.f32 %v374_v33, 0.0 }
  0x3d   : > { %v366_v31 = vadd.f32 %v1155_v17, %v330_v23  ;;  %v373_v32 = vadd.f32 %v1155_v17, %v337_v24  ;;  %v414_v42 = vpack.c.bf16 %v390_v36, %v389_v9 }
  0x3f   : > { %v398_v38 = vmax.f32 %v366_v31, 0.0  ;;  %v405_v39 = vmax.f32 %v373_v32, 0.0 }
  0x41   : > { %v418_v43 = vpack.c.bf16 %v398_v38, %v397_v37  ;;  %v422_v44 = vpack.c.bf16 %v406_v40, %v405_v39 }
  0x4b   : > { %505 = vmatmul.bf16.gmra.mxu0 %v409_v1  ;;  %525 = vmatmul.bf16.gmra.mxu1 %v413_v5 }
  0x4c   : > { %545 = vmatmul.bf16.gmra.mxu2 %v417_v11  ;;  %565 = vmatmul.bf16.gmra.mxu3 %v421_v15 }
  0x5b   : > { %510 = vmatmul.bf16.gmra.mxu0 %v410_v41  ;;  %530 = vmatmul.bf16.gmra.mxu1 %v414_v42 }
  0x5c   : > { %550 = vmatmul.bf16.gmra.mxu2 %v418_v43  ;;  %570 = vmatmul.bf16.gmra.mxu3 %v422_v44 }
  0xa8   : > { %v1248_v17 = vpop.f32.mrf.mxu0  ;;  %v1250_v45 = vpop.f32.mrf.mxu1 }
  0xa9   : > { %v576_v46 = vpack.c.bf16 %v1248_v17, %v1248_v17  ;;  %v584_v47 = vpack.c.bf16 %v1250_v45, %v1250_v45  ;;  %v711_v26 = vmul.f32 %v1248_v17, %v1248_v17  ;;  %v642_v30 = vsel %vm641_vm1, %v1248_v17, 0.0 }
  0xab   : > { %609 = vst.msk [vmem:[%s1246_s26] sm:$0xf] %vm608_vm0, %v576_v46  ;;  %v743_v34 = vsel %vm641_vm1, %v711_v26, 0.0 }
  0xac   : > { %617 = vst.msk [vmem:[%s1246_s26 + $0x20] sm:$0xf] %vm608_vm0, %v584_v47 }
  0xaf   : > { %v1260_v48 = vpop.f32.mrf.mxu2  ;;  %v1268_v54 = vpop.f32.mrf.mxu3 }
  0xb0   : > { %v498_v49 = vpop.f32.mrf.mxu0  ;;  %v1262_v50 = vpop.f32.mrf.mxu1  ;;  %v592_v51 = vpack.c.bf16 %v1260_v48, %v1260_v48  ;;  %v600_v55 = vpack.c.bf16 %v1268_v54, %v1268_v54 }
  0xb1   : > { %v577_v52 = vpack.c.bf16 %v498_v49, %v498_v49  ;;  %v585_v53 = vpack.c.bf16 %v1262_v50, %v1262_v50  ;;  %v712_v22 = vmul.f32 %v498_v49, %v498_v49  ;;  %v643_v27 = vsel %vm641_vm1, %v498_v49, 0.0 }
  0xb2   : > { %625 = vst.msk [vmem:[%s1246_s26 + $0x40] sm:$0xf] %vm608_vm0, %v592_v51  ;;  %v644_v33 = vadd.f32 %v643_v27, %v642_v30  ;;  %v657_v30 = vsel %vm641_vm1, %v1250_v45, 0.0 }
  0xb3   : > { %610 = vst.msk [vmem:[%s1246_s26 + $0x4] sm:$0xf] %vm608_vm0, %v577_v52  ;;  %v744_v31 = vsel %vm641_vm1, %v712_v22, 0.0 }
  0xb4   : > { %618 = vst.msk [vmem:[%s1246_s26 + $0x24] sm:$0xf] %vm608_vm0, %v585_v53  ;;  %v745_v38 = vadd.f32 %v744_v31, %v743_v34  ;;  %v720_v31 = vmul.f32 %v1262_v50, %v1262_v50 }
  0xb5   : > { %633 = vst.msk [vmem:[%s1246_s26 + $0x60] sm:$0xf] %vm608_vm0, %v600_v55 }
  0xb7   : > { %v1280_v56 = vpop.f32.mrf.mxu2  ;;  %v1288_v62 = vpop.f32.mrf.mxu3 }
  0xb8   : > { %v501_v57 = vpop.f32.mrf.mxu0  ;;  %v1282_v58 = vpop.f32.mrf.mxu1  ;;  %v593_v59 = vpack.c.bf16 %v1280_v56, %v1280_v56  ;;  %v601_v63 = vpack.c.bf16 %v1288_v62, %v1288_v62 }
  0xb9   : > { %v578_v60 = vpack.c.bf16 %v501_v57, %v501_v57  ;;  %v586_v61 = vpack.c.bf16 %v1282_v58, %v1282_v58  ;;  %v713_v28 = vmul.f32 %v501_v57, %v501_v57  ;;  %v645_v32 = vsel %vm641_vm1, %v501_v57, 0.0 }
  0xba   : > { %626 = vst.msk [vmem:[%s1246_s26 + $0x44] sm:$0xf] %vm608_vm0, %v593_v59  ;;  %v646_v39 = vadd.f32 %v645_v32, %v644_v33 }
  0xbb   : > { %611 = vst.msk [vmem:[%s1246_s26 + $0x8] sm:$0xf] %vm608_vm0, %v578_v60  ;;  %v746_v35 = vsel %vm641_vm1, %v713_v28, 0.0 }
  0xbc   : > { %619 = vst.msk [vmem:[%s1246_s26 + $0x28] sm:$0xf] %vm608_vm0, %v586_v61  ;;  %v747_v51 = vadd.f32 %v746_v35, %v745_v38 }
  0xbd   : > { %634 = vst.msk [vmem:[%s1246_s26 + $0x64] sm:$0xf] %vm608_vm0, %v601_v63 }
  0xbf   : > { %v1300_v0 = vpop.f32.mrf.mxu2  ;;  %v1308_v6 = vpop.f32.mrf.mxu3 }
  0xc0   : > { %v503_v1 = vpop.f32.mrf.mxu0  ;;  %v1302_v2 = vpop.f32.mrf.mxu1  ;;  %v594_v3 = vpack.c.bf16 %v1300_v0, %v1300_v0  ;;  %v602_v15 = vpack.c.bf16 %v1308_v6, %v1308_v6 }
  0xc1   : > { %v579_v4 = vpack.c.bf16 %v503_v1, %v503_v1  ;;  %v587_v5 = vpack.c.bf16 %v1302_v2, %v1302_v2  ;;  %v714_v29 = vmul.f32 %v503_v1, %v503_v1  ;;  %v647_v9 = vsel %vm641_vm1, %v503_v1, 0.0 }
  0xc2   : > { %627 = vst.msk [vmem:[%s1246_s26 + $0x48] sm:$0xf] %vm608_vm0, %v594_v3  ;;  %v648_v52 = vadd.f32 %v647_v9, %v646_v39  ;;  %v659_v9 = vsel %vm641_vm1, %v1262_v50, 0.0  ;;  %v760_v39 = vsel %vm641_vm1, %v720_v31, 0.0 }
  0xc3   : > { %612 = vst.msk [vmem:[%s1246_s26 + $0xc] sm:$0xf] %vm608_vm0, %v579_v4  ;;  %v748_v40 = vsel %vm641_vm1, %v714_v29, 0.0 }
  0xc4   : > { %620 = vst.msk [vmem:[%s1246_s26 + $0x2c] sm:$0xf] %vm608_vm0, %v587_v5  ;;  %v749_v60 = vadd.f32 %v748_v40, %v747_v51  ;;  %v661_v40 = vsel %vm641_vm1, %v1282_v58, 0.0 }
  0xc5   : > { %635 = vst.msk [vmem:[%s1246_s26 + $0x68] sm:$0xf] %vm608_vm0, %v602_v15 }
  0xc7   : > { %v1316_v7 = vpop.f32.mrf.mxu2  ;;  %v1324_v14 = vpop.f32.mrf.mxu3 }
  0xc8   : > { %v506_v8 = vpop.f32.mrf.mxu0  ;;  %v1318_v10 = vpop.f32.mrf.mxu1  ;;  %v595_v11 = vpack.c.bf16 %v1316_v7, %v1316_v7  ;;  %v603_v16 = vpack.c.bf16 %v1324_v14, %v1324_v14 }
  0xc9   : > { %v580_v12 = vpack.c.bf16 %v506_v8, %v506_v8  ;;  %v588_v13 = vpack.c.bf16 %v1318_v10, %v1318_v10  ;;  %v715_v36 = vmul.f32 %v506_v8, %v506_v8  ;;  %v649_v44 = vsel %vm641_vm1, %v506_v8, 0.0 }
  0xca   : > { %628 = vst.msk [vmem:[%s1246_s26 + $0x4c] sm:$0xf] %vm608_vm0, %v595_v11  ;;  %v650_v61 = vadd.f32 %v649_v44, %v648_v52 }
  0xcb   : > { %613 = vst.msk [vmem:[%s1246_s26 + $0x10] sm:$0xf] %vm608_vm0, %v580_v12  ;;  %v750_v53 = vsel %vm641_vm1, %v715_v36, 0.0  ;;  %v719_v12 = vmul.f32 %v1250_v45, %v1250_v45  ;;  %v721_v36 = vmul.f32 %v1282_v58, %v1282_v58  ;;  %v723_v58 = vmul.f32 %v1318_v10, %v1318_v10 }
  0xcc   : > { %621 = vst.msk [vmem:[%s1246_s26 + $0x30] sm:$0xf] %vm608_vm0, %v588_v13  ;;  %v751_v4 = vadd.f32 %v750_v53, %v749_v60 }
  0xcd   : > { %636 = vst.msk [vmem:[%s1246_s26 + $0x6c] sm:$0xf] %vm608_vm0, %v603_v16  ;;  %v758_v35 = vsel %vm641_vm1, %v719_v12, 0.0 }
  0xcf   : > { %v1340_v18 = vpop.f32.mrf.mxu2  ;;  %v1348_v25 = vpop.f32.mrf.mxu3 }
  0xd0   : > { %v508_v19 = vpop.f32.mrf.mxu0  ;;  %v1342_v20 = vpop.f32.mrf.mxu1  ;;  %v596_v21 = vpack.c.bf16 %v1340_v18, %v1340_v18  ;;  %v604_v59 = vpack.c.bf16 %v1348_v25, %v1348_v25 }
  0xd1   : > { %v581_v23 = vpack.c.bf16 %v508_v19, %v508_v19  ;;  %v589_v24 = vpack.c.bf16 %v1342_v20, %v1342_v20  ;;  %v716_v17 = vmul.f32 %v508_v19, %v508_v19  ;;  %v651_v55 = vsel %vm641_vm1, %v508_v19, 0.0 }
  0xd2   : > { %629 = vst.msk [vmem:[%s1246_s26 + $0x50] sm:$0xf] %vm608_vm0, %v596_v21  ;;  %v652_v5 = vadd.f32 %v651_v55, %v650_v61  ;;  %v724_v60 = vmul.f32 %v1342_v20, %v1342_v20 }
  0xd3   : > { %614 = vst.msk [vmem:[%s1246_s26 + $0x14] sm:$0xf] %vm608_vm0, %v581_v23  ;;  %v752_v1 = vsel %vm641_vm1, %v716_v17, 0.0 }
  0xd4   : > { %622 = vst.msk [vmem:[%s1246_s26 + $0x34] sm:$0xf] %vm608_vm0, %v589_v24  ;;  %v753_v13 = vadd.f32 %v752_v1, %v751_v4  ;;  %v766_v1 = vsel %vm641_vm1, %v723_v58, 0.0 }
  0xd5   : > { %637 = vst.msk [vmem:[%s1246_s26 + $0x70] sm:$0xf] %vm608_vm0, %v604_v59 }
  0xd7   : > { %v1366_v37 = vpop.f32.mrf.mxu2  ;;  %v1376_v49 = vpop.f32.mrf.mxu3 }
  0xd8   : > { %v511_v41 = vpop.f32.mrf.mxu0  ;;  %v1369_v42 = vpop.f32.mrf.mxu1  ;;  %v597_v43 = vpack.c.bf16 %v1366_v37, %v1366_v37  ;;  %v605_v63 = vpack.c.bf16 %v1376_v49, %v1376_v49 }
  0xd9   : > { %v582_v46 = vpack.c.bf16 %v511_v41, %v511_v41  ;;  %v590_v47 = vpack.c.bf16 %v1369_v42, %v1369_v42  ;;  %v717_v57 = vmul.f32 %v511_v41, %v511_v41  ;;  %v653_v3 = vsel %vm641_vm1, %v511_v41, 0.0 }
  0xda   : > { %630 = vst.msk [vmem:[%s1246_s26 + $0x54] sm:$0xf] %vm608_vm0, %v597_v43  ;;  %v654_v15 = vadd.f32 %v653_v3, %v652_v5  ;;  %v722_v41 = vmul.f32 %v1302_v2, %v1302_v2  ;;  %v667_v3 = vsel %vm641_vm1, %v1342_v20, 0.0  ;;  %v725_v4 = vmul.f32 %v1369_v42, %v1369_v42 }
  0xdb   : > { %615 = vst.msk [vmem:[%s1246_s26 + $0x18] sm:$0xf] %vm608_vm0, %v582_v46  ;;  %v754_v8 = vsel %vm641_vm1, %v717_v57, 0.0  ;;  %v762_v46 = vsel %vm641_vm1, %v721_v36, 0.0  ;;  %v669_v12 = vsel %vm641_vm1, %v1369_v42, 0.0 }
  0xdc   : > { %623 = vst.msk [vmem:[%s1246_s26 + $0x38] sm:$0xf] %vm608_vm0, %v590_v47  ;;  %v755_v28 = vadd.f32 %v754_v8, %v753_v13  ;;  %v663_v47 = vsel %vm641_vm1, %v1302_v2, 0.0  ;;  %v764_v59 = vsel %vm641_vm1, %v722_v41, 0.0  ;;  %v665_v2 = vsel %vm641_vm1, %v1318_v10, 0.0 }
  0xdd   : > { %638 = vst.msk [vmem:[%s1246_s26 + $0x74] sm:$0xf] %vm608_vm0, %v605_v63  ;;  %v768_v10 = vsel %vm641_vm1, %v724_v60, 0.0  ;;  %v735_v60 = vmul.f32 %v1268_v54, %v1268_v54 }
  0xdf   : > { %v1397_v11 = vpop.f32.mrf.mxu2  ;;  %v1404_v27 = vpop.f32.mrf.mxu3 }
  0xe0   : > { %v513_v16 = vpop.f32.mrf.mxu0  ;;  %v533_v19 = vpop.f32.mrf.mxu1  ;;  %v598_v21 = vpack.c.bf16 %v1397_v11, %v1397_v11  ;;  %v606_v51 = vpack.c.bf16 %v1404_v27, %v1404_v27  ;;  %v733_v58 = vmul.f32 %v1397_v11, %v1397_v11 }
  0xe1   : > { %v583_v22 = vpack.c.bf16 %v513_v16, %v513_v16  ;;  %v655_v23 = vsel %vm641_vm1, %v513_v16, 0.0  ;;  %v718_v24 = vmul.f32 %v513_v16, %v513_v16  ;;  %v591_v26 = vpack.c.bf16 %v533_v19, %v533_v19 }
  0xe2   : > { %v656_v29 = vadd.f32 %v655_v23, %v654_v15  ;;  %631 = vst.msk [vmem:[%s1246_s26 + $0x58] sm:$0xf] %vm608_vm0, %v598_v21  ;;  %v726_v13 = vmul.f32 %v533_v19, %v533_v19  ;;  %v727_v21 = vmul.f32 %v1260_v48, %v1260_v48  ;;  %v671_v20 = vsel %vm641_vm1, %v533_v19, 0.0 }
  0xe3   : > { %616 = vst.msk [vmem:[%s1246_s26 + $0x1c] sm:$0xf] %vm608_vm0, %v583_v22  ;;  %v756_v32 = vsel %vm641_vm1, %v718_v24, 0.0  ;;  %v770_v22 = vsel %vm641_vm1, %v725_v4, 0.0  ;;  %v729_v19 = vmul.f32 %v1300_v0, %v1300_v0 }
  0xe4   : > { %v658_v33 = vadd.f32 %v657_v30, %v656_v29  ;;  %v757_v34 = vadd.f32 %v756_v32, %v755_v28  ;;  %624 = vst.msk [vmem:[%s1246_s26 + $0x3c] sm:$0xf] %vm608_vm0, %v591_v26  ;;  %v673_v26 = vsel %vm641_vm1, %v1260_v48, 0.0  ;;  %v728_v28 = vmul.f32 %v1280_v56, %v1280_v56 }
  0xe5   : > { %639 = vst.msk [vmem:[%s1246_s26 + $0x78] sm:$0xf] %vm608_vm0, %v606_v51  ;;  %v772_v42 = vsel %vm641_vm1, %v726_v13, 0.0  ;;  %v774_v31 = vsel %vm641_vm1, %v727_v21, 0.0  ;;  %v675_v32 = vsel %vm641_vm1, %v1280_v56, 0.0  ;;  %v677_v48 = vsel %vm641_vm1, %v1300_v0, 0.0 }
  0xe6   : > { %v660_v45 = vadd.f32 %v659_v9, %v658_v33  ;;  %v759_v38 = vadd.f32 %v758_v35, %v757_v34  ;;  %v776_v35 = vsel %vm641_vm1, %v728_v28, 0.0  ;;  %v730_v9 = vmul.f32 %v1316_v7, %v1316_v7 }
  0xe7   : > { %v1427_v43 = vpop.f32.mrf.mxu2  ;;  %v1438_v52 = vpop.f32.mrf.mxu3  ;;  %v679_v56 = vsel %vm641_vm1, %v1316_v7, 0.0  ;;  %v681_v0 = vsel %vm641_vm1, %v1340_v18, 0.0  ;;  %v683_v7 = vsel %vm641_vm1, %v1366_v37, 0.0  ;;  %v738_v21 = vmul.f32 %v1324_v14, %v1324_v14 }
  0xe8   : > { %v662_v44 = vadd.f32 %v661_v40, %v660_v45  ;;  %v761_v17 = vadd.f32 %v760_v39, %v759_v38  ;;  %v599_v50 = vpack.c.bf16 %v1427_v43, %v1427_v43  ;;  %v607_v57 = vpack.c.bf16 %v1438_v52, %v1438_v52 }
  0xe9   : > { %v778_v38 = vsel %vm641_vm1, %v729_v19, 0.0  ;;  %v731_v39 = vmul.f32 %v1340_v18, %v1340_v18  ;;  %v685_v18 = vsel %vm641_vm1, %v1397_v11, 0.0  ;;  %v736_v11 = vmul.f32 %v1288_v62, %v1288_v62 }
  0xea   : > { %v763_v53 = vadd.f32 %v762_v46, %v761_v17  ;;  %v664_v55 = vadd.f32 %v663_v47, %v662_v44  ;;  %632 = vst.msk [vmem:[%s1246_s26 + $0x5c] sm:$0xf] %vm608_vm0, %v599_v50  ;;  %v780_v44 = vsel %vm641_vm1, %v730_v9, 0.0  ;;  %v732_v17 = vmul.f32 %v1366_v37, %v1366_v37 }
  0xeb   : > { %640 = vst.msk [vmem:[%s1246_s26 + $0x7c] sm:$0xf] %vm608_vm0, %v607_v57  ;;  %v782_v47 = vsel %vm641_vm1, %v731_v39, 0.0  ;;  %v734_v57 = vmul.f32 %v1427_v43, %v1427_v43  ;;  %v786_v37 = vsel %vm641_vm1, %v733_v58, 0.0  ;;  %v741_v19 = vmul.f32 %v1404_v27, %v1404_v27 }
  0xec   : > { %v666_v61 = vadd.f32 %v665_v2, %v664_v55  ;;  %v765_v63 = vadd.f32 %v764_v59, %v763_v53  ;;  %v784_v55 = vsel %vm641_vm1, %v732_v17, 0.0 }
  0xed   : > { %v788_v4 = vsel %vm641_vm1, %v734_v57, 0.0 }
  0xee   : > { %v668_v5 = vadd.f32 %v667_v3, %v666_v61  ;;  %v767_v8 = vadd.f32 %v766_v1, %v765_v63  ;;  %v687_v61 = vsel %vm641_vm1, %v1427_v43, 0.0  ;;  %v689_v3 = vsel %vm641_vm1, %v1268_v54, 0.0 }
  0xef   : > { %v737_v43 = vmul.f32 %v1308_v6, %v1308_v6  ;;  %v693_v54 = vsel %vm641_vm1, %v1308_v6, 0.0  ;;  %v697_v6 = vsel %vm641_vm1, %v1348_v25, 0.0 }
  0xf0   : > { %v670_v15 = vadd.f32 %v669_v12, %v668_v5  ;;  %v769_v16 = vadd.f32 %v768_v10, %v767_v8  ;;  %v790_v10 = vsel %vm641_vm1, %v735_v60, 0.0  ;;  %v691_v12 = vsel %vm641_vm1, %v1288_v62, 0.0 }
  0xf1   : > { %v695_v62 = vsel %vm641_vm1, %v1324_v14, 0.0  ;;  %v699_v14 = vsel %vm641_vm1, %v1376_v49, 0.0 }
  0xf2   : > { %v771_v23 = vadd.f32 %v770_v22, %v769_v16  ;;  %v672_v24 = vadd.f32 %v671_v20, %v670_v15  ;;  %v792_v16 = vsel %vm641_vm1, %v736_v11, 0.0 }
  0xf4   : > { %v674_v29 = vadd.f32 %v673_v26, %v672_v24  ;;  %v773_v30 = vadd.f32 %v772_v42, %v771_v23  ;;  %v794_v23 = vsel %vm641_vm1, %v737_v43, 0.0  ;;  %v739_v24 = vmul.f32 %v1348_v25, %v1348_v25 }
  0xf5   : > { %v796_v42 = vsel %vm641_vm1, %v738_v21, 0.0  ;;  %v701_v25 = vsel %vm641_vm1, %v1404_v27, 0.0 }
  0xf6   : > { %v676_v33 = vadd.f32 %v675_v32, %v674_v29  ;;  %v775_v34 = vadd.f32 %v774_v31, %v773_v30  ;;  %v740_v29 = vmul.f32 %v1376_v49, %v1376_v49  ;;  %v798_v32 = vsel %vm641_vm1, %v739_v24, 0.0 }
  0xf7   : > { %v703_v49 = vsel %vm641_vm1, %v1438_v52, 0.0 }
  0xf8   : > { %v678_v36 = vadd.f32 %v677_v48, %v676_v33  ;;  %v777_v45 = vadd.f32 %v776_v35, %v775_v34  ;;  %v800_v35 = vsel %vm641_vm1, %v740_v29, 0.0  ;;  %v742_v48 = vmul.f32 %v1438_v52, %v1438_v52 }
  0xfa   : > { %v779_v40 = vadd.f32 %v778_v38, %v777_v45  ;;  %v680_v41 = vadd.f32 %v679_v56, %v678_v36  ;;  %v802_v45 = vsel %vm641_vm1, %v741_v19, 0.0  ;;  %v804_v39 = vsel %vm641_vm1, %v742_v48, 0.0 }
  0xfc   : > { %v682_v50 = vadd.f32 %v681_v0, %v680_v41  ;;  %v781_v46 = vadd.f32 %v780_v44, %v779_v40 }
  0xfe   : > { %v684_v51 = vadd.f32 %v683_v7, %v682_v50  ;;  %v783_v53 = vadd.f32 %v782_v47, %v781_v46 }
 0x100   : > { %v785_v59 = vadd.f32 %v784_v55, %v783_v53  ;;  %v686_v2 = vadd.f32 %v685_v18, %v684_v51 }
 0x102   : > { %v787_v63 = vadd.f32 %v786_v37, %v785_v59  ;;  %v688_v1 = vadd.f32 %v687_v61, %v686_v2 }
 0x104   : > { %v690_v5 = vadd.f32 %v689_v3, %v688_v1  ;;  %v789_v8 = vadd.f32 %v788_v4, %v787_v63 }
 0x106   : > { %v692_v13 = vadd.f32 %v691_v12, %v690_v5  ;;  %v791_v15 = vadd.f32 %v790_v10, %v789_v8 }
 0x108   : > { %v694_v22 = vadd.f32 %v693_v54, %v692_v13  ;;  %v793_v20 = vadd.f32 %v792_v16, %v791_v15 }
 0x10a   : > { %v795_v26 = vadd.f32 %v794_v23, %v793_v20  ;;  %v696_v28 = vadd.f32 %v695_v62, %v694_v22 }
 0x10c   : > { %v698_v30 = vadd.f32 %v697_v6, %v696_v28  ;;  %v797_v31 = vadd.f32 %v796_v42, %v795_v26 }
 0x10e   : > { %v700_v33 = vadd.f32 %v699_v14, %v698_v30  ;;  %v799_v34 = vadd.f32 %v798_v32, %v797_v31 }
 0x110   : > { %v801_v9 = vadd.f32 %v800_v35, %v799_v34  ;;  %v702_v36 = vadd.f32 %v701_v25, %v700_v33 }
 0x112   : > { %v803_v38 = vadd.f32 %v802_v45, %v801_v9  ;;  %v704_v56 = vadd.f32 %v703_v49, %v702_v36 }
 0x114   : > { %v705_v40 = vrot.slane %v704_v56, 4  ;;  %v805_v41 = vadd.f32 %v804_v39, %v803_v38 }
 0x116   : > { %v706_v44 = vadd.f32 %v705_v40, %v704_v56  ;;  %v806_v27 = vrot.slane %v805_v41, 4 }
 0x118   : > { %v707_v0 = vrot.slane %v706_v44, 2  ;;  %v807_v17 = vadd.f32 %v806_v27, %v805_v41 }
 0x11a   : > { %v708_v50 = vadd.f32 %v707_v0, %v706_v44  ;;  %v808_v46 = vrot.slane %v807_v17, 2 }
 0x11c   : > { %v709_v47 = vrot.slane %v708_v50, 1  ;;  %v809_v7 = vadd.f32 %v808_v46, %v807_v17 }
 0x11e   : > { %v810_v58 = vrot.slane %v809_v7, 1  ;;  %v710_v52 = vadd.f32 %v709_v47, %v708_v50 }
 0x120   : > { %v811_v51 = vadd.f32 %v810_v58, %v809_v7 }
 0x122   : > { %v813_v53 = vsel %vm812_vm2, %v710_v52, %v811_v51 }
 0x123   : > { %815 = vst.msk [vmem:[%s238_s28] sm:$0x3] %vm814_vm3, %v813_v53 }
 0x124 PF: > { %s16_s18 = sadd.s32 1, %s1074_s18  }
 0x125   : > { %p13_p5 = scmp.ge.s32.totalorder %s16_s18, 4  }
 0x127   :  { %15 = sbr.rel (!%p13_p5) target bundleno = 1 (0x1), region = 78 }

// kernel: _lambda_.7
= control target key start
LH: loop header
LB: loop body
LE: loop exit
PB: predicated region body
PF: predicated region fallthrough
CT: control target
= control target key end

     0   :  { %s691_s15 = smov 0   ;;  %s911_s0 = inlined_call_operand.vmem [shape: bf16[512,16], index: 0, kind: input, shape index: {}]   ;;  %s912_s1 = inlined_call_operand.vmem [shape: f32[512,16], index: 1, kind: input, shape index: {}]   ;;  %s913_s2 = inlined_call_operand.vmem [shape: f32[1,16], index: 2, kind: input, shape index: {}]   ;;  %s914_s3 = inlined_call_operand.vmem [shape: f32[1,16], index: 3, kind: input, shape index: {}]   ;;  %s915_s4 = inlined_call_operand.vmem [shape: f32[512,16], index: 4, kind: output, shape index: {}]  }
   0x1 LB: > { %s556_s16 = sadd.s32 4294967295, %s664_s15   ;;  %p560_p0 = scmp.ge.s32.totalorder %s664_s15, 1  ;;  %s664_s15 = sphi %s691_s15, %s14_s15  }
   0x2   : > { %p174_p1 = scmp.lt.s32.totalorder %s664_s15, 3 }
   0x4   : > { %p175_p2 = pnand %p560_p0, %p174_p1 }
   0x5   : > { %s561_s17 = sshll.u32 (!%p175_p2), %s556_s16, 5 }
   0x6   : > { %178 = sbr.rel (%p175_p2) target bundleno = 62 (0x3e), region = 36  ;;  %p206_p3 = scmp.lt.s32.totalorder (!%p175_p2), %s561_s17, 63 }
   0xb   : > { %s917_s17 = smov (!%p206_p3, %s561_s17), 63  ;;  %v711_v0 = vld [vmem:[%s913_s2] ss:$0 sm:$0xff]  ;;  %vm455_vm0 = vcmask 130048  }
   0xc   : > { %s562_s18 = sshll.u32 %s917_s17, 2  ;;  %s564_s19 = sshll.u32 %s917_s17, 3  ;;  %v724_v3 = vld [vmem:[%s914_s3] ss:$0 sm:$0xff] }
   0xd   : > { %s706_s22 = scalar_lea.vmem %s911_s0, %s562_s18  ;;  %s719_s27 = scalar_lea.vmem %s912_s1, %s564_s19 }
   0xe   : > { %v570_v1 = vld [vmem:[%s706_s22] sm:$0xff]   ;;  %v633_v5 = vld [vmem:[%s706_s22 + $0x8] sm:$0xff]   ;;  %v634_v8 = vld [vmem:[%s706_s22 + $0x10] sm:$0xff]   ;;  %s756_s6 = scalar_lea.vmem %s915_s4, %s564_s19 }
   0xf   : > { %v571_v2 = vunpack.c.l.bf16 %v570_v1  ;;  %v572_v4 = vunpack.c.h.bf16 %v570_v1  ;;  %v575_v6 = vunpack.c.l.bf16 %v633_v5  ;;  %v576_v7 = vunpack.c.h.bf16 %v633_v5  ;;  %v635_v13 = vld [vmem:[%s706_s22 + $0x18] sm:$0xff]   ;;  %v359_v14 = vld [vmem:[%s719_s27] sm:$0xff]  ;;  %v360_v15 = vld [vmem:[%s719_s27 + $0x8] sm:$0xff] }
  0x10   : > { %v579_v11 = vunpack.c.l.bf16 %v634_v8  ;;  %v580_v12 = vunpack.c.h.bf16 %v634_v8  ;;  %v583_v18 = vunpack.c.l.bf16 %v635_v13  ;;  %v584_v19 = vunpack.c.h.bf16 %v635_v13  ;;  %v361_v22 = vld [vmem:[%s719_s27 + $0x10] sm:$0xff]  ;;  %v362_v23 = vld [vmem:[%s719_s27 + $0x18] sm:$0xff]  ;;  %v363_v28 = vld [vmem:[%s719_s27 + $0x20] sm:$0xff] }
  0x11   : > { %v291_v9 = vmul.f32 %v711_v0, %v571_v2  ;;  %v292_v10 = vmul.f32 %v711_v0, %v572_v4  ;;  %v293_v16 = vmul.f32 %v711_v0, %v575_v6  ;;  %v294_v17 = vmul.f32 %v711_v0, %v576_v7  ;;  %v364_v29 = vld [vmem:[%s719_s27 + $0x28] sm:$0xff]  ;;  %v365_v36 = vld [vmem:[%s719_s27 + $0x30] sm:$0xff]  ;;  %v366_v37 = vld [vmem:[%s719_s27 + $0x38] sm:$0xff] }
  0x12   : > { %v295_v24 = vmul.f32 %v711_v0, %v579_v11  ;;  %v296_v25 = vmul.f32 %v711_v0, %v580_v12  ;;  %v297_v30 = vmul.f32 %v711_v0, %v583_v18  ;;  %v298_v31 = vmul.f32 %v711_v0, %v584_v19  ;;  %v636_v42 = vld [vmem:[%s706_s22 + $0x20] sm:$0xff]   ;;  %v637_v47 = vld [vmem:[%s706_s22 + $0x28] sm:$0xff]   ;;  %v638_v52 = vld [vmem:[%s706_s22 + $0x30] sm:$0xff]  }
  0x13   : > { %v327_v20 = vadd.f32 %v724_v3, %v291_v9  ;;  %v328_v21 = vadd.f32 %v724_v3, %v292_v10  ;;  %v329_v26 = vadd.f32 %v724_v3, %v293_v16  ;;  %v330_v27 = vadd.f32 %v724_v3, %v294_v17  ;;  %v639_v57 = vld [vmem:[%s706_s22 + $0x38] sm:$0xff]   ;;  %v367_v4 = vld [vmem:[%s719_s27 + $0x40] sm:$0xff]  ;;  %v368_v5 = vld [vmem:[%s719_s27 + $0x48] sm:$0xff] }
  0x14   : > { %v331_v34 = vadd.f32 %v724_v3, %v295_v24  ;;  %v332_v35 = vadd.f32 %v724_v3, %v296_v25  ;;  %v333_v40 = vadd.f32 %v724_v3, %v297_v30  ;;  %v334_v41 = vadd.f32 %v724_v3, %v298_v31  ;;  %v369_v12 = vld [vmem:[%s719_s27 + $0x50] sm:$0xff]  ;;  %v370_v13 = vld [vmem:[%s719_s27 + $0x58] sm:$0xff]  ;;  %v371_v18 = vld [vmem:[%s719_s27 + $0x60] sm:$0xff] }
  0x15   : > { %v391_v32 = vadd.f32 %v359_v14, %v327_v20  ;;  %v392_v33 = vadd.f32 %v360_v15, %v328_v21  ;;  %v393_v38 = vadd.f32 %v361_v22, %v329_v26  ;;  %v394_v39 = vadd.f32 %v362_v23, %v330_v27  ;;  %v372_v19 = vld [vmem:[%s719_s27 + $0x68] sm:$0xff]  ;;  %v373_v26 = vld [vmem:[%s719_s27 + $0x70] sm:$0xff]  ;;  %v374_v27 = vld [vmem:[%s719_s27 + $0x78] sm:$0xff] }
  0x16   : > { %v395_v45 = vadd.f32 %v363_v28, %v331_v34  ;;  %v396_v46 = vadd.f32 %v364_v29, %v332_v35  ;;  %v397_v50 = vadd.f32 %v365_v36, %v333_v40  ;;  %v398_v51 = vadd.f32 %v366_v37, %v334_v41  ;;  %v641_v37 = vld [vmem:[%s706_s22 + $0x48] sm:$0xff]  }
  0x17   : > { %v423_v43 = vmax.f32 %v391_v32, 0.0  ;;  %v424_v44 = vmax.f32 %v392_v33, 0.0  ;;  %v425_v48 = vmax.f32 %v393_v38, 0.0  ;;  %v426_v49 = vmax.f32 %v394_v39, 0.0  ;;  %v640_v32 = vld [vmem:[%s706_s22 + $0x40] sm:$0xff]  }
  0x18   : > { %v427_v53 = vmax.f32 %v395_v45, 0.0  ;;  %v428_v54 = vmax.f32 %v396_v46, 0.0  ;;  %v587_v55 = vunpack.c.l.bf16 %v636_v42  ;;  %v588_v56 = vunpack.c.h.bf16 %v636_v42  ;;  %v642_v42 = vld [vmem:[%s706_s22 + $0x50] sm:$0xff]  }
  0x19   : > { %456 = vst.msk [vmem:[%s756_s6] sm:$0xff] %vm455_vm0, %v423_v43  ;;  %v429_v58 = vmax.f32 %v397_v50, 0.0  ;;  %v430_v59 = vmax.f32 %v398_v51, 0.0  ;;  %v591_v60 = vunpack.c.l.bf16 %v637_v47  ;;  %v592_v61 = vunpack.c.h.bf16 %v637_v47  ;;  %v643_v47 = vld [vmem:[%s706_s22 + $0x58] sm:$0xff]  }
  0x1a   : > { %457 = vst.msk [vmem:[%s756_s6 + $0x8] sm:$0xff] %vm455_vm0, %v424_v44  ;;  %v299_v62 = vmul.f32 %v711_v0, %v587_v55  ;;  %v300_v63 = vmul.f32 %v711_v0, %v588_v56  ;;  %v595_v1 = vunpack.c.l.bf16 %v638_v52  ;;  %v596_v2 = vunpack.c.h.bf16 %v638_v52  ;;  %v375_v56 = vld [vmem:[%s719_s27 + $0x80] sm:$0xff] }
  0x1b   : > { %458 = vst.msk [vmem:[%s756_s6 + $0x10] sm:$0xff] %vm455_vm0, %v425_v48  ;;  %v301_v6 = vmul.f32 %v711_v0, %v591_v60  ;;  %v302_v7 = vmul.f32 %v711_v0, %v592_v61  ;;  %v599_v8 = vunpack.c.l.bf16 %v639_v57  ;;  %v600_v9 = vunpack.c.h.bf16 %v639_v57  ;;  %v376_v57 = vld [vmem:[%s719_s27 + $0x88] sm:$0xff] }
  0x1c   : > { %459 = vst.msk [vmem:[%s756_s6 + $0x18] sm:$0xff] %vm455_vm0, %v426_v49  ;;  %v335_v10 = vadd.f32 %v724_v3, %v299_v62  ;;  %v336_v11 = vadd.f32 %v724_v3, %v300_v63  ;;  %v303_v14 = vmul.f32 %v711_v0, %v595_v1  ;;  %v304_v15 = vmul.f32 %v711_v0, %v596_v2  ;;  %v377_v1 = vld [vmem:[%s719_s27 + $0x90] sm:$0xff]  ;;  %v378_v2 = vld [vmem:[%s719_s27 + $0x98] sm:$0xff] }
  0x1d   : > { %460 = vst.msk [vmem:[%s756_s6 + $0x20] sm:$0xff] %vm455_vm0, %v427_v53  ;;  %v337_v16 = vadd.f32 %v724_v3, %v301_v6  ;;  %v338_v17 = vadd.f32 %v724_v3, %v302_v7  ;;  %v305_v20 = vmul.f32 %v711_v0, %v599_v8  ;;  %v306_v21 = vmul.f32 %v711_v0, %v600_v9  ;;  %v379_v8 = vld [vmem:[%s719_s27 + $0xa0] sm:$0xff]  ;;  %v380_v9 = vld [vmem:[%s719_s27 + $0xa8] sm:$0xff] }
  0x1e   : > { %461 = vst.msk [vmem:[%s756_s6 + $0x28] sm:$0xff] %vm455_vm0, %v428_v54  ;;  %v399_v22 = vadd.f32 %v367_v4, %v335_v10  ;;  %v400_v23 = vadd.f32 %v368_v5, %v336_v11  ;;  %v339_v24 = vadd.f32 %v724_v3, %v303_v14  ;;  %v340_v25 = vadd.f32 %v724_v3, %v304_v15 }
  0x1f   : > { %462 = vst.msk [vmem:[%s756_s6 + $0x30] sm:$0xff] %vm455_vm0, %v429_v58  ;;  %v401_v28 = vadd.f32 %v369_v12, %v337_v16  ;;  %v402_v29 = vadd.f32 %v370_v13, %v338_v17  ;;  %v341_v30 = vadd.f32 %v724_v3, %v305_v20  ;;  %v342_v31 = vadd.f32 %v724_v3, %v306_v21  ;;  %v381_v16 = vld [vmem:[%s719_s27 + $0xb0] sm:$0xff]  ;;  %v382_v17 = vld [vmem:[%s719_s27 + $0xb8] sm:$0xff] }
  0x20   : > { %463 = vst.msk [vmem:[%s756_s6 + $0x38] sm:$0xff] %vm455_vm0, %v430_v59  ;;  %v431_v33 = vmax.f32 %v399_v22, 0.0  ;;  %v432_v34 = vmax.f32 %v400_v23, 0.0  ;;  %v403_v35 = vadd.f32 %v371_v18, %v339_v24  ;;  %v404_v36 = vadd.f32 %v372_v19, %v340_v25  ;;  %v644_v22 = vld [vmem:[%s706_s22 + $0x60] sm:$0xff]  }
  0x21   : > { %v433_v38 = vmax.f32 %v401_v28, 0.0  ;;  %v434_v39 = vmax.f32 %v402_v29, 0.0  ;;  %v405_v40 = vadd.f32 %v373_v26, %v341_v30  ;;  %v406_v41 = vadd.f32 %v374_v27, %v342_v31  ;;  %v645_v27 = vld [vmem:[%s706_s22 + $0x68] sm:$0xff]  }
  0x22   : > { %464 = vst.msk [vmem:[%s756_s6 + $0x40] sm:$0xff] %vm455_vm0, %v431_v33  ;;  %v435_v43 = vmax.f32 %v403_v35, 0.0  ;;  %v436_v44 = vmax.f32 %v404_v36, 0.0  ;;  %v603_v45 = vunpack.c.l.bf16 %v640_v32  ;;  %v604_v46 = vunpack.c.h.bf16 %v640_v32  ;;  %v646_v32 = vld [vmem:[%s706_s22 + $0x70] sm:$0xff]  }
  0x23   : > { %465 = vst.msk [vmem:[%s756_s6 + $0x48] sm:$0xff] %vm455_vm0, %v432_v34  ;;  %v437_v48 = vmax.f32 %v405_v40, 0.0  ;;  %v438_v49 = vmax.f32 %v406_v41, 0.0  ;;  %v607_v50 = vunpack.c.l.bf16 %v641_v37  ;;  %v608_v51 = vunpack.c.h.bf16 %v641_v37  ;;  %v647_v37 = vld [vmem:[%s706_s22 + $0x78] sm:$0xff]  }
  0x24   : > { %466 = vst.msk [vmem:[%s756_s6 + $0x50] sm:$0xff] %vm455_vm0, %v433_v38  ;;  %v307_v52 = vmul.f32 %v711_v0, %v603_v45  ;;  %v308_v53 = vmul.f32 %v711_v0, %v604_v46  ;;  %v611_v54 = vunpack.c.l.bf16 %v642_v42  ;;  %v612_v55 = vunpack.c.h.bf16 %v642_v42  ;;  %v383_v46 = vld [vmem:[%s719_s27 + $0xc0] sm:$0xff] }
  0x25   : > { %467 = vst.msk [vmem:[%s756_s6 + $0x58] sm:$0xff] %vm455_vm0, %v434_v39  ;;  %v309_v58 = vmul.f32 %v711_v0, %v607_v50  ;;  %v310_v59 = vmul.f32 %v711_v0, %v608_v51  ;;  %v615_v60 = vunpack.c.l.bf16 %v643_v47  ;;  %v616_v61 = vunpack.c.h.bf16 %v643_v47  ;;  %v384_v47 = vld [vmem:[%s719_s27 + $0xc8] sm:$0xff] }
  0x26   : > { %468 = vst.msk [vmem:[%s756_s6 + $0x60] sm:$0xff] %vm455_vm0, %v435_v43  ;;  %v343_v62 = vadd.f32 %v724_v3, %v307_v52  ;;  %v344_v63 = vadd.f32 %v724_v3, %v308_v53  ;;  %v311_v4 = vmul.f32 %v711_v0, %v611_v54  ;;  %v312_v5 = vmul.f32 %v711_v0, %v612_v55  ;;  %v385_v54 = vld [vmem:[%s719_s27 + $0xd0] sm:$0xff]  ;;  %v386_v55 = vld [vmem:[%s719_s27 + $0xd8] sm:$0xff] }
  0x27   : > { %469 = vst.msk [vmem:[%s756_s6 + $0x68] sm:$0xff] %vm455_vm0, %v436_v44  ;;  %v345_v6 = vadd.f32 %v724_v3, %v309_v58  ;;  %v346_v7 = vadd.f32 %v724_v3, %v310_v59  ;;  %v313_v10 = vmul.f32 %v711_v0, %v615_v60  ;;  %v314_v11 = vmul.f32 %v711_v0, %v616_v61  ;;  %v387_v60 = vld [vmem:[%s719_s27 + $0xe0] sm:$0xff]  ;;  %v388_v61 = vld [vmem:[%s719_s27 + $0xe8] sm:$0xff] }
  0x28   : > { %470 = vst.msk [vmem:[%s756_s6 + $0x70] sm:$0xff] %vm455_vm0, %v437_v48  ;;  %v407_v12 = vadd.f32 %v375_v56, %v343_v62  ;;  %v408_v13 = vadd.f32 %v376_v57, %v344_v63  ;;  %v347_v14 = vadd.f32 %v724_v3, %v311_v4  ;;  %v348_v15 = vadd.f32 %v724_v3, %v312_v5 }
  0x29   : > { %471 = vst.msk [vmem:[%s756_s6 + $0x78] sm:$0xff] %vm455_vm0, %v438_v49  ;;  %v409_v18 = vadd.f32 %v377_v1, %v345_v6  ;;  %v410_v19 = vadd.f32 %v378_v2, %v346_v7  ;;  %v349_v20 = vadd.f32 %v724_v3, %v313_v10  ;;  %v350_v21 = vadd.f32 %v724_v3, %v314_v11  ;;  %v389_v6 = vld [vmem:[%s719_s27 + $0xf0] sm:$0xff]  ;;  %v390_v7 = vld [vmem:[%s719_s27 + $0xf8] sm:$0xff] }
  0x2a   : > { %v439_v23 = vmax.f32 %v407_v12, 0.0  ;;  %v440_v24 = vmax.f32 %v408_v13, 0.0  ;;  %v411_v25 = vadd.f32 %v379_v8, %v347_v14  ;;  %v412_v26 = vadd.f32 %v380_v9, %v348_v15 }
  0x2b   : > { %v441_v28 = vmax.f32 %v409_v18, 0.0  ;;  %v442_v29 = vmax.f32 %v410_v19, 0.0  ;;  %v413_v30 = vadd.f32 %v381_v16, %v349_v20  ;;  %v414_v31 = vadd.f32 %v382_v17, %v350_v21 }
  0x2c   : > { %472 = vst.msk [vmem:[%s756_s6 + $0x80] sm:$0xff] %vm455_vm0, %v439_v23  ;;  %v443_v33 = vmax.f32 %v411_v25, 0.0  ;;  %v444_v34 = vmax.f32 %v412_v26, 0.0  ;;  %v619_v35 = vunpack.c.l.bf16 %v644_v22  ;;  %v620_v36 = vunpack.c.h.bf16 %v644_v22 }
  0x2d   : > { %473 = vst.msk [vmem:[%s756_s6 + $0x88] sm:$0xff] %vm455_vm0, %v440_v24  ;;  %v445_v38 = vmax.f32 %v413_v30, 0.0  ;;  %v446_v39 = vmax.f32 %v414_v31, 0.0  ;;  %v623_v40 = vunpack.c.l.bf16 %v645_v27  ;;  %v624_v41 = vunpack.c.h.bf16 %v645_v27 }
  0x2e   : > { %474 = vst.msk [vmem:[%s756_s6 + $0x90] sm:$0xff] %vm455_vm0, %v441_v28  ;;  %v315_v42 = vmul.f32 %v711_v0, %v619_v35  ;;  %v316_v43 = vmul.f32 %v711_v0, %v620_v36  ;;  %v627_v44 = vunpack.c.l.bf16 %v646_v32  ;;  %v628_v45 = vunpack.c.h.bf16 %v646_v32 }
  0x2f   : > { %475 = vst.msk [vmem:[%s756_s6 + $0x98] sm:$0xff] %vm455_vm0, %v442_v29  ;;  %v317_v48 = vmul.f32 %v711_v0, %v623_v40  ;;  %v318_v49 = vmul.f32 %v711_v0, %v624_v41  ;;  %v631_v50 = vunpack.c.l.bf16 %v647_v37  ;;  %v632_v51 = vunpack.c.h.bf16 %v647_v37 }
  0x30   : > { %476 = vst.msk [vmem:[%s756_s6 + $0xa0] sm:$0xff] %vm455_vm0, %v443_v33  ;;  %v351_v52 = vadd.f32 %v724_v3, %v315_v42  ;;  %v352_v53 = vadd.f32 %v724_v3, %v316_v43  ;;  %v319_v56 = vmul.f32 %v711_v0, %v627_v44  ;;  %v320_v57 = vmul.f32 %v711_v0, %v628_v45 }
  0x31   : > { %477 = vst.msk [vmem:[%s756_s6 + $0xa8] sm:$0xff] %vm455_vm0, %v444_v34  ;;  %v353_v58 = vadd.f32 %v724_v3, %v317_v48  ;;  %v354_v59 = vadd.f32 %v724_v3, %v318_v49  ;;  %v321_v62 = vmul.f32 %v711_v0, %v631_v50  ;;  %v322_v63 = vmul.f32 %v711_v0, %v632_v51 }
  0x32   : > { %478 = vst.msk [vmem:[%s756_s6 + $0xb0] sm:$0xff] %vm455_vm0, %v445_v38  ;;  %v415_v1 = vadd.f32 %v383_v46, %v351_v52  ;;  %v416_v2 = vadd.f32 %v384_v47, %v352_v53  ;;  %v355_v4 = vadd.f32 %v724_v3, %v319_v56  ;;  %v356_v5 = vadd.f32 %v724_v3, %v320_v57 }
  0x33   : > { %479 = vst.msk [vmem:[%s756_s6 + $0xb8] sm:$0xff] %vm455_vm0, %v446_v39  ;;  %v417_v8 = vadd.f32 %v385_v54, %v353_v58  ;;  %v418_v9 = vadd.f32 %v386_v55, %v354_v59  ;;  %v357_v10 = vadd.f32 %v724_v3, %v321_v62  ;;  %v358_v0 = vadd.f32 %v724_v3, %v322_v63 }
  0x34   : > { %v447_v11 = vmax.f32 %v415_v1, 0.0  ;;  %v448_v12 = vmax.f32 %v416_v2, 0.0  ;;  %v419_v13 = vadd.f32 %v387_v60, %v355_v4  ;;  %v420_v14 = vadd.f32 %v388_v61, %v356_v5 }
  0x35   : > { %v449_v15 = vmax.f32 %v417_v8, 0.0  ;;  %v450_v16 = vmax.f32 %v418_v9, 0.0  ;;  %v421_v17 = vadd.f32 %v389_v6, %v357_v10  ;;  %v422_v18 = vadd.f32 %v390_v7, %v358_v0 }
  0x36   : > { %480 = vst.msk [vmem:[%s756_s6 + $0xc0] sm:$0xff] %vm455_vm0, %v447_v11  ;;  %v451_v19 = vmax.f32 %v419_v13, 0.0  ;;  %v452_v20 = vmax.f32 %v420_v14, 0.0 }
  0x37   : > { %481 = vst.msk [vmem:[%s756_s6 + $0xc8] sm:$0xff] %vm455_vm0, %v448_v12  ;;  %v453_v3 = vmax.f32 %v421_v17, 0.0  ;;  %v454_v21 = vmax.f32 %v422_v18, 0.0 }
  0x38   : > { %482 = vst.msk [vmem:[%s756_s6 + $0xd0] sm:$0xff] %vm455_vm0, %v449_v15 }
  0x39   : > { %483 = vst.msk [vmem:[%s756_s6 + $0xd8] sm:$0xff] %vm455_vm0, %v450_v16 }
  0x3a   : > { %484 = vst.msk [vmem:[%s756_s6 + $0xe0] sm:$0xff] %vm455_vm0, %v451_v19 }
  0x3b   : > { %485 = vst.msk [vmem:[%s756_s6 + $0xe8] sm:$0xff] %vm455_vm0, %v452_v20 }
  0x3c   : > { %486 = vst.msk [vmem:[%s756_s6 + $0xf0] sm:$0xff] %vm455_vm0, %v453_v3 }
  0x3d   : > { %487 = vst.msk [vmem:[%s756_s6 + $0xf8] sm:$0xff] %vm455_vm0, %v454_v21 }
  0x3e PF: > { %s14_s15 = sadd.s32 1, %s664_s15  }
  0x3f   : > { %p11_p4 = scmp.ge.s32.totalorder %s14_s15, 4  }
  0x41   :  { %13 = sbr.rel (!%p11_p4) target bundleno = 1 (0x1), region = 69 }

// kernel: _lambda_.4
= control target key start
LH: loop header
LB: loop body
LE: loop exit
PB: predicated region body
PF: predicated region fallthrough
CT: control target
= control target key end

     0   :  { %9 = vsyncpa [#allocation3], 0  ;;  %s1032_s12 = smov 0   ;;  %s1234_s0 = inlined_call_operand.vmem [shape: bf16[512,16], index: 0, kind: input, shape index: {}]   ;;  %s1235_s1 = inlined_call_operand.hbm [shape: bf16[16,128], index: 1, kind: input, shape index: {}]   ;;  %s1236_s2 = inlined_call_operand.vmem [shape: bf16[512,128], index: 2, kind: output, shape index: {0}]   ;;  %s1237_s3 = inlined_call_operand.vmem [shape: f32[2,2,128], index: 3, kind: output, shape index: {1}]  }
   0x1 LB: > { %s130_s15 = sshll.u32 %s1235_s1, 4  ;;  %s1041_s16 = sadd.s32 4294967295, %s1007_s12   ;;  %s1007_s12 = sphi %s1032_s12, %s15_s12   ;;  %s131_s15 = int_to_ptr.hbm [resolvable:$true] %s130_s15 }
   0x2   : > { %p735_p0 = scmp.ge.s32.totalorder %s1007_s12, 1  ;;  %p119_p1 = scmp.lt.s32.totalorder %s1007_s12, 3 }
   0x3   : > { %p954_p2 = scmp.eq.s32.totalorder %s1041_s16, 0  ;;  %s1009_s17 = smov [#allocation2]  }
   0x4   : > { %p120_p3 = pnand %p735_p0, %p119_p1  ;;  %s132_s18 = sshll.u32 %s1009_s17, 4  ;;  %s133_s18 = int_to_ptr.vmem [resolvable:$true] %s132_s18 }
   0x5   : > { %s1010_s19 = smov 64   ;;  %s1011_s20 = smov 4  }
   0x6   : > { %p950_p4 = pneg %p120_p3  ;;  %157 = sbr.rel (%p120_p3) target bundleno = 267 (0x10b), region = 28 }
   0x8   : > { %p951_p5 = pnand %p954_p2, %p950_p4 }
   0xa   : > { %953 = dma.hbm_to_vmem [thread:$0]  (!%p951_p5), %s131_s15, 128, %s133_s18, [#allocation3], %s1010_s19, %s1010_s19, %s1011_s20  }
   0xb   : > { %1002 = dma.done.wait (%p954_p2), [#allocation3], 128  }
   0xc   : > { %1004 = vsyncadd (%p954_p2), [#allocation3], 4294967168  ;;  %s740_s21 = sshll.u32 %s1041_s16, 5  ;;  %v847_v0 = vld [vmem:[#allocation2] sm:$0xff]  ;;  %vm323_vm0 = vcmask 130048   ;;  %p198_p7 = scmp.lt.s32.totalorder %s1041_s16, 1 }
   0xd   : > { %p187_p6 = scmp.lt.s32.totalorder %s740_s21, 63  ;;  %379 = vmatpush.bf16.msra.mxu0 %v847_v0  ;;  %943 = vmatpush.bf16.msra.mxu1 %v847_v0  ;;  %vm631_vm1 = vcmask 1040384  }
   0xe   : > { %944 = vmatpush.bf16.msra.mxu2 %v847_v0  ;;  %945 = vmatpush.bf16.msra.mxu3 %v847_v0  ;;  %s1241_s16 = smov (!%p198_p7, %s1041_s16), 1 }
   0xf   : > { %s1239_s21 = smov (!%p187_p6, %s740_s21), 63  ;;  %s744_s29 = sshll.u32 %s1241_s16, 1 }
  0x10   : > { %s741_s22 = sshll.u32 %s1239_s21, 2  ;;  %s201_s5 = scalar_lea.vmem %s1237_s3, %s744_s29 }
  0x11   : > { %s1055_s25 = scalar_lea.vmem %s1234_s0, %s741_s22  ;;  %s1098_s28 = scalar_lea.vmem %s1236_s2, %s741_s22 }
  0x12   : > { %v831_v1 = vld [vmem:[%s1055_s25] sm:$0xff]  ;;  %v832_v5 = vld [vmem:[%s1055_s25 + $0x8] sm:$0xff]  ;;  %v833_v9 = vld [vmem:[%s1055_s25 + $0x10] sm:$0xff] }
  0x13   : > { %v835_v2 = vld [vmem:[%s1055_s25 + $0x20] sm:$0xff]  ;;  %813 = vmatmul.msk.bf16.vlgmr.msra.gmra.mxu0 %vm323_vm0, %v831_v1  ;;  %v836_v6 = vld [vmem:[%s1055_s25 + $0x28] sm:$0xff]  ;;  %v837_v10 = vld [vmem:[%s1055_s25 + $0x30] sm:$0xff] }
  0x14   : > { %v839_v3 = vld [vmem:[%s1055_s25 + $0x40] sm:$0xff]  ;;  %817 = vmatmul.msk.bf16.vlgmr.msra.gmra.mxu1 %vm323_vm0, %v835_v2  ;;  %v840_v7 = vld [vmem:[%s1055_s25 + $0x48] sm:$0xff]  ;;  %v841_v11 = vld [vmem:[%s1055_s25 + $0x50] sm:$0xff] }
  0x15   : > { %v843_v4 = vld [vmem:[%s1055_s25 + $0x60] sm:$0xff]  ;;  %821 = vmatmul.msk.bf16.vlgmr.msra.gmra.mxu2 %vm323_vm0, %v839_v3  ;;  %v844_v8 = vld [vmem:[%s1055_s25 + $0x68] sm:$0xff]  ;;  %v845_v12 = vld [vmem:[%s1055_s25 + $0x70] sm:$0xff] }
  0x16   : > { %825 = vmatmul.msk.bf16.vlgmr.msra.gmra.mxu3 %vm323_vm0, %v843_v4  ;;  %v834_v13 = vld [vmem:[%s1055_s25 + $0x18] sm:$0xff] }
  0x17   : > { %v838_v14 = vld [vmem:[%s1055_s25 + $0x38] sm:$0xff] }
  0x18   : > { %v842_v15 = vld [vmem:[%s1055_s25 + $0x58] sm:$0xff] }
  0x19   : > { %v846_v16 = vld [vmem:[%s1055_s25 + $0x78] sm:$0xff] }
  0x23   : > { %814 = vmatmul.msk.bf16.gmra.mxu0 %vm323_vm0, %v832_v5 }
  0x24   : > { %818 = vmatmul.msk.bf16.gmra.mxu1 %vm323_vm0, %v836_v6 }
  0x25   : > { %822 = vmatmul.msk.bf16.gmra.mxu2 %vm323_vm0, %v840_v7 }
  0x26   : > { %826 = vmatmul.msk.bf16.gmra.mxu3 %vm323_vm0, %v844_v8 }
  0x33   : > { %815 = vmatmul.msk.bf16.gmra.mxu0 %vm323_vm0, %v833_v9 }
  0x34   : > { %819 = vmatmul.msk.bf16.gmra.mxu1 %vm323_vm0, %v837_v10 }
  0x35   : > { %823 = vmatmul.msk.bf16.gmra.mxu2 %vm323_vm0, %v841_v11 }
  0x36   : > { %827 = vmatmul.msk.bf16.gmra.mxu3 %vm323_vm0, %v845_v12 }
  0x43   : > { %816 = vmatmul.msk.bf16.gmra.mxu0 %vm323_vm0, %v834_v13 }
  0x44   : > { %820 = vmatmul.msk.bf16.gmra.mxu1 %vm323_vm0, %v838_v14 }
  0x45   : > { %824 = vmatmul.msk.bf16.gmra.mxu2 %vm323_vm0, %v842_v15 }
  0x46   : > { %828 = vmatmul.msk.bf16.gmra.mxu3 %vm323_vm0, %v846_v16 }
  0x90   : > { %v381_v17 = vpop.f32.mrf.mxu0 }
  0x91   : > { %v1089_v18 = vpop.f32.mrf.mxu1  ;;  %v562_v50 = vmul.f32 %v381_v17, %v381_v17 }
  0x98   : > { %v1091_v19 = vpop.f32.mrf.mxu2  ;;  %v383_v20 = vpop.f32.mrf.mxu0 }
  0x99   : > { %v1100_v21 = vpop.f32.mrf.mxu1  ;;  %v851_v22 = vpack.c.bf16 %v383_v20, %v381_v17  ;;  %v1104_v24 = vpop.f32.mrf.mxu3  ;;  %v563_v49 = vmul.f32 %v383_v20, %v383_v20  ;;  %v525_v52 = vadd.f32 %v383_v20, %v381_v17  ;;  %v570_v20 = vmul.f32 %v1089_v18, %v1089_v18 }
  0x9a   : > { %v871_v23 = vpack.c.bf16 %v1100_v21, %v1089_v18 }
  0x9b   : > { %852 = vst [vmem:[%s1098_s28] sm:$0xff] %v851_v22   ;;  %v594_v53 = vadd.f32 %v563_v49, %v562_v50 }
  0x9c   : > { %931 = vst [vmem:[%s1098_s28 + $0x20] sm:$0xff] %v871_v23  }
  0xa0   : > { %v1108_v25 = vpop.f32.mrf.mxu2  ;;  %v386_v26 = vpop.f32.mrf.mxu0 }
  0xa1   : > { %v1110_v27 = vpop.f32.mrf.mxu1  ;;  %v891_v28 = vpack.c.bf16 %v1108_v25, %v1091_v19  ;;  %v1114_v29 = vpop.f32.mrf.mxu3  ;;  %v564_v51 = vmul.f32 %v386_v26, %v386_v26  ;;  %v526_v55 = vadd.f32 %v525_v52, %v386_v26 }
  0xa2   : > { %v911_v30 = vpack.c.bf16 %v1114_v29, %v1104_v24 }
  0xa3   : > { %935 = vst [vmem:[%s1098_s28 + $0x40] sm:$0xff] %v891_v28   ;;  %v595_v57 = vadd.f32 %v594_v53, %v564_v51 }
  0xa4   : > { %939 = vst [vmem:[%s1098_s28 + $0x60] sm:$0xff] %v911_v30  }
  0xa8   : > { %v1120_v31 = vpop.f32.mrf.mxu2  ;;  %v388_v32 = vpop.f32.mrf.mxu0 }
  0xa9   : > { %v1122_v33 = vpop.f32.mrf.mxu1  ;;  %v856_v34 = vpack.c.bf16 %v388_v32, %v386_v26  ;;  %v1126_v36 = vpop.f32.mrf.mxu3  ;;  %v565_v54 = vmul.f32 %v388_v32, %v388_v32  ;;  %v527_v62 = vadd.f32 %v526_v55, %v388_v32  ;;  %v571_v26 = vmul.f32 %v1100_v21, %v1100_v21 }
  0xaa   : > { %v876_v35 = vpack.c.bf16 %v1122_v33, %v1110_v27  ;;  %v572_v32 = vmul.f32 %v1110_v27, %v1110_v27 }
  0xab   : > { %928 = vst [vmem:[%s1098_s28 + $0x8] sm:$0xff] %v856_v34   ;;  %v596_v0 = vadd.f32 %v595_v57, %v565_v54 }
  0xac   : > { %932 = vst [vmem:[%s1098_s28 + $0x28] sm:$0xff] %v876_v35  }
  0xb0   : > { %v1130_v37 = vpop.f32.mrf.mxu2  ;;  %v391_v38 = vpop.f32.mrf.mxu0 }
  0xb1   : > { %v1132_v39 = vpop.f32.mrf.mxu1  ;;  %v896_v40 = vpack.c.bf16 %v1130_v37, %v1120_v31  ;;  %v1136_v41 = vpop.f32.mrf.mxu3  ;;  %v566_v58 = vmul.f32 %v391_v38, %v391_v38  ;;  %v528_v3 = vadd.f32 %v527_v62, %v391_v38  ;;  %v579_v62 = vmul.f32 %v1108_v25, %v1108_v25 }
  0xb2   : > { %v916_v42 = vpack.c.bf16 %v1136_v41, %v1126_v36 }
  0xb3   : > { %936 = vst [vmem:[%s1098_s28 + $0x48] sm:$0xff] %v896_v40   ;;  %v597_v4 = vadd.f32 %v596_v0, %v566_v58 }
  0xb4   : > { %940 = vst [vmem:[%s1098_s28 + $0x68] sm:$0xff] %v916_v42  }
  0xb8   : > { %v1142_v43 = vpop.f32.mrf.mxu2  ;;  %v393_v44 = vpop.f32.mrf.mxu0 }
  0xb9   : > { %v1144_v45 = vpop.f32.mrf.mxu1  ;;  %v861_v46 = vpack.c.bf16 %v393_v44, %v391_v38  ;;  %v1148_v48 = vpop.f32.mrf.mxu3  ;;  %v567_v1 = vmul.f32 %v393_v44, %v393_v44  ;;  %v529_v6 = vadd.f32 %v528_v3, %v393_v44  ;;  %v581_v3 = vmul.f32 %v1130_v37, %v1130_v37 }
  0xba   : > { %v881_v47 = vpack.c.bf16 %v1144_v45, %v1132_v39 }
  0xbb   : > { %929 = vst [vmem:[%s1098_s28 + $0x10] sm:$0xff] %v861_v46   ;;  %v598_v7 = vadd.f32 %v597_v4, %v567_v1 }
  0xbc   : > { %933 = vst [vmem:[%s1098_s28 + $0x30] sm:$0xff] %v881_v47   ;;  %v574_v47 = vmul.f32 %v1132_v39, %v1132_v39 }
  0xc0   : > { %v1152_v56 = vpop.f32.mrf.mxu2  ;;  %v396_v59 = vpop.f32.mrf.mxu0 }
  0xc1   : > { %v416_v60 = vpop.f32.mrf.mxu1  ;;  %v901_v61 = vpack.c.bf16 %v1152_v56, %v1142_v43  ;;  %v1156_v63 = vpop.f32.mrf.mxu3  ;;  %v568_v5 = vmul.f32 %v396_v59, %v396_v59  ;;  %v530_v8 = vadd.f32 %v529_v6, %v396_v59 }
  0xc2   : > { %v921_v2 = vpack.c.bf16 %v1156_v63, %v1148_v48  ;;  %v576_v54 = vmul.f32 %v416_v60, %v416_v60 }
  0xc3   : > { %937 = vst [vmem:[%s1098_s28 + $0x50] sm:$0xff] %v901_v61   ;;  %v599_v10 = vadd.f32 %v598_v7, %v568_v5 }
  0xc4   : > { %941 = vst [vmem:[%s1098_s28 + $0x70] sm:$0xff] %v921_v2  }
  0xc8   : > { %v436_v9 = vpop.f32.mrf.mxu2  ;;  %v398_v11 = vpop.f32.mrf.mxu0 }
  0xc9   : > { %v418_v12 = vpop.f32.mrf.mxu1  ;;  %v866_v13 = vpack.c.bf16 %v398_v11, %v396_v59  ;;  %v531_v14 = vadd.f32 %v530_v8, %v398_v11  ;;  %v569_v15 = vmul.f32 %v398_v11, %v398_v11  ;;  %v1162_v17 = vpop.f32.mrf.mxu3  ;;  %v578_v59 = vmul.f32 %v1091_v19, %v1091_v19 }
  0xca   : > { %v886_v16 = vpack.c.bf16 %v418_v12, %v416_v60  ;;  %v577_v58 = vmul.f32 %v418_v12, %v418_v12  ;;  %v583_v8 = vmul.f32 %v1152_v56, %v1152_v56 }
  0xcb   : > { %930 = vst [vmem:[%s1098_s28 + $0x18] sm:$0xff] %v866_v13   ;;  %v532_v22 = vadd.f32 %v531_v14, %v1089_v18  ;;  %v600_v23 = vadd.f32 %v599_v10, %v569_v15  ;;  %v573_v18 = vmul.f32 %v1122_v33, %v1122_v33 }
  0xcc   : > { %934 = vst [vmem:[%s1098_s28 + $0x38] sm:$0xff] %v886_v16  }
  0xcd   : > { %v533_v28 = vadd.f32 %v532_v22, %v1100_v21  ;;  %v601_v30 = vadd.f32 %v600_v23, %v570_v20 }
  0xcf   : > { %v534_v34 = vadd.f32 %v533_v28, %v1110_v27  ;;  %v602_v35 = vadd.f32 %v601_v30, %v571_v26  ;;  %v575_v27 = vmul.f32 %v1144_v45, %v1144_v45  ;;  %v589_v28 = vmul.f32 %v1136_v41, %v1136_v41 }
  0xd0   : > { %v438_v38 = vpop.f32.mrf.mxu2 }
  0xd1   : > { %v906_v40 = vpack.c.bf16 %v438_v38, %v436_v9  ;;  %v603_v42 = vadd.f32 %v602_v35, %v572_v32  ;;  %v535_v44 = vadd.f32 %v534_v34, %v1122_v33  ;;  %v458_v46 = vpop.f32.mrf.mxu3  ;;  %v585_v15 = vmul.f32 %v438_v38, %v438_v38 }
  0xd2   : > { %v926_v21 = vpack.c.bf16 %v458_v46, %v1162_v17  ;;  %v590_v32 = vmul.f32 %v1148_v48, %v1148_v48 }
  0xd3   : > { %938 = vst [vmem:[%s1098_s28 + $0x58] sm:$0xff] %v906_v40   ;;  %v536_v49 = vadd.f32 %v535_v44, %v1132_v39  ;;  %v604_v50 = vadd.f32 %v603_v42, %v573_v18  ;;  %v592_v42 = vmul.f32 %v1162_v17, %v1162_v17 }
  0xd4   : > { %942 = vst [vmem:[%s1098_s28 + $0x78] sm:$0xff] %v926_v21   ;;  %v593_v21 = vmul.f32 %v458_v46, %v458_v46 }
  0xd5   : > { %v537_v51 = vadd.f32 %v536_v49, %v1144_v45  ;;  %v605_v52 = vadd.f32 %v604_v50, %v574_v47  ;;  %v580_v45 = vmul.f32 %v1120_v31, %v1120_v31 }
  0xd7   : > { %v538_v53 = vadd.f32 %v537_v51, %v416_v60  ;;  %v606_v33 = vadd.f32 %v605_v52, %v575_v27 }
  0xd9   : > { %v607_v55 = vadd.f32 %v606_v33, %v576_v54  ;;  %v539_v57 = vadd.f32 %v538_v53, %v418_v12  ;;  %v584_v12 = vmul.f32 %v436_v9, %v436_v9 }
  0xdb   : > { %v540_v61 = vadd.f32 %v539_v57, %v1091_v19  ;;  %v608_v39 = vadd.f32 %v607_v55, %v577_v58  ;;  %v582_v19 = vmul.f32 %v1142_v43, %v1142_v43 }
  0xdd   : > { %v541_v0 = vadd.f32 %v540_v61, %v1108_v25  ;;  %v609_v1 = vadd.f32 %v608_v39, %v578_v59 }
  0xdf   : > { %v542_v60 = vadd.f32 %v541_v0, %v1120_v31  ;;  %v610_v2 = vadd.f32 %v609_v1, %v579_v62 }
  0xe1   : > { %v611_v4 = vadd.f32 %v610_v2, %v580_v45  ;;  %v543_v5 = vadd.f32 %v542_v60, %v1130_v37  ;;  %v586_v37 = vmul.f32 %v1104_v24, %v1104_v24 }
  0xe3   : > { %v544_v6 = vadd.f32 %v543_v5, %v1142_v43  ;;  %v612_v7 = vadd.f32 %v611_v4, %v581_v3  ;;  %v587_v43 = vmul.f32 %v1114_v29, %v1114_v29 }
  0xe5   : > { %v545_v25 = vadd.f32 %v544_v6, %v1152_v56  ;;  %v613_v10 = vadd.f32 %v612_v7, %v582_v19  ;;  %v588_v56 = vmul.f32 %v1126_v36, %v1126_v36 }
  0xe7   : > { %v614_v31 = vadd.f32 %v613_v10, %v583_v8  ;;  %v546_v11 = vadd.f32 %v545_v25, %v436_v9 }
  0xe9   : > { %v615_v13 = vadd.f32 %v614_v31, %v584_v12  ;;  %v547_v14 = vadd.f32 %v546_v11, %v438_v38 }
  0xeb   : > { %v548_v16 = vadd.f32 %v547_v14, %v1104_v24  ;;  %v616_v20 = vadd.f32 %v615_v13, %v585_v15 }
  0xed   : > { %v549_v22 = vadd.f32 %v548_v16, %v1114_v29  ;;  %v617_v23 = vadd.f32 %v616_v20, %v586_v37 }
  0xef   : > { %v550_v9 = vadd.f32 %v549_v22, %v1126_v36  ;;  %v618_v26 = vadd.f32 %v617_v23, %v587_v43  ;;  %v591_v36 = vmul.f32 %v1156_v63, %v1156_v63 }
  0xf1   : > { %v619_v30 = vadd.f32 %v618_v26, %v588_v56  ;;  %v551_v24 = vadd.f32 %v550_v9, %v1136_v41 }
  0xf3   : > { %v552_v34 = vadd.f32 %v551_v24, %v1148_v48  ;;  %v620_v29 = vadd.f32 %v619_v30, %v589_v28 }
  0xf5   : > { %v553_v35 = vadd.f32 %v552_v34, %v1156_v63  ;;  %v621_v38 = vadd.f32 %v620_v29, %v590_v32 }
  0xf7   : > { %v622_v40 = vadd.f32 %v621_v38, %v591_v36  ;;  %v554_v18 = vadd.f32 %v553_v35, %v1162_v17 }
  0xf9   : > { %v623_v41 = vadd.f32 %v622_v40, %v592_v42  ;;  %v555_v44 = vadd.f32 %v554_v18, %v458_v46 }
  0xfb   : > { %v556_v47 = vrot.slane %v555_v44, 4  ;;  %v624_v49 = vadd.f32 %v623_v41, %v593_v21 }
  0xfd   : > { %v557_v48 = vadd.f32 %v556_v47, %v555_v44  ;;  %v625_v50 = vrot.slane %v624_v49, 4 }
  0xff   : > { %v558_v27 = vrot.slane %v557_v48, 2  ;;  %v626_v51 = vadd.f32 %v625_v50, %v624_v49 }
 0x101   : > { %v559_v52 = vadd.f32 %v558_v27, %v557_v48  ;;  %v627_v63 = vrot.slane %v626_v51, 2 }
 0x103   : > { %v560_v53 = vrot.slane %v559_v52, 1  ;;  %v628_v54 = vadd.f32 %v627_v63, %v626_v51 }
 0x105   : > { %v629_v33 = vrot.slane %v628_v54, 1  ;;  %v561_v17 = vadd.f32 %v560_v53, %v559_v52 }
 0x107   : > { %v630_v46 = vadd.f32 %v629_v33, %v628_v54 }
 0x109   : > { %v632_v55 = vsel %vm631_vm1, %v561_v17, %v630_v46 }
 0x10a   : > { %633 = vst [vmem:[%s201_s5] sm:$0x3] %v632_v55 }
 0x10b PF: > { %s15_s12 = sadd.s32 1, %s1007_s12  }
 0x10c   : > { %p12_p8 = scmp.ge.s32.totalorder %s15_s12, 4  }
 0x10e   :  { %14 = sbr.rel (!%p12_p8) target bundleno = 1 (0x1), region = 75 }
 0x113   :  { %670 = vsyncpa [#allocation3], 1 }
 0x114   :  { %672 = vsyncpa [#allocation3 + $0x1], 1 }

// kernel: _lambda_.5
= control target key start
LH: loop header
LB: loop body
LE: loop exit
PB: predicated region body
PF: predicated region fallthrough
CT: control target
= control target key end

     0   :  { %12 = vsyncpa [#allocation3], 0  ;;  %s7437_s0 = inlined_call_operand.vmem [shape: bf16[2,256,128], index: 0, kind: input, shape index: {}]   ;;  %s7438_s1 = inlined_call_operand.vmem [shape: f32[1,128], index: 1, kind: input, shape index: {}]   ;;  %s7439_s2 = inlined_call_operand.vmem [shape: f32[1,128], index: 2, kind: input, shape index: {}]   ;;  %s7440_s3 = inlined_call_operand.hbm [shape: bf16[9,128,128], index: 3, kind: input, shape index: {}]   ;;  %s7441_s4 = inlined_call_operand.hbm [shape: f32[9,256,1], index: 4, kind: input, shape index: {}]   ;;  %s7442_s5 = inlined_call_operand.vmem [shape: bf16[2,256,128], index: 5, kind: output, shape index: {0}]   ;;  %s7443_s6 = inlined_call_operand.vmem [shape: f32[2,2,128], index: 6, kind: output, shape index: {1}]  }
   0x1   :  { %13 = vsyncpa [#allocation5], 0  ;;  %s5163_s21 = smov 0  }
   0x2 LB: > { %s203_s24 = sshll.u32 %s7440_s3, 4  ;;  %s5172_s25 = sadd.s32 4294967295, %s5119_s21   ;;  %s5119_s21 = sphi %s5163_s21, %s19_s21   ;;  %s204_s24 = int_to_ptr.hbm [resolvable:$true] %s203_s24 }
   0x3   : > { %p4432_p0 = scmp.ge.s32.totalorder %s5119_s21, 1  ;;  %p186_p1 = scmp.lt.s32.totalorder %s5119_s21, 3 }
   0x4   : > { %p5021_p2 = scmp.eq.s32.totalorder %s5172_s25, 0  ;;  %s5121_s27 = smov [#allocation2]  }
   0x5   : > { %p5177_p3 = pnand %p4432_p0, %p186_p1  ;;  %s205_s28 = sshll.u32 %s5121_s27, 4  ;;  %s206_s28 = int_to_ptr.vmem [resolvable:$true] %s205_s28 }
   0x6   : > { %s217_s7 = sshll.u32 %s7441_s4, 4  ;;  %s5122_s8 = smov [#allocation4]   ;;  %s218_s7 = int_to_ptr.hbm [resolvable:$true] %s217_s7 }
   0x7   : > { %p5014_p4 = pneg %p5177_p3  ;;  %s219_s9 = sshll.u32 %s5122_s8, 4  ;;  %s220_s9 = int_to_ptr.vmem [resolvable:$true] %s219_s9 }
   0x8   : > { %s5123_s10 = smov 64   ;;  %s5124_s11 = smov 4  }
   0x9   : > { %p5015_p5 = pnand %p5021_p2, %p5014_p4  ;;  %s5125_s12 = smov 128  }
   0xa   : > { %s5126_s13 = smov 8   ;;  %243 = sbr.rel (%p5177_p3) target bundleno = 1056 (0x420), region = 40 }
   0xb   : > { %5017 = dma.hbm_to_vmem [thread:$0]  (!%p5015_p5), %s204_s24, 9216, %s206_s28, [#allocation3], %s5123_s10, %s5123_s10, %s5124_s11  }
   0xc   : > { %5020 = dma.hbm_to_vmem [thread:$0]  (!%p5015_p5), %s218_s7, 36864, %s220_s9, [#allocation5], %s5125_s12, %s5125_s12, %s5126_s13  }
   0xf   : > { %5110 = dma.done.wait (%p5021_p2), [#allocation3], 9216  }
  0x10   : > { %5112 = vsyncadd (%p5021_p2), [#allocation3], 4294958080 }
  0x11   : > { %5114 = dma.done.wait (%p5021_p2), [#allocation5], 36864  }
  0x12   : > { %5116 = vsyncadd (%p5021_p2), [#allocation5], 4294930432  ;;  %v5127_v0 = vmov 0   ;;  %v536_v1 = vld [vmem:[#allocation4 + $0x20] sm:$0xff]  ;;  %v534_v2 = vld [vmem:[#allocation4 + $0x10] sm:$0xff]  ;;  %p283_p6 = scmp.lt.s32.totalorder %s5172_s25, 1 }
  0x13   : > { %5042 = vset.pattern.permute.xlu2 %v5127_v0  ;;  %5041 = vset.pattern.permute.xlu1 %v5127_v0  ;;  %v532_v3 = vld [vmem:[#allocation4] sm:$0xff]  ;;  %v537_v4 = vld [vmem:[#allocation4 + $0x28] sm:$0xff]  ;;  %v535_v5 = vld [vmem:[#allocation4 + $0x18] sm:$0xff]  ;;  %vm4319_vm2 = vcmask 1040384  }
  0x14   : > { %5040 = vset.pattern.permute.xlu0 %v5127_v0  ;;  %586 = vperm.xlu2 %5042, %v536_v1   ;;  %v533_v6 = vld [vmem:[#allocation4 + $0x8] sm:$0xff]  ;;  %v540_v7 = vld [vmem:[#allocation4 + $0x40] sm:$0xff]  ;;  %v539_v8 = vld [vmem:[#allocation4 + $0x38] sm:$0xff]  ;;  %s8151_s25 = smov (!%p283_p6, %s5172_s25), 1 }
  0x15   : > { %576 = vperm.xlu1 %5041, %v534_v2   ;;  %566 = vperm.xlu0 %5040, %v532_v3   ;;  %v538_v9 = vld [vmem:[#allocation4 + $0x30] sm:$0xff]  ;;  %v543_v10 = vld [vmem:[#allocation4 + $0x58] sm:$0xff]  ;;  %v541_v12 = vld [vmem:[#allocation4 + $0x48] sm:$0xff]  ;;  %s4734_s14 = sshll.u32 %s8151_s25, 7  ;;  %s4443_s27 = sshll.u32 %s8151_s25, 1 }
  0x16   : > { %v542_v11 = vld [vmem:[#allocation4 + $0x50] sm:$0xff]  ;;  %v545_v14 = vld [vmem:[#allocation4 + $0x68] sm:$0xff]  ;;  %v544_v15 = vld [vmem:[#allocation4 + $0x60] sm:$0xff]  ;;  %s5268_s17 = scalar_lea.vmem %s7437_s0, %s4734_s14  ;;  %s7239_s26 = scalar_lea.vmem %s7442_s5, %s4734_s14 }
  0x17   : > { %v546_v13 = vld [vmem:[#allocation4 + $0x70] sm:$0xff]  ;;  %v549_v16 = vld [vmem:[#allocation4 + $0x88] sm:$0xff]  ;;  %v548_v17 = vld [vmem:[#allocation4 + $0x80] sm:$0xff]  ;;  %s296_s30 = scalar_lea.vmem %s7443_s6, %s4443_s27 }
  0x18   : > { %v547_v18 = vld [vmem:[#allocation4 + $0x78] sm:$0xff]  ;;  %v552_v19 = vld [vmem:[#allocation4 + $0xa0] sm:$0xff]  ;;  %v550_v21 = vld [vmem:[#allocation4 + $0x90] sm:$0xff] }
  0x19   : > { %v551_v20 = vld [vmem:[#allocation4 + $0x98] sm:$0xff]  ;;  %v554_v23 = vld [vmem:[#allocation4 + $0xb0] sm:$0xff]  ;;  %v553_v24 = vld [vmem:[#allocation4 + $0xa8] sm:$0xff] }
  0x1a   : > { %v555_v22 = vld [vmem:[#allocation4 + $0xb8] sm:$0xff]  ;;  %v558_v25 = vld [vmem:[#allocation4 + $0xd0] sm:$0xff]  ;;  %v557_v26 = vld [vmem:[#allocation4 + $0xc8] sm:$0xff] }
  0x1b   : > { %v556_v27 = vld [vmem:[#allocation4 + $0xc0] sm:$0xff]  ;;  %v561_v28 = vld [vmem:[#allocation4 + $0xe8] sm:$0xff]  ;;  %v559_v30 = vld [vmem:[#allocation4 + $0xd8] sm:$0xff] }
  0x1c   : > { %591 = vperm.xlu2 %5042, %v537_v4   ;;  %v560_v29 = vld [vmem:[#allocation4 + $0xe0] sm:$0xff]  ;;  %v563_v32 = vld [vmem:[#allocation4 + $0xf8] sm:$0xff]  ;;  %v562_v33 = vld [vmem:[#allocation4 + $0xf0] sm:$0xff] }
  0x1d   : > { %581 = vperm.xlu1 %5041, %v535_v5   ;;  %571 = vperm.xlu0 %5040, %v533_v6   ;;  %v789_v31 = vld [vmem:[#allocation4 + $0x100] sm:$0xff]  ;;  %v792_v34 = vld [vmem:[#allocation4 + $0x118] sm:$0xff]  ;;  %v791_v35 = vld [vmem:[#allocation4 + $0x110] sm:$0xff] }
  0x1e   : > { %v790_v36 = vld [vmem:[#allocation4 + $0x108] sm:$0xff]  ;;  %v795_v38 = vld [vmem:[#allocation4 + $0x130] sm:$0xff]  ;;  %v793_v40 = vld [vmem:[#allocation4 + $0x120] sm:$0xff] }
  0x1f   : > { %v794_v39 = vld [vmem:[#allocation4 + $0x128] sm:$0xff]  ;;  %v797_v43 = vld [vmem:[#allocation4 + $0x140] sm:$0xff]  ;;  %v796_v44 = vld [vmem:[#allocation4 + $0x138] sm:$0xff] }
  0x20   : > { %v798_v42 = vld [vmem:[#allocation4 + $0x148] sm:$0xff]  ;;  %v801_v46 = vld [vmem:[#allocation4 + $0x160] sm:$0xff]  ;;  %v800_v47 = vld [vmem:[#allocation4 + $0x158] sm:$0xff] }
  0x21   : > { %v799_v48 = vld [vmem:[#allocation4 + $0x150] sm:$0xff]  ;;  %v804_v52 = vld [vmem:[#allocation4 + $0x178] sm:$0xff]  ;;  %v802_v54 = vld [vmem:[#allocation4 + $0x168] sm:$0xff] }
  0x22   : > { %v803_v53 = vld [vmem:[#allocation4 + $0x170] sm:$0xff]  ;;  %v806_v59 = vld [vmem:[#allocation4 + $0x188] sm:$0xff]  ;;  %v805_v60 = vld [vmem:[#allocation4 + $0x180] sm:$0xff] }
  0x23   : > { %v807_v58 = vld [vmem:[#allocation4 + $0x190] sm:$0xff]  ;;  %v810_v0 = vld [vmem:[#allocation4 + $0x1a8] sm:$0xff]  ;;  %v809_v1 = vld [vmem:[#allocation4 + $0x1a0] sm:$0xff] }
  0x24   : > { %606 = vperm.xlu2 %5042, %v540_v7   ;;  %v808_v2 = vld [vmem:[#allocation4 + $0x198] sm:$0xff]  ;;  %v813_v6 = vld [vmem:[#allocation4 + $0x1c0] sm:$0xff] }
  0x25   : > { %601 = vperm.xlu1 %5041, %v539_v8   ;;  %596 = vperm.xlu0 %5040, %v538_v9   ;;  %v812_v7 = vld [vmem:[#allocation4 + $0x1b8] sm:$0xff]  ;;  %v811_v8 = vld [vmem:[#allocation4 + $0x1b0] sm:$0xff] }
  0x26   : > { %v4751_v9 = vld [vmem:[#allocation2 + $0x78] sm:$0xff] }
  0x27   : > { %1094 = vmatpush.bf16.msra.mxu0 %v4751_v9  ;;  %4982 = vmatpush.bf16.msra.mxu1 %v4751_v9 }
  0x28   : > { %4983 = vmatpush.bf16.msra.mxu2 %v4751_v9  ;;  %4984 = vmatpush.bf16.msra.mxu3 %v4751_v9 }
  0x2c   : > { %621 = vperm.xlu2 %5042, %v543_v10  }
  0x2d   : > { %616 = vperm.xlu1 %5041, %v542_v11   ;;  %611 = vperm.xlu0 %5040, %v541_v12  }
  0x34   : > { %636 = vperm.xlu2 %5042, %v546_v13   ;;  %v4750_v13 = vld [vmem:[#allocation2 + $0x70] sm:$0xff] }
  0x35   : > { %631 = vperm.xlu1 %5041, %v545_v14   ;;  %626 = vperm.xlu0 %5040, %v544_v15   ;;  %v816_v14 = vld [vmem:[#allocation4 + $0x1d8] sm:$0xff]  ;;  %v815_v15 = vld [vmem:[#allocation4 + $0x1d0] sm:$0xff] }
  0x36   : > { %1095 = vmatpush.bf16.msra.mxu0 %v4750_v13  ;;  %4985 = vmatpush.bf16.msra.mxu1 %v4750_v13 }
  0x37   : > { %4986 = vmatpush.bf16.msra.mxu2 %v4750_v13  ;;  %4987 = vmatpush.bf16.msra.mxu3 %v4750_v13 }
  0x3c   : > { %651 = vperm.xlu2 %5042, %v549_v16   ;;  %v814_v16 = vld [vmem:[#allocation4 + $0x1c8] sm:$0xff] }
  0x3d   : > { %646 = vperm.xlu1 %5041, %v548_v17   ;;  %641 = vperm.xlu0 %5040, %v547_v18   ;;  %v4749_v17 = vld [vmem:[#allocation2 + $0x68] sm:$0xff] }
  0x3e   : > { %1096 = vmatpush.bf16.msra.mxu0 %v4749_v17  ;;  %4988 = vmatpush.bf16.msra.mxu1 %v4749_v17 }
  0x3f   : > { %4989 = vmatpush.bf16.msra.mxu2 %v4749_v17  ;;  %4990 = vmatpush.bf16.msra.mxu3 %v4749_v17  ;;  %v1399_v17 = vld [vmem:[#allocation4 + $0x268] sm:$0xff] }
  0x44   : > { %666 = vperm.xlu2 %5042, %v552_v19  }
  0x45   : > { %661 = vperm.xlu1 %5041, %v551_v20   ;;  %656 = vperm.xlu0 %5040, %v550_v21   ;;  %v4748_v21 = vld [vmem:[#allocation2 + $0x60] sm:$0xff] }
  0x46   : > { %1097 = vmatpush.bf16.msra.mxu0 %v4748_v21  ;;  %4991 = vmatpush.bf16.msra.mxu1 %v4748_v21 }
  0x47   : > { %4992 = vmatpush.bf16.msra.mxu2 %v4748_v21  ;;  %4993 = vmatpush.bf16.msra.mxu3 %v4748_v21  ;;  %v1398_v21 = vld [vmem:[#allocation4 + $0x260] sm:$0xff] }
  0x4c   : > { %681 = vperm.xlu2 %5042, %v555_v22   ;;  %v819_v22 = vld [vmem:[#allocation4 + $0x1f0] sm:$0xff] }
  0x4d   : > { %676 = vperm.xlu1 %5041, %v554_v23   ;;  %671 = vperm.xlu0 %5040, %v553_v24   ;;  %v818_v23 = vld [vmem:[#allocation4 + $0x1e8] sm:$0xff]  ;;  %v817_v24 = vld [vmem:[#allocation4 + $0x1e0] sm:$0xff] }
  0x54   : > { %696 = vperm.xlu2 %5042, %v558_v25   ;;  %v4747_v25 = vld [vmem:[#allocation2 + $0x58] sm:$0xff] }
  0x55   : > { %691 = vperm.xlu1 %5041, %v557_v26   ;;  %686 = vperm.xlu0 %5040, %v556_v27  }
  0x56   : > { %1098 = vmatpush.bf16.msra.mxu0 %v4747_v25  ;;  %4994 = vmatpush.bf16.msra.mxu1 %v4747_v25 }
  0x57   : > { %4995 = vmatpush.bf16.msra.mxu2 %v4747_v25  ;;  %4996 = vmatpush.bf16.msra.mxu3 %v4747_v25  ;;  %v4809_v25 = vld [vmem:[%s5268_s17] sm:$0xff]  }
  0x5c   : > { %711 = vperm.xlu2 %5042, %v561_v28  }
  0x5d   : > { %706 = vperm.xlu1 %5041, %v560_v29   ;;  %701 = vperm.xlu0 %5040, %v559_v30   ;;  %v4746_v29 = vld [vmem:[#allocation2 + $0x50] sm:$0xff]  ;;  %v1387_v30 = vld [vmem:[#allocation4 + $0x208] sm:$0xff] }
  0x5e   : > { %1099 = vmatpush.bf16.msra.mxu0 %v4746_v29  ;;  %4997 = vmatpush.bf16.msra.mxu1 %v4746_v29 }
  0x5f   : > { %4998 = vmatpush.bf16.msra.mxu2 %v4746_v29  ;;  %4999 = vmatpush.bf16.msra.mxu3 %v4746_v29  ;;  %v4954_v29 = vld [vmem:[%s5268_s17 + $0x18] sm:$0xff]  }
  0x64   : > { %823 = vperm.xlu2 %5042, %v789_v31   ;;  %v1386_v31 = vld [vmem:[#allocation4 + $0x200] sm:$0xff] }
  0x65   : > { %721 = vperm.xlu1 %5041, %v563_v32   ;;  %716 = vperm.xlu0 %5040, %v562_v33   ;;  %v820_v32 = vld [vmem:[#allocation4 + $0x1f8] sm:$0xff]  ;;  %v4745_v33 = vld [vmem:[#allocation2 + $0x48] sm:$0xff] }
  0x66   : > { %1100 = vmatpush.bf16.msra.mxu0 %v4745_v33  ;;  %5000 = vmatpush.bf16.msra.mxu1 %v4745_v33 }
  0x67   : > { %5001 = vmatpush.bf16.msra.mxu2 %v4745_v33  ;;  %5002 = vmatpush.bf16.msra.mxu3 %v4745_v33 }
  0x6c   : > { %838 = vperm.xlu2 %5042, %v792_v34  }
  0x6d   : > { %833 = vperm.xlu1 %5041, %v791_v35   ;;  %828 = vperm.xlu0 %5040, %v790_v36  }
  0x6e   : > { %v5198_v37 = vpop.permute.xlu2 %586 }
  0x74   : > { %853 = vperm.xlu2 %5042, %v795_v38   ;;  %v4744_v38 = vld [vmem:[#allocation2 + $0x40] sm:$0xff] }
  0x75   : > { %848 = vperm.xlu1 %5041, %v794_v39   ;;  %843 = vperm.xlu0 %5040, %v793_v40   ;;  %v1390_v39 = vld [vmem:[#allocation4 + $0x220] sm:$0xff]  ;;  %v1389_v40 = vld [vmem:[#allocation4 + $0x218] sm:$0xff] }
  0x76   : > { %v5200_v41 = vpop.permute.xlu2 %591  ;;  %1101 = vmatpush.bf16.msra.mxu0 %v4744_v38  ;;  %5003 = vmatpush.bf16.msra.mxu1 %v4744_v38 }
  0x77   : > { %5004 = vmatpush.bf16.msra.mxu2 %v4744_v38  ;;  %5005 = vmatpush.bf16.msra.mxu3 %v4744_v38 }
  0x7c   : > { %868 = vperm.xlu2 %5042, %v798_v42   ;;  %v1388_v42 = vld [vmem:[#allocation4 + $0x210] sm:$0xff] }
  0x7d   : > { %863 = vperm.xlu1 %5041, %v797_v43   ;;  %858 = vperm.xlu0 %5040, %v796_v44  }
  0x7e   : > { %v5202_v45 = vpop.permute.xlu2 %606 }
  0x84   : > { %883 = vperm.xlu2 %5042, %v801_v46  }
  0x85   : > { %878 = vperm.xlu1 %5041, %v800_v47   ;;  %873 = vperm.xlu0 %5040, %v799_v48   ;;  %v1393_v47 = vld [vmem:[#allocation4 + $0x238] sm:$0xff]  ;;  %v1392_v48 = vld [vmem:[#allocation4 + $0x230] sm:$0xff] }
  0x86   : > { %v5204_v49 = vpop.permute.xlu2 %621 }
  0x87   : > { %v5206_v50 = vpop.permute.xlu1 %576  ;;  %v5208_v51 = vpop.permute.xlu0 %566 }
  0x8c   : > { %898 = vperm.xlu2 %5042, %v804_v52   ;;  %v1391_v52 = vld [vmem:[#allocation4 + $0x228] sm:$0xff] }
  0x8d   : > { %893 = vperm.xlu1 %5041, %v803_v53   ;;  %888 = vperm.xlu0 %5040, %v802_v54  }
  0x8e   : > { %v5210_v55 = vpop.permute.xlu2 %636 }
  0x8f   : > { %7628 = vst [vmem:[#allocation8_spill] sm:$0xff] %v5210_v55  ;;  %v5212_v56 = vpop.permute.xlu1 %581  ;;  %v5214_v57 = vpop.permute.xlu0 %571  ;;  %v5418_v55 = vld [vmem:[%s5268_s17 + $0x70] sm:$0xff]  }
  0x94   : > { %913 = vperm.xlu2 %5042, %v807_v58   ;;  %v4966_v58 = vld [vmem:[%s5268_s17 + $0x78] sm:$0xff]  }
  0x95   : > { %908 = vperm.xlu1 %5041, %v806_v59   ;;  %903 = vperm.xlu0 %5040, %v805_v60   ;;  %v1396_v60 = vld [vmem:[#allocation4 + $0x250] sm:$0xff] }
  0x96   : > { %v5216_v61 = vpop.permute.xlu2 %651 }
  0x97   : > { %7629 = vst [vmem:[#allocation9_spill] sm:$0xff] %v5216_v61  ;;  %v5218_v62 = vpop.permute.xlu1 %601  ;;  %v5220_v63 = vpop.permute.xlu0 %596 }
  0x9c   : > { %928 = vperm.xlu2 %5042, %v810_v0   ;;  %v1395_v0 = vld [vmem:[#allocation4 + $0x248] sm:$0xff] }
  0x9d   : > { %923 = vperm.xlu1 %5041, %v809_v1   ;;  %918 = vperm.xlu0 %5040, %v808_v2   ;;  %v5280_v1 = vld [vmem:[%s7438_s1] ss:$0 sm:$0xff]  ;;  %v4871_v2 = vunpack.c.h.bf16 %v4966_v58 }
  0x9e   : > { %v5222_v3 = vpop.permute.xlu2 %666 }
  0x9f   : > { %7630 = vst [vmem:[#allocation10_spill] sm:$0xff] %v5222_v3  ;;  %v5224_v4 = vpop.permute.xlu1 %616  ;;  %v5226_v5 = vpop.permute.xlu0 %611  ;;  %v396_v9 = vmul.f32 %v5280_v1, %v4871_v2  ;;  %v1400_v2 = vld [vmem:[#allocation4 + $0x270] sm:$0xff] }
  0xa4   : > { %943 = vperm.xlu2 %5042, %v813_v6   ;;  %v4870_v6 = vunpack.c.l.bf16 %v4966_v58  ;;  %v4811_v58 = vunpack.c.h.bf16 %v4809_v25 }
  0xa5   : > { %938 = vperm.xlu1 %5041, %v812_v7   ;;  %933 = vperm.xlu0 %5040, %v811_v8   ;;  %v1394_v7 = vld [vmem:[#allocation4 + $0x240] sm:$0xff] }
  0xa6   : > { %v5228_v10 = vpop.permute.xlu2 %681  ;;  %v5285_v8 = vld [vmem:[%s7439_s2] ss:$0 sm:$0xff]  ;;  %v395_v13 = vmul.f32 %v5280_v1, %v4870_v6 }
  0xa7   : > { %7631 = vst [vmem:[#allocation11_spill] sm:$0xff] %v5228_v10  ;;  %v5230_v11 = vpop.permute.xlu1 %631  ;;  %v5232_v12 = vpop.permute.xlu0 %626 }
  0xa8   : > { %7632 = vst [vmem:[#allocation12_spill] sm:$0xff] %v5230_v11  ;;  %v4961_v11 = vld [vmem:[%s5268_s17 + $0x50] sm:$0xff]  }
  0xa9   : > { %7633 = vst [vmem:[#allocation13_spill] sm:$0xff] %v5232_v12 }
  0xac   : > { %958 = vperm.xlu2 %5042, %v816_v14  }
  0xad   : > { %953 = vperm.xlu1 %5041, %v815_v15   ;;  %948 = vperm.xlu0 %5040, %v814_v16  }
  0xae   : > { %v5234_v18 = vpop.permute.xlu2 %696 }
  0xaf   : > { %7634 = vst [vmem:[#allocation14_spill] sm:$0xff] %v5234_v18  ;;  %v5236_v19 = vpop.permute.xlu1 %646  ;;  %v5238_v20 = vpop.permute.xlu0 %641  ;;  %v4956_v18 = vld [vmem:[%s5268_s17 + $0x28] sm:$0xff]  }
  0xb0   : > { %7635 = vst [vmem:[#allocation15_spill] sm:$0xff] %v5236_v19 }
  0xb1   : > { %7636 = vst [vmem:[#allocation16_spill] sm:$0xff] %v5238_v20  ;;  %v4755_v20 = vld [vmem:[#allocation2 + $0x98] sm:$0xff] }
  0xb4   : > { %973 = vperm.xlu2 %5042, %v819_v22   ;;  %v432_v22 = vadd.f32 %v5285_v8, %v396_v9 }
  0xb5   : > { %968 = vperm.xlu1 %5041, %v818_v23   ;;  %963 = vperm.xlu0 %5040, %v817_v24   ;;  %v431_v23 = vadd.f32 %v5285_v8, %v395_v13  ;;  %v1397_v24 = vld [vmem:[#allocation4 + $0x258] sm:$0xff] }
  0xb6   : > { %v5240_v26 = vpop.permute.xlu2 %711 }
  0xb7   : > { %7637 = vst [vmem:[#allocation17_spill] sm:$0xff] %v5240_v26  ;;  %v5242_v27 = vpop.permute.xlu1 %661  ;;  %v5244_v28 = vpop.permute.xlu0 %656 }
  0xb8   : > { %7638 = vst [vmem:[#allocation18_spill] sm:$0xff] %v5242_v27 }
  0xb9   : > { %7639 = vst [vmem:[#allocation19_spill] sm:$0xff] %v5244_v28  ;;  %v4759_v28 = vld [vmem:[#allocation2 + $0xb8] sm:$0xff] }
  0xba   : > { %1691 = vmatpush.bf16.msrb.mxu2 %v4759_v28 }
  0xbc   : > { %1425 = vperm.xlu2 %5042, %v1387_v30   ;;  %v5297_v30 = vmax.f32 %v432_v22, 0.0 }
  0xbd   : > { %1420 = vperm.xlu1 %5041, %v1386_v31   ;;  %978 = vperm.xlu0 %5040, %v820_v32   ;;  %v5299_v31 = vmax.f32 %v431_v23, 0.0 }
  0xbe   : > { %v5246_v34 = vpop.permute.xlu2 %823  ;;  %7648 = vst [vmem:[#allocation28_spill] sm:$0xff] %v5297_v30 }
  0xbf   : > { %v5248_v35 = vpop.permute.xlu1 %676  ;;  %v5250_v36 = vpop.permute.xlu0 %671  ;;  %7649 = vst [vmem:[#allocation29_spill] sm:$0xff] %v5299_v31 }
  0xc0   : > { %7640 = vst [vmem:[#allocation20_spill] sm:$0xff] %v5248_v35  ;;  %v1412_v35 = vld [vmem:[#allocation4 + $0x2d0] sm:$0xff] }
  0xc1   : > { %7641 = vst [vmem:[#allocation21_spill] sm:$0xff] %v5250_v36 }
  0xc4   : > { %1440 = vperm.xlu2 %5042, %v1390_v39   ;;  %v4810_v39 = vunpack.c.l.bf16 %v4809_v25  ;;  %v1405_v25 = vld [vmem:[#allocation4 + $0x298] sm:$0xff] }
  0xc5   : > { %1435 = vperm.xlu1 %5041, %v1389_v40   ;;  %1430 = vperm.xlu0 %5040, %v1388_v42   ;;  %v981_v40 = vmul.f32 %v5246_v34, %v5299_v31  ;;  %v366_v34 = vmul.f32 %v5280_v1, %v4811_v58 }
  0xc6   : > { %v5256_v43 = vpop.permute.xlu2 %838  ;;  %v365_v6 = vmul.f32 %v5280_v1, %v4810_v39  ;;  %v1403_v39 = vld [vmem:[#allocation4 + $0x288] sm:$0xff] }
  0xc7   : > { %v5258_v44 = vpop.permute.xlu1 %691  ;;  %v5260_v46 = vpop.permute.xlu0 %686 }
  0xc8   : > { %7642 = vst [vmem:[#allocation22_spill] sm:$0xff] %v5258_v44  ;;  %v401_v22 = vadd.f32 %v5285_v8, %v365_v6 }
  0xc9   : > { %7643 = vst [vmem:[#allocation23_spill] sm:$0xff] %v5260_v46 }
  0xcc   : > { %1455 = vperm.xlu2 %5042, %v1393_v47   ;;  %v4822_v47 = vunpack.c.l.bf16 %v4954_v29 }
  0xcd   : > { %1450 = vperm.xlu1 %5041, %v1392_v48   ;;  %1445 = vperm.xlu0 %5040, %v1391_v52   ;;  %v4823_v48 = vunpack.c.h.bf16 %v4954_v29  ;;  %v1402_v52 = vld [vmem:[#allocation4 + $0x280] sm:$0xff]  ;;  %v402_v29 = vadd.f32 %v5285_v8, %v366_v34 }
  0xce   : > { %v5270_v53 = vpop.permute.xlu2 %853 }
  0xcf   : > { %v5272_v54 = vpop.permute.xlu1 %706  ;;  %v5275_v59 = vpop.permute.xlu0 %701  ;;  %v372_v9 = vmul.f32 %v5280_v1, %v4823_v48  ;;  %v5328_v58 = vmax.f32 %v402_v29, 0.0 }
  0xd0   : > { %7644 = vst [vmem:[#allocation24_spill] sm:$0xff] %v5272_v54 }
  0xd1   : > { %7645 = vst [vmem:[#allocation25_spill] sm:$0xff] %v5275_v59 }
  0xd2   : > { %7653 = vst [vmem:[#allocation33_spill] sm:$0xff] %v5328_v58 }
  0xd4   : > { %1470 = vperm.xlu2 %5042, %v1396_v60  }
  0xd5   : > { %1465 = vperm.xlu1 %5041, %v1395_v0   ;;  %1460 = vperm.xlu0 %5040, %v1394_v7   ;;  %v1401_v0 = vld [vmem:[#allocation4 + $0x278] sm:$0xff]  ;;  %v371_v7 = vmul.f32 %v5280_v1, %v4822_v47  ;;  %v4952_v47 = vld [vmem:[%s5268_s17 + $0x8] sm:$0xff]  }
  0xd6   : > { %v869_v14 = vpop.permute.xlu2 %868 }
  0xd7   : > { %v5289_v15 = vpop.permute.xlu1 %721  ;;  %v5291_v16 = vpop.permute.xlu0 %716  ;;  %v407_v23 = vadd.f32 %v5285_v8, %v371_v7 }
  0xd8   : > { %7646 = vst [vmem:[#allocation26_spill] sm:$0xff] %v5289_v15 }
  0xd9   : > { %7647 = vst [vmem:[#allocation27_spill] sm:$0xff] %v5291_v16  ;;  %v5324_v48 = vmax.f32 %v407_v23, 0.0  ;;  %v4814_v23 = vunpack.c.l.bf16 %v4952_v47  ;;  %v1406_v16 = vld [vmem:[#allocation4 + $0x2a0] sm:$0xff] }
  0xdb   : > { %7651 = vst [vmem:[#allocation31_spill] sm:$0xff] %v5324_v48 }
  0xdc   : > { %1485 = vperm.xlu2 %5042, %v1399_v17  }
  0xdd   : > { %1480 = vperm.xlu1 %5041, %v1398_v21   ;;  %1475 = vperm.xlu0 %5040, %v1397_v24   ;;  %v408_v24 = vadd.f32 %v5285_v8, %v372_v9 }
  0xde   : > { %v5301_v32 = vpop.permute.xlu2 %883 }
  0xdf   : > { %v834_v33 = vpop.permute.xlu1 %833  ;;  %v829_v38 = vpop.permute.xlu0 %828 }
  0xe0   : > { %v982_v42 = vmul.f32 %v829_v38, %v5297_v30  ;;  %v1404_v38 = vld [vmem:[#allocation4 + $0x290] sm:$0xff] }
  0xe2   : > { %v1013_v60 = vpack.c.bf16 %v982_v42, %v981_v40  ;;  %v4955_v40 = vld [vmem:[%s5268_s17 + $0x20] sm:$0xff]   ;;  %v5321_v42 = vmax.f32 %v401_v22, 0.0 }
  0xe3   : > { %v4826_v6 = vunpack.c.l.bf16 %v4955_v40  ;;  %v4827_v7 = vunpack.c.h.bf16 %v4955_v40 }
  0xe4   : > { %1102 = vmatmul.bf16.vlgmr.msra.gmra.mxu0 %v1013_v60  ;;  %1500 = vperm.xlu2 %5042, %v1402_v52   ;;  %7650 = vst [vmem:[#allocation30_spill] sm:$0xff] %v5321_v42  ;;  %v5326_v52 = vmax.f32 %v408_v24, 0.0  ;;  %v983_v60 = vmul.f32 %v834_v33, %v5321_v42  ;;  %v4815_v24 = vunpack.c.h.bf16 %v4952_v47 }
  0xe5   : > { %1495 = vperm.xlu1 %5041, %v1401_v0   ;;  %1490 = vperm.xlu0 %5040, %v1400_v2   ;;  %v373_v15 = vmul.f32 %v5280_v1, %v4826_v6  ;;  %v374_v40 = vmul.f32 %v5280_v1, %v4827_v7 }
  0xe6   : > { %v5310_v13 = vpop.permute.xlu2 %898  ;;  %7652 = vst [vmem:[#allocation32_spill] sm:$0xff] %v5326_v52  ;;  %v990_v9 = vmul.f32 %v869_v14, %v5326_v52  ;;  %v4743_v14 = vld [vmem:[#allocation2 + $0x38] sm:$0xff]  ;;  %v368_v26 = vmul.f32 %v5280_v1, %v4815_v24 }
  0xe7   : > { %v5312_v17 = vpop.permute.xlu1 %848  ;;  %v5314_v21 = vpop.permute.xlu0 %843  ;;  %1231 = vmatpush.bf16.msrb.mxu1 %v4743_v14  ;;  %v410_v6 = vadd.f32 %v5285_v8, %v374_v40 }
  0xe8   : > { %v404_v24 = vadd.f32 %v5285_v8, %v368_v26 }
  0xe9   : > { %v5352_v14 = vmax.f32 %v410_v6, 0.0 }
  0xea   : > { %v5356_v54 = vmax.f32 %v404_v24, 0.0 }
  0xeb   : > { %7655 = vst [vmem:[#allocation35_spill] sm:$0xff] %v5352_v14 }
  0xec   : > { %1515 = vperm.xlu2 %5042, %v1405_v25   ;;  %v984_v25 = vmul.f32 %v5256_v43, %v5328_v58  ;;  %v4958_v43 = vld [vmem:[%s5268_s17 + $0x38] sm:$0xff]   ;;  %7657 = vst [vmem:[#allocation37_spill] sm:$0xff] %v5356_v54  ;;  %v986_v6 = vmul.f32 %v5312_v17, %v5356_v54 }
  0xed   : > { %1510 = vperm.xlu1 %5041, %v1404_v38   ;;  %1505 = vperm.xlu0 %5040, %v1403_v39   ;;  %v1408_v38 = vld [vmem:[#allocation4 + $0x2b0] sm:$0xff]  ;;  %v1407_v39 = vld [vmem:[#allocation4 + $0x2a8] sm:$0xff] }
  0xee   : > { %v5331_v0 = vpop.permute.xlu2 %913  ;;  %v1014_v33 = vpack.c.bf16 %v984_v25, %v983_v60  ;;  %v4839_v25 = vunpack.c.h.bf16 %v4958_v43 }
  0xef   : > { %v864_v2 = vpop.permute.xlu1 %863  ;;  %v5335_v22 = vpop.permute.xlu0 %858 }
  0xf0   : > { %v989_v34 = vmul.f32 %v864_v2, %v5324_v48  ;;  %v367_v2 = vmul.f32 %v5280_v1, %v4814_v23  ;;  %v380_v26 = vmul.f32 %v5280_v1, %v4839_v25  ;;  %v4831_v25 = vunpack.c.h.bf16 %v4956_v18 }
  0xf2   : > { %v1017_v29 = vpack.c.bf16 %v990_v9, %v989_v34  ;;  %v409_v9 = vadd.f32 %v5285_v8, %v373_v15  ;;  %v4742_v34 = vld [vmem:[#allocation2 + $0x30] sm:$0xff]  ;;  %v403_v23 = vadd.f32 %v5285_v8, %v367_v2  ;;  %v4741_v15 = vld [vmem:[#allocation2 + $0x28] sm:$0xff]  ;;  %v376_v3 = vmul.f32 %v5280_v1, %v4831_v25 }
  0xf3   : > { %1232 = vmatpush.bf16.msrb.mxu1 %v4742_v34  ;;  %v4953_v2 = vld [vmem:[%s5268_s17 + $0x10] sm:$0xff]  }
  0xf4   : > { %1122 = vmatmul.bf16.vlgmr.msra.gmra.mxu1 %v1017_v29  ;;  %1107 = vmatmul.bf16.gmra.mxu0 %v1014_v33  ;;  %v1411_v29 = vld [vmem:[#allocation4 + $0x2c8] sm:$0xff]  ;;  %v1409_v33 = vld [vmem:[#allocation4 + $0x2b8] sm:$0xff]  ;;  %v5354_v40 = vmax.f32 %v403_v23, 0.0  ;;  %v4819_v46 = vunpack.c.h.bf16 %v4953_v2  ;;  %v4818_v44 = vunpack.c.l.bf16 %v4953_v2  ;;  %v4738_v25 = vld [vmem:[#allocation2 + $0x10] sm:$0xff] }
  0xf5   : > { %1530 = vperm.xlu2 %5042, %v1408_v38   ;;  %1525 = vperm.xlu1 %5041, %v1407_v39   ;;  %v1410_v38 = vld [vmem:[#allocation4 + $0x2c0] sm:$0xff]  ;;  %v5350_v39 = vmax.f32 %v409_v9, 0.0 }
  0xf6   : > { %1520 = vperm.xlu0 %5040, %v1406_v16   ;;  %v5344_v47 = vpop.permute.xlu2 %928  ;;  %v4838_v16 = vunpack.c.l.bf16 %v4958_v43  ;;  %7656 = vst [vmem:[#allocation36_spill] sm:$0xff] %v5354_v40  ;;  %v985_v34 = vmul.f32 %v5314_v21, %v5354_v40  ;;  %v1413_v21 = vld [vmem:[#allocation4 + $0x2d8] sm:$0xff]  ;;  %v370_v36 = vmul.f32 %v5280_v1, %v4819_v46 }
  0xf7   : > { %v879_v60 = vpop.permute.xlu1 %878  ;;  %v874_v7 = vpop.permute.xlu0 %873  ;;  %7654 = vst [vmem:[#allocation34_spill] sm:$0xff] %v5350_v39  ;;  %1233 = vmatpush.bf16.msrb.mxu1 %v4741_v15  ;;  %v4739_v15 = vld [vmem:[#allocation2 + $0x18] sm:$0xff] }
  0xf8   : > { %v992_v59 = vmul.f32 %v879_v60, %v5352_v14  ;;  %v991_v43 = vmul.f32 %v874_v7, %v5350_v39  ;;  %v379_v9 = vmul.f32 %v5280_v1, %v4838_v16  ;;  %v4740_v60 = vld [vmem:[#allocation2 + $0x20] sm:$0xff]  ;;  %v416_v7 = vadd.f32 %v5285_v8, %v380_v26 }
  0xf9   : > { %v1015_v10 = vpack.c.bf16 %v986_v6, %v985_v34  ;;  %v412_v34 = vadd.f32 %v5285_v8, %v376_v3 }
  0xfa   : > { %v1018_v16 = vpack.c.bf16 %v992_v59, %v991_v43  ;;  %v415_v17 = vadd.f32 %v5285_v8, %v379_v9  ;;  %v5376_v26 = vmax.f32 %v416_v7, 0.0  ;;  %v369_v43 = vmul.f32 %v5280_v1, %v4818_v44 }
  0xfb   : > { %1234 = vmatpush.bf16.msrb.mxu1 %v4740_v60  ;;  %v406_v60 = vadd.f32 %v5285_v8, %v370_v36  ;;  %v5391_v3 = vmax.f32 %v412_v34, 0.0  ;;  %v4957_v36 = vld [vmem:[%s5268_s17 + $0x30] sm:$0xff]  }
  0xfc   : > { %7658 = vst [vmem:[#allocation38_spill] sm:$0xff] %v5376_v26  ;;  %v5380_v2 = vmax.f32 %v415_v17, 0.0  ;;  %v405_v44 = vadd.f32 %v5285_v8, %v369_v43 }
  0xfd   : > { %1545 = vperm.xlu2 %5042, %v1411_v29   ;;  %1540 = vperm.xlu1 %5041, %v1410_v38   ;;  %v4830_v38 = vunpack.c.l.bf16 %v4956_v18  ;;  %v4959_v18 = vld [vmem:[%s5268_s17 + $0x40] sm:$0xff]   ;;  %7660 = vst [vmem:[#allocation40_spill] sm:$0xff] %v5391_v3  ;;  %v5393_v27 = vmax.f32 %v406_v60, 0.0 }
  0xfe   : > { %1535 = vperm.xlu0 %5040, %v1409_v33   ;;  %v5368_v23 = vpop.permute.xlu2 %943  ;;  %v1414_v33 = vld [vmem:[#allocation4 + $0x2e0] sm:$0xff]  ;;  %7659 = vst [vmem:[#allocation39_spill] sm:$0xff] %v5380_v2  ;;  %v4843_v7 = vunpack.c.h.bf16 %v4959_v18  ;;  %v5400_v43 = vmax.f32 %v405_v44, 0.0  ;;  %v4758_v44 = vld [vmem:[#allocation2 + $0xb0] sm:$0xff] }
  0xff   : > { %v5370_v24 = vpop.permute.xlu1 %893  ;;  %v889_v29 = vpop.permute.xlu0 %888  ;;  %v375_v59 = vmul.f32 %v5280_v1, %v4830_v38  ;;  %1235 = vmatpush.bf16.msrb.mxu1 %v4739_v15  ;;  %v1415_v15 = vld [vmem:[#allocation4 + $0x2e8] sm:$0xff]  ;;  %7661 = vst [vmem:[#allocation41_spill] sm:$0xff] %v5393_v27  ;;  %1692 = vmatpush.bf16.msrb.mxu2 %v4758_v44 }
 0x100   : > { %7663 = vst [vmem:[#allocation43_spill] sm:$0xff] %v5400_v43 }
 0x101   : > { %v411_v38 = vadd.f32 %v5285_v8, %v375_v59 }
 0x103   : > { %1236 = vmatpush.bf16.msrb.mxu1 %v4738_v25  ;;  %v5397_v59 = vmax.f32 %v411_v38, 0.0 }
 0x104   : > { %1127 = vmatmul.bf16.gmra.mxu1 %v1018_v16  ;;  %1112 = vmatmul.bf16.gmra.mxu0 %v1015_v10  ;;  %v1417_v16 = vld [vmem:[#allocation4 + $0x2f8] sm:$0xff] }
 0x105   : > { %1560 = vperm.xlu2 %5042, %v1414_v33   ;;  %1555 = vperm.xlu1 %5041, %v1413_v21   ;;  %v4842_v33 = vunpack.c.l.bf16 %v4959_v18  ;;  %v1416_v21 = vld [vmem:[#allocation4 + $0x2f0] sm:$0xff]  ;;  %7662 = vst [vmem:[#allocation42_spill] sm:$0xff] %v5397_v59  ;;  %v994_v18 = vmul.f32 %v889_v29, %v5391_v3  ;;  %v993_v29 = vmul.f32 %v5301_v32, %v5397_v59  ;;  %v1813_v32 = vld [vmem:[#allocation4 + $0x300] sm:$0xff] }
 0x106   : > { %1550 = vperm.xlu0 %5040, %v1412_v35   ;;  %v5383_v9 = vpop.permute.xlu2 %958 }
 0x107   : > { %v909_v6 = vpop.permute.xlu1 %908  ;;  %v904_v46 = vpop.permute.xlu0 %903  ;;  %v381_v34 = vmul.f32 %v5280_v1, %v4842_v33  ;;  %v4835_v33 = vunpack.c.h.bf16 %v4957_v36 }
 0x108   : > { %v998_v10 = vmul.f32 %v909_v6, %v5376_v26  ;;  %v997_v35 = vmul.f32 %v904_v46, %v5380_v2  ;;  %v4737_v6 = vld [vmem:[#allocation2 + $0x8] sm:$0xff]  ;;  %v382_v46 = vmul.f32 %v5280_v1, %v4843_v7  ;;  %v4834_v7 = vunpack.c.l.bf16 %v4957_v36 }
 0x109   : > { %1237 = vmatpush.bf16.msrb.mxu1 %v4737_v6  ;;  %v417_v28 = vadd.f32 %v5285_v8, %v381_v34  ;;  %v1814_v26 = vld [vmem:[#allocation4 + $0x308] sm:$0xff] }
 0x10a   : > { %v1021_v17 = vpack.c.bf16 %v998_v10, %v997_v35  ;;  %v988_v10 = vmul.f32 %v5335_v22, %v5393_v27  ;;  %v4962_v35 = vld [vmem:[%s5268_s17 + $0x58] sm:$0xff]   ;;  %v987_v22 = vmul.f32 %v5270_v53, %v5400_v43  ;;  %v377_v2 = vmul.f32 %v5280_v1, %v4834_v7  ;;  %v4960_v36 = vld [vmem:[%s5268_s17 + $0x48] sm:$0xff]  }
 0x10b   : > { %v4855_v6 = vunpack.c.h.bf16 %v4962_v35  ;;  %v4854_v61 = vunpack.c.l.bf16 %v4962_v35 }
 0x10c   : > { %1142 = vmatmul.bf16.vlgmr.msra.gmra.mxu2 %v1021_v17  ;;  %v418_v17 = vadd.f32 %v5285_v8, %v382_v46  ;;  %v1016_v19 = vpack.c.bf16 %v988_v10, %v987_v22  ;;  %v4757_v46 = vld [vmem:[#allocation2 + $0xa8] sm:$0xff]  ;;  %v5425_v10 = vmax.f32 %v417_v28, 0.0  ;;  %v413_v44 = vadd.f32 %v5285_v8, %v377_v2 }
 0x10d   : > { %1575 = vperm.xlu2 %5042, %v1417_v16   ;;  %1570 = vperm.xlu1 %5041, %v1416_v21   ;;  %v4736_v16 = vld [vmem:[#allocation2] sm:$0xff]  ;;  %v1019_v21 = vpack.c.bf16 %v994_v18, %v993_v29  ;;  %v378_v18 = vmul.f32 %v5280_v1, %v4835_v33  ;;  %v388_v34 = vmul.f32 %v5280_v1, %v4855_v6  ;;  %v4846_v22 = vunpack.c.l.bf16 %v4960_v36 }
 0x10e   : > { %1565 = vperm.xlu0 %5040, %v1415_v15   ;;  %v5405_v25 = vpop.permute.xlu2 %973  ;;  %v1815_v15 = vld [vmem:[#allocation4 + $0x310] sm:$0xff]  ;;  %1238 = vmatpush.bf16.msrb.mxu1 %v4736_v16  ;;  %v5420_v53 = vmax.f32 %v418_v17, 0.0  ;;  %7665 = vst [vmem:[#allocation45_spill] sm:$0xff] %v5425_v10  ;;  %v387_v35 = vmul.f32 %v5280_v1, %v4854_v61  ;;  %v999_v33 = vmul.f32 %v5331_v0, %v5425_v10 }
 0x10f   : > { %v5407_v60 = vpop.permute.xlu1 %923  ;;  %v919_v38 = vpop.permute.xlu0 %918  ;;  %1693 = vmatpush.bf16.msrb.mxu2 %v4757_v46  ;;  %v414_v61 = vadd.f32 %v5285_v8, %v378_v18  ;;  %v1816_v46 = vld [vmem:[#allocation4 + $0x318] sm:$0xff]  ;;  %v383_v0 = vmul.f32 %v5280_v1, %v4846_v22  ;;  %v4963_v18 = vld [vmem:[%s5268_s17 + $0x60] sm:$0xff]  }
 0x110   : > { %7664 = vst [vmem:[#allocation44_spill] sm:$0xff] %v5420_v53  ;;  %v1000_v7 = vmul.f32 %v919_v38, %v5420_v53  ;;  %v1818_v38 = vld [vmem:[#allocation4 + $0x328] sm:$0xff]  ;;  %v423_v6 = vadd.f32 %v5285_v8, %v387_v35  ;;  %v5443_v53 = vmax.f32 %v413_v44, 0.0 }
 0x111   : > { %v5447_v10 = vmax.f32 %v414_v61, 0.0  ;;  %v419_v61 = vadd.f32 %v5285_v8, %v383_v0  ;;  %v4753_v0 = vld [vmem:[#allocation2 + $0x88] sm:$0xff] }
 0x112   : > { %v1022_v28 = vpack.c.bf16 %v1000_v7, %v999_v33  ;;  %7666 = vst [vmem:[#allocation46_spill] sm:$0xff] %v5443_v53  ;;  %v5454_v7 = vmax.f32 %v423_v6, 0.0  ;;  %v497_v6 = vlaneseq }
 0x113   : > { %7667 = vst [vmem:[#allocation47_spill] sm:$0xff] %v5447_v10  ;;  %v996_v22 = vmul.f32 %v5310_v13, %v5447_v10  ;;  %v1819_v13 = vld [vmem:[#allocation4 + $0x330] sm:$0xff]  ;;  %v5470_v12 = vmax.f32 %v419_v61, 0.0 }
 0x114   : > { %1132 = vmatmul.bf16.gmra.mxu1 %v1019_v21  ;;  %1117 = vmatmul.bf16.gmra.mxu0 %v1016_v19  ;;  %v4867_v19 = vunpack.c.h.bf16 %v5418_v55  ;;  %v424_v21 = vadd.f32 %v5285_v8, %v388_v34  ;;  %7669 = vst [vmem:[#allocation49_spill] sm:$0xff] %v5454_v7 }
 0x115   : > { %1857 = vperm.xlu2 %5042, %v1815_v15   ;;  %1852 = vperm.xlu1 %5041, %v1814_v26   ;;  %v4756_v26 = vld [vmem:[#allocation2 + $0xa0] sm:$0xff]  ;;  %v4847_v15 = vunpack.c.h.bf16 %v4960_v36  ;;  %v995_v36 = vmul.f32 %v5370_v24, %v5443_v53  ;;  %v4754_v24 = vld [vmem:[#allocation2 + $0x90] sm:$0xff]  ;;  %v1820_v53 = vld [vmem:[#allocation4 + $0x338] sm:$0xff]  ;;  %7671 = vst [vmem:[#allocation51_spill] sm:$0xff] %v5470_v12 }
 0x116   : > { %1847 = vperm.xlu0 %5040, %v1813_v32   ;;  %v5429_v29 = vpop.permute.xlu2 %1425  ;;  %v1817_v32 = vld [vmem:[#allocation4 + $0x320] sm:$0xff]  ;;  %1694 = vmatpush.bf16.msrb.mxu2 %v4756_v26  ;;  %v394_v2 = vmul.f32 %v5280_v1, %v4867_v19  ;;  %v5451_v34 = vmax.f32 %v424_v21, 0.0  ;;  %v1005_v21 = vmul.f32 %v5368_v23, %v5454_v7 }
 0x117   : > { %v5431_v16 = vpop.permute.xlu1 %938  ;;  %v5435_v17 = vpop.permute.xlu0 %933  ;;  %v384_v35 = vmul.f32 %v5280_v1, %v4847_v15 }
 0x118   : > { %7668 = vst [vmem:[#allocation48_spill] sm:$0xff] %v5451_v34  ;;  %v430_v26 = vadd.f32 %v5285_v8, %v394_v2 }
 0x11a   : > { %1695 = vmatpush.bf16.msrb.mxu2 %v4755_v20  ;;  %v420_v20 = vadd.f32 %v5285_v8, %v384_v35  ;;  %v5468_v10 = vmax.f32 %v430_v26, 0.0  ;;  %v1001_v26 = vmul.f32 %v5407_v60, %v5470_v12 }
 0x11c   : > { %1147 = vmatmul.bf16.gmra.mxu2 %v1022_v28  ;;  %v1020_v28 = vpack.c.bf16 %v996_v22, %v995_v36  ;;  %7670 = vst [vmem:[#allocation50_spill] sm:$0xff] %v5468_v10  ;;  %v5474_v36 = vshrl.u32 %v497_v6, 7  ;;  %v7459_v61 = vrot.slane %v5468_v10, 7  ;;  %v4851_v6 = vunpack.c.h.bf16 %v4961_v11 }
 0x11d   : > { %1872 = vperm.xlu2 %5042, %v1818_v38   ;;  %1867 = vperm.xlu1 %5041, %v1817_v32   ;;  %v4858_v38 = vunpack.c.l.bf16 %v4963_v18  ;;  %v1821_v32 = vld [vmem:[#allocation4 + $0x340] sm:$0xff] }
 0x11e   : > { %1862 = vperm.xlu0 %5040, %v1816_v46   ;;  %v5456_v19 = vpop.permute.xlu2 %1440  ;;  %v4859_v46 = vunpack.c.h.bf16 %v4963_v18  ;;  %1696 = vmatpush.bf16.msrb.mxu2 %v4754_v24  ;;  %v5476_v18 = vmax.f32 %v420_v20, 0.0  ;;  %v7458_v24 = vrot.slane %v5297_v30, 7  ;;  %vm499_vm0 = vcmp.lt.s32.totalorder %v5474_v36, 1 }
 0x11f   : > { %v5458_v44 = vpop.permute.xlu1 %953  ;;  %v949_v33 = vpop.permute.xlu0 %948  ;;  %v389_v23 = vmul.f32 %v5280_v1, %v4858_v38  ;;  %v4850_v38 = vunpack.c.l.bf16 %v4961_v11  ;;  %v1822_v11 = vld [vmem:[#allocation4 + $0x348] sm:$0xff]  ;;  %vm1352_vm1 = vcmp.lt.s32.totalorder %v5474_v36, 7  ;;  %v3307_v36 = vld [vmem:[#allocation4 + $0x758] sm:$0xff] }
 0x120   : > { %v1006_v15 = vmul.f32 %v949_v33, %v5451_v34  ;;  %7672 = vst [vmem:[#allocation52_spill] sm:$0xff] %v5476_v18  ;;  %v390_v35 = vmul.f32 %v5280_v1, %v4859_v46  ;;  %v1002_v60 = vmul.f32 %v5344_v47, %v5476_v18 }
 0x122   : > { %v1025_v2 = vpack.c.bf16 %v1006_v15, %v1005_v21  ;;  %1697 = vmatpush.bf16.msrb.mxu2 %v4753_v0  ;;  %v495_v15 = vrot.slane %v5299_v31, 7  ;;  %v426_v46 = vadd.f32 %v5285_v8, %v390_v35  ;;  %v385_v0 = vmul.f32 %v5280_v1, %v4850_v38 }
 0x124   : > { %1137 = vmatmul.bf16.gmra.mxu1 %v1020_v28  ;;  %1162 = vmatmul.bf16.vlgmr.msra.gmra.mxu3 %v1025_v2  ;;  %v425_v28 = vadd.f32 %v5285_v8, %v389_v23  ;;  %v5498_v20 = vsel %vm499_vm0, %v495_v15, %v7458_v24  ;;  %v1023_v2 = vpack.c.bf16 %v1002_v60, %v1001_v26  ;;  %v4767_v24 = vld [vmem:[#allocation2 + $0xf8] sm:$0xff]  ;;  %v4964_v26 = vld [vmem:[%s5268_s17 + $0x68] sm:$0xff]   ;;  %v5514_v38 = vmax.f32 %v426_v46, 0.0 }
 0x125   : > { %1887 = vperm.xlu2 %5042, %v1821_v32   ;;  %1882 = vperm.xlu1 %5041, %v1820_v53   ;;  %v4752_v53 = vld [vmem:[#allocation2 + $0x80] sm:$0xff]  ;;  %v1824_v32 = vld [vmem:[#allocation4 + $0x358] sm:$0xff]  ;;  %7673 = vst [vmem:[#allocation53_spill] sm:$0xff] %v5498_v20  ;;  %v5506_v47 = vsel %vm499_vm0, %v7459_v61, %v495_v15  ;;  %v386_v23 = vmul.f32 %v5280_v1, %v4851_v6  ;;  %v4863_v46 = vunpack.c.h.bf16 %v4964_v26 }
 0x126   : > { %1877 = vperm.xlu0 %5040, %v1819_v13   ;;  %v5481_v22 = vpop.permute.xlu2 %1455  ;;  %v1823_v13 = vld [vmem:[#allocation4 + $0x350] sm:$0xff]  ;;  %1698 = vmatpush.bf16.msrb.mxu2 %v4752_v53  ;;  %7674 = vst [vmem:[#allocation54_spill] sm:$0xff] %v5506_v47  ;;  %v5509_v34 = vmax.f32 %v425_v28, 0.0  ;;  %v725_v35 = vmul.f32 %v5214_v57, %v5498_v20  ;;  %v724_v6 = vmul.f32 %v5208_v51, %v5506_v47  ;;  %v1826_v20 = vld [vmem:[#allocation4 + $0x368] sm:$0xff] }
 0x127   : > { %v5483_v33 = vpop.permute.xlu1 %968  ;;  %v5487_v21 = vpop.permute.xlu0 %963  ;;  %7676 = vst [vmem:[#allocation56_spill] sm:$0xff] %v5514_v38  ;;  %2118 = vmatpush.bf16.msrb.mxu3 %v4767_v24  ;;  %v421_v28 = vadd.f32 %v5285_v8, %v385_v0  ;;  %v422_v57 = vadd.f32 %v5285_v8, %v386_v23  ;;  %v4775_v24 = vld [vmem:[#allocation2 + $0x138] sm:$0xff]  ;;  %v392_v23 = vmul.f32 %v5280_v1, %v4863_v46  ;;  %v1830_v46 = vld [vmem:[#allocation4 + $0x388] sm:$0xff] }
 0x128   : > { %7675 = vst [vmem:[#allocation55_spill] sm:$0xff] %v5509_v34  ;;  %v1007_v53 = vmul.f32 %v5458_v44, %v5509_v34  ;;  %v756_v44 = vpack.c.bf16 %v725_v35, %v724_v6  ;;  %v1825_v34 = vld [vmem:[#allocation4 + $0x360] sm:$0xff]  ;;  %2320 = vmatpush.bf16.msrb.mxu0 %v4775_v24  ;;  %v7680_v24 = vrot.slane %v5297_v30, 7  ;;  %v4765_v47 = vld [vmem:[#allocation2 + $0xe8] sm:$0xff] }
 0x129   : > { %v5530_v7 = vmax.f32 %v421_v28, 0.0  ;;  %v5532_v51 = vmax.f32 %v422_v57, 0.0 }
 0x12b   : > { %7677 = vst [vmem:[#allocation57_spill] sm:$0xff] %v5530_v7  ;;  %v1004_v35 = vmul.f32 %v5431_v16, %v5532_v51 }
 0x12c   : > { %1152 = vmatmul.bf16.gmra.mxu2 %v1023_v2  ;;  %v4862_v2 = vunpack.c.l.bf16 %v4964_v26  ;;  %7678 = vst [vmem:[#allocation58_spill] sm:$0xff] %v5532_v51  ;;  %v4766_v26 = vld [vmem:[#allocation2 + $0xf0] sm:$0xff] }
 0x12d   : > { %1902 = vperm.xlu2 %5042, %v1824_v32   ;;  %1897 = vperm.xlu1 %5041, %v1823_v13   ;;  %v1008_v13 = vmul.f32 %v5383_v9, %v5514_v38  ;;  %v7468_v9 = vrot.slane %v5328_v58, 7 }
 0x12e   : > { %1892 = vperm.xlu0 %5040, %v1822_v11   ;;  %v5518_v15 = vpop.permute.xlu2 %1470  ;;  %v1827_v11 = vld [vmem:[#allocation4 + $0x370] sm:$0xff]  ;;  %v391_v0 = vmul.f32 %v5280_v1, %v4862_v2  ;;  %2119 = vmatpush.bf16.msrb.mxu3 %v4766_v26  ;;  %v428_v2 = vadd.f32 %v5285_v8, %v392_v23 }
 0x12f   : > { %v5520_v60 = vpop.permute.xlu1 %1420  ;;  %v5525_v32 = vpop.permute.xlu0 %978  ;;  %v1026_v61 = vpack.c.bf16 %v1008_v13, %v1007_v53  ;;  %v1003_v53 = vmul.f32 %v5435_v17, %v5530_v7  ;;  %v1829_v13 = vld [vmem:[#allocation4 + $0x380] sm:$0xff] }
 0x130   : > { %v5564_v23 = vmax.f32 %v428_v2, 0.0 }
 0x131   : > { %v1024_v17 = vpack.c.bf16 %v1004_v35, %v1003_v53 }
 0x132   : > { %7683 = vst [vmem:[#allocation62_spill] sm:$0xff] %v5564_v23  ;;  %v1010_v53 = vmul.f32 %v5483_v33, %v5564_v23  ;;  %2120 = vmatpush.bf16.msrb.mxu3 %v4765_v47  ;;  %v1351_v33 = vrot.slane %v5297_v30, 1  ;;  %v4771_v23 = vld [vmem:[#allocation2 + $0x118] sm:$0xff] }
 0x133   : > { %v4763_v30 = vld [vmem:[#allocation2 + $0xd8] sm:$0xff] }
 0x134   : > { %1239 = vmatmul.bf16.vlgmr.msrb.gmra.mxu1 %v756_v44  ;;  %1167 = vmatmul.bf16.gmra.mxu3 %v1026_v61  ;;  %v4774_v61 = vld [vmem:[#allocation2 + $0x130] sm:$0xff]  ;;  %v1828_v44 = vld [vmem:[#allocation4 + $0x378] sm:$0xff] }
 0x135   : > { %1917 = vperm.xlu2 %5042, %v1827_v11   ;;  %1912 = vperm.xlu1 %5041, %v1826_v20   ;;  %v465_v20 = vrot.slane %v5321_v42, 7  ;;  %v4773_v11 = vld [vmem:[#allocation2 + $0x128] sm:$0xff] }
 0x136   : > { %1907 = vperm.xlu0 %5040, %v1825_v34   ;;  %v5541_v6 = vpop.permute.xlu2 %1485  ;;  %v427_v34 = vadd.f32 %v5285_v8, %v391_v0  ;;  %2321 = vmatpush.bf16.msrb.mxu0 %v4774_v61 }
 0x137   : > { %v5543_v28 = vpop.permute.xlu1 %1435  ;;  %v5545_v57 = vpop.permute.xlu0 %1430  ;;  %v5554_v16 = vsel %vm499_vm0, %v465_v20, %v7468_v9  ;;  %v5560_v26 = vsel %vm499_vm0, %v7680_v24, %v465_v20  ;;  %v4866_v24 = vunpack.c.l.bf16 %v5418_v55  ;;  %v1831_v9 = vld [vmem:[#allocation4 + $0x390] sm:$0xff] }
 0x138   : > { %7679 = vst [vmem:[#allocation59_spill] sm:$0xff] %v5554_v16  ;;  %v5562_v0 = vmax.f32 %v427_v34, 0.0  ;;  %v727_v35 = vmul.f32 %v5212_v56, %v5554_v16  ;;  %v726_v2 = vmul.f32 %v5206_v50, %v5560_v26 }
 0x139   : > { %7681 = vst [vmem:[#allocation60_spill] sm:$0xff] %v5560_v26 }
 0x13a   : > { %7682 = vst [vmem:[#allocation61_spill] sm:$0xff] %v5562_v0  ;;  %v1009_v61 = vmul.f32 %v5487_v21, %v5562_v0  ;;  %2322 = vmatpush.bf16.msrb.mxu0 %v4773_v11  ;;  %v1833_v21 = vld [vmem:[#allocation4 + $0x3a0] sm:$0xff]  ;;  %v1832_v11 = vld [vmem:[#allocation4 + $0x398] sm:$0xff] }
 0x13c   : > { %1157 = vmatmul.bf16.gmra.mxu2 %v1024_v17  ;;  %v4772_v17 = vld [vmem:[#allocation2 + $0x120] sm:$0xff]  ;;  %v1027_v47 = vpack.c.bf16 %v1010_v53, %v1009_v61  ;;  %v467_v53 = vrot.slane %v5354_v40, 7  ;;  %v7476_v61 = vrot.slane %v5356_v54, 7 }
 0x13d   : > { %1932 = vperm.xlu2 %5042, %v1830_v46   ;;  %1927 = vperm.xlu1 %5041, %v1829_v13   ;;  %v7471_v46 = vrot.slane %v5299_v31, 1  ;;  %v4764_v13 = vld [vmem:[#allocation2 + $0xe0] sm:$0xff]  ;;  %v1844_v31 = vld [vmem:[#allocation4 + $0x3f8] sm:$0xff] }
 0x13e   : > { %1922 = vperm.xlu0 %5040, %v1828_v44   ;;  %v5572_v20 = vpop.permute.xlu2 %1500  ;;  %v757_v44 = vpack.c.bf16 %v727_v35, %v726_v2  ;;  %2323 = vmatpush.bf16.msrb.mxu0 %v4772_v17  ;;  %v7685_v35 = vrot.slane %v5321_v42, 1  ;;  %v393_v2 = vmul.f32 %v5280_v1, %v4866_v24  ;;  %v1835_v24 = vld [vmem:[#allocation4 + $0x3b0] sm:$0xff] }
 0x13f   : > { %v5574_v34 = vpop.permute.xlu1 %1450  ;;  %v5579_v56 = vpop.permute.xlu0 %1445  ;;  %v5589_v50 = vsel %vm1352_vm1, %v7471_v46, %v1351_v33  ;;  %2121 = vmatpush.bf16.msrb.mxu3 %v4764_v13  ;;  %v1834_v46 = vld [vmem:[#allocation4 + $0x3a8] sm:$0xff] }
 0x140   : > { %7684 = vst [vmem:[#allocation63_spill] sm:$0xff] %v5589_v50  ;;  %v5595_v55 = vsel %vm1352_vm1, %v1351_v33, %v7685_v35  ;;  %v1578_v17 = vmul.f32 %v5520_v60, %v5589_v50  ;;  %v4770_v33 = vld [vmem:[#allocation2 + $0x110] sm:$0xff]  ;;  %v7687_v35 = vrot.slane %v5328_v58, 7  ;;  %v5620_v60 = vsel %vm499_vm0, %v467_v53, %v7476_v61 }
 0x141   : > { %7686 = vst [vmem:[#allocation64_spill] sm:$0xff] %v5595_v55  ;;  %v7693_v61 = vrot.slane %v5321_v42, 1 }
 0x142   : > { %2324 = vmatpush.bf16.msrb.mxu0 %v4771_v23  ;;  %v5614_v1 = vsel %vm499_vm0, %v7687_v35, %v467_v53  ;;  %7689 = vst [vmem:[#allocation66_spill] sm:$0xff] %v5620_v60  ;;  %v429_v23 = vadd.f32 %v5285_v8, %v393_v2  ;;  %v1012_v8 = vmul.f32 %v5525_v32, %v5468_v10  ;;  %v1838_v32 = vld [vmem:[#allocation4 + $0x3c8] sm:$0xff] }
 0x143   : > { %7688 = vst [vmem:[#allocation65_spill] sm:$0xff] %v5614_v1  ;;  %v728_v35 = vmul.f32 %v5198_v37, %v5614_v1  ;;  %2122 = vmatpush.bf16.msrb.mxu3 %v4763_v30  ;;  %v4768_v37 = vld [vmem:[#allocation2 + $0x100] sm:$0xff]  ;;  %v2239_v30 = vpack.c.bf16 %v5328_v58, %v5321_v42 }
 0x144   : > { %1244 = vmatmul.bf16.gmra.mxu1 %v757_v44  ;;  %1172 = vmatmul.bf16.gmra.mxu3 %v1027_v47  ;;  %v5627_v53 = vmax.f32 %v429_v23, 0.0  ;;  %v1839_v23 = vld [vmem:[#allocation4 + $0x3d0] sm:$0xff] }
 0x145   : > { %1947 = vperm.xlu2 %5042, %v1833_v21   ;;  %1942 = vperm.xlu1 %5041, %v1832_v11   ;;  %v1836_v11 = vld [vmem:[#allocation4 + $0x3b8] sm:$0xff] }
 0x146   : > { %1937 = vperm.xlu0 %5040, %v1831_v9   ;;  %v5602_v44 = vpop.permute.xlu2 %1515  ;;  %v1579_v9 = vmul.f32 %v5429_v29, %v5595_v55  ;;  %2325 = vmatpush.bf16.msrb.mxu0 %v4770_v33  ;;  %v4769_v29 = vld [vmem:[#allocation2 + $0x108] sm:$0xff]  ;;  %v729_v55 = vmul.f32 %v5200_v41, %v5620_v60  ;;  %7690 = vst [vmem:[#allocation67_spill] sm:$0xff] %v5627_v53  ;;  %v1321_v33 = vrot.slane %v5328_v58, 1 }
 0x147   : > { %v5604_v21 = vpop.permute.xlu1 %1465  ;;  %v5606_v47 = vpop.permute.xlu0 %1460  ;;  %v1011_v41 = vmul.f32 %v5405_v25, %v5627_v53 }
 0x148   : > { %v1610_v13 = vpack.c.bf16 %v1579_v9, %v1578_v17  ;;  %v5651_v25 = vsel %vm1352_vm1, %v7693_v61, %v1321_v33 }
 0x149   : > { %7694 = vst [vmem:[#allocation70_spill] sm:$0xff] %v5651_v25 }
 0x14a   : > { %2326 = vmatpush.bf16.msrb.mxu0 %v4769_v29 }
 0x14c   : > { %1699 = vmatmul.bf16.vlgmr.msrb.gmra.mxu2 %v1610_v13  ;;  %v1028_v13 = vpack.c.bf16 %v1012_v8, %v1011_v41  ;;  %v469_v8 = vrot.slane %v5400_v43, 7  ;;  %v1580_v41 = vmul.f32 %v5545_v57, %v5651_v25 }
 0x14d   : > { %1962 = vperm.xlu2 %5042, %v1836_v11   ;;  %1957 = vperm.xlu1 %5041, %v1835_v24   ;;  %v758_v11 = vpack.c.bf16 %v729_v55, %v728_v35  ;;  %v1837_v24 = vld [vmem:[#allocation4 + $0x3c0] sm:$0xff]  ;;  %v4762_v55 = vld [vmem:[#allocation2 + $0xd0] sm:$0xff]  ;;  %v470_v35 = vrot.slane %v5393_v27, 7 }
 0x14e   : > { %1952 = vperm.xlu0 %5040, %v1834_v46   ;;  %v1322_v46 = vrot.slane %v5354_v40, 1  ;;  %2327 = vmatpush.bf16.msrb.mxu0 %v4768_v37 }
 0x14f   : > { %v5631_v2 = vpop.permute.xlu2 %1530  ;;  %v5633_v17 = vpop.permute.xlu1 %1480  ;;  %2123 = vmatpush.bf16.msrb.mxu3 %v4762_v55 }
 0x150   : > { %7691 = vst [vmem:[#allocation68_spill] sm:$0xff] %v5631_v2  ;;  %v5636_v9 = vpop.permute.xlu0 %1475  ;;  %v5645_v29 = vsel %vm1352_vm1, %v1321_v33, %v1322_v46 }
 0x151   : > { %7692 = vst [vmem:[#allocation69_spill] sm:$0xff] %v5645_v29  ;;  %v1581_v37 = vmul.f32 %v5543_v28, %v5645_v29  ;;  %2328 = vmatmul.bf16.vlgmr.msrb.gmra.mxu0 %v2239_v30  ;;  %v4761_v30 = vld [vmem:[#allocation2 + $0xc8] sm:$0xff] }
 0x153   : > { %v1611_v57 = vpack.c.bf16 %v1581_v37, %v1580_v41  ;;  %2124 = vmatpush.bf16.msrb.mxu3 %v4761_v30  ;;  %v1323_v41 = vrot.slane %v5356_v54, 1 }
 0x154   : > { %1249 = vmatmul.bf16.gmra.mxu1 %v758_v11  ;;  %1177 = vmatmul.bf16.gmra.mxu3 %v1028_v13  ;;  %v1842_v11 = vld [vmem:[#allocation4 + $0x3e8] sm:$0xff]  ;;  %v7697_v13 = vrot.slane %v5356_v54, 7 }
 0x155   : > { %1977 = vperm.xlu2 %5042, %v1839_v23   ;;  %1972 = vperm.xlu1 %5041, %v1838_v32   ;;  %v5667_v23 = vsel %vm499_vm0, %v469_v8, %v470_v35  ;;  %v1841_v32 = vld [vmem:[#allocation4 + $0x3e0] sm:$0xff]  ;;  %v5695_v30 = vsel %vm1352_vm1, %v1322_v46, %v1323_v41 }
 0x156   : > { %1967 = vperm.xlu0 %5040, %v1837_v24   ;;  %7696 = vst [vmem:[#allocation72_spill] sm:$0xff] %v5667_v23  ;;  %v5673_v28 = vsel %vm499_vm0, %v7697_v13, %v469_v8  ;;  %v1840_v24 = vld [vmem:[#allocation4 + $0x3d8] sm:$0xff]  ;;  %v731_v55 = vmul.f32 %v5218_v62, %v5667_v23  ;;  %v1324_v8 = vrot.slane %v5400_v43, 1  ;;  %v1843_v62 = vld [vmem:[#allocation4 + $0x3f0] sm:$0xff]  ;;  %v1582_v46 = vmul.f32 %v5456_v19, %v5695_v30 }
 0x157   : > { %v5659_v42 = vpop.permute.xlu2 %1545  ;;  %v5661_v61 = vpop.permute.xlu1 %1495  ;;  %7698 = vst [vmem:[#allocation73_spill] sm:$0xff] %v5673_v28  ;;  %v730_v58 = vmul.f32 %v5220_v63, %v5673_v28  ;;  %v2240_v63 = vpack.c.bf16 %v5356_v54, %v5354_v40  ;;  %v2443_v54 = vld [vmem:[#allocation4 + $0x508] sm:$0xff] }
 0x158   : > { %7695 = vst [vmem:[#allocation71_spill] sm:$0xff] %v5659_v42  ;;  %v5663_v33 = vpop.permute.xlu0 %1490 }
 0x159   : > { %7701 = vst [vmem:[#allocation76_spill] sm:$0xff] %v5695_v30 }
 0x15c   : > { %1704 = vmatmul.bf16.gmra.mxu2 %v1611_v57  ;;  %v2442_v57 = vld [vmem:[#allocation4 + $0x500] sm:$0xff] }
 0x15d   : > { %1992 = vperm.xlu2 %5042, %v1842_v11   ;;  %1987 = vperm.xlu1 %5041, %v1841_v32   ;;  %v759_v11 = vpack.c.bf16 %v731_v55, %v730_v58  ;;  %v5691_v32 = vsel %vm1352_vm1, %v1323_v41, %v1324_v8  ;;  %v472_v58 = vrot.slane %v5326_v52, 7 }
 0x15e   : > { %1982 = vperm.xlu0 %5040, %v1840_v24   ;;  %7700 = vst [vmem:[#allocation75_spill] sm:$0xff] %v5691_v32  ;;  %v4760_v24 = vld [vmem:[#allocation2 + $0xc0] sm:$0xff]  ;;  %v1583_v55 = vmul.f32 %v5579_v56, %v5691_v32  ;;  %v2444_v56 = vld [vmem:[#allocation4 + $0x510] sm:$0xff] }
 0x15f   : > { %v5679_v50 = vpop.permute.xlu2 %1560  ;;  %v5682_v13 = vpop.permute.xlu1 %1510  ;;  %2125 = vmatpush.bf16.msrb.mxu3 %v4760_v24  ;;  %v4799_v24 = vld [vmem:[#allocation2 + $0x1f8] sm:$0xff] }
 0x160   : > { %7699 = vst [vmem:[#allocation74_spill] sm:$0xff] %v5679_v50  ;;  %v5684_v37 = vpop.permute.xlu0 %1505 }
 0x161   : > { %2333 = vmatmul.bf16.gmra.mxu0 %v2240_v63 }
 0x163   : > { %3601 = vmatpush.bf16.msra.mxu3 %v4799_v24 }
 0x164   : > { %1254 = vmatmul.bf16.gmra.mxu1 %v759_v11 }
 0x165   : > { %2476 = vperm.xlu2 %5042, %v2442_v57   ;;  %2002 = vperm.xlu1 %5041, %v1844_v31   ;;  %v471_v57 = vrot.slane %v5324_v48, 7  ;;  %v2445_v31 = vld [vmem:[#allocation4 + $0x518] sm:$0xff] }
 0x166   : > { %1997 = vperm.xlu0 %5040, %v1843_v62   ;;  %v1612_v62 = vpack.c.bf16 %v1583_v55, %v1582_v46  ;;  %v4783_v55 = vld [vmem:[#allocation2 + $0x178] sm:$0xff] }
 0x167   : > { %v5700_v50 = vpop.permute.xlu2 %1575  ;;  %v5702_v40 = vpop.permute.xlu1 %1525  ;;  %v5711_v41 = vsel %vm499_vm0, %v471_v57, %v472_v58  ;;  %v5715_v63 = vsel %vm499_vm0, %v470_v35, %v471_v57  ;;  %2747 = vmatpush.bf16.msra.mxu1 %v4783_v55 }
 0x168   : > { %7702 = vst [vmem:[#allocation77_spill] sm:$0xff] %v5700_v50  ;;  %v5704_v11 = vpop.permute.xlu0 %1520  ;;  %v4791_v50 = vld [vmem:[#allocation2 + $0x1b8] sm:$0xff]  ;;  %v733_v42 = vmul.f32 %v5226_v5, %v5711_v41  ;;  %v732_v46 = vmul.f32 %v5202_v45, %v5715_v63  ;;  %v1326_v5 = vrot.slane %v5324_v48, 1  ;;  %v2241_v45 = vpack.c.bf16 %v5393_v27, %v5400_v43 }
 0x169   : > { %7703 = vst [vmem:[#allocation78_spill] sm:$0xff] %v5702_v40  ;;  %3174 = vmatpush.bf16.msra.mxu2 %v4791_v50  ;;  %v2446_v50 = vld [vmem:[#allocation4 + $0x520] sm:$0xff]  ;;  %v473_v43 = vrot.slane %v5350_v39, 7  ;;  %v7736_v40 = vrot.slane %v5391_v3, 7 }
 0x16a   : > { %7704 = vst [vmem:[#allocation79_spill] sm:$0xff] %v5704_v11  ;;  %v2461_v11 = vld [vmem:[#allocation4 + $0x598] sm:$0xff] }
 0x16b   : > { %7705 = vst [vmem:[#allocation80_spill] sm:$0xff] %v5711_v41 }
 0x16c   : > { %7706 = vst [vmem:[#allocation81_spill] sm:$0xff] %v5715_v63  ;;  %1709 = vmatmul.bf16.gmra.mxu2 %v1612_v62  ;;  %v2448_v62 = vld [vmem:[#allocation4 + $0x530] sm:$0xff] }
 0x16d   : > { %2491 = vperm.xlu2 %5042, %v2445_v31   ;;  %2486 = vperm.xlu1 %5041, %v2444_v56   ;;  %v1325_v31 = vrot.slane %v5393_v27, 1  ;;  %v2447_v56 = vld [vmem:[#allocation4 + $0x528] sm:$0xff]  ;;  %v2450_v27 = vld [vmem:[#allocation4 + $0x540] sm:$0xff] }
 0x16e   : > { %2481 = vperm.xlu0 %5040, %v2443_v54   ;;  %v760_v54 = vpack.c.bf16 %v733_v42, %v732_v46 }
 0x16f   : > { %v5719_v19 = vpop.permute.xlu2 %1857  ;;  %v5723_v2 = vpop.permute.xlu1 %1540  ;;  %v5733_v24 = vsel %vm1352_vm1, %v1324_v8, %v1325_v31  ;;  %v5739_v55 = vsel %vm1352_vm1, %v1325_v31, %v1326_v5 }
 0x170   : > { %7707 = vst [vmem:[#allocation82_spill] sm:$0xff] %v5723_v2  ;;  %v5725_v35 = vpop.permute.xlu0 %1535  ;;  %v4807_v2 = vld [vmem:[#allocation2 + $0x238] sm:$0xff]  ;;  %v1584_v42 = vmul.f32 %v5574_v34, %v5733_v24  ;;  %v1585_v31 = vmul.f32 %v5481_v22, %v5739_v55  ;;  %v5757_v34 = vsel %vm499_vm0, %v472_v58, %v473_v43 }
 0x171   : > { %7708 = vst [vmem:[#allocation83_spill] sm:$0xff] %v5725_v35  ;;  %v5727_v57 = vpop.f32.mrf.mxu1  ;;  %2338 = vmatmul.bf16.gmra.mxu0 %v2241_v45 }
 0x172   : > { %7709 = vst [vmem:[#allocation84_spill] sm:$0xff] %v5727_v57  ;;  %4028 = vmatpush.bf16.msra.mxu0 %v4807_v2  ;;  %v1613_v45 = vpack.c.bf16 %v1585_v31, %v1584_v42  ;;  %v1327_v42 = vrot.slane %v5326_v52, 1  ;;  %v2454_v57 = vld [vmem:[#allocation4 + $0x560] sm:$0xff] }
 0x173   : > { %7710 = vst [vmem:[#allocation85_spill] sm:$0xff] %v5733_v24 }
 0x174   : > { %1259 = vmatmul.bf16.gmra.mxu1 %v760_v54  ;;  %7711 = vst [vmem:[#allocation86_spill] sm:$0xff] %v5739_v55 }
 0x175   : > { %2506 = vperm.xlu2 %5042, %v2448_v62   ;;  %2501 = vperm.xlu1 %5041, %v2447_v56   ;;  %v474_v62 = vrot.slane %v5352_v14, 7  ;;  %7715 = vst [vmem:[#allocation90_spill] sm:$0xff] %v5757_v34 }
 0x176   : > { %2496 = vperm.xlu0 %5040, %v2446_v50   ;;  %v2451_v50 = vld [vmem:[#allocation4 + $0x548] sm:$0xff] }
 0x177   : > { %v5743_v46 = vpop.permute.xlu2 %1872  ;;  %v5745_v8 = vpop.permute.xlu1 %1555  ;;  %v5761_v2 = vsel %vm499_vm0, %v473_v43, %v474_v62 }
 0x178   : > { %7712 = vst [vmem:[#allocation87_spill] sm:$0xff] %v5745_v8  ;;  %v5747_v54 = vpop.permute.xlu0 %1550  ;;  %v2449_v8 = vld [vmem:[#allocation4 + $0x538] sm:$0xff]  ;;  %v735_v58 = vmul.f32 %v5204_v49, %v5761_v2  ;;  %v5785_v49 = vsel %vm1352_vm1, %v1326_v5, %v1327_v42 }
 0x179   : > { %7713 = vst [vmem:[#allocation88_spill] sm:$0xff] %v5747_v54  ;;  %v5753_v56 = vpop.f32.mrf.mxu1  ;;  %v734_v54 = vmul.f32 %v5224_v4, %v5757_v34  ;;  %v5777_v4 = vpop.f32.mrf.mxu0 }
 0x17a   : > { %7714 = vst [vmem:[#allocation89_spill] sm:$0xff] %v5753_v56 }
 0x17b   : > { %7716 = vst [vmem:[#allocation91_spill] sm:$0xff] %v5761_v2 }
 0x17c   : > { %1714 = vmatmul.bf16.gmra.mxu2 %v1613_v45  ;;  %v761_v45 = vpack.c.bf16 %v735_v58, %v734_v54  ;;  %7721 = vst [vmem:[#allocation96_spill] sm:$0xff] %v5785_v49  ;;  %v475_v54 = vrot.slane %v5397_v59, 7 }
 0x17d   : > { %2521 = vperm.xlu2 %5042, %v2451_v50   ;;  %2516 = vperm.xlu1 %5041, %v2450_v27   ;;  %v1328_v50 = vrot.slane %v5350_v39, 1  ;;  %v2453_v27 = vld [vmem:[#allocation4 + $0x558] sm:$0xff] }
 0x17e   : > { %2511 = vperm.xlu0 %5040, %v2449_v8   ;;  %v2452_v8 = vld [vmem:[#allocation4 + $0x550] sm:$0xff] }
 0x17f   : > { %v5765_v22 = vpop.permute.xlu2 %1887  ;;  %v5770_v31 = vpop.permute.xlu1 %1570  ;;  %v5781_v35 = vsel %vm1352_vm1, %v1327_v42, %v1328_v50 }
 0x180   : > { %7717 = vst [vmem:[#allocation92_spill] sm:$0xff] %v5770_v31  ;;  %v5772_v56 = vpop.permute.xlu0 %1565  ;;  %v2242_v31 = vpack.c.bf16 %v5326_v52, %v5324_v48  ;;  %v1587_v58 = vmul.f32 %v5604_v21, %v5781_v35 }
 0x181   : > { %7718 = vst [vmem:[#allocation93_spill] sm:$0xff] %v5772_v56  ;;  %v5774_v43 = vpop.f32.mrf.mxu1  ;;  %v1586_v56 = vmul.f32 %v5606_v47, %v5785_v49  ;;  %v5809_v47 = vsel %vm499_vm0, %v474_v62, %v475_v54  ;;  %v2456_v49 = vld [vmem:[#allocation4 + $0x570] sm:$0xff] }
 0x182   : > { %7719 = vst [vmem:[#allocation94_spill] sm:$0xff] %v5774_v43  ;;  %2343 = vmatmul.bf16.gmra.mxu0 %v2242_v31  ;;  %v4782_v62 = vld [vmem:[#allocation2 + $0x170] sm:$0xff] }
 0x183   : > { %7720 = vst [vmem:[#allocation95_spill] sm:$0xff] %v5781_v35  ;;  %v1614_v48 = vpack.c.bf16 %v1587_v58, %v1586_v56  ;;  %v2457_v35 = vld [vmem:[#allocation4 + $0x578] sm:$0xff]  ;;  %v1330_v56 = vrot.slane %v5397_v59, 1  ;;  %2748 = vmatpush.bf16.msra.mxu1 %v4782_v62 }
 0x184   : > { %1264 = vmatmul.bf16.gmra.mxu1 %v761_v45  ;;  %v7495_v45 = vrot.slane %v5391_v3, 7  ;;  %7724 = vst [vmem:[#allocation99_spill] sm:$0xff] %v5809_v47  ;;  %v7731_v62 = vld [vmem:[#allocation47_spill] sm:$0xff] }
 0x185   : > { %2536 = vperm.xlu2 %5042, %v2454_v57   ;;  %2531 = vperm.xlu1 %5041, %v2453_v27  }
 0x186   : > { %2526 = vperm.xlu0 %5040, %v2452_v8   ;;  %v4790_v8 = vld [vmem:[#allocation2 + $0x1b0] sm:$0xff]  ;;  %v5805_v21 = vsel %vm499_vm0, %v475_v54, %v7495_v45  ;;  %v7726_v45 = vld [vmem:[#allocation13_spill] sm:$0xff] }
 0x187   : > { %v5794_v43 = vpop.permute.xlu2 %1902  ;;  %v1853_v5 = vpop.permute.xlu1 %1852  ;;  %7723 = vst [vmem:[#allocation98_spill] sm:$0xff] %v5805_v21  ;;  %3175 = vmatpush.bf16.msra.mxu2 %v4790_v8  ;;  %v736_v24 = vmul.f32 %v7726_v45, %v5809_v47 }
 0x188   : > { %v1848_v42 = vpop.permute.xlu0 %1847  ;;  %v2006_v52 = vmul.f32 %v1853_v5, %v5554_v16  ;;  %v2455_v5 = vld [vmem:[#allocation4 + $0x568] sm:$0xff]  ;;  %v4798_v16 = vld [vmem:[#allocation2 + $0x1f0] sm:$0xff] }
 0x189   : > { %v2005_v57 = vmul.f32 %v1848_v42, %v5560_v26  ;;  %v5799_v27 = vpop.f32.mrf.mxu1  ;;  %v5811_v42 = vpop.f32.mrf.mxu0  ;;  %v7725_v26 = vld [vmem:[#allocation12_spill] sm:$0xff]  ;;  %3602 = vmatpush.bf16.msra.mxu3 %v4798_v16 }
 0x18a   : > { %7722 = vst [vmem:[#allocation97_spill] sm:$0xff] %v5799_v27  ;;  %v737_v27 = vmul.f32 %v7725_v26, %v5805_v21  ;;  %v1329_v26 = vrot.slane %v5352_v14, 1  ;;  %v2458_v16 = vld [vmem:[#allocation4 + $0x580] sm:$0xff] }
 0x18b   : > { %v2037_v31 = vpack.c.bf16 %v2006_v52, %v2005_v57 }
 0x18c   : > { %1719 = vmatmul.bf16.gmra.mxu2 %v1614_v48  ;;  %v762_v45 = vpack.c.bf16 %v737_v27, %v736_v24  ;;  %v5829_v8 = vsel %vm1352_vm1, %v1329_v26, %v1330_v56  ;;  %v478_v24 = vrot.slane %v7731_v62, 7 }
 0x18d   : > { %2126 = vmatmul.bf16.vlgmr.msrb.gmra.mxu3 %v2037_v31  ;;  %2551 = vperm.xlu2 %5042, %v2457_v35   ;;  %v2460_v35 = vld [vmem:[#allocation4 + $0x590] sm:$0xff]  ;;  %7729 = vst [vmem:[#allocation100_spill] sm:$0xff] %v5829_v8  ;;  %v2243_v31 = vpack.c.bf16 %v5352_v14, %v5350_v39  ;;  %v1589_v27 = vmul.f32 %v5636_v9, %v5829_v8  ;;  %v2463_v8 = vld [vmem:[#allocation4 + $0x5a8] sm:$0xff] }
 0x18e   : > { %2546 = vperm.xlu1 %5041, %v2456_v49   ;;  %2541 = vperm.xlu0 %5040, %v2455_v5   ;;  %v2459_v49 = vld [vmem:[#allocation4 + $0x588] sm:$0xff]  ;;  %v4806_v5 = vld [vmem:[#allocation2 + $0x230] sm:$0xff]  ;;  %v2007_v9 = vmul.f32 %v5719_v19, %v5614_v1  ;;  %v7738_v19 = vld [vmem:[#allocation16_spill] sm:$0xff] }
 0x18f   : > { %v5817_v52 = vpop.permute.xlu2 %1917  ;;  %v5820_v54 = vpop.permute.xlu1 %1867  ;;  %4029 = vmatpush.bf16.msra.mxu0 %v4806_v5  ;;  %v2462_v5 = vld [vmem:[#allocation4 + $0x5a0] sm:$0xff] }
 0x190   : > { %v1863_v48 = vpop.permute.xlu0 %1862  ;;  %v5822_v58 = vpop.f32.mrf.mxu2 }
 0x191   : > { %7727 = vst [vmem:[#allocation12_spill] sm:$0xff] %v5822_v58  ;;  %v5824_v57 = vpop.f32.mrf.mxu1  ;;  %v5835_v58 = vsel %vm1352_vm1, %v1328_v50, %v1329_v26  ;;  %v7732_v50 = vld [vmem:[#allocation46_spill] sm:$0xff] }
 0x192   : > { %7728 = vst [vmem:[#allocation13_spill] sm:$0xff] %v5824_v57  ;;  %v5840_v57 = vpop.f32.mrf.mxu0  ;;  %2348 = vmatmul.bf16.gmra.mxu0 %v2243_v31  ;;  %v477_v26 = vrot.slane %v7732_v50, 7 }
 0x193   : > { %7730 = vst [vmem:[#allocation101_spill] sm:$0xff] %v5835_v58 }
 0x194   : > { %1269 = vmatmul.bf16.gmra.mxu1 %v762_v45  ;;  %v2008_v45 = vmul.f32 %v1863_v48, %v5620_v60 }
 0x195   : > { %2566 = vperm.xlu2 %5042, %v2460_v35   ;;  %v1588_v35 = vmul.f32 %v5518_v15, %v5835_v58  ;;  %v5866_v15 = vsel %vm499_vm0, %v7736_v40, %v477_v26 }
 0x196   : > { %2561 = vperm.xlu1 %5041, %v2459_v49   ;;  %2556 = vperm.xlu0 %5040, %v2458_v16   ;;  %v5860_v16 = vsel %vm499_vm0, %v477_v26, %v478_v24  ;;  %v2038_v60 = vpack.c.bf16 %v2008_v45, %v2007_v9  ;;  %7737 = vst [vmem:[#allocation105_spill] sm:$0xff] %v5866_v15  ;;  %v7510_v26 = vrot.slane %v7732_v50, 1 }
 0x197   : > { %v5843_v55 = vpop.permute.xlu2 %1932  ;;  %v5845_v39 = vpop.permute.xlu1 %1882  ;;  %7735 = vst [vmem:[#allocation104_spill] sm:$0xff] %v5860_v16  ;;  %v1615_v31 = vpack.c.bf16 %v1589_v27, %v1588_v35  ;;  %v7739_v27 = vld [vmem:[#allocation8_spill] sm:$0xff] }
 0x198   : > { %v5847_v14 = vpop.permute.xlu0 %1877  ;;  %v5854_v49 = vpop.f32.mrf.mxu2  ;;  %v738_v45 = vmul.f32 %v7739_v27, %v5866_v15  ;;  %v2464_v27 = vld [vmem:[#allocation4 + $0x5b0] sm:$0xff]  ;;  %v7752_v15 = vld [vmem:[#allocation45_spill] sm:$0xff] }
 0x199   : > { %7733 = vst [vmem:[#allocation102_spill] sm:$0xff] %v5854_v49  ;;  %v5856_v48 = vpop.f32.mrf.mxu1  ;;  %v739_v49 = vmul.f32 %v7738_v19, %v5860_v16  ;;  %v2467_v16 = vld [vmem:[#allocation4 + $0x5c8] sm:$0xff] }
 0x19a   : > { %7734 = vst [vmem:[#allocation103_spill] sm:$0xff] %v5856_v48 }
 0x19c   : > { %1724 = vmatmul.bf16.gmra.mxu2 %v1615_v31  ;;  %v5884_v31 = vpop.f32.mrf.mxu0 }
 0x19d   : > { %2131 = vmatmul.bf16.gmra.mxu3 %v2038_v60  ;;  %2581 = vperm.xlu2 %5042, %v2463_v8   ;;  %v1331_v60 = vrot.slane %v5391_v3, 1  ;;  %v763_v8 = vpack.c.bf16 %v739_v49, %v738_v45  ;;  %7742 = vst [vmem:[#allocation106_spill] sm:$0xff] %v5884_v31  ;;  %v2468_v31 = vld [vmem:[#allocation4 + $0x5d0] sm:$0xff] }
 0x19e   : > { %2576 = vperm.xlu1 %5041, %v2462_v5   ;;  %2571 = vperm.xlu0 %5040, %v2461_v11   ;;  %v2466_v11 = vld [vmem:[#allocation4 + $0x5c0] sm:$0xff]  ;;  %v2465_v5 = vld [vmem:[#allocation4 + $0x5b8] sm:$0xff] }
 0x19f   : > { %v5870_v1 = vpop.permute.xlu2 %1947  ;;  %v5874_v35 = vpop.permute.xlu1 %1897  ;;  %v5888_v19 = vsel %vm1352_vm1, %v1330_v56, %v1331_v60  ;;  %v2009_v56 = vmul.f32 %v5820_v54, %v5673_v28 }
 0x1a0   : > { %v5876_v9 = vpop.permute.xlu0 %1892  ;;  %v5878_v48 = vpop.f32.mrf.mxu2  ;;  %7743 = vst [vmem:[#allocation107_spill] sm:$0xff] %v5888_v19  ;;  %v1590_v49 = vmul.f32 %v5633_v17, %v5888_v19  ;;  %v2010_v17 = vmul.f32 %v5743_v46, %v5667_v23  ;;  %v2469_v19 = vld [vmem:[#allocation4 + $0x5d8] sm:$0xff]  ;;  %v7755_v23 = vld [vmem:[#allocation44_spill] sm:$0xff] }
 0x1a1   : > { %7740 = vst [vmem:[#allocation16_spill] sm:$0xff] %v5878_v48  ;;  %v5880_v40 = vpop.f32.mrf.mxu1  ;;  %v2244_v48 = vpack.c.bf16 %v5391_v3, %v5397_v59  ;;  %v7747_v3 = vld [vmem:[#allocation39_spill] sm:$0xff] }
 0x1a2   : > { %7741 = vst [vmem:[#allocation8_spill] sm:$0xff] %v5880_v40  ;;  %v5896_v40 = vsel %vm1352_vm1, %v1331_v60, %v7510_v26  ;;  %v479_v58 = vrot.slane %v7747_v3, 7  ;;  %v7748_v60 = vld [vmem:[#allocation38_spill] sm:$0xff]  ;;  %v2039_v28 = vpack.c.bf16 %v2010_v17, %v2009_v56 }
 0x1a3   : > { %7744 = vst [vmem:[#allocation108_spill] sm:$0xff] %v5896_v40  ;;  %2353 = vmatmul.bf16.gmra.mxu0 %v2244_v48  ;;  %v480_v26 = vrot.slane %v7748_v60, 7 }
 0x1a4   : > { %1274 = vmatmul.bf16.gmra.mxu1 %v763_v8  ;;  %v5920_v48 = vsel %vm499_vm0, %v478_v24, %v479_v58  ;;  %v5927_v46 = vpop.f32.mrf.mxu0  ;;  %v482_v24 = vrot.slane %v7755_v23, 7 }
 0x1a5   : > { %2596 = vperm.xlu2 %5042, %v2466_v11   ;;  %v1591_v11 = vmul.f32 %v5541_v6, %v5896_v40  ;;  %7751 = vst [vmem:[#allocation113_spill] sm:$0xff] %v5920_v48  ;;  %v5925_v6 = vsel %vm499_vm0, %v479_v58, %v480_v26  ;;  %v4781_v58 = vld [vmem:[#allocation2 + $0x168] sm:$0xff] }
 0x1a6   : > { %2591 = vperm.xlu1 %5041, %v2465_v5   ;;  %2586 = vperm.xlu0 %5040, %v2464_v27   ;;  %7753 = vst [vmem:[#allocation114_spill] sm:$0xff] %v5925_v6 }
 0x1a7   : > { %v5902_v45 = vpop.permute.xlu2 %1962  ;;  %v5904_v8 = vpop.permute.xlu1 %1912  ;;  %v1616_v27 = vpack.c.bf16 %v1591_v11, %v1590_v49  ;;  %7754 = vst [vmem:[#allocation115_spill] sm:$0xff] %v5927_v46  ;;  %v7756_v49 = vld [vmem:[#allocation15_spill] sm:$0xff]  ;;  %v1333_v11 = vrot.slane %v7731_v62, 1  ;;  %2749 = vmatpush.bf16.msra.mxu1 %v4781_v58 }
 0x1a8   : > { %7745 = vst [vmem:[#allocation109_spill] sm:$0xff] %v5904_v8  ;;  %v5906_v59 = vpop.permute.xlu0 %1907  ;;  %v5914_v5 = vpop.f32.mrf.mxu2  ;;  %v481_v8 = vrot.slane %v7752_v15, 7  ;;  %v740_v56 = vmul.f32 %v7756_v49, %v5920_v48 }
 0x1a9   : > { %7746 = vst [vmem:[#allocation110_spill] sm:$0xff] %v5906_v59  ;;  %v5916_v54 = vpop.f32.mrf.mxu1  ;;  %v4789_v59 = vld [vmem:[#allocation2 + $0x1a8] sm:$0xff] }
 0x1aa   : > { %7749 = vst [vmem:[#allocation111_spill] sm:$0xff] %v5914_v5  ;;  %v4797_v5 = vld [vmem:[#allocation2 + $0x1e8] sm:$0xff]  ;;  %3176 = vmatpush.bf16.msra.mxu2 %v4789_v59  ;;  %v5948_v59 = vmul.f32 %v5817_v52, %v5920_v48 }
 0x1ab   : > { %7750 = vst [vmem:[#allocation112_spill] sm:$0xff] %v5916_v54  ;;  %v7757_v54 = vld [vmem:[#allocation9_spill] sm:$0xff]  ;;  %3603 = vmatpush.bf16.msra.mxu3 %v4797_v5  ;;  %v7765_v5 = vrot.slane %v7747_v3, 1 }
 0x1ac   : > { %1729 = vmatmul.bf16.gmra.mxu2 %v1616_v27  ;;  %v741_v40 = vmul.f32 %v7757_v54, %v5925_v6  ;;  %v5943_v27 = vsel %vm499_vm0, %v480_v26, %v481_v8  ;;  %7760 = vst [vmem:[#allocation116_spill] sm:$0xff] %v5948_v59  ;;  %v2471_v48 = vld [vmem:[#allocation4 + $0x5e8] sm:$0xff]  ;;  %v7777_v59 = vld [vmem:[#allocation18_spill] sm:$0xff] }
 0x1ad   : > { %2136 = vmatmul.bf16.gmra.mxu3 %v2039_v28  ;;  %2611 = vperm.xlu2 %5042, %v2469_v19   ;;  %v5939_v28 = vsel %vm499_vm0, %v481_v8, %v482_v24  ;;  %7759 = vst [vmem:[#allocation9_spill] sm:$0xff] %v5943_v27  ;;  %v5968_v52 = vsel %vm1352_vm1, %v1333_v11, %v7765_v5  ;;  %v2470_v5 = vld [vmem:[#allocation4 + $0x5e0] sm:$0xff] }
 0x1ae   : > { %2606 = vperm.xlu1 %5041, %v2468_v31   ;;  %2601 = vperm.xlu0 %5040, %v2467_v16   ;;  %7758 = vst [vmem:[#allocation15_spill] sm:$0xff] %v5939_v28  ;;  %v5952_v16 = vmul.f32 %v5843_v55, %v5939_v28  ;;  %v764_v8 = vpack.c.bf16 %v741_v40, %v740_v56  ;;  %v484_v40 = vrot.slane %v5476_v18, 7  ;;  %v7767_v56 = vrot.slane %v7732_v50, 1 }
 0x1af   : > { %v5933_v17 = vpop.permute.xlu2 %1977  ;;  %v1928_v19 = vpop.permute.xlu1 %1927  ;;  %7766 = vst [vmem:[#allocation121_spill] sm:$0xff] %v5968_v52  ;;  %v2245_v55 = vpack.c.bf16 %v7731_v62, %v7732_v50 }
 0x1b0   : > { %v1923_v49 = vpop.permute.xlu0 %1922  ;;  %7761 = vst [vmem:[#allocation117_spill] sm:$0xff] %v5952_v16  ;;  %v5955_v54 = vmul.f32 %v1928_v19, %v5943_v27  ;;  %v5960_v26 = vpop.f32.mrf.mxu2  ;;  %v2472_v19 = vld [vmem:[#allocation4 + $0x5f0] sm:$0xff]  ;;  %v5980_v58 = vsel %vm1352_vm1, %v7767_v56, %v1333_v11  ;;  %v2012_v11 = vmul.f32 %v5845_v39, %v5711_v41  ;;  %v2869_v41 = vld [vmem:[#allocation4 + $0x600] sm:$0xff] }
 0x1b1   : > { %v5958_v46 = vmul.f32 %v1923_v49, %v5925_v6  ;;  %7764 = vst [vmem:[#allocation120_spill] sm:$0xff] %v5960_v26  ;;  %v5962_v31 = vpop.f32.mrf.mxu1  ;;  %v483_v26 = vrot.slane %v5470_v12, 7  ;;  %v4805_v6 = vld [vmem:[#allocation2 + $0x228] sm:$0xff]  ;;  %v1592_v49 = vmul.f32 %v5663_v33, %v5980_v58  ;;  %v5988_v16 = vpop.f32.mrf.mxu0 }
 0x1b2   : > { %7762 = vst [vmem:[#allocation118_spill] sm:$0xff] %v5955_v54  ;;  %v1593_v54 = vmul.f32 %v5661_v61, %v5968_v52  ;;  %4030 = vmatpush.bf16.msra.mxu0 %v4805_v6  ;;  %v2870_v6 = vld [vmem:[#allocation4 + $0x608] sm:$0xff] }
 0x1b3   : > { %7763 = vst [vmem:[#allocation119_spill] sm:$0xff] %v5958_v46  ;;  %2358 = vmatmul.bf16.gmra.mxu0 %v2245_v55  ;;  %v5998_v61 = vsel %vm499_vm0, %v482_v24, %v483_v26  ;;  %v485_v55 = vrot.slane %v5530_v7, 7  ;;  %v486_v24 = vrot.slane %v5532_v51, 7  ;;  %v743_v46 = vmul.f32 %v7777_v59, %v5939_v28  ;;  %v7789_v28 = vld [vmem:[#allocation55_spill] sm:$0xff] }
 0x1b4   : > { %7768 = vst [vmem:[#allocation122_spill] sm:$0xff] %v5980_v58  ;;  %1279 = vmatmul.bf16.gmra.mxu1 %v764_v8  ;;  %v2011_v8 = vmul.f32 %v5847_v14, %v5715_v63  ;;  %v1617_v50 = vpack.c.bf16 %v1593_v54, %v1592_v49  ;;  %v2473_v58 = vld [vmem:[#allocation4 + $0x5f8] sm:$0xff] }
 0x1b5   : > { %2626 = vperm.xlu2 %5042, %v2472_v19   ;;  %7769 = vst [vmem:[#allocation123_spill] sm:$0xff] %v5988_v16  ;;  %v7778_v16 = vld [vmem:[#allocation19_spill] sm:$0xff]  ;;  %v6026_v54 = vsel %vm499_vm0, %v485_v55, %v486_v24 }
 0x1b6   : > { %2621 = vperm.xlu1 %5041, %v2471_v48   ;;  %2616 = vperm.xlu0 %5040, %v2470_v5   ;;  %7770 = vst [vmem:[#allocation124_spill] sm:$0xff] %v5998_v61  ;;  %v6002_v48 = vsel %vm499_vm0, %v483_v26, %v484_v40  ;;  %v2040_v63 = vpack.c.bf16 %v2012_v11, %v2011_v8 }
 0x1b7   : > { %v5994_v56 = vpop.permute.xlu2 %1992  ;;  %7771 = vst [vmem:[#allocation125_spill] sm:$0xff] %v6002_v48  ;;  %v1943_v33 = vpop.permute.xlu1 %1942  ;;  %v742_v51 = vmul.f32 %v7778_v16, %v5943_v27  ;;  %v2873_v27 = vld [vmem:[#allocation4 + $0x620] sm:$0xff] }
 0x1b8   : > { %v1938_v19 = vpop.permute.xlu0 %1937  ;;  %v6005_v39 = vmul.f32 %v1943_v33, %v6002_v48  ;;  %v6010_v5 = vpop.f32.mrf.mxu2  ;;  %v7775_v33 = vld [vmem:[#allocation49_spill] sm:$0xff]  ;;  %7779 = vst [vmem:[#allocation18_spill] sm:$0xff] %v6026_v54 }
 0x1b9   : > { %v6008_v14 = vmul.f32 %v1938_v19, %v5998_v61  ;;  %7774 = vst [vmem:[#allocation128_spill] sm:$0xff] %v6010_v5  ;;  %v6013_v62 = vpop.f32.mrf.mxu1  ;;  %v487_v52 = vrot.slane %v7775_v33, 7  ;;  %v7776_v19 = vld [vmem:[#allocation48_spill] sm:$0xff]  ;;  %v6060_v26 = vpop.f32.mrf.mxu0 }
 0x1ba   : > { %7772 = vst [vmem:[#allocation126_spill] sm:$0xff] %v6005_v39  ;;  %v488_v5 = vrot.slane %v7776_v19, 7 }
 0x1bb   : > { %7773 = vst [vmem:[#allocation127_spill] sm:$0xff] %v6008_v14  ;;  %v6040_v59 = vsel %vm499_vm0, %v486_v24, %v487_v52  ;;  %v765_v24 = vpack.c.bf16 %v743_v46, %v742_v51  ;;  %v489_v14 = vrot.slane %v7789_v28, 7  ;;  %v490_v51 = vrot.slane %v5514_v38, 7  ;;  %v4788_v38 = vld [vmem:[#allocation2 + $0x1a0] sm:$0xff] }
 0x1bc   : > { %1734 = vmatmul.bf16.gmra.mxu2 %v1617_v50  ;;  %v6036_v50 = vsel %vm499_vm0, %v487_v52, %v488_v5  ;;  %7782 = vst [vmem:[#allocation130_spill] sm:$0xff] %v6040_v59  ;;  %v7790_v46 = vrot.slane %v7752_v15, 1 }
 0x1bd   : > { %2141 = vmatmul.bf16.gmra.mxu3 %v2040_v63  ;;  %2908 = vperm.xlu2 %5042, %v2870_v6   ;;  %v6032_v63 = vsel %vm499_vm0, %v484_v40, %v485_v55  ;;  %7781 = vst [vmem:[#allocation129_spill] sm:$0xff] %v6036_v50  ;;  %v6049_v40 = vmul.f32 %v5902_v45, %v6036_v50  ;;  %v1335_v6 = vrot.slane %v7748_v60, 1 }
 0x1be   : > { %2903 = vperm.xlu1 %5041, %v2869_v41   ;;  %2631 = vperm.xlu0 %5040, %v2473_v58   ;;  %7780 = vst [vmem:[#allocation19_spill] sm:$0xff] %v6032_v63  ;;  %v6045_v58 = vmul.f32 %v5870_v1, %v6032_v63  ;;  %v6064_v1 = vpop.f32.mrf.mxu3  ;;  %v2246_v45 = vpack.c.bf16 %v7748_v60, %v7747_v3 }
 0x1bf   : > { %v6028_v49 = vpop.permute.xlu2 %2476  ;;  %v1958_v16 = vpop.permute.xlu1 %1957  ;;  %7784 = vst [vmem:[#allocation132_spill] sm:$0xff] %v6049_v40  ;;  %v6094_v60 = vsel %vm499_vm0, %v488_v5, %v489_v14  ;;  %3177 = vmatpush.bf16.msra.mxu2 %v4788_v38 }
 0x1c0   : > { %v1953_v11 = vpop.permute.xlu0 %1952  ;;  %7783 = vst [vmem:[#allocation131_spill] sm:$0xff] %v6045_v58  ;;  %v6052_v8 = vmul.f32 %v1958_v16, %v6040_v59  ;;  %v6057_v52 = vpop.f32.mrf.mxu2 }
 0x1c1   : > { %v6055_v55 = vmul.f32 %v1953_v11, %v6026_v54  ;;  %7787 = vst [vmem:[#allocation135_spill] sm:$0xff] %v6057_v52  ;;  %v6062_v41 = vpop.f32.mrf.mxu1  ;;  %v2872_v11 = vld [vmem:[#allocation4 + $0x618] sm:$0xff]  ;;  %v6076_v52 = vsel %vm1352_vm1, %v1335_v6, %v7790_v46  ;;  %v2014_v46 = vmul.f32 %v5876_v9, %v5761_v2  ;;  %v2013_v9 = vmul.f32 %v5765_v22, %v5757_v34  ;;  %v2875_v34 = vld [vmem:[#allocation4 + $0x630] sm:$0xff]  ;;  %v6119_v39 = vpop.f32.mrf.mxu0 }
 0x1c2   : > { %7785 = vst [vmem:[#allocation133_spill] sm:$0xff] %v6052_v8  ;;  %v7792_v8 = vrot.slane %v7747_v3, 1  ;;  %v1595_v40 = vmul.f32 %v5684_v37, %v6076_v52  ;;  %v7797_v3 = vld [vmem:[#allocation62_spill] sm:$0xff]  ;;  %v2876_v22 = vld [vmem:[#allocation4 + $0x638] sm:$0xff] }
 0x1c3   : > { %7786 = vst [vmem:[#allocation134_spill] sm:$0xff] %v6055_v55  ;;  %2363 = vmatmul.bf16.gmra.mxu0 %v2246_v45  ;;  %v492_v2 = vrot.slane %v7797_v3, 7  ;;  %v2041_v55 = vpack.c.bf16 %v2014_v46, %v2013_v9  ;;  %v7799_v3 = vld [vmem:[#allocation21_spill] sm:$0xff]  ;;  %v7800_v46 = vld [vmem:[#allocation10_spill] sm:$0xff] }
 0x1c4   : > { %7788 = vst [vmem:[#allocation136_spill] sm:$0xff] %v6064_v1  ;;  %1284 = vmatmul.bf16.gmra.mxu1 %v765_v24  ;;  %v2871_v1 = vld [vmem:[#allocation4 + $0x610] sm:$0xff]  ;;  %v6084_v16 = vsel %vm1352_vm1, %v7792_v8, %v1335_v6  ;;  %v6098_v8 = vsel %vm499_vm0, %v489_v14, %v490_v51 }
 0x1c5   : > { %7791 = vst [vmem:[#allocation137_spill] sm:$0xff] %v6076_v52  ;;  %2923 = vperm.xlu2 %5042, %v2873_v27   ;;  %v1594_v37 = vmul.f32 %v5572_v20, %v6084_v16 }
 0x1c6   : > { %7793 = vst [vmem:[#allocation138_spill] sm:$0xff] %v6084_v16  ;;  %2918 = vperm.xlu1 %5041, %v2872_v11   ;;  %2913 = vperm.xlu0 %5040, %v2871_v1   ;;  %v491_v11 = vrot.slane %v5562_v0, 7  ;;  %v4796_v0 = vld [vmem:[#allocation2 + $0x1e0] sm:$0xff] }
 0x1c7   : > { %v6090_v24 = vpop.permute.xlu2 %2491  ;;  %7794 = vst [vmem:[#allocation139_spill] sm:$0xff] %v6094_v60  ;;  %v1973_v27 = vpop.permute.xlu1 %1972  ;;  %v1618_v58 = vpack.c.bf16 %v1595_v40, %v1594_v37  ;;  %v745_v40 = vmul.f32 %v7799_v3, %v6002_v48  ;;  %v744_v37 = vmul.f32 %v7800_v46, %v5998_v61  ;;  %v7803_v3 = vrot.slane %v5468_v10, 7  ;;  %3604 = vmatpush.bf16.msra.mxu3 %v4796_v0  ;;  %v2879_v48 = vld [vmem:[#allocation4 + $0x650] sm:$0xff] }
 0x1c8   : > { %7795 = vst [vmem:[#allocation140_spill] sm:$0xff] %v6098_v8  ;;  %v1968_v6 = vpop.permute.xlu0 %1967  ;;  %v6105_v1 = vmul.f32 %v1973_v27, %v6098_v8  ;;  %v6110_v5 = vpop.f32.mrf.mxu2  ;;  %v493_v27 = vrot.slane %v5627_v53, 7  ;;  %v6129_v9 = vsel %vm499_vm0, %v491_v11, %v492_v2  ;;  %v7558_v0 = vrot.slane %v5470_v12, 1 }
 0x1c9   : > { %v6108_v45 = vmul.f32 %v1968_v6, %v6094_v60  ;;  %7796 = vst [vmem:[#allocation141_spill] sm:$0xff] %v6110_v5  ;;  %v6113_v14 = vpop.f32.mrf.mxu1  ;;  %v2874_v6 = vld [vmem:[#allocation4 + $0x628] sm:$0xff]  ;;  %v6121_v5 = vpop.f32.mrf.mxu3  ;;  %v7810_v61 = vrot.slane %v7752_v15, 1 }
 0x1ca   : > { %7798 = vst [vmem:[#allocation142_spill] sm:$0xff] %v6121_v5  ;;  %v4780_v5 = vld [vmem:[#allocation2 + $0x160] sm:$0xff] }
 0x1cb   : > { %7801 = vst [vmem:[#allocation21_spill] sm:$0xff] %v6129_v9  ;;  %2750 = vmatpush.bf16.msra.mxu1 %v4780_v5 }
 0x1cc   : > { %1739 = vmatmul.bf16.gmra.mxu2 %v1618_v58  ;;  %v6135_v58 = vsel %vm499_vm0, %v490_v51, %v491_v11 }
 0x1cd   : > { %2146 = vmatmul.bf16.gmra.mxu3 %v2041_v55  ;;  %2938 = vperm.xlu2 %5042, %v2876_v22   ;;  %7802 = vst [vmem:[#allocation10_spill] sm:$0xff] %v6135_v58  ;;  %v6145_v55 = vsel %vm499_vm0, %v492_v2, %v493_v27  ;;  %v1241_v22 = vadd.f32 %v5962_v31, %v5777_v4  ;;  %v1337_v31 = vrot.slane %v7755_v23, 1 }
 0x1ce   : > { %2933 = vperm.xlu1 %5041, %v2875_v34   ;;  %2928 = vperm.xlu0 %5040, %v2874_v6   ;;  %v6141_v34 = vsel %vm499_vm0, %v493_v27, %v7803_v3  ;;  %7805 = vst [vmem:[#allocation144_spill] sm:$0xff] %v6145_v55  ;;  %v6151_v51 = vmul.f32 %v5933_v17, %v6135_v58 }
 0x1cf   : > { %v6131_v20 = vpop.permute.xlu2 %2506  ;;  %7804 = vst [vmem:[#allocation143_spill] sm:$0xff] %v6141_v34  ;;  %v1988_v6 = vpop.permute.xlu1 %1987  ;;  %v6155_v11 = vmul.f32 %v5994_v56, %v6141_v34  ;;  %v766_v4 = vpack.c.bf16 %v745_v40, %v744_v37  ;;  %v6177_v5 = vsel %vm1352_vm1, %v7810_v61, %v1337_v31  ;;  %v2877_v40 = vld [vmem:[#allocation4 + $0x640] sm:$0xff]  ;;  %v6187_v56 = vsel %vm1352_vm1, %v1337_v31, %v7558_v0  ;;  %v7816_v0 = vld [vmem:[#allocation54_spill] sm:$0xff] }
 0x1d0   : > { %v1983_v38 = vpop.permute.xlu0 %1982  ;;  %7806 = vst [vmem:[#allocation145_spill] sm:$0xff] %v6151_v51  ;;  %v6158_v46 = vmul.f32 %v1988_v6, %v6145_v55  ;;  %v1700_v27 = vpop.f32.mrf.mxu2  ;;  %v1596_v61 = vmul.f32 %v5682_v13, %v6177_v5  ;;  %v2016_v13 = vmul.f32 %v5794_v43, %v5805_v21  ;;  %v2880_v51 = vld [vmem:[#allocation4 + $0x658] sm:$0xff]  ;;  %v7828_v21 = vld [vmem:[#allocation109_spill] sm:$0xff] }
 0x1d1   : > { %7807 = vst [vmem:[#allocation146_spill] sm:$0xff] %v6155_v11  ;;  %v6161_v2 = vmul.f32 %v1983_v38, %v6129_v9  ;;  %v6165_v3 = vadd.f32 %v1700_v27, %v1241_v22  ;;  %v6167_v17 = vpop.f32.mrf.mxu1  ;;  %v2878_v38 = vld [vmem:[#allocation4 + $0x648] sm:$0xff]  ;;  %v6179_v37 = vpop.f32.mrf.mxu0  ;;  %v2247_v22 = vpack.c.bf16 %v7755_v23, %v7752_v15  ;;  %v4804_v27 = vld [vmem:[#allocation2 + $0x220] sm:$0xff]  ;;  %v1243_v15 = vadd.f32 %v6013_v62, %v5811_v42 }
 0x1d2   : > { %7808 = vst [vmem:[#allocation147_spill] sm:$0xff] %v6158_v46  ;;  %v6193_v6 = vpop.f32.mrf.mxu3  ;;  %4031 = vmatpush.bf16.msra.mxu0 %v4804_v27  ;;  %v2881_v11 = vld [vmem:[#allocation4 + $0x660] sm:$0xff] }
 0x1d3   : > { %7809 = vst [vmem:[#allocation148_spill] sm:$0xff] %v6161_v2  ;;  %2368 = vmatmul.bf16.gmra.mxu0 %v2247_v22  ;;  %v2887_v2 = vld [vmem:[#allocation4 + $0x690] sm:$0xff] }
 0x1d4   : > { %7811 = vst [vmem:[#allocation149_spill] sm:$0xff] %v6177_v5  ;;  %1289 = vmatmul.bf16.gmra.mxu1 %v766_v4  ;;  %v2015_v4 = vmul.f32 %v5874_v35, %v5809_v47 }
 0x1d5   : > { %7812 = vst [vmem:[#allocation150_spill] sm:$0xff] %v6187_v56  ;;  %2953 = vperm.xlu2 %5042, %v2879_v48   ;;  %v1597_v48 = vmul.f32 %v5602_v44, %v6187_v56  ;;  %v2882_v44 = vld [vmem:[#allocation4 + $0x668] sm:$0xff] }
 0x1d6   : > { %2948 = vperm.xlu1 %5041, %v2878_v38   ;;  %7813 = vst [vmem:[#allocation151_spill] sm:$0xff] %v6193_v6  ;;  %2943 = vperm.xlu0 %5040, %v2877_v40   ;;  %v7814_v38 = vld [vmem:[#allocation53_spill] sm:$0xff]  ;;  %v2042_v27 = vpack.c.bf16 %v2016_v13, %v2015_v4  ;;  %v1246_v13 = vadd.f32 %v6062_v41, %v5840_v57 }
 0x1d7   : > { %v6195_v46 = vpop.permute.xlu2 %2521  ;;  %v2003_v23 = vpop.permute.xlu1 %2002  ;;  %v1619_v42 = vpack.c.bf16 %v1597_v48, %v1596_v61  ;;  %v7819_v61 = vld [vmem:[#allocation11_spill] sm:$0xff] }
 0x1d8   : > { %v1998_v31 = vpop.permute.xlu0 %1997  ;;  %v6204_v35 = vmul.f32 %v2003_v23, %v7814_v38  ;;  %v1702_v6 = vpop.f32.mrf.mxu2  ;;  %v7818_v23 = vld [vmem:[#allocation20_spill] sm:$0xff]  ;;  %v747_v4 = vmul.f32 %v7819_v61, %v6026_v54 }
 0x1d9   : > { %v6207_v40 = vmul.f32 %v1998_v31, %v7816_v0  ;;  %v6209_v22 = vadd.f32 %v1702_v6, %v1243_v15  ;;  %v6211_v47 = vpop.f32.mrf.mxu1  ;;  %v6215_v43 = vpop.f32.mrf.mxu0  ;;  %v746_v31 = vmul.f32 %v7818_v23, %v6032_v63  ;;  %v1339_v15 = vrot.slane %v5476_v18, 1 }
 0x1da   : > { %7815 = vst [vmem:[#allocation152_spill] sm:$0xff] %v6204_v35  ;;  %v6229_v23 = vmul.f32 %v6028_v49, %v5651_v25  ;;  %v7821_v49 = vrot.slane %v5530_v7, 1  ;;  %v7831_v35 = vld [vmem:[#allocation106_spill] sm:$0xff] }
 0x1db   : > { %7817 = vst [vmem:[#allocation153_spill] sm:$0xff] %v6207_v40  ;;  %v767_v57 = vpack.c.bf16 %v747_v4, %v746_v31  ;;  %v7823_v31 = vrot.slane %v5470_v12, 1  ;;  %v2883_v4 = vld [vmem:[#allocation4 + $0x670] sm:$0xff] }
 0x1dc   : > { %1744 = vmatmul.bf16.gmra.mxu2 %v1619_v42  ;;  %v6251_v25 = vsel %vm1352_vm1, %v1339_v15, %v7821_v49  ;;  %v2248_v49 = vpack.c.bf16 %v5476_v18, %v5470_v12 }
 0x1dd   : > { %2151 = vmatmul.bf16.gmra.mxu3 %v2042_v27  ;;  %2968 = vperm.xlu2 %5042, %v2882_v44   ;;  %7822 = vst [vmem:[#allocation11_spill] sm:$0xff] %v6251_v25 }
 0x1de   : > { %2963 = vperm.xlu1 %5041, %v2881_v11   ;;  %2958 = vperm.xlu0 %5040, %v2880_v51   ;;  %v6231_v11 = vpop.f32.mrf.mxu3  ;;  %v6235_v51 = vmul.f32 %v6090_v24, %v5691_v32  ;;  %v7825_v24 = vld [vmem:[#allocation78_spill] sm:$0xff] }
 0x1df   : > { %v6220_v6 = vpop.permute.xlu2 %2536  ;;  %v2487_v42 = vpop.permute.xlu1 %2486  ;;  %7820 = vst [vmem:[#allocation20_spill] sm:$0xff] %v6231_v11  ;;  %v1599_v38 = vmul.f32 %v7825_v24, %v6251_v25  ;;  %v7827_v11 = vld [vmem:[#allocation104_spill] sm:$0xff]  ;;  %v7832_v24 = vld [vmem:[#allocation86_spill] sm:$0xff] }
 0x1e0   : > { %v2482_v27 = vpop.permute.xlu0 %2481  ;;  %v6238_v44 = vmul.f32 %v2487_v42, %v5695_v30  ;;  %v1705_v62 = vpop.f32.mrf.mxu2  ;;  %v7826_v42 = vld [vmem:[#allocation79_spill] sm:$0xff]  ;;  %v2018_v40 = vmul.f32 %v7828_v21, %v7827_v11  ;;  %v1248_v30 = vadd.f32 %v6113_v14, %v7831_v35 }
 0x1e1   : > { %v6241_v61 = vmul.f32 %v2482_v27, %v5645_v29  ;;  %v6243_v41 = vadd.f32 %v1705_v62, %v1246_v13  ;;  %v6245_v48 = vpop.f32.mrf.mxu1  ;;  %v2885_v27 = vld [vmem:[#allocation4 + $0x680] sm:$0xff]  ;;  %v2884_v29 = vld [vmem:[#allocation4 + $0x678] sm:$0xff]  ;;  %v6261_v62 = vsel %vm1352_vm1, %v7823_v31, %v1339_v15  ;;  %v6263_v13 = vpop.f32.mrf.mxu0  ;;  %v7829_v15 = vld [vmem:[#allocation105_spill] sm:$0xff] }
 0x1e2   : > { %7824 = vst [vmem:[#allocation154_spill] sm:$0xff] %v6261_v62  ;;  %v1598_v0 = vmul.f32 %v7826_v42, %v6261_v62  ;;  %v7830_v31 = vld [vmem:[#allocation110_spill] sm:$0xff]  ;;  %v7834_v42 = vld [vmem:[#allocation85_spill] sm:$0xff]  ;;  %v2888_v35 = vld [vmem:[#allocation4 + $0x698] sm:$0xff] }
 0x1e3   : > { %2373 = vmatmul.bf16.gmra.mxu0 %v2248_v49 }
 0x1e4   : > { %1294 = vmatmul.bf16.gmra.mxu1 %v767_v57  ;;  %v2017_v57 = vmul.f32 %v7830_v31, %v7829_v15  ;;  %v1620_v31 = vpack.c.bf16 %v1599_v38, %v1598_v0  ;;  %v7838_v0 = vld [vmem:[#allocation23_spill] sm:$0xff] }
 0x1e5   : > { %2983 = vperm.xlu2 %5042, %v2885_v27   ;;  %v748_v38 = vmul.f32 %v7838_v0, %v6040_v59 }
 0x1e6   : > { %2978 = vperm.xlu1 %5041, %v2884_v29   ;;  %2973 = vperm.xlu0 %5040, %v2883_v4   ;;  %v6287_v4 = vpop.f32.mrf.mxu3  ;;  %v2043_v14 = vpack.c.bf16 %v2018_v40, %v2017_v57  ;;  %v7839_v57 = vld [vmem:[#allocation115_spill] sm:$0xff]  ;;  %v7845_v40 = vld [vmem:[#allocation96_spill] sm:$0xff] }
 0x1e7   : > { %v6277_v18 = vpop.permute.xlu2 %2551  ;;  %v2502_v12 = vpop.permute.xlu1 %2501  ;;  %7836 = vst [vmem:[#allocation109_spill] sm:$0xff] %v6287_v4 }
 0x1e8   : > { %v6280_v27 = vmul.f32 %v2502_v12, %v7832_v24  ;;  %v2497_v29 = vpop.permute.xlu0 %2496  ;;  %v1707_v32 = vpop.f32.mrf.mxu2  ;;  %v2886_v24 = vld [vmem:[#allocation4 + $0x688] sm:$0xff]  ;;  %v1251_v12 = vadd.f32 %v6167_v17, %v7839_v57  ;;  %v6315_v17 = vmul.f32 %v6131_v20, %v7845_v40  ;;  %v7847_v57 = vld [vmem:[#allocation95_spill] sm:$0xff]  ;;  %v7852_v40 = vrot.slane %v5530_v7, 1 }
 0x1e9   : > { %v6283_v63 = vmul.f32 %v2497_v29, %v7834_v42  ;;  %v6285_v21 = vadd.f32 %v1707_v32, %v1248_v30  ;;  %v1257_v54 = vpop.f32.mrf.mxu1  ;;  %v6294_v11 = vpop.f32.mrf.mxu0  ;;  %v4787_v29 = vld [vmem:[#allocation2 + $0x198] sm:$0xff]  ;;  %v7837_v32 = vld [vmem:[#allocation22_spill] sm:$0xff] }
 0x1ea   : > { %7833 = vst [vmem:[#allocation78_spill] sm:$0xff] %v6280_v27  ;;  %v6290_v49 = vadd.f32 %v1257_v54, %v6119_v39  ;;  %v749_v30 = vmul.f32 %v7837_v32, %v6036_v50  ;;  %v4795_v39 = vld [vmem:[#allocation2 + $0x1d8] sm:$0xff]  ;;  %3178 = vmatpush.bf16.msra.mxu2 %v4787_v29  ;;  %v7840_v50 = vld [vmem:[#allocation100_spill] sm:$0xff]  ;;  %v7844_v29 = vld [vmem:[#allocation58_spill] sm:$0xff] }
 0x1eb   : > { %7835 = vst [vmem:[#allocation79_spill] sm:$0xff] %v6283_v63  ;;  %v4779_v54 = vld [vmem:[#allocation2 + $0x158] sm:$0xff]  ;;  %3605 = vmatpush.bf16.msra.mxu3 %v4795_v39  ;;  %v1341_v0 = vrot.slane %v7844_v29, 1  ;;  %v2890_v39 = vld [vmem:[#allocation4 + $0x6a8] sm:$0xff] }
 0x1ec   : > { %1749 = vmatmul.bf16.gmra.mxu2 %v1620_v31  ;;  %v768_v32 = vpack.c.bf16 %v749_v30, %v748_v38  ;;  %v6307_v31 = vmul.f32 %v6195_v46, %v7840_v50  ;;  %2751 = vmatpush.bf16.msra.mxu1 %v4779_v54  ;;  %7846 = vst [vmem:[#allocation106_spill] sm:$0xff] %v6315_v17  ;;  %v7849_v54 = vrot.slane %v7775_v33, 1  ;;  %v7855_v20 = vld [vmem:[#allocation123_spill] sm:$0xff]  ;;  %v7857_v17 = vld [vmem:[#allocation108_spill] sm:$0xff]  ;;  %v3297_v63 = vld [vmem:[#allocation4 + $0x708] sm:$0xff] }
 0x1ed   : > { %2156 = vmatmul.bf16.gmra.mxu3 %v2043_v14  ;;  %2998 = vperm.xlu2 %5042, %v2888_v35   ;;  %v7842_v14 = vld [vmem:[#allocation101_spill] sm:$0xff]  ;;  %v7861_v27 = vld [vmem:[#allocation119_spill] sm:$0xff] }
 0x1ee   : > { %2993 = vperm.xlu1 %5041, %v2887_v2   ;;  %2988 = vperm.xlu0 %5040, %v2886_v24   ;;  %7841 = vst [vmem:[#allocation105_spill] sm:$0xff] %v6307_v31  ;;  %v6330_v50 = vsel %vm1352_vm1, %v1341_v0, %v7849_v54  ;;  %v6338_v46 = vpop.f32.mrf.mxu3  ;;  %v7854_v54 = vld [vmem:[#allocation83_spill] sm:$0xff] }
 0x1ef   : > { %v6303_v4 = vpop.permute.xlu2 %2566  ;;  %v2517_v42 = vpop.permute.xlu1 %2516  ;;  %7850 = vst [vmem:[#allocation23_spill] sm:$0xff] %v6330_v50 }
 0x1f0   : > { %v6310_v35 = vmul.f32 %v2517_v42, %v7842_v14  ;;  %v2512_v2 = vpop.permute.xlu0 %2511  ;;  %v1710_v24 = vpop.f32.mrf.mxu2  ;;  %v3296_v42 = vld [vmem:[#allocation4 + $0x700] sm:$0xff]  ;;  %v4803_v14 = vld [vmem:[#allocation2 + $0x218] sm:$0xff]  ;;  %7851 = vst [vmem:[#allocation115_spill] sm:$0xff] %v6338_v46 }
 0x1f1   : > { %v6318_v59 = vmul.f32 %v2512_v2, %v7847_v57  ;;  %v6320_v30 = vadd.f32 %v1710_v24, %v1251_v12  ;;  %v6322_v38 = vpop.f32.mrf.mxu1  ;;  %v2889_v2 = vld [vmem:[#allocation4 + $0x6a0] sm:$0xff]  ;;  %v6334_v12 = vpop.f32.mrf.mxu0  ;;  %v2249_v24 = vpack.c.bf16 %v7844_v29, %v5530_v7  ;;  %v6344_v57 = vsel %vm1352_vm1, %v7852_v40, %v1341_v0  ;;  %4032 = vmatpush.bf16.msra.mxu0 %v4803_v14 }
 0x1f2   : > { %7843 = vst [vmem:[#allocation110_spill] sm:$0xff] %v6310_v35  ;;  %v1253_v35 = vadd.f32 %v6211_v47, %v7855_v20  ;;  %v7856_v7 = vld [vmem:[#allocation68_spill] sm:$0xff]  ;;  %v3724_v20 = vld [vmem:[#allocation4 + $0x808] sm:$0xff] }
 0x1f3   : > { %7848 = vst [vmem:[#allocation22_spill] sm:$0xff] %v6318_v59  ;;  %2378 = vmatmul.bf16.gmra.mxu0 %v2249_v24  ;;  %v1600_v46 = vmul.f32 %v7856_v7, %v6344_v57 }
 0x1f4   : > { %1299 = vmatmul.bf16.gmra.mxu1 %v768_v32  ;;  %7853 = vst [vmem:[#allocation155_spill] sm:$0xff] %v6344_v57  ;;  %v1601_v32 = vmul.f32 %v7854_v54, %v6330_v50  ;;  %v3723_v54 = vld [vmem:[#allocation4 + $0x800] sm:$0xff] }
 0x1f5   : > { %3330 = vperm.xlu2 %5042, %v3296_v42  }
 0x1f6   : > { %3008 = vperm.xlu1 %5041, %v2890_v39   ;;  %3003 = vperm.xlu0 %5040, %v2889_v2   ;;  %v7858_v39 = vld [vmem:[#allocation107_spill] sm:$0xff]  ;;  %v1621_v47 = vpack.c.bf16 %v1601_v32, %v1600_v46  ;;  %v6375_v32 = vpop.f32.mrf.mxu3 }
 0x1f7   : > { %v6350_v29 = vpop.permute.xlu2 %2581  ;;  %v2532_v31 = vpop.permute.xlu1 %2531  ;;  %7865 = vst [vmem:[#allocation123_spill] sm:$0xff] %v6375_v32 }
 0x1f8   : > { %v6355_v40 = vmul.f32 %v2532_v31, %v7857_v17  ;;  %v2527_v0 = vpop.permute.xlu0 %2526  ;;  %v1712_v42 = vpop.f32.mrf.mxu2  ;;  %v7860_v31 = vld [vmem:[#allocation25_spill] sm:$0xff] }
 0x1f9   : > { %v6358_v59 = vmul.f32 %v2527_v0, %v7858_v39  ;;  %v6360_v2 = vadd.f32 %v1712_v42, %v1253_v35  ;;  %v6362_v24 = vpop.f32.mrf.mxu1  ;;  %v6366_v7 = vpop.f32.mrf.mxu0  ;;  %v751_v17 = vmul.f32 %v7860_v31, %v6098_v8  ;;  %v7862_v0 = vld [vmem:[#allocation116_spill] sm:$0xff]  ;;  %v7864_v35 = vld [vmem:[#allocation14_spill] sm:$0xff]  ;;  %v1256_v42 = vadd.f32 %v6245_v48, %v6060_v26  ;;  %v7870_v48 = vld [vmem:[#allocation121_spill] sm:$0xff] }
 0x1fa   : > { %v7863_v39 = vpack.c.bf16 %v7861_v27, %v7862_v0  ;;  %v750_v46 = vmul.f32 %v7864_v35, %v6094_v60  ;;  %v6384_v27 = vmul.f32 %v6277_v18, %v6076_v52  ;;  %v7868_v0 = vld [vmem:[#allocation122_spill] sm:$0xff]  ;;  %v3299_v8 = vld [vmem:[#allocation4 + $0x718] sm:$0xff]  ;;  %v7872_v60 = vrot.slane %v7775_v33, 1 }
 0x1fb   : > { %7859 = vst [vmem:[#allocation83_spill] sm:$0xff] %v6358_v59  ;;  %v6392_v26 = vmul.f32 %v6220_v6, %v7868_v0  ;;  %v7874_v18 = vrot.slane %v7789_v28, 1  ;;  %v7877_v0 = vld [vmem:[#allocation71_spill] sm:$0xff] }
 0x1fc   : > { %1754 = vmatmul.bf16.gmra.mxu2 %v1621_v47  ;;  %v769_v31 = vpack.c.bf16 %v751_v17, %v750_v46  ;;  %v1343_v47 = vrot.slane %v7776_v19, 1  ;;  %7866 = vst [vmem:[#allocation68_spill] sm:$0xff] %v6384_v27 }
 0x1fd   : > { %2161 = vmatmul.bf16.gmra.mxu3 %v7863_v39  ;;  %3762 = vperm.xlu2 %5042, %v3724_v20   ;;  %7869 = vst [vmem:[#allocation119_spill] sm:$0xff] %v6392_v26  ;;  %v4794_v26 = vld [vmem:[#allocation2 + $0x1d0] sm:$0xff] }
 0x1fe   : > { %3757 = vperm.xlu1 %5041, %v3723_v54   ;;  %3335 = vperm.xlu0 %5040, %v3297_v63   ;;  %v6407_v63 = vsel %vm1352_vm1, %v7872_v60, %v1343_v47  ;;  %v6419_v52 = vsel %vm1352_vm1, %v1343_v47, %v7874_v18  ;;  %v7876_v60 = vld [vmem:[#allocation82_spill] sm:$0xff]  ;;  %v6430_v47 = vpop.f32.mrf.mxu3 }
 0x1ff   : > { %v6379_v14 = vpop.permute.xlu2 %2596  ;;  %7873 = vst [vmem:[#allocation14_spill] sm:$0xff] %v6407_v63  ;;  %3606 = vmatpush.bf16.msra.mxu3 %v4794_v26 }
 0x200   : > { %v2547_v59 = vpop.permute.xlu1 %2546  ;;  %v2542_v20 = vpop.permute.xlu0 %2541  ;;  %7875 = vst [vmem:[#allocation156_spill] sm:$0xff] %v6419_v52 }
 0x201   : > { %v6387_v39 = vmul.f32 %v2547_v59, %v6084_v16  ;;  %v1715_v54 = vpop.f32.mrf.mxu2  ;;  %v6395_v35 = vmul.f32 %v2542_v20, %v7870_v48  ;;  %v6399_v46 = vpop.f32.mrf.mxu1  ;;  %v3725_v59 = vld [vmem:[#allocation4 + $0x810] sm:$0xff]  ;;  %v1602_v16 = vmul.f32 %v7876_v60, %v6407_v63  ;;  %v1603_v48 = vmul.f32 %v7877_v0, %v6419_v52  ;;  %7879 = vst [vmem:[#allocation71_spill] sm:$0xff] %v6430_v47  ;;  %v3301_v60 = vld [vmem:[#allocation4 + $0x728] sm:$0xff] }
 0x202   : > { %v6397_v17 = vadd.f32 %v1715_v54, %v1256_v42  ;;  %v3298_v20 = vld [vmem:[#allocation4 + $0x710] sm:$0xff]  ;;  %v6411_v42 = vpop.f32.mrf.mxu0  ;;  %v2250_v54 = vpack.c.bf16 %v7776_v19, %v7775_v33 }
 0x203   : > { %7867 = vst [vmem:[#allocation25_spill] sm:$0xff] %v6387_v39  ;;  %v3300_v39 = vld [vmem:[#allocation4 + $0x720] sm:$0xff]  ;;  %v4786_v47 = vld [vmem:[#allocation2 + $0x190] sm:$0xff] }
 0x204   : > { %7871 = vst [vmem:[#allocation116_spill] sm:$0xff] %v6395_v35  ;;  %1304 = vmatmul.bf16.gmra.mxu1 %v769_v31  ;;  %2383 = vmatmul.bf16.gmra.mxu0 %v2250_v54  ;;  %v1622_v54 = vpack.c.bf16 %v1603_v48, %v1602_v16  ;;  %v4777_v16 = vld [vmem:[#allocation2 + $0x148] sm:$0xff] }
 0x205   : > { %3767 = vperm.xlu2 %5042, %v3725_v59   ;;  %v7885_v48 = vld [vmem:[#allocation17_spill] sm:$0xff]  ;;  %3179 = vmatpush.bf16.msra.mxu2 %v4786_v47 }
 0x206   : > { %3345 = vperm.xlu1 %5041, %v3299_v8   ;;  %3340 = vperm.xlu0 %5040, %v3298_v20   ;;  %v4778_v20 = vld [vmem:[#allocation2 + $0x150] sm:$0xff]  ;;  %v753_v0 = vmul.f32 %v7885_v48, %v6129_v9  ;;  %v3728_v9 = vld [vmem:[#allocation4 + $0x828] sm:$0xff] }
 0x207   : > { %v6423_v31 = vpop.permute.xlu2 %2611  ;;  %2752 = vmatpush.bf16.msra.mxu1 %v4778_v20 }
 0x208   : > { %v2562_v6 = vpop.permute.xlu1 %2561  ;;  %v2557_v19 = vpop.permute.xlu0 %2556 }
 0x209   : > { %v6428_v33 = vmul.f32 %v2562_v6, %v6187_v56  ;;  %v1717_v32 = vpop.f32.mrf.mxu2  ;;  %v6433_v8 = vmul.f32 %v2557_v19, %v6177_v5  ;;  %v6438_v59 = vpop.f32.mrf.mxu1  ;;  %v3726_v6 = vld [vmem:[#allocation4 + $0x818] sm:$0xff]  ;;  %v7881_v19 = vld [vmem:[#allocation24_spill] sm:$0xff] }
 0x20a   : > { %v6436_v18 = vadd.f32 %v1717_v32, %v6290_v49  ;;  %v6442_v56 = vpop.f32.mrf.mxu0  ;;  %v752_v5 = vmul.f32 %v7881_v19, %v6135_v58  ;;  %v7882_v49 = vld [vmem:[#allocation117_spill] sm:$0xff]  ;;  %v7883_v32 = vld [vmem:[#allocation118_spill] sm:$0xff]  ;;  %v3727_v58 = vld [vmem:[#allocation4 + $0x820] sm:$0xff] }
 0x20b   : > { %7878 = vst [vmem:[#allocation82_spill] sm:$0xff] %v6428_v33  ;;  %v7884_v27 = vpack.c.bf16 %v7882_v49, %v7883_v32  ;;  %v7887_v33 = vld [vmem:[#allocation84_spill] sm:$0xff]  ;;  %2753 = vmatpush.bf16.msra.mxu1 %v4777_v16  ;;  %v7889_v49 = vld [vmem:[#allocation61_spill] sm:$0xff] }
 0x20c   : > { %7880 = vst [vmem:[#allocation157_spill] sm:$0xff] %v6433_v8  ;;  %1759 = vmatmul.bf16.gmra.mxu2 %v1622_v54  ;;  %v7886_v8 = vld [vmem:[#allocation56_spill] sm:$0xff]  ;;  %v1261_v35 = vadd.f32 %v6322_v38, %v7887_v33  ;;  %v1346_v32 = vrot.slane %v7889_v49, 1  ;;  %v6466_v33 = vmul.f32 %v6303_v4, %v6261_v62 }
 0x20d   : > { %2166 = vmatmul.bf16.gmra.mxu3 %v7884_v27  ;;  %3355 = vperm.xlu2 %5042, %v3301_v60   ;;  %v1345_v20 = vrot.slane %v7886_v8, 1  ;;  %v770_v27 = vpack.c.bf16 %v753_v0, %v752_v5 }
 0x20e   : > { %3350 = vperm.xlu1 %5041, %v3300_v39   ;;  %3772 = vperm.xlu0 %5040, %v3726_v6   ;;  %v6458_v39 = vmul.f32 %v6350_v29, %v6330_v50  ;;  %v4776_v29 = vld [vmem:[#allocation2 + $0x140] sm:$0xff] }
 0x20f   : > { %v6454_v19 = vpop.permute.xlu2 %2626  ;;  %v6480_v4 = vsel %vm1352_vm1, %v1345_v20, %v1346_v32  ;;  %2754 = vmatpush.bf16.msra.mxu1 %v4776_v29 }
 0x210   : > { %v2577_v54 = vpop.permute.xlu1 %2576  ;;  %v2572_v6 = vpop.permute.xlu0 %2571  ;;  %7890 = vst [vmem:[#allocation117_spill] sm:$0xff] %v6480_v4 }
 0x211   : > { %v6461_v60 = vmul.f32 %v2577_v54, %v6344_v57  ;;  %v1720_v47 = vpop.f32.mrf.mxu2  ;;  %v6469_v38 = vmul.f32 %v2572_v6, %v6251_v25  ;;  %v2127_v5 = vpop.f32.mrf.mxu3  ;;  %v3302_v54 = vld [vmem:[#allocation4 + $0x730] sm:$0xff]  ;;  %v7891_v6 = vrot.slane %v7789_v28, 1  ;;  %v7895_v57 = vld [vmem:[#allocation88_spill] sm:$0xff] }
 0x212   : > { %v6471_v26 = vadd.f32 %v1720_v47, %v1261_v35  ;;  %v6473_v0 = vpop.f32.mrf.mxu1  ;;  %v2207_v48 = vadd.f32 %v2127_v5, %v6165_v3  ;;  %v6490_v16 = vpop.f32.mrf.mxu0  ;;  %v2251_v3 = vpack.c.bf16 %v7886_v8, %v7789_v28  ;;  %v4802_v5 = vld [vmem:[#allocation2 + $0x210] sm:$0xff] }
 0x213   : > { %7888 = vst [vmem:[#allocation24_spill] sm:$0xff] %v6461_v60  ;;  %v6486_v35 = vsel %vm1352_vm1, %v7891_v6, %v1345_v20  ;;  %v7894_v20 = vld [vmem:[#allocation87_spill] sm:$0xff]  ;;  %4033 = vmatpush.bf16.msra.mxu0 %v4802_v5  ;;  %v7897_v8 = vld [vmem:[#allocation62_spill] sm:$0xff] }
 0x214   : > { %7892 = vst [vmem:[#allocation118_spill] sm:$0xff] %v6486_v35  ;;  %1309 = vmatmul.bf16.gmra.mxu1 %v770_v27  ;;  %v6495_v50 = vadd.f32 %v6179_v37, %v2207_v48  ;;  %v1605_v6 = vmul.f32 %v7894_v20, %v6480_v4  ;;  %v1604_v47 = vmul.f32 %v7895_v57, %v6486_v35  ;;  %v7896_v27 = vld [vmem:[#allocation89_spill] sm:$0xff]  ;;  %v3730_v20 = vld [vmem:[#allocation4 + $0x838] sm:$0xff]  ;;  %v1347_v5 = vrot.slane %v7897_v8, 1 }
 0x215   : > { %3360 = vperm.xlu2 %5042, %v3302_v54   ;;  %2388 = vmatmul.bf16.gmra.mxu0 %v2251_v3  ;;  %v1263_v62 = vadd.f32 %v6362_v24, %v7896_v27  ;;  %v3729_v27 = vld [vmem:[#allocation4 + $0x830] sm:$0xff] }
 0x216   : > { %7893 = vst [vmem:[#allocation17_spill] sm:$0xff] %v6495_v50  ;;  %3782 = vperm.xlu1 %5041, %v3728_v9   ;;  %3777 = vperm.xlu0 %5040, %v3727_v58   ;;  %v1623_v3 = vpack.c.bf16 %v1605_v6, %v1604_v47  ;;  %v6534_v50 = vsel %vm1352_vm1, %v1346_v32, %v1347_v5 }
 0x217   : > { %v6503_v25 = vpop.permute.xlu2 %2908  ;;  %7905 = vst [vmem:[#allocation88_spill] sm:$0xff] %v6534_v50 }
 0x218   : > { %v2592_v28 = vpop.permute.xlu1 %2591  ;;  %v2587_v29 = vpop.permute.xlu0 %2586 }
 0x219   : > { %v6506_v37 = vmul.f32 %v2592_v28, %v6419_v52  ;;  %v1722_v9 = vpop.f32.mrf.mxu2  ;;  %v6509_v48 = vmul.f32 %v2587_v29, %v6407_v63  ;;  %v2129_v57 = vpop.f32.mrf.mxu3  ;;  %v1348_v28 = vrot.slane %v5627_v53, 1  ;;  %v3303_v52 = vld [vmem:[#allocation4 + $0x738] sm:$0xff] }
 0x21a   : > { %v6511_v54 = vadd.f32 %v1722_v9, %v1263_v62  ;;  %v6513_v58 = vpop.f32.mrf.mxu1  ;;  %v2208_v24 = vadd.f32 %v2129_v57, %v6209_v22  ;;  %v6520_v29 = vpop.f32.mrf.mxu0  ;;  %v7899_v62 = vld [vmem:[#allocation126_spill] sm:$0xff]  ;;  %v7900_v9 = vld [vmem:[#allocation127_spill] sm:$0xff] }
 0x21b   : > { %7898 = vst [vmem:[#allocation84_spill] sm:$0xff] %v6520_v29  ;;  %v7901_v63 = vpack.c.bf16 %v7899_v62, %v7900_v9  ;;  %v7903_v22 = vld [vmem:[#allocation26_spill] sm:$0xff]  ;;  %v7904_v57 = vld [vmem:[#allocation27_spill] sm:$0xff]  ;;  %v3731_v29 = vld [vmem:[#allocation4 + $0x840] sm:$0xff] }
 0x21c   : > { %1764 = vmatmul.bf16.gmra.mxu2 %v1623_v3  ;;  %v6526_v47 = vadd.f32 %v6215_v43, %v2208_v24  ;;  %v755_v6 = vmul.f32 %v7903_v22, %v6141_v34  ;;  %v754_v60 = vmul.f32 %v7904_v57, %v6145_v55  ;;  %v6538_v3 = vsel %vm1352_vm1, %v1347_v5, %v1348_v28  ;;  %v3305_v34 = vld [vmem:[#allocation4 + $0x748] sm:$0xff] }
 0x21d   : > { %2171 = vmatmul.bf16.gmra.mxu3 %v7901_v63  ;;  %3792 = vperm.xlu2 %5042, %v3730_v20   ;;  %7906 = vst [vmem:[#allocation89_spill] sm:$0xff] %v6538_v3  ;;  %v7907_v63 = vld [vmem:[#allocation94_spill] sm:$0xff]  ;;  %v6546_v9 = vmul.f32 %v6423_v31, %v6538_v3  ;;  %v6553_v5 = vmul.f32 %v6379_v14, %v6486_v35  ;;  %v7910_v35 = vld [vmem:[#allocation29_spill] sm:$0xff] }
 0x21e   : > { %7902 = vst [vmem:[#allocation87_spill] sm:$0xff] %v6526_v47  ;;  %3787 = vperm.xlu1 %5041, %v3729_v27   ;;  %3365 = vperm.xlu0 %5040, %v3303_v52   ;;  %v1266_v43 = vadd.f32 %v6399_v46, %v7907_v63  ;;  %v771_v27 = vpack.c.bf16 %v755_v6, %v754_v60  ;;  %v1349_v60 = vrot.slane %v5468_v10, 1  ;;  %v3304_v6 = vld [vmem:[#allocation4 + $0x740] sm:$0xff]  ;;  %v7911_v14 = vrot.slane %v7910_v35, 1  ;;  %v4793_v55 = vld [vmem:[#allocation2 + $0x1c8] sm:$0xff] }
 0x21f   : > { %v6542_v24 = vpop.permute.xlu2 %2923  ;;  %3607 = vmatpush.bf16.msra.mxu3 %v4793_v55 }
 0x220   : > { %v2607_v62 = vpop.permute.xlu1 %2606  ;;  %v2602_v20 = vpop.permute.xlu0 %2601 }
 0x221   : > { %v6549_v52 = vmul.f32 %v2607_v62, %v6534_v50  ;;  %v1725_v32 = vpop.f32.mrf.mxu2  ;;  %v6556_v22 = vmul.f32 %v2602_v20, %v6480_v4  ;;  %v2132_v57 = vpop.f32.mrf.mxu3  ;;  %v7913_v4 = vld [vmem:[#allocation97_spill] sm:$0xff] }
 0x222   : > { %v6558_v46 = vadd.f32 %v1725_v32, %v1266_v43  ;;  %v6560_v63 = vpop.f32.mrf.mxu1  ;;  %v2209_v62 = vadd.f32 %v2132_v57, %v6243_v41  ;;  %v6568_v20 = vpop.f32.mrf.mxu0  ;;  %v2252_v43 = vpack.c.bf16 %v7897_v8, %v7889_v49  ;;  %v4785_v41 = vld [vmem:[#allocation2 + $0x188] sm:$0xff]  ;;  %v1268_v49 = vadd.f32 %v6438_v59, %v7913_v4 }
 0x223   : > { %v7909_v57 = vld [vmem:[#allocation93_spill] sm:$0xff]  ;;  %3180 = vmatpush.bf16.msra.mxu2 %v4785_v41  ;;  %v4784_v41 = vld [vmem:[#allocation2 + $0x180] sm:$0xff] }
 0x224   : > { %1314 = vmatmul.bf16.gmra.mxu1 %v771_v27  ;;  %v6573_v32 = vadd.f32 %v6263_v13, %v2209_v62  ;;  %v1607_v31 = vmul.f32 %v7909_v57, %v6538_v3  ;;  %v6581_v27 = vsel %vm1352_vm1, %v1349_v60, %v7911_v14  ;;  %v6591_v62 = vsel %vm1352_vm1, %v1348_v28, %v1349_v60  ;;  %v3306_v28 = vld [vmem:[#allocation4 + $0x750] sm:$0xff]  ;;  %v7924_v60 = vld [vmem:[#allocation63_spill] sm:$0xff] }
 0x225   : > { %3797 = vperm.xlu2 %5042, %v3731_v29   ;;  %2393 = vmatmul.bf16.gmra.mxu0 %v2252_v43  ;;  %7912 = vst [vmem:[#allocation127_spill] sm:$0xff] %v6581_v27 }
 0x226   : > { %7908 = vst [vmem:[#allocation126_spill] sm:$0xff] %v6573_v32  ;;  %3375 = vperm.xlu1 %5041, %v3305_v34   ;;  %3370 = vperm.xlu0 %5040, %v3304_v6   ;;  %v7914_v34 = vld [vmem:[#allocation74_spill] sm:$0xff] }
 0x227   : > { %v6585_v8 = vpop.permute.xlu2 %2938  ;;  %v1606_v29 = vmul.f32 %v7914_v34, %v6534_v50  ;;  %7915 = vst [vmem:[#allocation26_spill] sm:$0xff] %v6591_v62  ;;  %3181 = vmatpush.bf16.msra.mxu2 %v4784_v41 }
 0x228   : > { %v2622_v13 = vpop.permute.xlu1 %2621  ;;  %v2617_v43 = vpop.permute.xlu0 %2616 }
 0x229   : > { %v6594_v6 = vmul.f32 %v2622_v13, %v6581_v27  ;;  %v1727_v14 = vpop.f32.mrf.mxu2  ;;  %v6597_v57 = vmul.f32 %v2617_v43, %v6591_v62  ;;  %v2134_v4 = vpop.f32.mrf.mxu3  ;;  %v1624_v32 = vpack.c.bf16 %v1607_v31, %v1606_v29  ;;  %v3732_v13 = vld [vmem:[#allocation4 + $0x848] sm:$0xff]  ;;  %v7919_v43 = vld [vmem:[#allocation134_spill] sm:$0xff] }
 0x22a   : > { %v6599_v59 = vadd.f32 %v1727_v14, %v1268_v49  ;;  %v6601_v3 = vpop.f32.mrf.mxu1  ;;  %v2210_v34 = vadd.f32 %v2134_v4, %v6285_v21  ;;  %v6606_v50 = vpop.f32.mrf.mxu0  ;;  %v7920_v49 = vld [vmem:[#allocation131_spill] sm:$0xff]  ;;  %v7923_v21 = vld [vmem:[#allocation13_spill] sm:$0xff] }
 0x22b   : > { %7916 = vst [vmem:[#allocation27_spill] sm:$0xff] %v6594_v6  ;;  %v7921_v14 = vpack.c.bf16 %v7919_v43, %v7920_v49  ;;  %v1271_v31 = vadd.f32 %v6473_v0, %v7923_v21  ;;  %v6622_v43 = vmul.f32 %v6454_v19, %v7924_v60  ;;  %v7926_v49 = vld [vmem:[#allocation64_spill] sm:$0xff]  ;;  %v7928_v21 = vpack.c.bf16 %v6241_v61, %v6229_v23  ;;  %v3733_v19 = vld [vmem:[#allocation4 + $0x850] sm:$0xff]  ;;  %v3309_v60 = vld [vmem:[#allocation4 + $0x768] sm:$0xff] }
 0x22c   : > { %7917 = vst [vmem:[#allocation94_spill] sm:$0xff] %v6597_v57  ;;  %1769 = vmatmul.bf16.gmra.mxu2 %v1624_v32  ;;  %v6612_v47 = vadd.f32 %v6294_v11, %v2210_v34 }
 0x22d   : > { %7918 = vst [vmem:[#allocation93_spill] sm:$0xff] %v6606_v50  ;;  %2176 = vmatmul.bf16.gmra.mxu3 %v7921_v14  ;;  %3385 = vperm.xlu2 %5042, %v3307_v36   ;;  %v7931_v14 = vld [vmem:[#allocation103_spill] sm:$0xff] }
 0x22e   : > { %7922 = vst [vmem:[#allocation97_spill] sm:$0xff] %v6612_v47  ;;  %3380 = vperm.xlu1 %5041, %v3306_v28   ;;  %3802 = vperm.xlu0 %5040, %v3732_v13   ;;  %v3308_v28 = vld [vmem:[#allocation4 + $0x760] sm:$0xff]  ;;  %v3734_v13 = vld [vmem:[#allocation4 + $0x858] sm:$0xff]  ;;  %v1273_v23 = vadd.f32 %v6513_v58, %v7931_v14  ;;  %v3736_v58 = vld [vmem:[#allocation4 + $0x868] sm:$0xff] }
 0x22f   : > { %v6616_v29 = vpop.permute.xlu2 %2953  ;;  %7925 = vst [vmem:[#allocation74_spill] sm:$0xff] %v6622_v43  ;;  %v3735_v14 = vld [vmem:[#allocation4 + $0x860] sm:$0xff] }
 0x230   : > { %v6618_v4 = vpop.permute.xlu1 %2903  ;;  %v2632_v32 = vpop.permute.xlu0 %2631 }
 0x231   : > { %v1730_v41 = vpop.f32.mrf.mxu2  ;;  %v6625_v11 = vmul.f32 %v2632_v32, %v7926_v49  ;;  %v2137_v36 = vpop.f32.mrf.mxu3  ;;  %v4801_v32 = vld [vmem:[#allocation2 + $0x208] sm:$0xff] }
 0x232   : > { %v6627_v34 = vadd.f32 %v1730_v41, %v1271_v31  ;;  %v6629_v55 = vpop.f32.mrf.mxu1  ;;  %v2211_v0 = vadd.f32 %v2137_v36, %v6320_v30  ;;  %v6637_v50 = vpop.f32.mrf.mxu0  ;;  %v2253_v31 = vpack.c.bf16 %v5468_v10, %v5627_v53  ;;  %v7930_v30 = vld [vmem:[#allocation92_spill] sm:$0xff]  ;;  %4034 = vmatpush.bf16.msra.mxu0 %v4801_v32  ;;  %v7932_v53 = vld [vmem:[#allocation77_spill] sm:$0xff] }
 0x233   : > { %7927 = vst [vmem:[#allocation134_spill] sm:$0xff] %v6625_v11  ;;  %v1608_v36 = vmul.f32 %v7930_v30, %v6591_v62  ;;  %v1609_v10 = vmul.f32 %v7932_v53, %v6581_v27  ;;  %v7934_v32 = vld [vmem:[#allocation132_spill] sm:$0xff]  ;;  %v7935_v62 = vld [vmem:[#allocation133_spill] sm:$0xff] }
 0x234   : > { %2755 = vmatmul.bf16.vlgmr.msra.gmra.mxu1 %v7928_v21  ;;  %v6642_v41 = vadd.f32 %v6334_v12, %v2211_v0  ;;  %v7936_v53 = vpack.c.bf16 %v7934_v32, %v7935_v62 }
 0x235   : > { %3390 = vperm.xlu2 %5042, %v3308_v28   ;;  %2398 = vmatmul.bf16.gmra.mxu0 %v2253_v31 }
 0x236   : > { %7929 = vst [vmem:[#allocation131_spill] sm:$0xff] %v6642_v41  ;;  %3812 = vperm.xlu1 %5041, %v3734_v13   ;;  %3807 = vperm.xlu0 %5040, %v3733_v19   ;;  %v1625_v19 = vpack.c.bf16 %v1609_v10, %v1608_v36 }
 0x237   : > { %v6648_v61 = vpop.permute.xlu2 %2968 }
 0x238   : > { %v6650_v21 = vpop.permute.xlu1 %2918  ;;  %v6654_v12 = vpop.permute.xlu0 %2913 }
 0x239   : > { %v1732_v0 = vpop.f32.mrf.mxu2  ;;  %v2139_v13 = vpop.f32.mrf.mxu3 }
 0x23a   : > { %v6656_v28 = vadd.f32 %v1732_v0, %v1273_v23  ;;  %v6658_v30 = vpop.f32.mrf.mxu1  ;;  %v2212_v31 = vadd.f32 %v2139_v13, %v6360_v2  ;;  %v6661_v49 = vpop.f32.mrf.mxu0  ;;  %v7938_v23 = vld [vmem:[#allocation8_spill] sm:$0xff] }
 0x23b   : > { %7933 = vst [vmem:[#allocation13_spill] sm:$0xff] %v6661_v49  ;;  %v1276_v10 = vadd.f32 %v6560_v63, %v7938_v23  ;;  %v3310_v63 = vld [vmem:[#allocation4 + $0x770] sm:$0xff] }
 0x23c   : > { %1774 = vmatmul.bf16.gmra.mxu2 %v1625_v19  ;;  %v6667_v27 = vadd.f32 %v6366_v7, %v2212_v31  ;;  %v3737_v31 = vld [vmem:[#allocation4 + $0x870] sm:$0xff] }
 0x23d   : > { %2181 = vmatmul.bf16.gmra.mxu3 %v7936_v53  ;;  %3822 = vperm.xlu2 %5042, %v3736_v58   ;;  %v3311_v58 = vld [vmem:[#allocation4 + $0x778] sm:$0xff]  ;;  %v7940_v53 = vld [vmem:[#allocation28_spill] sm:$0xff]  ;;  %v7944_v49 = vld [vmem:[#allocation66_spill] sm:$0xff] }
 0x23e   : > { %7937 = vst [vmem:[#allocation92_spill] sm:$0xff] %v6667_v27  ;;  %3817 = vperm.xlu1 %5041, %v3735_v14   ;;  %3395 = vperm.xlu0 %5040, %v3309_v60   ;;  %v7939_v60 = vpack.c.bf16 %v6235_v51, %v6238_v44  ;;  %v2254_v23 = vpack.c.bf16 %v7940_v53, %v7910_v35  ;;  %v7964_v27 = vld [vmem:[#allocation145_spill] sm:$0xff] }
 0x23f   : > { %v6671_v2 = vpop.permute.xlu2 %2983  ;;  %v3062_v35 = vmul.f32 %v6503_v25, %v7944_v49  ;;  %v4792_v25 = vld [vmem:[#allocation2 + $0x1c0] sm:$0xff] }
 0x240   : > { %v6673_v36 = vpop.permute.xlu1 %2933  ;;  %v6675_v0 = vpop.permute.xlu0 %2928  ;;  %3608 = vmatpush.bf16.msra.mxu3 %v4792_v25 }
 0x241   : > { %v1735_v13 = vpop.f32.mrf.mxu2  ;;  %v2142_v62 = vpop.f32.mrf.mxu3 }
 0x242   : > { %v6677_v19 = vadd.f32 %v1735_v13, %v1276_v10  ;;  %v6679_v32 = vpop.f32.mrf.mxu1  ;;  %v2213_v7 = vadd.f32 %v2142_v62, %v6397_v17  ;;  %v6685_v14 = vpop.f32.mrf.mxu0  ;;  %v7942_v13 = vld [vmem:[#allocation65_spill] sm:$0xff]  ;;  %v7943_v62 = vld [vmem:[#allocation112_spill] sm:$0xff] }
 0x243   : > { %v3061_v17 = vmul.f32 %v6618_v4, %v7942_v13  ;;  %v1278_v51 = vadd.f32 %v6601_v3, %v7943_v62  ;;  %v3738_v3 = vld [vmem:[#allocation4 + $0x878] sm:$0xff] }
 0x244   : > { %2760 = vmatmul.bf16.gmra.mxu1 %v7939_v60  ;;  %v6690_v10 = vadd.f32 %v6411_v42, %v2213_v7 }
 0x245   : > { %3827 = vperm.xlu2 %5042, %v3737_v31   ;;  %2403 = vmatmul.bf16.gmra.mxu0 %v2254_v23  ;;  %v3312_v23 = vld [vmem:[#allocation4 + $0x780] sm:$0xff] }
 0x246   : > { %7941 = vst [vmem:[#allocation103_spill] sm:$0xff] %v6690_v10  ;;  %3405 = vperm.xlu1 %5041, %v3311_v58   ;;  %3400 = vperm.xlu0 %5040, %v3310_v63   ;;  %v3093_v58 = vpack.c.bf16 %v3062_v35, %v3061_v17  ;;  %v3313_v63 = vld [vmem:[#allocation4 + $0x788] sm:$0xff]  ;;  %v7946_v10 = vpack.c.bf16 %v6105_v1, %v6108_v45 }
 0x247   : > { %v6696_v44 = vpop.permute.xlu2 %2998  ;;  %v7950_v1 = vld [vmem:[#allocation113_spill] sm:$0xff] }
 0x248   : > { %v6698_v60 = vpop.permute.xlu1 %2948  ;;  %v6702_v53 = vpop.permute.xlu0 %2943 }
 0x249   : > { %v1737_v42 = vpop.f32.mrf.mxu2  ;;  %v2144_v31 = vpop.f32.mrf.mxu3 }
 0x24a   : > { %v6704_v7 = vadd.f32 %v1737_v42, %v1278_v51  ;;  %v2214_v4 = vadd.f32 %v2144_v31, %v6436_v18  ;;  %v6707_v13 = vpop.f32.mrf.mxu1  ;;  %v6709_v62 = vpop.f32.mrf.mxu0  ;;  %v7948_v18 = vld [vmem:[#allocation12_spill] sm:$0xff]  ;;  %v7949_v42 = vld [vmem:[#allocation114_spill] sm:$0xff] }
 0x24b   : > { %7945 = vst [vmem:[#allocation77_spill] sm:$0xff] %v6709_v62  ;;  %v1281_v35 = vadd.f32 %v6629_v55, %v7948_v18  ;;  %v6723_v31 = vmul.f32 %v6648_v61, %v7949_v42  ;;  %v3314_v18 = vld [vmem:[#allocation4 + $0x790] sm:$0xff]  ;;  %v7957_v61 = vld [vmem:[#allocation73_spill] sm:$0xff]  ;;  %v7959_v62 = vld [vmem:[#allocation15_spill] sm:$0xff] }
 0x24c   : > { %3182 = vmatmul.bf16.vlgmr.msra.gmra.mxu2 %v3093_v58  ;;  %v6715_v49 = vadd.f32 %v6442_v56, %v2214_v4  ;;  %v6730_v58 = vmul.f32 %v6616_v29, %v7829_v15  ;;  %v7951_v4 = vld [vmem:[#allocation104_spill] sm:$0xff]  ;;  %v7953_v15 = vld [vmem:[#allocation79_spill] sm:$0xff]  ;;  %v3063_v42 = vmul.f32 %v6654_v12, %v7957_v61 }
 0x24d   : > { %2186 = vmatmul.bf16.gmra.mxu3 %v7946_v10  ;;  %3415 = vperm.xlu2 %5042, %v3313_v63   ;;  %v3742_v61 = vld [vmem:[#allocation4 + $0x898] sm:$0xff] }
 0x24e   : > { %7947 = vst [vmem:[#allocation132_spill] sm:$0xff] %v6715_v49  ;;  %3410 = vperm.xlu1 %5041, %v3312_v23   ;;  %3832 = vperm.xlu0 %5040, %v3738_v3   ;;  %v4800_v3 = vld [vmem:[#allocation2 + $0x200] sm:$0xff] }
 0x24f   : > { %v6719_v17 = vpop.permute.xlu2 %3330  ;;  %4035 = vmatpush.bf16.msra.mxu0 %v4800_v3 }
 0x250   : > { %v2964_v51 = vpop.permute.xlu1 %2963  ;;  %v2959_v10 = vpop.permute.xlu0 %2958 }
 0x251   : > { %v6726_v45 = vmul.f32 %v2964_v51, %v7950_v1  ;;  %v1740_v56 = vpop.f32.mrf.mxu2  ;;  %v6733_v63 = vmul.f32 %v2959_v10, %v7951_v4  ;;  %v2147_v23 = vpop.f32.mrf.mxu3  ;;  %v3740_v51 = vld [vmem:[#allocation4 + $0x888] sm:$0xff]  ;;  %v7952_v1 = vld [vmem:[#allocation78_spill] sm:$0xff]  ;;  %v3739_v10 = vld [vmem:[#allocation4 + $0x880] sm:$0xff] }
 0x252   : > { %v6735_v55 = vadd.f32 %v1740_v56, %v1281_v35  ;;  %v2215_v25 = vadd.f32 %v2147_v23, %v6471_v26  ;;  %v7954_v29 = vpack.c.bf16 %v7952_v1, %v7953_v15  ;;  %v6745_v4 = vpop.f32.mrf.mxu0  ;;  %v6750_v56 = vpop.f32.mrf.mxu1  ;;  %v7956_v26 = vld [vmem:[#allocation72_spill] sm:$0xff]  ;;  %v7958_v1 = vld [vmem:[#allocation102_spill] sm:$0xff] }
 0x253   : > { %v3064_v23 = vmul.f32 %v6650_v21, %v7956_v26  ;;  %v1283_v15 = vadd.f32 %v6658_v30, %v7958_v1  ;;  %v3741_v30 = vld [vmem:[#allocation4 + $0x890] sm:$0xff] }
 0x254   : > { %2765 = vmatmul.bf16.gmra.mxu1 %v7954_v29  ;;  %v6748_v35 = vadd.f32 %v6490_v16, %v2215_v25 }
 0x255   : > { %3420 = vperm.xlu2 %5042, %v3314_v18   ;;  %v7960_v18 = vld [vmem:[#allocation9_spill] sm:$0xff]  ;;  %v3094_v26 = vpack.c.bf16 %v3064_v23, %v3063_v42  ;;  %v7966_v42 = vld [vmem:[#allocation16_spill] sm:$0xff] }
 0x256   : > { %7955 = vst [vmem:[#allocation133_spill] sm:$0xff] %v6748_v35  ;;  %3842 = vperm.xlu1 %5041, %v3740_v51   ;;  %3837 = vperm.xlu0 %5040, %v3739_v10   ;;  %v3315_v10 = vld [vmem:[#allocation4 + $0x798] sm:$0xff] }
 0x257   : > { %v6761_v35 = vpop.permute.xlu2 %3762 }
 0x258   : > { %v2979_v29 = vpop.permute.xlu1 %2978  ;;  %v2974_v16 = vpop.permute.xlu0 %2973 }
 0x259   : > { %v6759_v3 = vmul.f32 %v2979_v29, %v7959_v62  ;;  %v1742_v25 = vpop.f32.mrf.mxu2  ;;  %v6764_v51 = vmul.f32 %v2974_v16, %v7960_v18  ;;  %v2149_v21 = vpop.f32.mrf.mxu3  ;;  %v7963_v29 = vld [vmem:[#allocation148_spill] sm:$0xff]  ;;  %v7967_v16 = vld [vmem:[#allocation18_spill] sm:$0xff]  ;;  %v7968_v18 = vld [vmem:[#allocation19_spill] sm:$0xff] }
 0x25a   : > { %v6766_v49 = vadd.f32 %v1742_v25, %v1283_v15  ;;  %v6769_v12 = vadd.f32 %v2149_v21, %v6511_v54  ;;  %v6773_v1 = vpop.f32.mrf.mxu0  ;;  %v7965_v41 = vpack.c.bf16 %v7963_v29, %v7964_v27  ;;  %v1286_v54 = vadd.f32 %v6679_v32, %v7966_v42  ;;  %v6780_v23 = vpop.f32.mrf.mxu1  ;;  %v3743_v42 = vld [vmem:[#allocation4 + $0x8a0] sm:$0xff] }
 0x25b   : > { %7962 = vst [vmem:[#allocation65_spill] sm:$0xff] %v6773_v1  ;;  %v6784_v25 = vmul.f32 %v6696_v44, %v7967_v16 }
 0x25c   : > { %7961 = vst [vmem:[#allocation8_spill] sm:$0xff] %v6769_v12  ;;  %3187 = vmatmul.bf16.gmra.mxu2 %v3094_v26  ;;  %v7977_v12 = vld [vmem:[#allocation81_spill] sm:$0xff] }
 0x25d   : > { %2191 = vmatmul.bf16.gmra.mxu3 %v7965_v41  ;;  %3852 = vperm.xlu2 %5042, %v3742_v61   ;;  %v7969_v41 = vld [vmem:[#allocation124_spill] sm:$0xff]  ;;  %v7970_v61 = vld [vmem:[#allocation125_spill] sm:$0xff] }
 0x25e   : > { %3847 = vperm.xlu1 %5041, %v3741_v30   ;;  %3425 = vperm.xlu0 %5040, %v3315_v10   ;;  %v6791_v26 = vmul.f32 %v6671_v2, %v7969_v41  ;;  %v7971_v2 = vld [vmem:[#allocation22_spill] sm:$0xff] }
 0x25f   : > { %v6801_v16 = vpop.permute.xlu2 %3767  ;;  %v7972_v41 = vld [vmem:[#allocation106_spill] sm:$0xff] }
 0x260   : > { %v2994_v15 = vpop.permute.xlu1 %2993  ;;  %v2989_v62 = vpop.permute.xlu0 %2988  ;;  %v7973_v1 = vpack.c.bf16 %v7971_v2, %v7972_v41  ;;  %v3065_v2 = vmul.f32 %v6542_v24, %v7977_v12  ;;  %v3744_v12 = vld [vmem:[#allocation4 + $0x8a8] sm:$0xff] }
 0x261   : > { %v6787_v21 = vmul.f32 %v2994_v15, %v7968_v18  ;;  %v1745_v27 = vpop.f32.mrf.mxu2  ;;  %v6794_v30 = vmul.f32 %v2989_v62, %v7970_v61  ;;  %v2152_v10 = vpop.f32.mrf.mxu3  ;;  %v3317_v15 = vld [vmem:[#allocation4 + $0x7a8] sm:$0xff]  ;;  %v3316_v62 = vld [vmem:[#allocation4 + $0x7a0] sm:$0xff] }
 0x262   : > { %v6796_v32 = vadd.f32 %v1745_v27, %v1286_v54  ;;  %v2217_v44 = vadd.f32 %v2152_v10, %v6558_v46  ;;  %v6811_v27 = vpop.f32.mrf.mxu0  ;;  %v7975_v46 = vld [vmem:[#allocation80_spill] sm:$0xff]  ;;  %v7976_v10 = vld [vmem:[#allocation111_spill] sm:$0xff] }
 0x263   : > { %v3066_v61 = vmul.f32 %v6675_v0, %v7975_v46  ;;  %v1288_v29 = vadd.f32 %v6707_v13, %v7976_v10  ;;  %v2892_v13 = vld [vmem:[#allocation4 + $0x6b8] sm:$0xff]  ;;  %v2891_v10 = vld [vmem:[#allocation4 + $0x6b0] sm:$0xff] }
 0x264   : > { %2770 = vmatmul.bf16.gmra.mxu1 %v7973_v1  ;;  %v6809_v54 = vadd.f32 %v6568_v20, %v2217_v44  ;;  %v7978_v1 = vld [vmem:[#allocation129_spill] sm:$0xff] }
 0x265   : > { %3857 = vperm.xlu2 %5042, %v3743_v42   ;;  %v1295_v42 = vpop.f32.mrf.mxu1 }
 0x266   : > { %7974 = vst [vmem:[#allocation112_spill] sm:$0xff] %v6809_v54  ;;  %3435 = vperm.xlu1 %5041, %v3317_v15   ;;  %3430 = vperm.xlu0 %5040, %v3316_v62   ;;  %v7979_v15 = vld [vmem:[#allocation130_spill] sm:$0xff]  ;;  %v3095_v62 = vpack.c.bf16 %v3066_v61, %v3065_v2 }
 0x268   : > { %v3009_v18 = vpop.permute.xlu1 %3008  ;;  %v3004_v20 = vpop.permute.xlu0 %3003 }
 0x269   : > { %v6820_v41 = vmul.f32 %v3009_v18, %v7978_v1  ;;  %v1747_v44 = vpop.f32.mrf.mxu2  ;;  %v6823_v54 = vmul.f32 %v3004_v20, %v7979_v15  ;;  %v2154_v0 = vpop.f32.mrf.mxu3  ;;  %v7981_v18 = vld [vmem:[#allocation146_spill] sm:$0xff]  ;;  %v7982_v1 = vld [vmem:[#allocation147_spill] sm:$0xff] }
 0x26a   : > { %v6825_v47 = vadd.f32 %v1747_v44, %v1288_v29  ;;  %v6828_v46 = vadd.f32 %v2154_v0, %v6599_v59  ;;  %v7983_v43 = vpack.c.bf16 %v7981_v18, %v7982_v1  ;;  %v6835_v20 = vpop.permute.xlu2 %3355  ;;  %v7984_v29 = vld [vmem:[#allocation120_spill] sm:$0xff]  ;;  %v6839_v2 = vpop.f32.mrf.mxu0  ;;  %v7986_v44 = vld [vmem:[#allocation75_spill] sm:$0xff] }
 0x26b   : > { %v1291_v59 = vadd.f32 %v6750_v56, %v7984_v29  ;;  %7985 = vst [vmem:[#allocation12_spill] sm:$0xff] %v6839_v2  ;;  %v3916_v15 = vmul.f32 %v6761_v35, %v7986_v44  ;;  %v7987_v0 = vld [vmem:[#allocation76_spill] sm:$0xff]  ;;  %v7988_v56 = vld [vmem:[#allocation105_spill] sm:$0xff]  ;;  %v7989_v29 = vld [vmem:[#allocation110_spill] sm:$0xff] }
 0x26c   : > { %7980 = vst [vmem:[#allocation66_spill] sm:$0xff] %v6828_v46  ;;  %3192 = vmatmul.bf16.gmra.mxu2 %v3095_v62  ;;  %v7990_v57 = vpack.c.bf16 %v7988_v56, %v7989_v29  ;;  %v3318_v2 = vld [vmem:[#allocation4 + $0x7b0] sm:$0xff]  ;;  %v7996_v56 = vld [vmem:[#allocation152_spill] sm:$0xff]  ;;  %v7997_v29 = vld [vmem:[#allocation153_spill] sm:$0xff] }
 0x26d   : > { %2196 = vmatmul.bf16.gmra.mxu3 %v7983_v43  ;;  %3018 = vperm.xlu2 %5042, %v2892_v13   ;;  %v1297_v11 = vpop.f32.mrf.mxu1 }
 0x26e   : > { %3013 = vperm.xlu1 %5041, %v2891_v10   ;;  %3862 = vperm.xlu0 %5040, %v3744_v12   ;;  %v3745_v10 = vld [vmem:[#allocation4 + $0x8b0] sm:$0xff]  ;;  %v3319_v12 = vld [vmem:[#allocation4 + $0x7b8] sm:$0xff] }
 0x270   : > { %v3758_v61 = vpop.permute.xlu1 %3757  ;;  %v3336_v46 = vpop.permute.xlu0 %3335 }
 0x271   : > { %v3915_v24 = vmul.f32 %v3758_v61, %v7987_v0  ;;  %v1750_v18 = vpop.f32.mrf.mxu2  ;;  %v2157_v62 = vpop.f32.mrf.mxu3  ;;  %v7994_v0 = vld [vmem:[#allocation91_spill] sm:$0xff] }
 0x272   : > { %v6844_v43 = vadd.f32 %v1750_v18, %v1291_v59  ;;  %v2219_v13 = vadd.f32 %v2157_v62, %v6627_v34  ;;  %v7992_v59 = vld [vmem:[#allocation90_spill] sm:$0xff]  ;;  %v6857_v44 = vpop.permute.xlu2 %3360 }
 0x273   : > { %v3947_v1 = vpack.c.bf16 %v3916_v15, %v3915_v24  ;;  %v3067_v61 = vmul.f32 %v6673_v36, %v7992_v59  ;;  %v7993_v24 = vld [vmem:[#allocation128_spill] sm:$0xff]  ;;  %v7998_v59 = vpack.c.bf16 %v7996_v56, %v7997_v29 }
 0x274   : > { %2775 = vmatmul.bf16.gmra.mxu1 %v7990_v57  ;;  %v6851_v35 = vadd.f32 %v6637_v50, %v2219_v13  ;;  %v1293_v34 = vadd.f32 %v6780_v23, %v7993_v24  ;;  %v3068_v57 = vmul.f32 %v6585_v8, %v7994_v0  ;;  %v6870_v23 = vpop.f32.mrf.mxu0  ;;  %v7999_v24 = vld [vmem:[#allocation135_spill] sm:$0xff] }
 0x275   : > { %4036 = vmatmul.bf16.vlgmr.msra.gmra.mxu0 %v3947_v1  ;;  %3867 = vperm.xlu2 %5042, %v3745_v10   ;;  %v2893_v10 = vld [vmem:[#allocation4 + $0x6c0] sm:$0xff]  ;;  %v1300_v8 = vpop.f32.mrf.mxu1 }
 0x276   : > { %7991 = vst [vmem:[#allocation114_spill] sm:$0xff] %v6851_v35  ;;  %3445 = vperm.xlu1 %5041, %v3319_v12   ;;  %3440 = vperm.xlu0 %5040, %v3318_v2   ;;  %v3096_v13 = vpack.c.bf16 %v3068_v57, %v3067_v61  ;;  %v2894_v2 = vld [vmem:[#allocation4 + $0x6c8] sm:$0xff]  ;;  %v3746_v12 = vld [vmem:[#allocation4 + $0x8b8] sm:$0xff] }
 0x277   : > { %v8000_v57 = vld [vmem:[#allocation85_spill] sm:$0xff] }
 0x278   : > { %v6859_v15 = vpop.permute.xlu1 %3345  ;;  %v6863_v18 = vpop.permute.xlu0 %3340 }
 0x279   : > { %v1752_v50 = vpop.f32.mrf.mxu2  ;;  %v2159_v1 = vpop.f32.mrf.mxu3 }
 0x27a   : > { %v6865_v62 = vadd.f32 %v1752_v50, %v1293_v34  ;;  %v6868_v36 = vadd.f32 %v2159_v1, %v6656_v28  ;;  %v1296_v34 = vadd.f32 %v1295_v42, %v7999_v24  ;;  %v3917_v50 = vmul.f32 %v6801_v16, %v8000_v57  ;;  %v6880_v1 = vpop.permute.xlu2 %3792  ;;  %v8002_v42 = vld [vmem:[#allocation83_spill] sm:$0xff]  ;;  %v3320_v24 = vld [vmem:[#allocation4 + $0x7c0] sm:$0xff] }
 0x27b   : > { %v8003_v29 = vpack.c.bf16 %v6355_v40, %v8002_v42  ;;  %v8008_v40 = vld [vmem:[#allocation141_spill] sm:$0xff]  ;;  %v8009_v42 = vld [vmem:[#allocation36_spill] sm:$0xff] }
 0x27c   : > { %7995 = vst [vmem:[#allocation113_spill] sm:$0xff] %v6868_v36  ;;  %3197 = vmatmul.bf16.gmra.mxu2 %v3096_v13  ;;  %v8001_v36 = vld [vmem:[#allocation86_spill] sm:$0xff]  ;;  %v6889_v6 = vpop.f32.mrf.mxu0  ;;  %v1298_v57 = vadd.f32 %v1297_v11, %v8008_v40  ;;  %v3748_v11 = vld [vmem:[#allocation4 + $0x8c8] sm:$0xff] }
 0x27d   : > { %2201 = vmatmul.bf16.gmra.mxu3 %v7998_v59  ;;  %3028 = vperm.xlu2 %5042, %v2894_v2   ;;  %v3321_v59 = vld [vmem:[#allocation4 + $0x7c8] sm:$0xff]  ;;  %8004 = vst [vmem:[#allocation104_spill] sm:$0xff] %v6889_v6  ;;  %v3323_v6 = vld [vmem:[#allocation4 + $0x7d8] sm:$0xff] }
 0x27e   : > { %3023 = vperm.xlu1 %5041, %v2893_v10   ;;  %3872 = vperm.xlu0 %5040, %v3746_v12   ;;  %v3747_v10 = vld [vmem:[#allocation4 + $0x8c0] sm:$0xff] }
 0x280   : > { %v6876_v61 = vpop.permute.xlu1 %3350  ;;  %v3773_v28 = vpop.permute.xlu0 %3772 }
 0x281   : > { %v1755_v0 = vpop.f32.mrf.mxu2  ;;  %v3918_v35 = vmul.f32 %v3773_v28, %v8001_v36  ;;  %v2162_v13 = vpop.f32.mrf.mxu3  ;;  %v8005_v36 = vld [vmem:[#allocation98_spill] sm:$0xff]  ;;  %v8006_v28 = vld [vmem:[#allocation99_spill] sm:$0xff] }
 0x282   : > { %v6883_v56 = vadd.f32 %v1755_v0, %v1296_v34  ;;  %v2221_v2 = vadd.f32 %v2162_v13, %v6677_v19  ;;  %v3070_v34 = vmul.f32 %v6698_v60, %v8005_v36  ;;  %v3069_v19 = vmul.f32 %v6702_v53, %v8006_v28  ;;  %v8010_v28 = vld [vmem:[#allocation136_spill] sm:$0xff] }
 0x283   : > { %v3948_v12 = vpack.c.bf16 %v3918_v35, %v3917_v50  ;;  %v8007_v35 = vld [vmem:[#allocation37_spill] sm:$0xff]  ;;  %v1302_v50 = vpop.f32.mrf.mxu1 }
 0x284   : > { %2780 = vmatmul.bf16.gmra.mxu1 %v8003_v29  ;;  %v6892_v16 = vadd.f32 %v6685_v14, %v2221_v2  ;;  %v3489_v0 = vmul.f32 %v3336_v46, %v8007_v35  ;;  %v3488_v14 = vmul.f32 %v6719_v17, %v8009_v42  ;;  %v3097_v29 = vpack.c.bf16 %v3070_v34, %v3069_v19  ;;  %v2896_v46 = vld [vmem:[#allocation4 + $0x6d8] sm:$0xff]  ;;  %v6909_v17 = vpop.f32.mrf.mxu0 }
 0x285   : > { %4041 = vmatmul.bf16.gmra.mxu0 %v3948_v12  ;;  %3877 = vperm.xlu2 %5042, %v3747_v10   ;;  %v1301_v35 = vadd.f32 %v1300_v8, %v8010_v28  ;;  %v8011_v34 = vld [vmem:[#allocation95_spill] sm:$0xff]  ;;  %v3322_v8 = vld [vmem:[#allocation4 + $0x7d0] sm:$0xff] }
 0x286   : > { %3455 = vperm.xlu1 %5041, %v3321_v59   ;;  %3450 = vperm.xlu0 %5040, %v3320_v24   ;;  %v3520_v60 = vpack.c.bf16 %v3489_v0, %v3488_v14  ;;  %v6907_v59 = vpop.permute.xlu2 %3797  ;;  %v2895_v24 = vld [vmem:[#allocation4 + $0x6d0] sm:$0xff]  ;;  %v8012_v0 = vld [vmem:[#allocation96_spill] sm:$0xff] }
 0x288   : > { %v3783_v13 = vpop.permute.xlu1 %3782  ;;  %v3778_v36 = vpop.permute.xlu0 %3777 }
 0x289   : > { %v1757_v2 = vpop.f32.mrf.mxu2  ;;  %v2164_v10 = vpop.f32.mrf.mxu3  ;;  %v3920_v19 = vmul.f32 %v3783_v13, %v8011_v34  ;;  %v3919_v40 = vmul.f32 %v3778_v36, %v8012_v0  ;;  %v8017_v34 = vld [vmem:[#allocation43_spill] sm:$0xff]  ;;  %v8018_v0 = vld [vmem:[#allocation142_spill] sm:$0xff] }
 0x28a   : > { %v6902_v12 = vadd.f32 %v1757_v2, %v1298_v57  ;;  %v6905_v53 = vadd.f32 %v2164_v10, %v6704_v7 }
 0x28b   : > { %v1305_v42 = vpop.f32.mrf.mxu1 }
 0x28c   : > { %3202 = vmatmul.bf16.gmra.mxu2 %v3097_v29  ;;  %v3749_v29 = vld [vmem:[#allocation4 + $0x8d0] sm:$0xff] }
 0x28d   : > { %3609 = vmatmul.bf16.vlgmr.msra.gmra.mxu3 %v3520_v60  ;;  %3038 = vperm.xlu2 %5042, %v2896_v46   ;;  %v3949_v60 = vpack.c.bf16 %v3920_v19, %v3919_v40  ;;  %v8013_v46 = vld [vmem:[#allocation116_spill] sm:$0xff]  ;;  %v3490_v19 = vmul.f32 %v6863_v18, %v8017_v34  ;;  %v1303_v40 = vadd.f32 %v1302_v50, %v8018_v0  ;;  %v3750_v18 = vld [vmem:[#allocation4 + $0x8d8] sm:$0xff] }
 0x28e   : > { %3033 = vperm.xlu1 %5041, %v2895_v24   ;;  %3882 = vperm.xlu0 %5040, %v3748_v11   ;;  %v8014_v24 = vld [vmem:[#allocation119_spill] sm:$0xff]  ;;  %v6925_v36 = vpop.permute.xlu2 %3385 }
 0x28f   : > { %v8015_v11 = vpack.c.bf16 %v8013_v46, %v8014_v24  ;;  %v6934_v46 = vpop.f32.mrf.mxu0 }
 0x290   : > { %v3788_v7 = vpop.permute.xlu1 %3787  ;;  %v6920_v28 = vpop.permute.xlu0 %3365  ;;  %8019 = vst [vmem:[#allocation78_spill] sm:$0xff] %v6934_v46 }
 0x291   : > { %v1760_v57 = vpop.f32.mrf.mxu2  ;;  %v2167_v2 = vpop.f32.mrf.mxu3 }
 0x292   : > { %v6914_v14 = vadd.f32 %v1760_v57, %v1301_v35  ;;  %v2223_v10 = vadd.f32 %v2167_v2, %v6735_v55  ;;  %v8016_v35 = vld [vmem:[#allocation41_spill] sm:$0xff] }
 0x293   : > { %v3491_v55 = vmul.f32 %v6859_v15, %v8016_v35  ;;  %v2898_v15 = vld [vmem:[#allocation4 + $0x6e8] sm:$0xff]  ;;  %v1307_v24 = vpop.f32.mrf.mxu1 }
 0x294   : > { %2785 = vmatmul.bf16.gmra.mxu1 %v8015_v11  ;;  %v6923_v13 = vadd.f32 %v6745_v4, %v2223_v10  ;;  %v2897_v11 = vld [vmem:[#allocation4 + $0x6e0] sm:$0xff] }
 0x295   : > { %4046 = vmatmul.bf16.gmra.mxu0 %v3949_v60  ;;  %3887 = vperm.xlu2 %5042, %v3749_v29   ;;  %v3521_v60 = vpack.c.bf16 %v3491_v55, %v3490_v19 }
 0x296   : > { %3465 = vperm.xlu1 %5041, %v3323_v6   ;;  %3460 = vperm.xlu0 %5040, %v3322_v8   ;;  %v8020_v6 = vpack.c.bf16 %v6733_v63, %v6730_v58  ;;  %v8021_v8 = vld [vmem:[#allocation151_spill] sm:$0xff]  ;;  %v6947_v55 = vpop.permute.xlu2 %3390 }
 0x297   : > { %v1306_v35 = vadd.f32 %v1305_v42, %v8021_v8  ;;  %v8024_v42 = vld [vmem:[#allocation68_spill] sm:$0xff] }
 0x298   : > { %v6932_v57 = vpop.permute.xlu1 %3375  ;;  %v6944_v50 = vpop.permute.xlu0 %3370  ;;  %v3324_v8 = vld [vmem:[#allocation4 + $0x7e0] sm:$0xff] }
 0x299   : > { %v1762_v2 = vpop.f32.mrf.mxu2  ;;  %v2169_v10 = vpop.f32.mrf.mxu3 }
 0x29a   : > { %v6936_v4 = vadd.f32 %v1762_v2, %v1303_v40  ;;  %v6939_v29 = vadd.f32 %v2169_v10, %v6766_v49  ;;  %v8022_v49 = vld [vmem:[#allocation101_spill] sm:$0xff]  ;;  %v8023_v40 = vld [vmem:[#allocation100_spill] sm:$0xff] }
 0x29b   : > { %v3921_v34 = vmul.f32 %v3788_v7, %v8022_v49  ;;  %v3922_v2 = vmul.f32 %v6880_v1, %v8023_v40  ;;  %v3325_v7 = vld [vmem:[#allocation4 + $0x7e8] sm:$0xff]  ;;  %v1310_v46 = vpop.f32.mrf.mxu1  ;;  %v8027_v1 = vld [vmem:[#allocation31_spill] sm:$0xff]  ;;  %v8029_v40 = vld [vmem:[#allocation32_spill] sm:$0xff] }
 0x29c   : > { %3207 = vmatmul.bf16.gmra.mxu2 %v8020_v6 }
 0x29d   : > { %3614 = vmatmul.bf16.gmra.mxu3 %v3521_v60  ;;  %3048 = vperm.xlu2 %5042, %v2898_v15   ;;  %v3751_v60 = vld [vmem:[#allocation4 + $0x8e0] sm:$0xff]  ;;  %v6957_v15 = vpop.f32.mrf.mxu0 }
 0x29e   : > { %3043 = vperm.xlu1 %5041, %v2897_v11   ;;  %3892 = vperm.xlu0 %5040, %v3750_v18   ;;  %v3950_v11 = vpack.c.bf16 %v3922_v2, %v3921_v34  ;;  %v8025_v18 = vld [vmem:[#allocation25_spill] sm:$0xff]  ;;  %v3493_v2 = vmul.f32 %v6835_v20, %v8029_v40 }
 0x29f   : > { %v8026_v6 = vpack.c.bf16 %v8024_v42, %v8025_v18  ;;  %v6970_v18 = vpop.permute.xlu2 %3822 }
 0x2a0   : > { %v6950_v19 = vpop.permute.xlu1 %3380 }
 0x2a1   : > { %v1765_v0 = vpop.f32.mrf.mxu2  ;;  %v2172_v63 = vpop.f32.mrf.mxu3 }
 0x2a2   : > { %v6954_v58 = vadd.f32 %v1765_v0, %v1306_v35  ;;  %v2225_v10 = vadd.f32 %v2172_v63, %v6796_v32  ;;  %v3492_v35 = vmul.f32 %v6876_v61, %v8027_v1  ;;  %v8028_v32 = vld [vmem:[#allocation20_spill] sm:$0xff]  ;;  %v3803_v63 = vpop.permute.xlu0 %3802  ;;  %v2900_v61 = vld [vmem:[#allocation4 + $0x6f8] sm:$0xff] }
 0x2a3   : > { %v1308_v0 = vadd.f32 %v1307_v24, %v8028_v32  ;;  %v8030_v24 = vpack.c.bf16 %v6723_v31, %v6726_v45  ;;  %v1312_v32 = vpop.f32.mrf.mxu1 }
 0x2a4   : > { %2790 = vmatmul.bf16.gmra.mxu1 %v8026_v6  ;;  %v6963_v49 = vadd.f32 %v6811_v27, %v2225_v10  ;;  %v2899_v6 = vld [vmem:[#allocation4 + $0x6f0] sm:$0xff] }
 0x2a5   : > { %4051 = vmatmul.bf16.gmra.mxu0 %v3950_v11  ;;  %3897 = vperm.xlu2 %5042, %v3751_v60   ;;  %v3522_v11 = vpack.c.bf16 %v3493_v2, %v3492_v35  ;;  %v6980_v20 = vpop.f32.mrf.mxu0  ;;  %v8033_v35 = vld [vmem:[#allocation108_spill] sm:$0xff]  ;;  %v8034_v2 = vld [vmem:[#allocation107_spill] sm:$0xff] }
 0x2a6   : > { %3475 = vperm.xlu1 %5041, %v3325_v7   ;;  %3470 = vperm.xlu0 %5040, %v3324_v8   ;;  %v3752_v7 = vld [vmem:[#allocation4 + $0x8e8] sm:$0xff]  ;;  %8031 = vst [vmem:[#allocation79_spill] sm:$0xff] %v6980_v20 }
 0x2a7   : > { %v8032_v8 = vld [vmem:[#allocation109_spill] sm:$0xff] }
 0x2a8   : > { %v3813_v34 = vpop.permute.xlu1 %3812  ;;  %v1311_v1 = vadd.f32 %v1310_v46, %v8032_v8  ;;  %v8035_v46 = vld [vmem:[#allocation82_spill] sm:$0xff] }
 0x2a9   : > { %v1767_v42 = vpop.f32.mrf.mxu2  ;;  %v2174_v10 = vpop.f32.mrf.mxu3 }
 0x2aa   : > { %v6972_v27 = vadd.f32 %v1767_v42, %v1308_v0  ;;  %v6975_v60 = vadd.f32 %v2174_v10, %v6825_v47  ;;  %v3924_v0 = vmul.f32 %v3803_v63, %v8033_v35  ;;  %v3923_v42 = vmul.f32 %v6907_v59, %v8034_v2  ;;  %v3808_v45 = vpop.permute.xlu0 %3807  ;;  %v3327_v63 = vld [vmem:[#allocation4 + $0x7f8] sm:$0xff]  ;;  %v3326_v35 = vld [vmem:[#allocation4 + $0x7f0] sm:$0xff] }
 0x2ab   : > { %v8038_v59 = vld [vmem:[#allocation35_spill] sm:$0xff] }
 0x2ac   : > { %3212 = vmatmul.bf16.gmra.mxu2 %v8030_v24  ;;  %v8036_v24 = vld [vmem:[#allocation157_spill] sm:$0xff] }
 0x2ad   : > { %3619 = vmatmul.bf16.gmra.mxu3 %v3522_v11  ;;  %3058 = vperm.xlu2 %5042, %v2900_v61   ;;  %v3753_v61 = vld [vmem:[#allocation4 + $0x8f0] sm:$0xff]  ;;  %v8037_v8 = vpack.c.bf16 %v8035_v46, %v8036_v24  ;;  %v1315_v24 = vpop.f32.mrf.mxu1 }
 0x2ae   : > { %3053 = vperm.xlu1 %5041, %v2899_v6   ;;  %3902 = vperm.xlu0 %5040, %v3752_v7   ;;  %v6991_v6 = vpop.permute.xlu2 %3827  ;;  %v3951_v7 = vpack.c.bf16 %v3924_v0, %v3923_v42  ;;  %v8040_v42 = vld [vmem:[#allocation34_spill] sm:$0xff] }
 0x2b0   : > { %v6984_v47 = vpop.permute.xlu1 %3817 }
 0x2b1   : > { %v1770_v40 = vpop.f32.mrf.mxu2  ;;  %v2177_v31 = vpop.f32.mrf.mxu3 }
 0x2b2   : > { %v6988_v10 = vadd.f32 %v1770_v40, %v1311_v1  ;;  %v2227_v11 = vadd.f32 %v2177_v31, %v6844_v43  ;;  %v3495_v1 = vmul.f32 %v6920_v28, %v8038_v59  ;;  %v7001_v43 = vpop.f32.mrf.mxu0  ;;  %v8039_v40 = vld [vmem:[#allocation115_spill] sm:$0xff]  ;;  %v3494_v31 = vmul.f32 %v6857_v44, %v8040_v42  ;;  %v8043_v59 = vld [vmem:[#allocation121_spill] sm:$0xff] }
 0x2b3   : > { %v1313_v0 = vadd.f32 %v1312_v32, %v8039_v40  ;;  %v3754_v28 = vld [vmem:[#allocation4 + $0x8f8] sm:$0xff]  ;;  %v8041_v32 = vpack.c.bf16 %v6759_v3, %v6764_v51  ;;  %v3926_v40 = vmul.f32 %v3813_v34, %v8043_v59 }
 0x2b4   : > { %2795 = vmatmul.bf16.gmra.mxu1 %v8037_v8  ;;  %v6997_v20 = vadd.f32 %v6870_v23, %v2227_v11  ;;  %v7013_v8 = vpop.permute.xlu0 %3395  ;;  %v8042_v44 = vld [vmem:[#allocation123_spill] sm:$0xff] }
 0x2b5   : > { %4056 = vmatmul.bf16.gmra.mxu0 %v3951_v7  ;;  %3907 = vperm.xlu2 %5042, %v3753_v61   ;;  %v3523_v61 = vpack.c.bf16 %v3495_v1, %v3494_v31  ;;  %v8049_v59 = vld [vmem:[#allocation71_spill] sm:$0xff] }
 0x2b6   : > { %3485 = vperm.xlu1 %5041, %v3327_v63   ;;  %3480 = vperm.xlu0 %5040, %v3326_v35   ;;  %v7018_v63 = vpop.permute.xlu2 %3415  ;;  %v1316_v35 = vadd.f32 %v1315_v24, %v8042_v44 }
 0x2b8   : > { %v7004_v2 = vpop.permute.xlu1 %3405 }
 0x2b9   : > { %v1772_v46 = vpop.f32.mrf.mxu2  ;;  %v2179_v11 = vpop.f32.mrf.mxu3 }
 0x2ba   : > { %v7008_v23 = vadd.f32 %v1772_v46, %v1313_v0  ;;  %v7011_v7 = vadd.f32 %v2179_v11, %v6865_v62  ;;  %v8044_v0 = vld [vmem:[#allocation122_spill] sm:$0xff]  ;;  %v7025_v31 = vpop.f32.mrf.mxu0 }
 0x2bb   : > { %v3925_v1 = vmul.f32 %v3808_v45, %v8044_v0  ;;  %8045 = vst [vmem:[#allocation72_spill] sm:$0xff] %v7025_v31  ;;  %v8047_v45 = vld [vmem:[#allocation40_spill] sm:$0xff] }
 0x2bc   : > { %3217 = vmatmul.bf16.gmra.mxu2 %v8041_v32  ;;  %v3497_v24 = vmul.f32 %v6932_v57, %v8047_v45  ;;  %v8048_v32 = vld [vmem:[#allocation42_spill] sm:$0xff]  ;;  %v8050_v57 = vpack.c.bf16 %v6794_v30, %v6791_v26 }
 0x2bd   : > { %3624 = vmatmul.bf16.gmra.mxu3 %v3523_v61  ;;  %v3952_v51 = vpack.c.bf16 %v3926_v40, %v3925_v1  ;;  %v1317_v61 = vpop.f32.mrf.mxu1  ;;  %v3496_v44 = vmul.f32 %v6944_v50, %v8048_v32 }
 0x2be   : > { %3912 = vperm.xlu0 %5040, %v3754_v28   ;;  %v8046_v28 = vpack.c.bf16 %v6469_v38, %v6466_v33  ;;  %v7043_v40 = vpop.permute.xlu2 %3420 }
 0x2c0   : > { %v7023_v42 = vpop.permute.xlu1 %3410 }
 0x2c1   : > { %v1775_v62 = vpop.f32.mrf.mxu2  ;;  %v2182_v11 = vpop.f32.mrf.mxu3 }
 0x2c2   : > { %v7027_v46 = vadd.f32 %v1775_v62, %v1316_v35  ;;  %v2229_v3 = vadd.f32 %v2182_v11, %v6883_v56  ;;  %v7040_v35 = vpop.permute.xlu0 %3400  ;;  %v1318_v56 = vadd.f32 %v1317_v61, %v8049_v59  ;;  %v7050_v11 = vpop.f32.mrf.mxu0  ;;  %v8053_v59 = vld [vmem:[#allocation24_spill] sm:$0xff] }
 0x2c4   : > { %2800 = vmatmul.bf16.gmra.mxu1 %v8046_v28  ;;  %v7034_v34 = vadd.f32 %v6909_v17, %v2229_v3  ;;  %v3524_v17 = vpack.c.bf16 %v3497_v24, %v3496_v44  ;;  %v8051_v3 = vld [vmem:[#allocation138_spill] sm:$0xff]  ;;  %v8052_v24 = vld [vmem:[#allocation137_spill] sm:$0xff] }
 0x2c5   : > { %4061 = vmatmul.bf16.gmra.mxu0 %v3952_v51  ;;  %v7055_v50 = vpop.f32.mrf.mxu1  ;;  %v3927_v51 = vmul.f32 %v6984_v47, %v8051_v3 }
 0x2c6   : > { %v7065_v32 = vpop.permute.xlu2 %3852 }
 0x2c8   : > { %v3843_v0 = vpop.permute.xlu1 %3842 }
 0x2c9   : > { %v1777_v1 = vpop.f32.mrf.mxu2  ;;  %v2184_v38 = vpop.f32.mrf.mxu3 }
 0x2ca   : > { %v7045_v33 = vadd.f32 %v1777_v1, %v1318_v56  ;;  %v7048_v62 = vadd.f32 %v2184_v38, %v6902_v12  ;;  %v3833_v28 = vpop.permute.xlu0 %3832  ;;  %v3928_v12 = vmul.f32 %v6970_v18, %v8052_v24  ;;  %v8054_v56 = vpack.c.bf16 %v6458_v39, %v8053_v59  ;;  %v7071_v1 = vpop.f32.mrf.mxu0  ;;  %v8056_v38 = vld [vmem:[#allocation46_spill] sm:$0xff]  ;;  %v8060_v59 = vld [vmem:[#allocation149_spill] sm:$0xff] }
 0x2cb   : > { %8055 = vst [vmem:[#allocation73_spill] sm:$0xff] %v7071_v1 }
 0x2cc   : > { %3222 = vmatmul.bf16.gmra.mxu2 %v8050_v57  ;;  %v3953_v30 = vpack.c.bf16 %v3928_v12, %v3927_v51  ;;  %v8057_v57 = vld [vmem:[#allocation47_spill] sm:$0xff] }
 0x2cd   : > { %3629 = vmatmul.bf16.gmra.mxu3 %v3524_v17  ;;  %v3498_v17 = vmul.f32 %v6950_v19, %v8056_v38  ;;  %v7078_v18 = vpop.f32.mrf.mxu1  ;;  %v3499_v3 = vmul.f32 %v6925_v36, %v8057_v57  ;;  %v8058_v19 = vpack.c.bf16 %v6784_v25, %v6787_v21  ;;  %v8059_v36 = vld [vmem:[#allocation150_spill] sm:$0xff]  ;;  %v8061_v25 = vpack.c.bf16 %v6506_v37, %v6509_v48 }
 0x2cf   : > { %v3525_v39 = vpack.c.bf16 %v3499_v3, %v3498_v17 }
 0x2d0   : > { %v7059_v61 = vpop.permute.xlu1 %3847 }
 0x2d1   : > { %v7061_v45 = vpop.f32.mrf.mxu2  ;;  %v2187_v44 = vpop.f32.mrf.mxu3 }
 0x2d2   : > { %v2231_v26 = vadd.f32 %v2187_v44, %v6914_v14  ;;  %v3838_v12 = vpop.permute.xlu0 %3837 }
 0x2d4   : > { %2805 = vmatmul.bf16.gmra.mxu1 %v8054_v56  ;;  %v7074_v47 = vadd.f32 %v6957_v15, %v2231_v26  ;;  %v7089_v15 = vpop.permute.xlu2 %3857  ;;  %v7094_v26 = vpop.f32.mrf.mxu0  ;;  %v3929_v56 = vmul.f32 %v6991_v6, %v8060_v59  ;;  %v8062_v6 = vld [vmem:[#allocation38_spill] sm:$0xff] }
 0x2d5   : > { %4066 = vmatmul.bf16.gmra.mxu0 %v3953_v30  ;;  %v3930_v30 = vmul.f32 %v3833_v28, %v8059_v36  ;;  %v7099_v38 = vpop.f32.mrf.mxu1  ;;  %v8063_v36 = vld [vmem:[#allocation39_spill] sm:$0xff] }
 0x2d7   : > { %v3954_v3 = vpack.c.bf16 %v3930_v30, %v3929_v56 }
 0x2d8   : > { %v7082_v14 = vpop.permute.xlu1 %3435 }
 0x2d9   : > { %v2189_v51 = vpop.f32.mrf.mxu3  ;;  %v7084_v24 = vpop.f32.mrf.mxu2 }
 0x2da   : > { %v7087_v44 = vadd.f32 %v2189_v51, %v6936_v4  ;;  %v7107_v21 = vpop.permute.xlu0 %3425 }
 0x2dc   : > { %3227 = vmatmul.bf16.gmra.mxu2 %v8058_v19  ;;  %v3501_v19 = vmul.f32 %v7013_v8, %v8062_v6  ;;  %v7116_v30 = vpop.f32.mrf.mxu0 }
 0x2dd   : > { %3634 = vmatmul.bf16.gmra.mxu3 %v3525_v39  ;;  %v3019_v39 = vpop.permute.xlu2 %3018  ;;  %v7121_v48 = vpop.f32.mrf.mxu1 }
 0x2e0   : > { %v3014_v57 = vpop.permute.xlu1 %3013 }
 0x2e1   : > { %v2192_v17 = vpop.f32.mrf.mxu3  ;;  %v7102_v51 = vpop.f32.mrf.mxu2 }
 0x2e2   : > { %v2233_v4 = vadd.f32 %v2192_v17, %v6954_v58  ;;  %v3500_v58 = vmul.f32 %v6947_v55, %v8063_v36  ;;  %v8065_v55 = vld [vmem:[#allocation11_spill] sm:$0xff] }
 0x2e4   : > { %2810 = vmatmul.bf16.gmra.mxu1 %v8061_v25  ;;  %v7110_v28 = vadd.f32 %v7001_v43, %v2233_v4  ;;  %v3526_v56 = vpack.c.bf16 %v3501_v19, %v3500_v58  ;;  %v8064_v43 = vpack.c.bf16 %v6820_v41, %v6823_v54  ;;  %v7130_v4 = vpop.permute.xlu0 %3430  ;;  %v8066_v25 = vld [vmem:[#allocation154_spill] sm:$0xff]  ;;  %v8067_v54 = vpack.c.bf16 %v6556_v22, %v6553_v5 }
 0x2e5   : > { %4071 = vmatmul.bf16.gmra.mxu0 %v3954_v3  ;;  %v3932_v3 = vmul.f32 %v3843_v0, %v8065_v55  ;;  %v3931_v6 = vmul.f32 %v3838_v12, %v8066_v25  ;;  %v7134_v19 = vpop.permute.xlu2 %3867  ;;  %v8069_v0 = vld [vmem:[#allocation44_spill] sm:$0xff] }
 0x2e6   : > { %v3503_v12 = vmul.f32 %v7004_v2, %v8069_v0  ;;  %v8074_v2 = vld [vmem:[#allocation155_spill] sm:$0xff] }
 0x2e8   : > { %v7123_v17 = vpop.permute.xlu1 %3445 }
 0x2e9   : > { %v2194_v59 = vpop.f32.mrf.mxu3  ;;  %v7128_v8 = vpop.f32.mrf.mxu2 }
 0x2ea   : > { %v7119_v37 = vadd.f32 %v2194_v59, %v6972_v27  ;;  %v3955_v59 = vpack.c.bf16 %v3932_v3, %v3931_v6  ;;  %v8072_v6 = vld [vmem:[#allocation140_spill] sm:$0xff] }
 0x2eb   : > { %v3084_v5 = vmul.f32 %v3019_v39, %v8072_v6 }
 0x2ec   : > { %3232 = vmatmul.bf16.gmra.mxu2 %v8064_v43  ;;  %v8070_v43 = vld [vmem:[#allocation45_spill] sm:$0xff]  ;;  %v3863_v22 = vpop.permute.xlu0 %3862 }
 0x2ed   : > { %3639 = vmatmul.bf16.gmra.mxu3 %v3526_v56  ;;  %v7145_v56 = vpop.f32.mrf.mxu1  ;;  %v3502_v55 = vmul.f32 %v7040_v35, %v8070_v43  ;;  %v3933_v35 = vmul.f32 %v7059_v61, %v8074_v2  ;;  %v8075_v43 = vld [vmem:[#allocation23_spill] sm:$0xff]  ;;  %v8076_v61 = vpack.c.bf16 %v6546_v9, %v6549_v52 }
 0x2ee   : > { %v3934_v39 = vmul.f32 %v7065_v32, %v8075_v43  ;;  %v8078_v32 = vld [vmem:[#allocation51_spill] sm:$0xff]  ;;  %v8080_v43 = vld [vmem:[#allocation52_spill] sm:$0xff] }
 0x2f1   : > { %v2197_v27 = vpop.f32.mrf.mxu3  ;;  %v7152_v3 = vpop.f32.mrf.mxu2 }
 0x2f2   : > { %v2235_v36 = vadd.f32 %v2197_v27, %v6988_v10  ;;  %v7137_v58 = vpop.f32.mrf.mxu0  ;;  %v8071_v10 = vld [vmem:[#allocation139_spill] sm:$0xff]  ;;  %v3024_v27 = vpop.permute.xlu1 %3023 }
 0x2f3   : > { %v3083_v25 = vmul.f32 %v3014_v57, %v8071_v10 }
 0x2f4   : > { %2815 = vmatmul.bf16.gmra.mxu1 %v8067_v54  ;;  %v7143_v41 = vadd.f32 %v7050_v11, %v2235_v36  ;;  %v3029_v54 = vpop.permute.xlu2 %3028  ;;  %v3527_v36 = vpack.c.bf16 %v3503_v12, %v3502_v55  ;;  %v7168_v55 = vpop.permute.xlu0 %3440 }
 0x2f5   : > { %4076 = vmatmul.bf16.gmra.mxu0 %v3955_v59  ;;  %v3104_v1 = vpack.c.bf16 %v3084_v5, %v3083_v25  ;;  %v7160_v57 = vpop.f32.mrf.mxu1 }
 0x2f6   : > { %8068 = vst [vmem:[#allocation102_spill] sm:$0xff] %v7143_v41 }
 0x2f9   : > { %v2199_v11 = vpop.f32.mrf.mxu3  ;;  %v7166_v10 = vpop.f32.mrf.mxu2 }
 0x2fa   : > { %v7156_v59 = vadd.f32 %v2199_v11, %v7008_v23  ;;  %v4039_v41 = vpop.f32.mrf.mxu0  ;;  %v7162_v0 = vpop.permute.xlu1 %3455  ;;  %v3504_v11 = vmul.f32 %v7023_v42, %v8078_v32  ;;  %v8084_v32 = vld [vmem:[#allocation14_spill] sm:$0xff] }
 0x2fc   : > { %8073 = vst [vmem:[#allocation15_spill] sm:$0xff] %v7156_v59  ;;  %3237 = vmatmul.bf16.gmra.mxu2 %v3104_v1  ;;  %v3956_v1 = vpack.c.bf16 %v3934_v39, %v3933_v35  ;;  %v7173_v6 = vpop.permute.xlu2 %3877  ;;  %v3873_v42 = vpop.permute.xlu0 %3872 }
 0x2fd   : > { %3644 = vmatmul.bf16.gmra.mxu3 %v3527_v36  ;;  %v8079_v36 = vld [vmem:[#allocation10_spill] sm:$0xff]  ;;  %v7187_v39 = vpop.f32.mrf.mxu1 }
 0x2fe   : > { %v3085_v2 = vmul.f32 %v3024_v27, %v8079_v36 }
 0x301   : > { %v2202_v12 = vpop.f32.mrf.mxu3 }
 0x302   : > { %v2237_v23 = vadd.f32 %v2202_v12, %v7027_v46  ;;  %v7171_v25 = vpop.f32.mrf.mxu0  ;;  %v3505_v46 = vmul.f32 %v7018_v63, %v8080_v43  ;;  %v8081_v12 = vld [vmem:[#allocation21_spill] sm:$0xff]  ;;  %v3034_v52 = vpop.permute.xlu1 %3033 }
 0x303   : > { %v3086_v35 = vmul.f32 %v3029_v54, %v8081_v12  ;;  %v8083_v54 = vld [vmem:[#allocation156_spill] sm:$0xff]  ;;  %v8086_v12 = vld [vmem:[#allocation27_spill] sm:$0xff] }
 0x304   : > { %2820 = vmatmul.bf16.gmra.mxu1 %v8076_v61  ;;  %v7179_v5 = vadd.f32 %v7094_v26, %v2237_v23  ;;  %v3528_v31 = vpack.c.bf16 %v3505_v46, %v3504_v11  ;;  %v3039_v63 = vpop.permute.xlu2 %3038  ;;  %v3936_v61 = vmul.f32 %v3863_v22, %v8083_v54  ;;  %v3935_v11 = vmul.f32 %v7089_v15, %v8084_v32  ;;  %v8089_v15 = vld [vmem:[#allocation87_spill] sm:$0xff]  ;;  %v8091_v32 = vld [vmem:[#allocation144_spill] sm:$0xff] }
 0x305   : > { %4081 = vmatmul.bf16.gmra.mxu0 %v3956_v1  ;;  %v3105_v9 = vpack.c.bf16 %v3086_v35, %v3085_v2  ;;  %v7192_v1 = vpop.f32.mrf.mxu2  ;;  %v8085_v2 = vld [vmem:[#allocation17_spill] sm:$0xff]  ;;  %v7204_v46 = vpop.f32.mrf.mxu1 }
 0x306   : > { %8077 = vst [vmem:[#allocation9_spill] sm:$0xff] %v7179_v5  ;;  %v3957_v43 = vpack.c.bf16 %v3936_v61, %v3935_v11  ;;  %v7218_v61 = vpop.permute.xlu0 %3450  ;;  %v3087_v11 = vmul.f32 %v3034_v52, %v8091_v32 }
 0x309   : > { %v2204_v59 = vpop.f32.mrf.mxu3 }
 0x30a   : > { %v2238_v26 = vadd.f32 %v2204_v59, %v7045_v33  ;;  %v7190_v23 = vpop.f32.mrf.mxu0  ;;  %v2836_v33 = vadd.f32 %v7055_v50, %v8085_v2  ;;  %v8090_v50 = vld [vmem:[#allocation58_spill] sm:$0xff] }
 0x30b   : > { %v3507_v54 = vmul.f32 %v7107_v21, %v8090_v50 }
 0x30c   : > { %3242 = vmatmul.bf16.gmra.mxu2 %v3105_v9  ;;  %v7195_v27 = vadd.f32 %v7116_v30, %v2238_v26  ;;  %v3263_v30 = vadd.f32 %v7061_v45, %v2836_v33  ;;  %v7210_v9 = vpop.permute.xlu1 %3465  ;;  %v2837_v26 = vadd.f32 %v7078_v18, %v8089_v15  ;;  %v8092_v45 = vld [vmem:[#allocation57_spill] sm:$0xff] }
 0x30d   : > { %3649 = vmatmul.bf16.gmra.mxu3 %v3528_v31  ;;  %v8087_v31 = vld [vmem:[#allocation94_spill] sm:$0xff]  ;;  %v7212_v22 = vpop.f32.mrf.mxu2  ;;  %v3506_v33 = vmul.f32 %v7043_v40, %v8092_v45  ;;  %v7232_v32 = vpop.f32.mrf.mxu1 }
 0x30e   : > { %8082 = vst [vmem:[#allocation148_spill] sm:$0xff] %v7195_v27  ;;  %v8088_v35 = vpack.c.bf16 %v8086_v12, %v8087_v31  ;;  %v7221_v12 = vpop.permute.xlu2 %3887  ;;  %v3264_v31 = vadd.f32 %v7084_v24, %v2837_v26  ;;  %v8096_v45 = vld [vmem:[#allocation118_spill] sm:$0xff] }
 0x30f   : > { %v3529_v18 = vpack.c.bf16 %v3507_v54, %v3506_v33  ;;  %v3937_v33 = vmul.f32 %v7134_v19, %v8096_v45  ;;  %v8102_v19 = vld [vmem:[#allocation49_spill] sm:$0xff] }
 0x311   : > { %v3610_v36 = vpop.f32.mrf.mxu3 }
 0x312   : > { %v7202_v59 = vpop.f32.mrf.mxu0  ;;  %v3690_v2 = vadd.f32 %v3610_v36, %v3263_v30  ;;  %v8094_v36 = vld [vmem:[#allocation126_spill] sm:$0xff] }
 0x313   : > { %v2838_v30 = vadd.f32 %v7099_v38, %v8094_v36  ;;  %v8100_v36 = vld [vmem:[#allocation97_spill] sm:$0xff] }
 0x314   : > { %2825 = vmatmul.bf16.gmra.mxu1 %v8088_v35  ;;  %v4117_v21 = vadd.f32 %v7137_v58, %v3690_v2  ;;  %v3044_v40 = vpop.permute.xlu1 %3043 }
 0x315   : > { %4086 = vmatmul.bf16.gmra.mxu0 %v3957_v43  ;;  %v8093_v43 = vld [vmem:[#allocation143_spill] sm:$0xff]  ;;  %v7242_v54 = vpop.f32.mrf.mxu2  ;;  %v3265_v38 = vadd.f32 %v7102_v51, %v2838_v30  ;;  %v2839_v51 = vadd.f32 %v7121_v48, %v8100_v36  ;;  %v8101_v30 = vld [vmem:[#allocation48_spill] sm:$0xff]  ;;  %v7261_v45 = vpop.f32.mrf.mxu1 }
 0x316   : > { %v3088_v35 = vmul.f32 %v3039_v63, %v8093_v43  ;;  %v4250_v24 = vmul.f32 %v4117_v21, %v4117_v21 }
 0x318   : > { %v3106_v15 = vpack.c.bf16 %v3088_v35, %v3087_v11  ;;  %v3883_v11 = vpop.permute.xlu0 %3882 }
 0x319   : > { %v3612_v27 = vpop.f32.mrf.mxu3 }
 0x31a   : > { %v3691_v50 = vadd.f32 %v3612_v27, %v3264_v31  ;;  %v7228_v5 = vpop.f32.mrf.mxu0  ;;  %v3049_v31 = vpop.permute.xlu2 %3048 }
 0x31c   : > { %v4118_v52 = vadd.f32 %v4039_v41, %v3691_v50  ;;  %3247 = vmatmul.bf16.gmra.mxu2 %v3106_v15  ;;  %v8095_v41 = vld [vmem:[#allocation117_spill] sm:$0xff]  ;;  %v8098_v50 = vld [vmem:[#allocation74_spill] sm:$0xff] }
 0x31d   : > { %3654 = vmatmul.bf16.gmra.mxu3 %v3529_v18  ;;  %v3938_v26 = vmul.f32 %v3873_v42, %v8095_v41 }
 0x31e   : > { %v4875_v58 = vpack.c.bf16 %v4118_v52, %v4117_v21  ;;  %v4213_v27 = vadd.f32 %v4118_v52, %v4117_v21  ;;  %v4251_v63 = vmul.f32 %v4118_v52, %v4118_v52  ;;  %v8097_v21 = vld [vmem:[#allocation134_spill] sm:$0xff] }
 0x31f   : > { %v3958_v15 = vpack.c.bf16 %v3938_v26, %v3937_v33  ;;  %v8099_v52 = vpack.c.bf16 %v8097_v21, %v8098_v50  ;;  %v3266_v33 = vadd.f32 %v7128_v8, %v2839_v51  ;;  %v7267_v21 = vpop.f32.mrf.mxu2 }
 0x320   : > { %4876 = vst [vmem:[%s7239_s26] sm:$0xff] %v4875_v58   ;;  %v4282_v2 = vadd.f32 %v4251_v63, %v4250_v24  ;;  %v3509_v24 = vmul.f32 %v7082_v14, %v8101_v30  ;;  %v3508_v58 = vmul.f32 %v7130_v4, %v8102_v19  ;;  %v8103_v63 = vld [vmem:[#allocation54_spill] sm:$0xff]  ;;  %v7269_v50 = vpop.permute.xlu0 %3460  ;;  %v8106_v19 = vld [vmem:[#allocation89_spill] sm:$0xff] }
 0x321   : > { %v3615_v43 = vpop.f32.mrf.mxu3  ;;  %v3089_v41 = vmul.f32 %v3044_v40, %v8103_v63 }
 0x322   : > { %v3692_v35 = vadd.f32 %v3615_v43, %v3265_v38  ;;  %v7248_v18 = vpop.f32.mrf.mxu0  ;;  %v8104_v43 = vld [vmem:[#allocation53_spill] sm:$0xff] }
 0x324   : > { %2830 = vmatmul.bf16.gmra.mxu1 %v8099_v52  ;;  %v4119_v42 = vadd.f32 %v7171_v25, %v3692_v35  ;;  %v3090_v25 = vmul.f32 %v3049_v31, %v8104_v43  ;;  %v7265_v35 = vpop.permute.xlu1 %3475  ;;  %v7273_v52 = vpop.permute.xlu2 %3897  ;;  %v8105_v31 = vld [vmem:[#allocation131_spill] sm:$0xff] }
 0x325   : > { %4091 = vmatmul.bf16.gmra.mxu0 %v3958_v15  ;;  %v3530_v15 = vpack.c.bf16 %v3509_v24, %v3508_v58  ;;  %v3940_v24 = vmul.f32 %v3883_v11, %v8106_v19 }
 0x326   : > { %v4214_v38 = vadd.f32 %v4213_v27, %v4119_v42  ;;  %v4252_v26 = vmul.f32 %v4119_v42, %v4119_v42  ;;  %v3107_v4 = vpack.c.bf16 %v3090_v25, %v3089_v41  ;;  %v8107_v41 = vld [vmem:[#allocation88_spill] sm:$0xff] }
 0x328   : > { %v4283_v48 = vadd.f32 %v4282_v2, %v4252_v26  ;;  %v2840_v2 = vadd.f32 %v7145_v56, %v8105_v31  ;;  %v3939_v26 = vmul.f32 %v7173_v6, %v8107_v41  ;;  %v8111_v31 = vld [vmem:[#allocation60_spill] sm:$0xff] }
 0x329   : > { %v3617_v14 = vpop.f32.mrf.mxu3 }
 0x32a   : > { %v3693_v40 = vadd.f32 %v3617_v14, %v3266_v33  ;;  %v7271_v27 = vpop.f32.mrf.mxu0  ;;  %v3267_v58 = vadd.f32 %v7152_v3, %v2840_v2  ;;  %v7283_v33 = vpop.f32.mrf.mxu1  ;;  %v3959_v14 = vpack.c.bf16 %v3940_v24, %v3939_v26  ;;  %v8112_v24 = vld [vmem:[#allocation59_spill] sm:$0xff] }
 0x32c   : > { %v4120_v8 = vadd.f32 %v7190_v23, %v3693_v40  ;;  %3252 = vmatmul.bf16.gmra.mxu2 %v3107_v4  ;;  %v3054_v56 = vpop.permute.xlu1 %3053  ;;  %v3059_v6 = vpop.permute.xlu2 %3058  ;;  %v8110_v40 = vld [vmem:[#allocation55_spill] sm:$0xff] }
 0x32d   : > { %3659 = vmatmul.bf16.gmra.mxu3 %v3530_v15  ;;  %v8108_v15 = vld [vmem:[#allocation92_spill] sm:$0xff]  ;;  %v3091_v2 = vmul.f32 %v3054_v56, %v8111_v31 }
 0x32e   : > { %v4880_v36 = vpack.c.bf16 %v4120_v8, %v4119_v42  ;;  %v4215_v51 = vadd.f32 %v4214_v38, %v4120_v8  ;;  %v4253_v30 = vmul.f32 %v4120_v8, %v4120_v8  ;;  %v7287_v42 = vpop.f32.mrf.mxu2  ;;  %v3893_v38 = vpop.permute.xlu0 %3892  ;;  %v2841_v3 = vadd.f32 %v7160_v57, %v8108_v15 }
 0x32f   : > { %v3510_v8 = vmul.f32 %v7168_v55, %v8110_v40 }
 0x330   : > { %4967 = vst [vmem:[%s7239_s26 + $0x8] sm:$0xff] %v4880_v36   ;;  %v4284_v63 = vadd.f32 %v4283_v48, %v4253_v30  ;;  %v8109_v48 = vld [vmem:[#allocation56_spill] sm:$0xff]  ;;  %v3268_v19 = vadd.f32 %v7166_v10, %v2841_v3 }
 0x331   : > { %v3620_v23 = vpop.f32.mrf.mxu3  ;;  %v3511_v4 = vmul.f32 %v7123_v17, %v8109_v48  ;;  %v8114_v48 = vld [vmem:[#allocation127_spill] sm:$0xff] }
 0x332   : > { %v3694_v43 = vadd.f32 %v3620_v23, %v3267_v58  ;;  %v7285_v25 = vpop.f32.mrf.mxu0  ;;  %v3092_v58 = vmul.f32 %v3059_v6, %v8112_v24  ;;  %v8116_v24 = vld [vmem:[#allocation132_spill] sm:$0xff] }
 0x333   : > { %v3531_v26 = vpack.c.bf16 %v3511_v4, %v3510_v8  ;;  %v3942_v4 = vmul.f32 %v3893_v38, %v8114_v48  ;;  %v8115_v8 = vld [vmem:[#allocation26_spill] sm:$0xff] }
 0x334   : > { %v4121_v11 = vadd.f32 %v7202_v59, %v3694_v43  ;;  %v3108_v57 = vpack.c.bf16 %v3092_v58, %v3091_v2  ;;  %v7301_v43 = vpop.f32.mrf.mxu1  ;;  %v8117_v38 = vld [vmem:[#allocation62_spill] sm:$0xff]  ;;  %v8118_v58 = vld [vmem:[#allocation61_spill] sm:$0xff] }
 0x335   : > { %4096 = vmatmul.bf16.gmra.mxu0 %v3959_v14  ;;  %v8113_v14 = vld [vmem:[#allocation103_spill] sm:$0xff] }
 0x336   : > { %v4216_v36 = vadd.f32 %v4215_v51, %v4121_v11  ;;  %v4254_v30 = vmul.f32 %v4121_v11, %v4121_v11  ;;  %v7304_v51 = vpop.f32.mrf.mxu2  ;;  %v2842_v10 = vadd.f32 %v7187_v39, %v8113_v14  ;;  %v7308_v56 = vpop.permute.xlu0 %3470 }
 0x338   : > { %v4285_v59 = vadd.f32 %v4284_v63, %v4254_v30  ;;  %v3269_v6 = vadd.f32 %v7192_v1, %v2842_v10  ;;  %v3513_v1 = vmul.f32 %v7162_v0, %v8117_v38  ;;  %v8119_v0 = vld [vmem:[#allocation133_spill] sm:$0xff] }
 0x339   : > { %v3622_v41 = vpop.f32.mrf.mxu3 }
 0x33a   : > { %v3695_v23 = vadd.f32 %v3622_v41, %v3268_v19  ;;  %v7299_v17 = vpop.f32.mrf.mxu0 }
 0x33c   : > { %v4122_v55 = vadd.f32 %v7228_v5, %v3695_v23  ;;  %3257 = vmatmul.bf16.gmra.mxu2 %v3108_v57  ;;  %v3941_v5 = vmul.f32 %v7221_v12, %v8115_v8 }
 0x33d   : > { %3664 = vmatmul.bf16.gmra.mxu3 %v3531_v26 }
 0x33e   : > { %v4885_v63 = vpack.c.bf16 %v4122_v55, %v4121_v11  ;;  %v4217_v15 = vadd.f32 %v4216_v36, %v4122_v55  ;;  %v4255_v3 = vmul.f32 %v4122_v55, %v4122_v55  ;;  %v3960_v19 = vpack.c.bf16 %v3942_v4, %v3941_v5  ;;  %v7320_v36 = vpop.f32.mrf.mxu1  ;;  %v7326_v26 = vpop.f32.mrf.mxu2  ;;  %v8121_v5 = vld [vmem:[#allocation63_spill] sm:$0xff] }
 0x33f   : > { %v2843_v11 = vadd.f32 %v7204_v46, %v8116_v24  ;;  %v8122_v24 = vld [vmem:[#allocation8_spill] sm:$0xff] }
 0x340   : > { %4968 = vst [vmem:[%s7239_s26 + $0x10] sm:$0xff] %v4885_v63   ;;  %v4286_v40 = vadd.f32 %v4285_v59, %v4255_v3  ;;  %v3512_v59 = vmul.f32 %v7218_v61, %v8118_v58  ;;  %v2844_v61 = vadd.f32 %v7232_v32, %v8119_v0 }
 0x341   : > { %v3625_v31 = vpop.f32.mrf.mxu3  ;;  %v3270_v57 = vadd.f32 %v7212_v22, %v2843_v11  ;;  %v8120_v22 = vld [vmem:[#allocation64_spill] sm:$0xff] }
 0x342   : > { %v3696_v2 = vadd.f32 %v3625_v31, %v3269_v6  ;;  %v7315_v30 = vpop.f32.mrf.mxu0  ;;  %v3532_v46 = vpack.c.bf16 %v3513_v1, %v3512_v59  ;;  %v3943_v31 = vmul.f32 %v7273_v52, %v8121_v5  ;;  %v8123_v11 = vld [vmem:[#allocation84_spill] sm:$0xff]  ;;  %v8124_v59 = vld [vmem:[#allocation50_spill] sm:$0xff] }
 0x343   : > { %v2418_v38 = vadd.f32 %v8123_v11, %v8122_v24  ;;  %v3515_v52 = vmul.f32 %v7210_v9, %v8124_v59 }
 0x344   : > { %v4123_v39 = vadd.f32 %v7248_v18, %v3696_v2  ;;  %v3903_v18 = vpop.permute.xlu0 %3902 }
 0x345   : > { %4101 = vmatmul.bf16.gmra.mxu0 %v3960_v19  ;;  %v3944_v6 = vmul.f32 %v3903_v18, %v8120_v22 }
 0x346   : > { %v4218_v12 = vadd.f32 %v4217_v15, %v4123_v39  ;;  %v4256_v41 = vmul.f32 %v4123_v39, %v4123_v39  ;;  %v7334_v4 = vpop.f32.mrf.mxu1  ;;  %v7341_v2 = vpop.f32.mrf.mxu2 }
 0x347   : > { %v3961_v1 = vpack.c.bf16 %v3944_v6, %v3943_v31  ;;  %v8127_v6 = vld [vmem:[#allocation69_spill] sm:$0xff]  ;;  %v8128_v31 = vld [vmem:[#allocation70_spill] sm:$0xff] }
 0x348   : > { %v4287_v23 = vadd.f32 %v4286_v40, %v4256_v41  ;;  %v3271_v40 = vadd.f32 %v7242_v54, %v2844_v61  ;;  %v2845_v54 = vadd.f32 %v7261_v45, %v2418_v38  ;;  %v8130_v38 = vld [vmem:[#allocation93_spill] sm:$0xff] }
 0x349   : > { %v3627_v55 = vpop.f32.mrf.mxu3 }
 0x34a   : > { %v3697_v14 = vadd.f32 %v3627_v55, %v3270_v57  ;;  %v7329_v10 = vpop.f32.mrf.mxu0 }
 0x34c   : > { %v4124_v63 = vadd.f32 %v7271_v27, %v3697_v14  ;;  %v7343_v19 = vpop.permute.xlu0 %3480 }
 0x34d   : > { %3669 = vmatmul.bf16.gmra.mxu3 %v3532_v46 }
 0x34e   : > { %v4890_v15 = vpack.c.bf16 %v4124_v63, %v4123_v39  ;;  %v4219_v3 = vadd.f32 %v4218_v12, %v4124_v63  ;;  %v4257_v48 = vmul.f32 %v4124_v63, %v4124_v63  ;;  %v8125_v12 = vld [vmem:[#allocation67_spill] sm:$0xff]  ;;  %v7356_v46 = vpop.f32.mrf.mxu1  ;;  %v7360_v45 = vpop.f32.mrf.mxu2 }
 0x34f   : > { %v3514_v41 = vmul.f32 %v7269_v50, %v8125_v12  ;;  %v8126_v50 = vld [vmem:[#allocation112_spill] sm:$0xff] }
 0x350   : > { %4969 = vst [vmem:[%s7239_s26 + $0x18] sm:$0xff] %v4890_v15   ;;  %v4288_v8 = vadd.f32 %v4287_v23, %v4257_v48  ;;  %v3272_v23 = vadd.f32 %v7267_v21, %v2845_v54  ;;  %v2846_v15 = vadd.f32 %v7283_v33, %v8126_v50  ;;  %v8131_v12 = vld [vmem:[#allocation28_spill] sm:$0xff]  ;;  %v8133_v50 = vld [vmem:[#allocation114_spill] sm:$0xff] }
 0x351   : > { %v3630_v27 = vpop.f32.mrf.mxu3  ;;  %v3533_v63 = vpack.c.bf16 %v3515_v52, %v3514_v41  ;;  %v8132_v41 = vld [vmem:[#allocation29_spill] sm:$0xff] }
 0x352   : > { %v3698_v32 = vadd.f32 %v3630_v27, %v3271_v40  ;;  %v7345_v39 = vpop.f32.mrf.mxu0 }
 0x354   : > { %v4125_v58 = vadd.f32 %v7285_v25, %v3698_v32  ;;  %v3913_v61 = vpop.permute.xlu0 %3912 }
 0x355   : > { %4106 = vmatmul.bf16.gmra.mxu0 %v3961_v1  ;;  %v3946_v40 = vmul.f32 %v3913_v61, %v8127_v6 }
 0x356   : > { %v4220_v57 = vadd.f32 %v4219_v3, %v4125_v58  ;;  %v4258_v18 = vmul.f32 %v4125_v58, %v4125_v58  ;;  %v3908_v3 = vpop.permute.xlu2 %3907  ;;  %v2793_v54 = vpop.f32.mrf.mxu1 }
 0x357   : > { %v3945_v27 = vmul.f32 %v3908_v3, %v8128_v31  ;;  %v3220_v52 = vpop.f32.mrf.mxu2  ;;  %v3486_v31 = vpop.permute.xlu1 %3485 }
 0x358   : > { %v4289_v55 = vadd.f32 %v4288_v8, %v4258_v18  ;;  %v3273_v8 = vadd.f32 %v7287_v42, %v2846_v15  ;;  %v3517_v42 = vmul.f32 %v7265_v35, %v8131_v12  ;;  %v2848_v35 = vadd.f32 %v7320_v36, %v8133_v50  ;;  %v8136_v36 = vld [vmem:[#allocation33_spill] sm:$0xff] }
 0x359   : > { %v3632_v14 = vpop.f32.mrf.mxu3  ;;  %v3962_v33 = vpack.c.bf16 %v3946_v40, %v3945_v27  ;;  %v8134_v40 = vld [vmem:[#allocation113_spill] sm:$0xff] }
 0x35a   : > { %v3699_v25 = vadd.f32 %v3632_v14, %v3272_v23  ;;  %v7358_v0 = vpop.f32.mrf.mxu0  ;;  %v8138_v50 = vld [vmem:[#allocation77_spill] sm:$0xff] }
 0x35c   : > { %v4126_v9 = vadd.f32 %v7299_v17, %v3699_v25  ;;  %v8129_v17 = vld [vmem:[#allocation66_spill] sm:$0xff] }
 0x35d   : > { %3674 = vmatmul.bf16.gmra.mxu3 %v3533_v63  ;;  %v2420_v1 = vadd.f32 %v8130_v38, %v8129_v17  ;;  %v8137_v17 = vld [vmem:[#allocation30_spill] sm:$0xff] }
 0x35e   : > { %v4895_v21 = vpack.c.bf16 %v4126_v9, %v4125_v58  ;;  %v4221_v48 = vadd.f32 %v4220_v57, %v4126_v9  ;;  %v4259_v22 = vmul.f32 %v4126_v9, %v4126_v9  ;;  %v3516_v57 = vmul.f32 %v7308_v56, %v8132_v41  ;;  %v2796_v9 = vpop.f32.mrf.mxu1 }
 0x35f   : > { %v2847_v59 = vadd.f32 %v7301_v43, %v2420_v1  ;;  %v3518_v38 = vmul.f32 %v7343_v19, %v8137_v17 }
 0x360   : > { %4970 = vst [vmem:[%s7239_s26 + $0x20] sm:$0xff] %v4895_v21   ;;  %v4290_v5 = vadd.f32 %v4289_v55, %v4259_v22  ;;  %v3534_v25 = vpack.c.bf16 %v3517_v42, %v3516_v57  ;;  %v3223_v21 = vpop.f32.mrf.mxu2 }
 0x361   : > { %v3635_v32 = vpop.f32.mrf.mxu3  ;;  %v3274_v55 = vadd.f32 %v7304_v51, %v2847_v59 }
 0x362   : > { %v3700_v24 = vadd.f32 %v3635_v32, %v3273_v8  ;;  %v4072_v11 = vpop.f32.mrf.mxu0  ;;  %v8135_v8 = vld [vmem:[#allocation13_spill] sm:$0xff] }
 0x364   : > { %v4127_v58 = vadd.f32 %v7315_v30, %v3700_v24  ;;  %v3519_v24 = vmul.f32 %v3486_v31, %v8136_v36 }
 0x365   : > { %4111 = vmatmul.bf16.gmra.mxu0 %v3962_v33 }
 0x366   : > { %v4222_v18 = vadd.f32 %v4221_v48, %v4127_v58  ;;  %v4260_v23 = vmul.f32 %v4127_v58, %v4127_v58  ;;  %v3275_v48 = vadd.f32 %v7326_v26, %v2848_v35  ;;  %v2798_v33 = vpop.f32.mrf.mxu1  ;;  %v3535_v41 = vpack.c.bf16 %v3519_v24, %v3518_v38 }
 0x367   : > { %v2424_v35 = vadd.f32 %v8138_v50, %v6905_v53 }
 0x368   : > { %v4291_v14 = vadd.f32 %v4290_v5, %v4260_v23  ;;  %v2422_v5 = vadd.f32 %v8135_v8, %v8134_v40  ;;  %v3225_v12 = vpop.f32.mrf.mxu2  ;;  %v2852_v8 = vadd.f32 %v2796_v9, %v6923_v13 }
 0x369   : > { %v3637_v63 = vpop.f32.mrf.mxu3 }
 0x36a   : > { %v3701_v61 = vadd.f32 %v3637_v63, %v3274_v55  ;;  %v4074_v30 = vpop.f32.mrf.mxu0  ;;  %v2849_v27 = vadd.f32 %v7334_v4, %v2422_v5  ;;  %v2850_v4 = vadd.f32 %v7356_v46, %v6892_v16 }
 0x36c   : > { %v4128_v43 = vadd.f32 %v7329_v10, %v3701_v61 }
 0x36d   : > { %3679 = vmatmul.bf16.gmra.mxu3 %v3534_v25 }
 0x36e   : > { %v4900_v15 = vpack.c.bf16 %v4128_v43, %v4127_v58  ;;  %v4223_v3 = vadd.f32 %v4222_v18, %v4128_v43  ;;  %v4261_v56 = vmul.f32 %v4128_v43, %v4128_v43  ;;  %v3276_v58 = vadd.f32 %v7341_v2, %v2849_v27  ;;  %v2801_v2 = vpop.f32.mrf.mxu1 }
 0x36f   : > { %v3279_v27 = vadd.f32 %v3223_v21, %v2852_v8 }
 0x370   : > { %4971 = vst [vmem:[%s7239_s26 + $0x28] sm:$0xff] %v4900_v15   ;;  %v4292_v51 = vadd.f32 %v4291_v14, %v4261_v56  ;;  %v3277_v14 = vadd.f32 %v7360_v45, %v2850_v4  ;;  %v3228_v43 = vpop.f32.mrf.mxu2  ;;  %v2851_v15 = vadd.f32 %v2793_v54, %v2424_v35 }
 0x371   : > { %v3640_v22 = vpop.f32.mrf.mxu3 }
 0x372   : > { %v3702_v6 = vadd.f32 %v3640_v22, %v3275_v48  ;;  %v4077_v32 = vpop.f32.mrf.mxu0  ;;  %v3278_v46 = vadd.f32 %v3220_v52, %v2851_v15  ;;  %v8139_v52 = vld [vmem:[#allocation65_spill] sm:$0xff] }
 0x373   : > { %v2426_v24 = vadd.f32 %v8139_v52, %v6939_v29 }
 0x374   : > { %v4129_v10 = vadd.f32 %v7345_v39, %v3702_v6 }
 0x376   : > { %v4224_v1 = vadd.f32 %v4223_v3, %v4129_v10  ;;  %v4262_v26 = vmul.f32 %v4129_v10, %v4129_v10  ;;  %v2803_v45 = vpop.f32.mrf.mxu1 }
 0x378   : > { %v4293_v59 = vadd.f32 %v4292_v51, %v4262_v26  ;;  %v3230_v40 = vpop.f32.mrf.mxu2 }
 0x379   : > { %v3642_v42 = vpop.f32.mrf.mxu3 }
 0x37a   : > { %v3703_v57 = vadd.f32 %v3642_v42, %v3276_v58  ;;  %v4079_v55 = vpop.f32.mrf.mxu0 }
 0x37c   : > { %v4130_v39 = vadd.f32 %v7358_v0, %v3703_v57  ;;  %v2854_v57 = vadd.f32 %v2801_v2, %v6963_v49 }
 0x37d   : > { %3684 = vmatmul.bf16.gmra.mxu3 %v3535_v41 }
 0x37e   : > { %v4905_v18 = vpack.c.bf16 %v4130_v39, %v4129_v10  ;;  %v4225_v23 = vadd.f32 %v4224_v1, %v4130_v39  ;;  %v4263_v19 = vmul.f32 %v4130_v39, %v4130_v39  ;;  %v2806_v38 = vpop.f32.mrf.mxu1  ;;  %v2853_v1 = vadd.f32 %v2798_v33, %v2426_v24 }
 0x37f   : > { %v3281_v29 = vadd.f32 %v3228_v43, %v2854_v57 }
 0x380   : > { %4972 = vst [vmem:[%s7239_s26 + $0x30] sm:$0xff] %v4905_v18   ;;  %v4294_v63 = vadd.f32 %v4293_v59, %v4263_v19  ;;  %v3233_v58 = vpop.f32.mrf.mxu2  ;;  %v3280_v13 = vadd.f32 %v3225_v12, %v2853_v1 }
 0x381   : > { %v3645_v25 = vpop.f32.mrf.mxu3 }
 0x382   : > { %v3704_v61 = vadd.f32 %v3645_v25, %v3277_v14  ;;  %v4082_v48 = vpop.f32.mrf.mxu0 }
 0x384   : > { %v4131_v0 = vadd.f32 %v4072_v11, %v3704_v61 }
 0x386   : > { %v4226_v3 = vadd.f32 %v4225_v23, %v4131_v0  ;;  %v4264_v16 = vmul.f32 %v4131_v0, %v4131_v0  ;;  %v2808_v23 = vpop.f32.mrf.mxu1 }
 0x388   : > { %v4295_v56 = vadd.f32 %v4294_v63, %v4264_v16  ;;  %v3235_v33 = vpop.f32.mrf.mxu2  ;;  %v8140_v63 = vld [vmem:[#allocation12_spill] sm:$0xff] }
 0x389   : > { %v3647_v51 = vpop.f32.mrf.mxu3  ;;  %v2428_v12 = vadd.f32 %v8140_v63, %v6975_v60 }
 0x38a   : > { %v3705_v22 = vadd.f32 %v3647_v51, %v3278_v46  ;;  %v4084_v36 = vpop.f32.mrf.mxu0  ;;  %v2856_v46 = vadd.f32 %v2806_v38, %v6997_v20 }
 0x38b   : > { %v2855_v61 = vadd.f32 %v2803_v45, %v2428_v12 }
 0x38c   : > { %v4132_v6 = vadd.f32 %v4074_v30, %v3705_v22 }
 0x38d   : > { %v3282_v49 = vadd.f32 %v3230_v40, %v2855_v61  ;;  %v8141_v40 = vld [vmem:[#allocation104_spill] sm:$0xff] }
 0x38e   : > { %v4910_v5 = vpack.c.bf16 %v4132_v6, %v4131_v0  ;;  %v4227_v31 = vadd.f32 %v4226_v3, %v4132_v6  ;;  %v4265_v10 = vmul.f32 %v4132_v6, %v4132_v6  ;;  %v2811_v0 = vpop.f32.mrf.mxu1  ;;  %v3283_v6 = vadd.f32 %v3233_v58, %v2856_v46 }
 0x390   : > { %4973 = vst [vmem:[%s7239_s26 + $0x38] sm:$0xff] %v4910_v5   ;;  %v4296_v53 = vadd.f32 %v4295_v56, %v4265_v10  ;;  %v3238_v43 = vpop.f32.mrf.mxu2 }
 0x391   : > { %v3650_v11 = vpop.f32.mrf.mxu3 }
 0x392   : > { %v3706_v54 = vadd.f32 %v3650_v11, %v3279_v27  ;;  %v4087_v41 = vpop.f32.mrf.mxu0 }
 0x394   : > { %v4133_v17 = vadd.f32 %v4077_v32, %v3706_v54 }
 0x396   : > { %v4228_v30 = vadd.f32 %v4227_v31, %v4133_v17  ;;  %v4266_v26 = vmul.f32 %v4133_v17, %v4133_v17  ;;  %v2813_v5 = vpop.f32.mrf.mxu1  ;;  %v2430_v31 = vadd.f32 %v8141_v40, %v7011_v7 }
 0x398   : > { %v4297_v9 = vadd.f32 %v4296_v53, %v4266_v26  ;;  %v3240_v27 = vpop.f32.mrf.mxu2  ;;  %v2857_v53 = vadd.f32 %v2808_v23, %v2430_v31 }
 0x399   : > { %v3652_v59 = vpop.f32.mrf.mxu3 }
 0x39a   : > { %v3707_v42 = vadd.f32 %v3652_v59, %v3280_v13  ;;  %v4089_v35 = vpop.f32.mrf.mxu0  ;;  %v3284_v20 = vadd.f32 %v3235_v33, %v2857_v53 }
 0x39c   : > { %v4134_v21 = vadd.f32 %v4079_v55, %v3707_v42 }
 0x39e   : > { %v4915_v39 = vpack.c.bf16 %v4134_v21, %v4133_v17  ;;  %v4229_v4 = vadd.f32 %v4228_v30, %v4134_v21  ;;  %v4267_v18 = vmul.f32 %v4134_v21, %v4134_v21  ;;  %v2816_v1 = vpop.f32.mrf.mxu1  ;;  %v2858_v30 = vadd.f32 %v2811_v0, %v7034_v34 }
 0x3a0   : > { %4974 = vst [vmem:[%s7239_s26 + $0x40] sm:$0xff] %v4915_v39   ;;  %v4298_v32 = vadd.f32 %v4297_v9, %v4267_v18  ;;  %v3243_v9 = vpop.f32.mrf.mxu2  ;;  %v3285_v7 = vadd.f32 %v3238_v43, %v2858_v30  ;;  %v8143_v43 = vld [vmem:[#allocation79_spill] sm:$0xff] }
 0x3a1   : > { %v3655_v19 = vpop.f32.mrf.mxu3 }
 0x3a2   : > { %v3708_v14 = vadd.f32 %v3655_v19, %v3281_v29 }
 0x3a4   : > { %v4135_v25 = vadd.f32 %v4082_v48, %v3708_v14  ;;  %v4092_v48 = vpop.f32.mrf.mxu0 }
 0x3a6   : > { %v4230_v55 = vadd.f32 %v4229_v4, %v4135_v25  ;;  %v4268_v50 = vmul.f32 %v4135_v25, %v4135_v25 }
 0x3a8   : > { %v4299_v2 = vadd.f32 %v4298_v32, %v4268_v50  ;;  %v2818_v32 = vpop.f32.mrf.mxu1  ;;  %v3245_v19 = vpop.f32.mrf.mxu2 }
 0x3a9   : > { %v3657_v15 = vpop.f32.mrf.mxu3 }
 0x3aa   : > { %v3709_v3 = vadd.f32 %v3657_v15, %v3282_v49 }
 0x3ac   : > { %v4136_v16 = vadd.f32 %v4084_v36, %v3709_v3  ;;  %v4094_v17 = vpop.f32.mrf.mxu0 }
 0x3ae   : > { %v4920_v56 = vpack.c.bf16 %v4136_v16, %v4135_v25  ;;  %v4231_v51 = vadd.f32 %v4230_v55, %v4136_v16  ;;  %v4269_v22 = vmul.f32 %v4136_v16, %v4136_v16  ;;  %v2860_v25 = vadd.f32 %v2816_v1, %v7074_v47 }
 0x3af   : > { %v2434_v16 = vadd.f32 %v8143_v43, %v7087_v44 }
 0x3b0   : > { %4975 = vst [vmem:[%s7239_s26 + $0x48] sm:$0xff] %v4920_v56   ;;  %v4300_v60 = vadd.f32 %v4299_v2, %v4269_v22  ;;  %v2821_v2 = vpop.f32.mrf.mxu1  ;;  %v3248_v3 = vpop.f32.mrf.mxu2 }
 0x3b1   : > { %v3660_v45 = vpop.f32.mrf.mxu3  ;;  %v2861_v56 = vadd.f32 %v2818_v32, %v2434_v16  ;;  %v2862_v31 = vadd.f32 %v2821_v2, %v7110_v28 }
 0x3b2   : > { %v3710_v8 = vadd.f32 %v3660_v45, %v3283_v6 }
 0x3b3   : > { %v3288_v47 = vadd.f32 %v3245_v19, %v2861_v56  ;;  %v8147_v19 = vld [vmem:[#allocation73_spill] sm:$0xff] }
 0x3b4   : > { %v4137_v10 = vadd.f32 %v4087_v41, %v3710_v8  ;;  %v8142_v41 = vld [vmem:[#allocation78_spill] sm:$0xff]  ;;  %v4097_v4 = vpop.f32.mrf.mxu0 }
 0x3b5   : > { %v2432_v57 = vadd.f32 %v8142_v41, %v7048_v62  ;;  %v3287_v62 = vadd.f32 %v3243_v9, %v2860_v25 }
 0x3b6   : > { %v4232_v11 = vadd.f32 %v4231_v51, %v4137_v10  ;;  %v4270_v54 = vmul.f32 %v4137_v10, %v4137_v10 }
 0x3b7   : > { %v2859_v18 = vadd.f32 %v2813_v5, %v2432_v57 }
 0x3b8   : > { %v4301_v36 = vadd.f32 %v4300_v60, %v4270_v54  ;;  %v2823_v8 = vpop.f32.mrf.mxu1  ;;  %v3250_v40 = vpop.f32.mrf.mxu2 }
 0x3b9   : > { %v3662_v52 = vpop.f32.mrf.mxu3  ;;  %v3286_v34 = vadd.f32 %v3240_v27, %v2859_v18 }
 0x3ba   : > { %v3711_v24 = vadd.f32 %v3662_v52, %v3284_v20  ;;  %v8144_v52 = vld [vmem:[#allocation72_spill] sm:$0xff] }
 0x3bc   : > { %v4138_v38 = vadd.f32 %v4089_v35, %v3711_v24  ;;  %v4099_v35 = vpop.f32.mrf.mxu0  ;;  %v2436_v24 = vadd.f32 %v8144_v52, %v7119_v37 }
 0x3be   : > { %v4925_v26 = vpack.c.bf16 %v4138_v38, %v4137_v10  ;;  %v4233_v58 = vadd.f32 %v4232_v11, %v4138_v38  ;;  %v4271_v13 = vmul.f32 %v4138_v38, %v4138_v38  ;;  %v3289_v11 = vadd.f32 %v3248_v3, %v2862_v31  ;;  %v8148_v3 = vld [vmem:[#allocation9_spill] sm:$0xff] }
 0x3bf   : > { %v2863_v1 = vadd.f32 %v2823_v8, %v2436_v24 }
 0x3c0   : > { %4976 = vst [vmem:[%s7239_s26 + $0x50] sm:$0xff] %v4925_v26   ;;  %v4302_v59 = vadd.f32 %v4301_v36, %v4271_v13  ;;  %v2826_v38 = vpop.f32.mrf.mxu1 }
 0x3c1   : > { %v3665_v42 = vpop.f32.mrf.mxu3  ;;  %v3290_v28 = vadd.f32 %v3250_v40, %v2863_v1 }
 0x3c2   : > { %v3712_v21 = vadd.f32 %v3665_v42, %v3285_v7 }
 0x3c4   : > { %v4139_v39 = vadd.f32 %v4092_v48, %v3712_v21  ;;  %v4102_v60 = vpop.f32.mrf.mxu0  ;;  %v8145_v21 = vld [vmem:[#allocation102_spill] sm:$0xff] }
 0x3c5   : > { %v2864_v41 = vadd.f32 %v2826_v38, %v8145_v21 }
 0x3c6   : > { %v4234_v23 = vadd.f32 %v4233_v58, %v4139_v39  ;;  %v4272_v29 = vmul.f32 %v4139_v39, %v4139_v39  ;;  %v3253_v58 = vpop.f32.mrf.mxu2 }
 0x3c7   : > { %v3291_v37 = vadd.f32 %v3253_v58, %v2864_v41 }
 0x3c8   : > { %v4303_v33 = vadd.f32 %v4302_v59, %v4272_v29  ;;  %v2828_v18 = vpop.f32.mrf.mxu1 }
 0x3c9   : > { %v3667_v14 = vpop.f32.mrf.mxu3 }
 0x3ca   : > { %v3713_v63 = vadd.f32 %v3667_v14, %v3286_v34 }
 0x3cc   : > { %v4140_v12 = vadd.f32 %v4094_v17, %v3713_v63  ;;  %v4104_v36 = vpop.f32.mrf.mxu0 }
 0x3ce   : > { %v4930_v61 = vpack.c.bf16 %v4140_v12, %v4139_v39  ;;  %v4235_v55 = vadd.f32 %v4234_v23, %v4140_v12  ;;  %v4273_v50 = vmul.f32 %v4140_v12, %v4140_v12  ;;  %v3255_v29 = vpop.f32.mrf.mxu2 }
 0x3d0   : > { %4977 = vst [vmem:[%s7239_s26 + $0x58] sm:$0xff] %v4930_v61   ;;  %v4304_v49 = vadd.f32 %v4303_v33, %v4273_v50  ;;  %v8146_v33 = vld [vmem:[#allocation15_spill] sm:$0xff] }
 0x3d1   : > { %v3670_v0 = vpop.f32.mrf.mxu3  ;;  %v2438_v14 = vadd.f32 %v8147_v19, %v8146_v33 }
 0x3d2   : > { %v3714_v15 = vadd.f32 %v3670_v0, %v3287_v62  ;;  %v2831_v62 = vpop.f32.mrf.mxu1 }
 0x3d3   : > { %v2865_v12 = vadd.f32 %v2828_v18, %v2438_v14  ;;  %v2866_v43 = vadd.f32 %v2831_v62, %v8148_v3 }
 0x3d4   : > { %v4141_v46 = vadd.f32 %v4097_v4, %v3714_v15  ;;  %v4107_v42 = vpop.f32.mrf.mxu0 }
 0x3d5   : > { %v3292_v50 = vadd.f32 %v3255_v29, %v2865_v12 }
 0x3d6   : > { %v4236_v51 = vadd.f32 %v4235_v55, %v4141_v46  ;;  %v4274_v22 = vmul.f32 %v4141_v46, %v4141_v46  ;;  %v3258_v0 = vpop.f32.mrf.mxu2 }
 0x3d8   : > { %v4305_v6 = vadd.f32 %v4304_v49, %v4274_v22 }
 0x3d9   : > { %v3672_v48 = vpop.f32.mrf.mxu3 }
 0x3da   : > { %v3715_v45 = vadd.f32 %v3672_v48, %v3288_v47  ;;  %v2833_v48 = vpop.f32.mrf.mxu1 }
 0x3dc   : > { %v4142_v5 = vadd.f32 %v4099_v35, %v3715_v45  ;;  %v4109_v55 = vpop.f32.mrf.mxu0 }
 0x3de   : > { %v4935_v10 = vpack.c.bf16 %v4142_v5, %v4141_v46  ;;  %v4237_v27 = vadd.f32 %v4236_v51, %v4142_v5  ;;  %v4275_v53 = vmul.f32 %v4142_v5, %v4142_v5  ;;  %v3293_v51 = vadd.f32 %v3258_v0, %v2866_v43  ;;  %v3260_v8 = vpop.f32.mrf.mxu2  ;;  %v8149_v5 = vld [vmem:[#allocation148_spill] sm:$0xff] }
 0x3df   : > { %v2867_v40 = vadd.f32 %v2833_v48, %v8149_v5 }
 0x3e0   : > { %4978 = vst [vmem:[%s7239_s26 + $0x60] sm:$0xff] %v4935_v10   ;;  %v4306_v44 = vadd.f32 %v4305_v6, %v4275_v53 }
 0x3e1   : > { %v3675_v54 = vpop.f32.mrf.mxu3 }
 0x3e2   : > { %v3716_v20 = vadd.f32 %v3675_v54, %v3289_v11 }
 0x3e4   : > { %v4143_v17 = vadd.f32 %v4102_v60, %v3716_v20  ;;  %v4112_v47 = vpop.f32.mrf.mxu0 }
 0x3e6   : > { %v4238_v30 = vadd.f32 %v4237_v27, %v4143_v17  ;;  %v4276_v26 = vmul.f32 %v4143_v17, %v4143_v17  ;;  %v3294_v27 = vadd.f32 %v3260_v8, %v2867_v40 }
 0x3e8   : > { %v4307_v13 = vadd.f32 %v4306_v44, %v4276_v26 }
 0x3e9   : > { %v3677_v9 = vpop.f32.mrf.mxu3 }
 0x3ea   : > { %v3717_v7 = vadd.f32 %v3677_v9, %v3290_v28 }
 0x3ec   : > { %v4144_v59 = vadd.f32 %v4104_v36, %v3717_v7  ;;  %v4114_v54 = vpop.f32.mrf.mxu0 }
 0x3ee   : > { %v4940_v57 = vpack.c.bf16 %v4144_v59, %v4143_v17  ;;  %v4239_v39 = vadd.f32 %v4238_v30, %v4144_v59  ;;  %v4277_v4 = vmul.f32 %v4144_v59, %v4144_v59 }
 0x3f0   : > { %4979 = vst [vmem:[%s7239_s26 + $0x68] sm:$0xff] %v4940_v57   ;;  %v4308_v23 = vadd.f32 %v4307_v13, %v4277_v4 }
 0x3f1   : > { %v3680_v32 = vpop.f32.mrf.mxu3 }
 0x3f2   : > { %v3718_v34 = vadd.f32 %v3680_v32, %v3291_v37 }
 0x3f4   : > { %v4145_v63 = vadd.f32 %v4107_v42, %v3718_v34 }
 0x3f6   : > { %v4240_v25 = vadd.f32 %v4239_v39, %v4145_v63  ;;  %v4278_v61 = vmul.f32 %v4145_v63, %v4145_v63 }
 0x3f8   : > { %v4309_v35 = vadd.f32 %v4308_v23, %v4278_v61 }
 0x3f9   : > { %v3682_v49 = vpop.f32.mrf.mxu3 }
 0x3fa   : > { %v3719_v2 = vadd.f32 %v3682_v49, %v3292_v50 }
 0x3fc   : > { %v4146_v15 = vadd.f32 %v4109_v55, %v3719_v2 }
 0x3fe   : > { %v4945_v16 = vpack.c.bf16 %v4146_v15, %v4145_v63  ;;  %v4241_v46 = vadd.f32 %v4240_v25, %v4146_v15  ;;  %v4279_v56 = vmul.f32 %v4146_v15, %v4146_v15 }
 0x400   : > { %4980 = vst [vmem:[%s7239_s26 + $0x70] sm:$0xff] %v4945_v16   ;;  %v4310_v22 = vadd.f32 %v4309_v35, %v4279_v56 }
 0x401   : > { %v3685_v6 = vpop.f32.mrf.mxu3 }
 0x402   : > { %v3720_v60 = vadd.f32 %v3685_v6, %v3293_v51 }
 0x404   : > { %v4147_v45 = vadd.f32 %v4112_v47, %v3720_v60 }
 0x406   : > { %v4242_v31 = vadd.f32 %v4241_v46, %v4147_v45  ;;  %v4280_v10 = vmul.f32 %v4147_v45, %v4147_v45 }
 0x408   : > { %v4311_v53 = vadd.f32 %v4310_v22, %v4280_v10 }
 0x409   : > { %v3687_v11 = vpop.f32.mrf.mxu3 }
 0x40a   : > { %v3721_v44 = vadd.f32 %v3687_v11, %v3294_v27 }
 0x40c   : > { %v4148_v20 = vadd.f32 %v4114_v54, %v3721_v44 }
 0x40e   : > { %v4950_v36 = vpack.c.bf16 %v4148_v20, %v4147_v45  ;;  %v4243_v52 = vadd.f32 %v4242_v31, %v4148_v20  ;;  %v4281_v24 = vmul.f32 %v4148_v20, %v4148_v20 }
 0x410   : > { %4981 = vst [vmem:[%s7239_s26 + $0x78] sm:$0xff] %v4950_v36   ;;  %v4244_v17 = vrot.slane %v4243_v52, 4  ;;  %v4312_v38 = vadd.f32 %v4311_v53, %v4281_v24 }
 0x412   : > { %v4245_v1 = vadd.f32 %v4244_v17, %v4243_v52  ;;  %v4313_v30 = vrot.slane %v4312_v38, 4 }
 0x414   : > { %v4246_v26 = vrot.slane %v4245_v1, 2  ;;  %v4314_v58 = vadd.f32 %v4313_v30, %v4312_v38 }
 0x416   : > { %v4247_v28 = vadd.f32 %v4246_v26, %v4245_v1  ;;  %v4315_v13 = vrot.slane %v4314_v58, 2 }
 0x418   : > { %v4248_v9 = vrot.slane %v4247_v28, 1  ;;  %v4316_v7 = vadd.f32 %v4315_v13, %v4314_v58 }
 0x41a   : > { %v4317_v59 = vrot.slane %v4316_v7, 1  ;;  %v4249_v42 = vadd.f32 %v4248_v9, %v4247_v28 }
 0x41c   : > { %v4318_v21 = vadd.f32 %v4317_v59, %v4316_v7 }
 0x41e   : > { %v4320_v41 = vsel %vm4319_vm2, %v4249_v42, %v4318_v21 }
 0x41f   : > { %4321 = vst [vmem:[%s296_s30] sm:$0x3] %v4320_v41 }
 0x420 PF: > { %s19_s21 = sadd.s32 1, %s5119_s21  }
 0x421   : > { %p16_p7 = scmp.ge.s32.totalorder %s19_s21, 4  }
 0x423   :  { %18 = sbr.rel (!%p16_p7) target bundleno = 2 (0x2), region = 106 }
 0x428   :  { %4357 = vsyncpa [#allocation3], 1 }
 0x429   :  { %4359 = vsyncpa [#allocation3 + $0x1], 1 }
 0x42a   :  { %4360 = vsyncpa [#allocation5], 1 }

</bundles_post_ra>
